<compile_context>
chip_gen: v6e
topology: v6e:2x2x1
jax: 0.10.0
libtpu: 0.0.40
codegen_flags: <defaults>
</compile_context>

<pallas_src>
import jax
import jax.numpy as jnp
from jax.experimental import pallas as pl
from jax.experimental.pallas import tpu as pltpu

BN_EPS = 1e-5


def _dense_block_kernel(x_ref, s1_ref, b1_ref, w1_ref, s2_ref, b2_ref, w2_ref,
                        out_ref):
    """Fully fused DenseBlock forward for one image.

    x_ref  : (1, H, W, Cin0)            input feature map (one image)
    s1_ref : (num, Cmax)                folded BN1 scale, zero-padded per layer
    b1_ref : (num, Cmax)                folded BN1 shift, zero-padded
    w1_ref : (num, Cmax, C4)            1x1 conv weights, zero-padded rows
    s2_ref : (num, C4)                  folded BN2 scale
    b2_ref : (num, C4)                  folded BN2 shift
    w2_ref : (num, 9*C4, G)             3x3 conv weights, im2col-flattened HWIO
    out_ref: (1, H, W, Cin0 + num*G)    concatenated dense-block output
    """
    H, W = x_ref.shape[1], x_ref.shape[2]
    cin0 = x_ref.shape[3]
    num = w2_ref.shape[0]
    c4 = s2_ref.shape[1]
    g = w2_ref.shape[2]

    # Stage all (tiny) layer parameters once; constant index_maps mean Pallas
    # never re-DMAs them across grid steps.
    s1_all = s1_ref[...]
    b1_all = b1_ref[...]
    w1_all = w1_ref[...]
    s2_all = s2_ref[...]
    b2_all = b2_ref[...]
    w2_all = w2_ref[...]

    # Running concatenated feature map, kept in registers (no HBM round trip).
    cur = x_ref[0].astype(jnp.float32).reshape(H * W, cin0)
    cin = cin0

    for i in range(num):                       # static unroll over bottlenecks
        # ---- BN1 (folded) + ReLU -------------------------------------------
        y = jnp.maximum(cur * s1_all[i:i + 1, :cin] + b1_all[i:i + 1, :cin],
                        0.0)                                   # (H*W, cin)
        # ---- 1x1 conv == channel matmul on the MXU -------------------------
        z = jnp.dot(y, w1_all[i, :cin, :],
                    preferred_element_type=jnp.float32)        # (H*W, C4)
        # ---- BN2 (folded) + ReLU -------------------------------------------
        z = jnp.maximum(z * s2_all[i:i + 1, :] + b2_all[i:i + 1, :], 0.0)

        # ---- 3x3 SAME conv via im2col: one K = 9*C4 matmul -----------------
        z3 = z.reshape(H, W, c4)
        zrow = jnp.zeros((1, W, c4), jnp.float32)
        zcol = jnp.zeros((H, 1, c4), jnp.float32)
        taps = []
        for ky in range(3):                    # tap(ky,kx)[h,w] = z[h+ky-1, w+kx-1]
            if ky == 0:                        # needs z[h-1]
                ty = jnp.concatenate([zrow, z3[:H - 1]], axis=0)
            elif ky == 1:
                ty = z3
            else:                              # needs z[h+1]
                ty = jnp.concatenate([z3[1:], zrow], axis=0)
            for kx in range(3):
                if kx == 0:                    # needs z[:, w-1]
                    t = jnp.concatenate([zcol, ty[:, :W - 1]], axis=1)
                elif kx == 1:
                    t = ty
                else:                          # needs z[:, w+1]
                    t = jnp.concatenate([ty[:, 1:], zcol], axis=1)
                taps.append(t)
        patches = jnp.concatenate(taps, axis=-1).reshape(H * W, 9 * c4)
        new = jnp.dot(patches, w2_all[i],
                      preferred_element_type=jnp.float32)      # (H*W, G)

        # ---- dense concatenation (torch.cat dim=1), in registers -----------
        cur = jnp.concatenate([cur, new], axis=-1)
        cin += g

    # Single lane-contiguous write of the whole concatenated output.
    out_ref[0] = cur.reshape(H, W, cin).astype(out_ref.dtype)


def _fold_bn(gamma, beta, mean, var):
    scale = gamma * jax.lax.rsqrt(var + BN_EPS)
    shift = beta - mean * scale
    return scale, shift


def dense_block_pallas(x, params):
    """x: (N, H, W, Cin0) -> (N, H, W, Cin0 + num*GrowthRate), fused block."""
    N, H, W, cin0 = x.shape
    num = len(params)
    c4 = params[0]["w2"].shape[2]
    g = params[0]["w2"].shape[3]
    cmax = cin0 + (num - 1) * g          # widest per-layer input channel count
    cfinal = cin0 + num * g

    # Stack per-layer params into uniform (zero-padded) tensors.
    s1_l, b1_l, w1_l, s2_l, b2_l, w2_l = [], [], [], [], [], []
    for i, p in enumerate(params):
        cin = cin0 + i * g
        pad = cmax - cin
        s1, b1 = _fold_bn(p["gamma1"], p["beta1"], p["mean1"], p["var1"])
        s2, b2 = _fold_bn(p["gamma2"], p["beta2"], p["mean2"], p["var2"])
        s1_l.append(jnp.pad(s1, (0, pad)))
        b1_l.append(jnp.pad(b1, (0, pad)))
        w1_l.append(jnp.pad(p["w1"], ((0, pad), (0, 0))))
        s2_l.append(s2)
        b2_l.append(b2)
        w2_l.append(p["w2"].reshape(9 * c4, g))    # HWIO -> (9*C4, G) im2col
    s1_all = jnp.stack(s1_l)
    b1_all = jnp.stack(b1_l)
    w1_all = jnp.stack(w1_l)
    s2_all = jnp.stack(s2_l)
    b2_all = jnp.stack(b2_l)
    w2_all = jnp.stack(w2_l)

    return pl.pallas_call(
        _dense_block_kernel,
        out_shape=jax.ShapeDtypeStruct((N, H, W, cfinal), x.dtype),
        grid_spec=pltpu.PrefetchScalarGridSpec(
            num_scalar_prefetch=0,
            grid=(N,),
            in_specs=[
                pl.BlockSpec((1, H, W, cin0), lambda n: (n, 0, 0, 0)),
                pl.BlockSpec((num, cmax), lambda n: (0, 0)),
                pl.BlockSpec((num, cmax), lambda n: (0, 0)),
                pl.BlockSpec((num, cmax, c4), lambda n: (0, 0, 0)),
                pl.BlockSpec((num, c4), lambda n: (0, 0)),
                pl.BlockSpec((num, c4), lambda n: (0, 0)),
                pl.BlockSpec((num, 9 * c4, g), lambda n: (0, 0, 0)),
            ],
            out_specs=pl.BlockSpec((1, H, W, cfinal), lambda n: (n, 0, 0, 0)),
        ),
        compiler_params=pltpu.CompilerParams(
            dimension_semantics=("parallel",)),
    )(x, s1_all, b1_all, w1_all, s2_all, b2_all, w2_all)


def make_dense_block_params(key, in_channel, growth_rate, num=4):
    """Deterministic parameter init matching the torch module's shapes."""
    params = []
    c = in_channel
    c4 = growth_rate * 4
    for i in range(num):
        ks = jax.random.split(jax.random.fold_in(key, i), 10)
        params.append(dict(
            gamma1=1.0 + 0.1 * jax.random.normal(ks[0], (c,), jnp.float32),
            beta1=0.1 * jax.random.normal(ks[1], (c,), jnp.float32),
            mean1=0.1 * jax.random.normal(ks[2], (c,), jnp.float32),
            var1=jnp.abs(jax.random.normal(ks[3], (c,), jnp.float32)) + 0.5,
            # torch Conv2d(c, c4, 1).weight is (c4, c, 1, 1) -> stored (c, c4)
            w1=0.2 * jax.random.normal(ks[4], (c, c4), jnp.float32),
            gamma2=1.0 + 0.1 * jax.random.normal(ks[5], (c4,), jnp.float32),
            beta2=0.1 * jax.random.normal(ks[6], (c4,), jnp.float32),
            mean2=0.1 * jax.random.normal(ks[7], (c4,), jnp.float32),
            var2=jnp.abs(jax.random.normal(ks[8], (c4,), jnp.float32)) + 0.5,
            # torch Conv2d(c4, G, 3).weight is (G, c4, 3, 3) -> HWIO
            w2=0.1 * jax.random.normal(ks[9], (3, 3, c4, growth_rate),
                                       jnp.float32),
        ))
        c += growth_rate
    return params


def dense_block_reference(x, params):
    """Pure-JAX reference (same NHWC layout) for correctness checking."""
    for p in params:
        s1, b1 = _fold_bn(p["gamma1"], p["beta1"], p["mean1"], p["var1"])
        s2, b2 = _fold_bn(p["gamma2"], p["beta2"], p["mean2"], p["var2"])
        y = jnp.maximum(x * s1 + b1, 0.0)
        z = jnp.einsum("nhwc,cd->nhwd", y, p["w1"])
        z = jnp.maximum(z * s2 + b2, 0.0)
        out = jax.lax.conv_general_dilated(
            z, p["w2"], window_strides=(1, 1), padding="SAME",
            dimension_numbers=("NHWC", "HWIO", "NHWC"))
        x = jnp.concatenate([x, out], axis=-1)    # torch.cat((x, out), dim=1)
    return x


if __name__ == "__main__":
    N, H, W = 2, 16, 16
    IN_CHANNEL, GROWTH_RATE, NUM = 4, 4, 4

    key = jax.random.PRNGKey(0)
    kx, kp = jax.random.split(key)
    # NHWC input (equivalent PyTorch input would be (N, IN_CHANNEL, H, W))
    x = jax.random.normal(kx, (N, H, W, IN_CHANNEL), jnp.float32)
    params = make_dense_block_params(kp, IN_CHANNEL, GROWTH_RATE, NUM)

    fwd = jax.jit(lambda xx: dense_block_pallas(xx, params))
    out = jax.block_until_ready(fwd(x))
    assert out.shape == (N, H, W, IN_CHANNEL + NUM * GROWTH_RATE), out.shape

    ref = jax.block_until_ready(dense_block_reference(x, params))
    max_err = float(jnp.max(jnp.abs(out - ref)))
    assert jnp.allclose(out, ref, rtol=1e-4, atol=1e-4), max_err

    print("KERNEL_OK")
</pallas_src>

<mosaic_0001>
module attributes {stable_mosaic.version = 11 : i64} {
  func.func @_dense_block_kernel(%arg0: i32, %arg1: memref<1x16x16x4xf32, #tpu.memory_space<vmem>>, %arg2: memref<4x16xf32, #tpu.memory_space<vmem>>, %arg3: memref<4x16xf32, #tpu.memory_space<vmem>>, %arg4: memref<4x16x16xf32, #tpu.memory_space<vmem>>, %arg5: memref<4x16xf32, #tpu.memory_space<vmem>>, %arg6: memref<4x16xf32, #tpu.memory_space<vmem>>, %arg7: memref<4x144x4xf32, #tpu.memory_space<vmem>>, %arg8: memref<1x16x16x20xf32, #tpu.memory_space<vmem>>) attributes {dimension_semantics = [#tpu.dimension_semantics<parallel>], iteration_bounds = array<i64: 2>, scalar_prefetch = 0 : i64, scratch_operands = 0 : i64, tpu.core_type = #tpu.core_type<tc>, window_params = [{transform_indices = @transform_0, window_bounds = array<i64: 1, 16, 16, 4>}, {pipeline_mode = #tpu.pipeline_mode<synchronous>, transform_indices = @transform_1, window_bounds = array<i64: 4, 16>}, {pipeline_mode = #tpu.pipeline_mode<synchronous>, transform_indices = @transform_2, window_bounds = array<i64: 4, 16>}, {pipeline_mode = #tpu.pipeline_mode<synchronous>, transform_indices = @transform_3, window_bounds = array<i64: 4, 16, 16>}, {pipeline_mode = #tpu.pipeline_mode<synchronous>, transform_indices = @transform_4, window_bounds = array<i64: 4, 16>}, {pipeline_mode = #tpu.pipeline_mode<synchronous>, transform_indices = @transform_5, window_bounds = array<i64: 4, 16>}, {pipeline_mode = #tpu.pipeline_mode<synchronous>, transform_indices = @transform_6, window_bounds = array<i64: 4, 144, 4>}, {transform_indices = @transform_7, window_bounds = array<i64: 1, 16, 16, 20>}]} {
    %c0 = arith.constant 0 : index
    %c0_0 = arith.constant 0 : index
    %0 = vector.load %arg2[%c0, %c0_0] : memref<4x16xf32, #tpu.memory_space<vmem>>, vector<4x16xf32>
    %c0_1 = arith.constant 0 : index
    %c0_2 = arith.constant 0 : index
    %1 = vector.load %arg3[%c0_1, %c0_2] : memref<4x16xf32, #tpu.memory_space<vmem>>, vector<4x16xf32>
    %c0_3 = arith.constant 0 : index
    %c0_4 = arith.constant 0 : index
    %c0_5 = arith.constant 0 : index
    %2 = vector.load %arg4[%c0_3, %c0_4, %c0_5] : memref<4x16x16xf32, #tpu.memory_space<vmem>>, vector<4x16x16xf32>
    %c0_6 = arith.constant 0 : index
    %c0_7 = arith.constant 0 : index
    %3 = vector.load %arg5[%c0_6, %c0_7] : memref<4x16xf32, #tpu.memory_space<vmem>>, vector<4x16xf32>
    %c0_8 = arith.constant 0 : index
    %c0_9 = arith.constant 0 : index
    %4 = vector.load %arg6[%c0_8, %c0_9] : memref<4x16xf32, #tpu.memory_space<vmem>>, vector<4x16xf32>
    %c0_10 = arith.constant 0 : index
    %c0_11 = arith.constant 0 : index
    %c0_12 = arith.constant 0 : index
    %5 = vector.load %arg7[%c0_10, %c0_11, %c0_12] : memref<4x144x4xf32, #tpu.memory_space<vmem>>, vector<4x144x4xf32>
    %c0_13 = arith.constant 0 : index
    %c0_14 = arith.constant 0 : index
    %c0_15 = arith.constant 0 : index
    %c0_16 = arith.constant 0 : index
    %6 = vector.load %arg1[%c0_13, %c0_14, %c0_15, %c0_16] : memref<1x16x16x4xf32, #tpu.memory_space<vmem>>, vector<1x16x16x4xf32>
    %7 = vector.shape_cast %6 : vector<1x16x16x4xf32> to vector<16x16x4xf32>
    %8 = vector.shape_cast %7 : vector<16x16x4xf32> to vector<256x4xf32>
    %9 = vector.extract_strided_slice %0 {offsets = [0, 0], sizes = [1, 4], strides = [1, 1]} : vector<4x16xf32> to vector<1x4xf32>
    %10 = vector.broadcast %9 : vector<1x4xf32> to vector<256x4xf32>
    %11 = arith.mulf %8, %10 : vector<256x4xf32>
    %12 = vector.extract_strided_slice %1 {offsets = [0, 0], sizes = [1, 4], strides = [1, 1]} : vector<4x16xf32> to vector<1x4xf32>
    %13 = vector.broadcast %12 : vector<1x4xf32> to vector<256x4xf32>
    %14 = arith.addf %11, %13 : vector<256x4xf32>
    %cst = arith.constant 0.000000e+00 : f32
    %15 = vector.broadcast %cst : f32 to vector<256x4xf32>
    %16 = arith.maximumf %14, %15 : vector<256x4xf32>
    %17 = vector.extract_strided_slice %2 {offsets = [0, 0, 0], sizes = [1, 4, 16], strides = [1, 1, 1]} : vector<4x16x16xf32> to vector<1x4x16xf32>
    %18 = vector.shape_cast %17 : vector<1x4x16xf32> to vector<4x16xf32>
    %cst_17 = arith.constant dense<0.000000e+00> : vector<256x16xf32>
    %19 = tpu.matmul %16, %18, %cst_17 {dimension_numbers = #tpu.dot_dimension_numbers<[1], [0], [0], [1], [0, 0, 1, 1], [], []>} : vector<256x4xf32>, vector<4x16xf32>, vector<256x16xf32> -> vector<256x16xf32>
    %20 = vector.extract_strided_slice %3 {offsets = [0, 0], sizes = [1, 16], strides = [1, 1]} : vector<4x16xf32> to vector<1x16xf32>
    %21 = vector.broadcast %20 : vector<1x16xf32> to vector<256x16xf32>
    %22 = arith.mulf %19, %21 : vector<256x16xf32>
    %23 = vector.extract_strided_slice %4 {offsets = [0, 0], sizes = [1, 16], strides = [1, 1]} : vector<4x16xf32> to vector<1x16xf32>
    %24 = vector.broadcast %23 : vector<1x16xf32> to vector<256x16xf32>
    %25 = arith.addf %22, %24 : vector<256x16xf32>
    %cst_18 = arith.constant 0.000000e+00 : f32
    %26 = vector.broadcast %cst_18 : f32 to vector<256x16xf32>
    %27 = arith.maximumf %25, %26 : vector<256x16xf32>
    %28 = vector.shape_cast %27 : vector<256x16xf32> to vector<16x16x16xf32>
    %cst_19 = arith.constant 0.000000e+00 : f32
    %29 = vector.broadcast %cst_19 : f32 to vector<1x16x16xf32>
    %cst_20 = arith.constant 0.000000e+00 : f32
    %30 = vector.broadcast %cst_20 : f32 to vector<16x1x16xf32>
    %31 = vector.extract_strided_slice %28 {offsets = [0, 0, 0], sizes = [15, 16, 16], strides = [1, 1, 1]} : vector<16x16x16xf32> to vector<15x16x16xf32>
    %32 = tpu.concatenate %29, %31 in 0 : vector<1x16x16xf32>, vector<15x16x16xf32> -> vector<16x16x16xf32>
    %33 = vector.extract_strided_slice %32 {offsets = [0, 0, 0], sizes = [16, 15, 16], strides = [1, 1, 1]} : vector<16x16x16xf32> to vector<16x15x16xf32>
    %34 = tpu.concatenate %30, %33 in 1 : vector<16x1x16xf32>, vector<16x15x16xf32> -> vector<16x16x16xf32>
    %35 = vector.extract_strided_slice %32 {offsets = [0, 1, 0], sizes = [16, 15, 16], strides = [1, 1, 1]} : vector<16x16x16xf32> to vector<16x15x16xf32>
    %36 = tpu.concatenate %35, %30 in 1 : vector<16x15x16xf32>, vector<16x1x16xf32> -> vector<16x16x16xf32>
    %37 = vector.extract_strided_slice %28 {offsets = [0, 0, 0], sizes = [16, 15, 16], strides = [1, 1, 1]} : vector<16x16x16xf32> to vector<16x15x16xf32>
    %38 = tpu.concatenate %30, %37 in 1 : vector<16x1x16xf32>, vector<16x15x16xf32> -> vector<16x16x16xf32>
    %39 = vector.extract_strided_slice %28 {offsets = [0, 1, 0], sizes = [16, 15, 16], strides = [1, 1, 1]} : vector<16x16x16xf32> to vector<16x15x16xf32>
    %40 = tpu.concatenate %39, %30 in 1 : vector<16x15x16xf32>, vector<16x1x16xf32> -> vector<16x16x16xf32>
    %41 = vector.extract_strided_slice %28 {offsets = [1, 0, 0], sizes = [15, 16, 16], strides = [1, 1, 1]} : vector<16x16x16xf32> to vector<15x16x16xf32>
    %42 = tpu.concatenate %41, %29 in 0 : vector<15x16x16xf32>, vector<1x16x16xf32> -> vector<16x16x16xf32>
    %43 = vector.extract_strided_slice %42 {offsets = [0, 0, 0], sizes = [16, 15, 16], strides = [1, 1, 1]} : vector<16x16x16xf32> to vector<16x15x16xf32>
    %44 = tpu.concatenate %30, %43 in 1 : vector<16x1x16xf32>, vector<16x15x16xf32> -> vector<16x16x16xf32>
    %45 = vector.extract_strided_slice %42 {offsets = [0, 1, 0], sizes = [16, 15, 16], strides = [1, 1, 1]} : vector<16x16x16xf32> to vector<16x15x16xf32>
    %46 = tpu.concatenate %45, %30 in 1 : vector<16x15x16xf32>, vector<16x1x16xf32> -> vector<16x16x16xf32>
    %47 = tpu.concatenate %34, %32, %36, %38, %28, %40, %44, %42, %46 in 2 : vector<16x16x16xf32>, vector<16x16x16xf32>, vector<16x16x16xf32>, vector<16x16x16xf32>, vector<16x16x16xf32>, vector<16x16x16xf32>, vector<16x16x16xf32>, vector<16x16x16xf32>, vector<16x16x16xf32> -> vector<16x16x144xf32>
    %48 = vector.shape_cast %47 : vector<16x16x144xf32> to vector<256x144xf32>
    %49 = vector.extract_strided_slice %5 {offsets = [0, 0, 0], sizes = [1, 144, 4], strides = [1, 1, 1]} : vector<4x144x4xf32> to vector<1x144x4xf32>
    %50 = vector.shape_cast %49 : vector<1x144x4xf32> to vector<144x4xf32>
    %cst_21 = arith.constant dense<0.000000e+00> : vector<256x4xf32>
    %51 = tpu.matmul %48, %50, %cst_21 {dimension_numbers = #tpu.dot_dimension_numbers<[1], [0], [0], [1], [0, 0, 1, 1], [], []>} : vector<256x144xf32>, vector<144x4xf32>, vector<256x4xf32> -> vector<256x4xf32>
    %52 = tpu.concatenate %8, %51 in 1 : vector<256x4xf32>, vector<256x4xf32> -> vector<256x8xf32>
    %53 = vector.extract_strided_slice %0 {offsets = [1, 0], sizes = [1, 8], strides = [1, 1]} : vector<4x16xf32> to vector<1x8xf32>
    %54 = vector.broadcast %53 : vector<1x8xf32> to vector<256x8xf32>
    %55 = arith.mulf %52, %54 : vector<256x8xf32>
    %56 = vector.extract_strided_slice %1 {offsets = [1, 0], sizes = [1, 8], strides = [1, 1]} : vector<4x16xf32> to vector<1x8xf32>
    %57 = vector.broadcast %56 : vector<1x8xf32> to vector<256x8xf32>
    %58 = arith.addf %55, %57 : vector<256x8xf32>
    %cst_22 = arith.constant 0.000000e+00 : f32
    %59 = vector.broadcast %cst_22 : f32 to vector<256x8xf32>
    %60 = arith.maximumf %58, %59 : vector<256x8xf32>
    %61 = vector.extract_strided_slice %2 {offsets = [1, 0, 0], sizes = [1, 8, 16], strides = [1, 1, 1]} : vector<4x16x16xf32> to vector<1x8x16xf32>
    %62 = vector.shape_cast %61 : vector<1x8x16xf32> to vector<8x16xf32>
    %cst_23 = arith.constant dense<0.000000e+00> : vector<256x16xf32>
    %63 = tpu.matmul %60, %62, %cst_23 {dimension_numbers = #tpu.dot_dimension_numbers<[1], [0], [0], [1], [0, 0, 1, 1], [], []>} : vector<256x8xf32>, vector<8x16xf32>, vector<256x16xf32> -> vector<256x16xf32>
    %64 = vector.extract_strided_slice %3 {offsets = [1, 0], sizes = [1, 16], strides = [1, 1]} : vector<4x16xf32> to vector<1x16xf32>
    %65 = vector.broadcast %64 : vector<1x16xf32> to vector<256x16xf32>
    %66 = arith.mulf %63, %65 : vector<256x16xf32>
    %67 = vector.extract_strided_slice %4 {offsets = [1, 0], sizes = [1, 16], strides = [1, 1]} : vector<4x16xf32> to vector<1x16xf32>
    %68 = vector.broadcast %67 : vector<1x16xf32> to vector<256x16xf32>
    %69 = arith.addf %66, %68 : vector<256x16xf32>
    %cst_24 = arith.constant 0.000000e+00 : f32
    %70 = vector.broadcast %cst_24 : f32 to vector<256x16xf32>
    %71 = arith.maximumf %69, %70 : vector<256x16xf32>
    %72 = vector.shape_cast %71 : vector<256x16xf32> to vector<16x16x16xf32>
    %cst_25 = arith.constant 0.000000e+00 : f32
    %73 = vector.broadcast %cst_25 : f32 to vector<1x16x16xf32>
    %cst_26 = arith.constant 0.000000e+00 : f32
    %74 = vector.broadcast %cst_26 : f32 to vector<16x1x16xf32>
    %75 = vector.extract_strided_slice %72 {offsets = [0, 0, 0], sizes = [15, 16, 16], strides = [1, 1, 1]} : vector<16x16x16xf32> to vector<15x16x16xf32>
    %76 = tpu.concatenate %73, %75 in 0 : vector<1x16x16xf32>, vector<15x16x16xf32> -> vector<16x16x16xf32>
    %77 = vector.extract_strided_slice %76 {offsets = [0, 0, 0], sizes = [16, 15, 16], strides = [1, 1, 1]} : vector<16x16x16xf32> to vector<16x15x16xf32>
    %78 = tpu.concatenate %74, %77 in 1 : vector<16x1x16xf32>, vector<16x15x16xf32> -> vector<16x16x16xf32>
    %79 = vector.extract_strided_slice %76 {offsets = [0, 1, 0], sizes = [16, 15, 16], strides = [1, 1, 1]} : vector<16x16x16xf32> to vector<16x15x16xf32>
    %80 = tpu.concatenate %79, %74 in 1 : vector<16x15x16xf32>, vector<16x1x16xf32> -> vector<16x16x16xf32>
    %81 = vector.extract_strided_slice %72 {offsets = [0, 0, 0], sizes = [16, 15, 16], strides = [1, 1, 1]} : vector<16x16x16xf32> to vector<16x15x16xf32>
    %82 = tpu.concatenate %74, %81 in 1 : vector<16x1x16xf32>, vector<16x15x16xf32> -> vector<16x16x16xf32>
    %83 = vector.extract_strided_slice %72 {offsets = [0, 1, 0], sizes = [16, 15, 16], strides = [1, 1, 1]} : vector<16x16x16xf32> to vector<16x15x16xf32>
    %84 = tpu.concatenate %83, %74 in 1 : vector<16x15x16xf32>, vector<16x1x16xf32> -> vector<16x16x16xf32>
    %85 = vector.extract_strided_slice %72 {offsets = [1, 0, 0], sizes = [15, 16, 16], strides = [1, 1, 1]} : vector<16x16x16xf32> to vector<15x16x16xf32>
    %86 = tpu.concatenate %85, %73 in 0 : vector<15x16x16xf32>, vector<1x16x16xf32> -> vector<16x16x16xf32>
    %87 = vector.extract_strided_slice %86 {offsets = [0, 0, 0], sizes = [16, 15, 16], strides = [1, 1, 1]} : vector<16x16x16xf32> to vector<16x15x16xf32>
    %88 = tpu.concatenate %74, %87 in 1 : vector<16x1x16xf32>, vector<16x15x16xf32> -> vector<16x16x16xf32>
    %89 = vector.extract_strided_slice %86 {offsets = [0, 1, 0], sizes = [16, 15, 16], strides = [1, 1, 1]} : vector<16x16x16xf32> to vector<16x15x16xf32>
    %90 = tpu.concatenate %89, %74 in 1 : vector<16x15x16xf32>, vector<16x1x16xf32> -> vector<16x16x16xf32>
    %91 = tpu.concatenate %78, %76, %80, %82, %72, %84, %88, %86, %90 in 2 : vector<16x16x16xf32>, vector<16x16x16xf32>, vector<16x16x16xf32>, vector<16x16x16xf32>, vector<16x16x16xf32>, vector<16x16x16xf32>, vector<16x16x16xf32>, vector<16x16x16xf32>, vector<16x16x16xf32> -> vector<16x16x144xf32>
    %92 = vector.shape_cast %91 : vector<16x16x144xf32> to vector<256x144xf32>
    %93 = vector.extract_strided_slice %5 {offsets = [1, 0, 0], sizes = [1, 144, 4], strides = [1, 1, 1]} : vector<4x144x4xf32> to vector<1x144x4xf32>
    %94 = vector.shape_cast %93 : vector<1x144x4xf32> to vector<144x4xf32>
    %cst_27 = arith.constant dense<0.000000e+00> : vector<256x4xf32>
    %95 = tpu.matmul %92, %94, %cst_27 {dimension_numbers = #tpu.dot_dimension_numbers<[1], [0], [0], [1], [0, 0, 1, 1], [], []>} : vector<256x144xf32>, vector<144x4xf32>, vector<256x4xf32> -> vector<256x4xf32>
    %96 = tpu.concatenate %52, %95 in 1 : vector<256x8xf32>, vector<256x4xf32> -> vector<256x12xf32>
    %97 = vector.extract_strided_slice %0 {offsets = [2, 0], sizes = [1, 12], strides = [1, 1]} : vector<4x16xf32> to vector<1x12xf32>
    %98 = vector.broadcast %97 : vector<1x12xf32> to vector<256x12xf32>
    %99 = arith.mulf %96, %98 : vector<256x12xf32>
    %100 = vector.extract_strided_slice %1 {offsets = [2, 0], sizes = [1, 12], strides = [1, 1]} : vector<4x16xf32> to vector<1x12xf32>
    %101 = vector.broadcast %100 : vector<1x12xf32> to vector<256x12xf32>
    %102 = arith.addf %99, %101 : vector<256x12xf32>
    %cst_28 = arith.constant 0.000000e+00 : f32
    %103 = vector.broadcast %cst_28 : f32 to vector<256x12xf32>
    %104 = arith.maximumf %102, %103 : vector<256x12xf32>
    %105 = vector.extract_strided_slice %2 {offsets = [2, 0, 0], sizes = [1, 12, 16], strides = [1, 1, 1]} : vector<4x16x16xf32> to vector<1x12x16xf32>
    %106 = vector.shape_cast %105 : vector<1x12x16xf32> to vector<12x16xf32>
    %cst_29 = arith.constant dense<0.000000e+00> : vector<256x16xf32>
    %107 = tpu.matmul %104, %106, %cst_29 {dimension_numbers = #tpu.dot_dimension_numbers<[1], [0], [0], [1], [0, 0, 1, 1], [], []>} : vector<256x12xf32>, vector<12x16xf32>, vector<256x16xf32> -> vector<256x16xf32>
    %108 = vector.extract_strided_slice %3 {offsets = [2, 0], sizes = [1, 16], strides = [1, 1]} : vector<4x16xf32> to vector<1x16xf32>
    %109 = vector.broadcast %108 : vector<1x16xf32> to vector<256x16xf32>
    %110 = arith.mulf %107, %109 : vector<256x16xf32>
    %111 = vector.extract_strided_slice %4 {offsets = [2, 0], sizes = [1, 16], strides = [1, 1]} : vector<4x16xf32> to vector<1x16xf32>
    %112 = vector.broadcast %111 : vector<1x16xf32> to vector<256x16xf32>
    %113 = arith.addf %110, %112 : vector<256x16xf32>
    %cst_30 = arith.constant 0.000000e+00 : f32
    %114 = vector.broadcast %cst_30 : f32 to vector<256x16xf32>
    %115 = arith.maximumf %113, %114 : vector<256x16xf32>
    %116 = vector.shape_cast %115 : vector<256x16xf32> to vector<16x16x16xf32>
    %cst_31 = arith.constant 0.000000e+00 : f32
    %117 = vector.broadcast %cst_31 : f32 to vector<1x16x16xf32>
    %cst_32 = arith.constant 0.000000e+00 : f32
    %118 = vector.broadcast %cst_32 : f32 to vector<16x1x16xf32>
    %119 = vector.extract_strided_slice %116 {offsets = [0, 0, 0], sizes = [15, 16, 16], strides = [1, 1, 1]} : vector<16x16x16xf32> to vector<15x16x16xf32>
    %120 = tpu.concatenate %117, %119 in 0 : vector<1x16x16xf32>, vector<15x16x16xf32> -> vector<16x16x16xf32>
    %121 = vector.extract_strided_slice %120 {offsets = [0, 0, 0], sizes = [16, 15, 16], strides = [1, 1, 1]} : vector<16x16x16xf32> to vector<16x15x16xf32>
    %122 = tpu.concatenate %118, %121 in 1 : vector<16x1x16xf32>, vector<16x15x16xf32> -> vector<16x16x16xf32>
    %123 = vector.extract_strided_slice %120 {offsets = [0, 1, 0], sizes = [16, 15, 16], strides = [1, 1, 1]} : vector<16x16x16xf32> to vector<16x15x16xf32>
    %124 = tpu.concatenate %123, %118 in 1 : vector<16x15x16xf32>, vector<16x1x16xf32> -> vector<16x16x16xf32>
    %125 = vector.extract_strided_slice %116 {offsets = [0, 0, 0], sizes = [16, 15, 16], strides = [1, 1, 1]} : vector<16x16x16xf32> to vector<16x15x16xf32>
    %126 = tpu.concatenate %118, %125 in 1 : vector<16x1x16xf32>, vector<16x15x16xf32> -> vector<16x16x16xf32>
    %127 = vector.extract_strided_slice %116 {offsets = [0, 1, 0], sizes = [16, 15, 16], strides = [1, 1, 1]} : vector<16x16x16xf32> to vector<16x15x16xf32>
    %128 = tpu.concatenate %127, %118 in 1 : vector<16x15x16xf32>, vector<16x1x16xf32> -> vector<16x16x16xf32>
    %129 = vector.extract_strided_slice %116 {offsets = [1, 0, 0], sizes = [15, 16, 16], strides = [1, 1, 1]} : vector<16x16x16xf32> to vector<15x16x16xf32>
    %130 = tpu.concatenate %129, %117 in 0 : vector<15x16x16xf32>, vector<1x16x16xf32> -> vector<16x16x16xf32>
    %131 = vector.extract_strided_slice %130 {offsets = [0, 0, 0], sizes = [16, 15, 16], strides = [1, 1, 1]} : vector<16x16x16xf32> to vector<16x15x16xf32>
    %132 = tpu.concatenate %118, %131 in 1 : vector<16x1x16xf32>, vector<16x15x16xf32> -> vector<16x16x16xf32>
    %133 = vector.extract_strided_slice %130 {offsets = [0, 1, 0], sizes = [16, 15, 16], strides = [1, 1, 1]} : vector<16x16x16xf32> to vector<16x15x16xf32>
    %134 = tpu.concatenate %133, %118 in 1 : vector<16x15x16xf32>, vector<16x1x16xf32> -> vector<16x16x16xf32>
    %135 = tpu.concatenate %122, %120, %124, %126, %116, %128, %132, %130, %134 in 2 : vector<16x16x16xf32>, vector<16x16x16xf32>, vector<16x16x16xf32>, vector<16x16x16xf32>, vector<16x16x16xf32>, vector<16x16x16xf32>, vector<16x16x16xf32>, vector<16x16x16xf32>, vector<16x16x16xf32> -> vector<16x16x144xf32>
    %136 = vector.shape_cast %135 : vector<16x16x144xf32> to vector<256x144xf32>
    %137 = vector.extract_strided_slice %5 {offsets = [2, 0, 0], sizes = [1, 144, 4], strides = [1, 1, 1]} : vector<4x144x4xf32> to vector<1x144x4xf32>
    %138 = vector.shape_cast %137 : vector<1x144x4xf32> to vector<144x4xf32>
    %cst_33 = arith.constant dense<0.000000e+00> : vector<256x4xf32>
    %139 = tpu.matmul %136, %138, %cst_33 {dimension_numbers = #tpu.dot_dimension_numbers<[1], [0], [0], [1], [0, 0, 1, 1], [], []>} : vector<256x144xf32>, vector<144x4xf32>, vector<256x4xf32> -> vector<256x4xf32>
    %140 = tpu.concatenate %96, %139 in 1 : vector<256x12xf32>, vector<256x4xf32> -> vector<256x16xf32>
    %141 = vector.extract_strided_slice %0 {offsets = [3, 0], sizes = [1, 16], strides = [1, 1]} : vector<4x16xf32> to vector<1x16xf32>
    %142 = vector.broadcast %141 : vector<1x16xf32> to vector<256x16xf32>
    %143 = arith.mulf %140, %142 : vector<256x16xf32>
    %144 = vector.extract_strided_slice %1 {offsets = [3, 0], sizes = [1, 16], strides = [1, 1]} : vector<4x16xf32> to vector<1x16xf32>
    %145 = vector.broadcast %144 : vector<1x16xf32> to vector<256x16xf32>
    %146 = arith.addf %143, %145 : vector<256x16xf32>
    %cst_34 = arith.constant 0.000000e+00 : f32
    %147 = vector.broadcast %cst_34 : f32 to vector<256x16xf32>
    %148 = arith.maximumf %146, %147 : vector<256x16xf32>
    %149 = vector.extract_strided_slice %2 {offsets = [3, 0, 0], sizes = [1, 16, 16], strides = [1, 1, 1]} : vector<4x16x16xf32> to vector<1x16x16xf32>
    %150 = vector.shape_cast %149 : vector<1x16x16xf32> to vector<16x16xf32>
    %cst_35 = arith.constant dense<0.000000e+00> : vector<256x16xf32>
    %151 = tpu.matmul %148, %150, %cst_35 {dimension_numbers = #tpu.dot_dimension_numbers<[1], [0], [0], [1], [0, 0, 1, 1], [], []>} : vector<256x16xf32>, vector<16x16xf32>, vector<256x16xf32> -> vector<256x16xf32>
    %152 = vector.extract_strided_slice %3 {offsets = [3, 0], sizes = [1, 16], strides = [1, 1]} : vector<4x16xf32> to vector<1x16xf32>
    %153 = vector.broadcast %152 : vector<1x16xf32> to vector<256x16xf32>
    %154 = arith.mulf %151, %153 : vector<256x16xf32>
    %155 = vector.extract_strided_slice %4 {offsets = [3, 0], sizes = [1, 16], strides = [1, 1]} : vector<4x16xf32> to vector<1x16xf32>
    %156 = vector.broadcast %155 : vector<1x16xf32> to vector<256x16xf32>
    %157 = arith.addf %154, %156 : vector<256x16xf32>
    %cst_36 = arith.constant 0.000000e+00 : f32
    %158 = vector.broadcast %cst_36 : f32 to vector<256x16xf32>
    %159 = arith.maximumf %157, %158 : vector<256x16xf32>
    %160 = vector.shape_cast %159 : vector<256x16xf32> to vector<16x16x16xf32>
    %cst_37 = arith.constant 0.000000e+00 : f32
    %161 = vector.broadcast %cst_37 : f32 to vector<1x16x16xf32>
    %cst_38 = arith.constant 0.000000e+00 : f32
    %162 = vector.broadcast %cst_38 : f32 to vector<16x1x16xf32>
    %163 = vector.extract_strided_slice %160 {offsets = [0, 0, 0], sizes = [15, 16, 16], strides = [1, 1, 1]} : vector<16x16x16xf32> to vector<15x16x16xf32>
    %164 = tpu.concatenate %161, %163 in 0 : vector<1x16x16xf32>, vector<15x16x16xf32> -> vector<16x16x16xf32>
    %165 = vector.extract_strided_slice %164 {offsets = [0, 0, 0], sizes = [16, 15, 16], strides = [1, 1, 1]} : vector<16x16x16xf32> to vector<16x15x16xf32>
    %166 = tpu.concatenate %162, %165 in 1 : vector<16x1x16xf32>, vector<16x15x16xf32> -> vector<16x16x16xf32>
    %167 = vector.extract_strided_slice %164 {offsets = [0, 1, 0], sizes = [16, 15, 16], strides = [1, 1, 1]} : vector<16x16x16xf32> to vector<16x15x16xf32>
    %168 = tpu.concatenate %167, %162 in 1 : vector<16x15x16xf32>, vector<16x1x16xf32> -> vector<16x16x16xf32>
    %169 = vector.extract_strided_slice %160 {offsets = [0, 0, 0], sizes = [16, 15, 16], strides = [1, 1, 1]} : vector<16x16x16xf32> to vector<16x15x16xf32>
    %170 = tpu.concatenate %162, %169 in 1 : vector<16x1x16xf32>, vector<16x15x16xf32> -> vector<16x16x16xf32>
    %171 = vector.extract_strided_slice %160 {offsets = [0, 1, 0], sizes = [16, 15, 16], strides = [1, 1, 1]} : vector<16x16x16xf32> to vector<16x15x16xf32>
    %172 = tpu.concatenate %171, %162 in 1 : vector<16x15x16xf32>, vector<16x1x16xf32> -> vector<16x16x16xf32>
    %173 = vector.extract_strided_slice %160 {offsets = [1, 0, 0], sizes = [15, 16, 16], strides = [1, 1, 1]} : vector<16x16x16xf32> to vector<15x16x16xf32>
    %174 = tpu.concatenate %173, %161 in 0 : vector<15x16x16xf32>, vector<1x16x16xf32> -> vector<16x16x16xf32>
    %175 = vector.extract_strided_slice %174 {offsets = [0, 0, 0], sizes = [16, 15, 16], strides = [1, 1, 1]} : vector<16x16x16xf32> to vector<16x15x16xf32>
    %176 = tpu.concatenate %162, %175 in 1 : vector<16x1x16xf32>, vector<16x15x16xf32> -> vector<16x16x16xf32>
    %177 = vector.extract_strided_slice %174 {offsets = [0, 1, 0], sizes = [16, 15, 16], strides = [1, 1, 1]} : vector<16x16x16xf32> to vector<16x15x16xf32>
    %178 = tpu.concatenate %177, %162 in 1 : vector<16x15x16xf32>, vector<16x1x16xf32> -> vector<16x16x16xf32>
    %179 = tpu.concatenate %166, %164, %168, %170, %160, %172, %176, %174, %178 in 2 : vector<16x16x16xf32>, vector<16x16x16xf32>, vector<16x16x16xf32>, vector<16x16x16xf32>, vector<16x16x16xf32>, vector<16x16x16xf32>, vector<16x16x16xf32>, vector<16x16x16xf32>, vector<16x16x16xf32> -> vector<16x16x144xf32>
    %180 = vector.shape_cast %179 : vector<16x16x144xf32> to vector<256x144xf32>
    %181 = vector.extract_strided_slice %5 {offsets = [3, 0, 0], sizes = [1, 144, 4], strides = [1, 1, 1]} : vector<4x144x4xf32> to vector<1x144x4xf32>
    %182 = vector.shape_cast %181 : vector<1x144x4xf32> to vector<144x4xf32>
    %cst_39 = arith.constant dense<0.000000e+00> : vector<256x4xf32>
    %183 = tpu.matmul %180, %182, %cst_39 {dimension_numbers = #tpu.dot_dimension_numbers<[1], [0], [0], [1], [0, 0, 1, 1], [], []>} : vector<256x144xf32>, vector<144x4xf32>, vector<256x4xf32> -> vector<256x4xf32>
    %184 = tpu.concatenate %140, %183 in 1 : vector<256x16xf32>, vector<256x4xf32> -> vector<256x20xf32>
    %185 = vector.shape_cast %184 : vector<256x20xf32> to vector<16x16x20xf32>
    %c0_40 = arith.constant 0 : index
    %c0_41 = arith.constant 0 : index
    %c0_42 = arith.constant 0 : index
    %c0_43 = arith.constant 0 : index
    %186 = vector.load %arg8[%c0_40, %c0_41, %c0_42, %c0_43] : memref<1x16x16x20xf32, #tpu.memory_space<vmem>>, vector<1x16x16x20xf32>
    %187 = vector.shape_cast %186 : vector<1x16x16x20xf32> to vector<16x16x20xf32>
    %188 = vector.shape_cast %185 : vector<16x16x20xf32> to vector<1x16x16x20xf32>
    tpu.vector_store %arg8[%c0_40, %c0_41, %c0_42, %c0_43], %188 {strides = array<i32>} : memref<1x16x16x20xf32, #tpu.memory_space<vmem>>, vector<1x16x16x20xf32>,
    return
  }
  func.func @transform_0(%arg0: i32) -> (i32, i32, i32, i32) {
    %c0_i32 = arith.constant 0 : i32
    %c0_i32_0 = arith.constant 0 : i32
    %c0_i32_1 = arith.constant 0 : i32
    %c0_i32_2 = arith.constant 0 : i32
    return %arg0, %c0_i32, %c0_i32_0, %c0_i32_1 : i32, i32, i32, i32
  }
  func.func @transform_1(%arg0: i32) -> (i32, i32) {
    %c0_i32 = arith.constant 0 : i32
    %c0_i32_0 = arith.constant 0 : i32
    %c0_i32_1 = arith.constant 0 : i32
    return %c0_i32, %c0_i32_0 : i32, i32
  }
  func.func @transform_2(%arg0: i32) -> (i32, i32) {
    %c0_i32 = arith.constant 0 : i32
    %c0_i32_0 = arith.constant 0 : i32
    %c0_i32_1 = arith.constant 0 : i32
    return %c0_i32, %c0_i32_0 : i32, i32
  }
  func.func @transform_3(%arg0: i32) -> (i32, i32, i32) {
    %c0_i32 = arith.constant 0 : i32
    %c0_i32_0 = arith.constant 0 : i32
    %c0_i32_1 = arith.constant 0 : i32
    %c0_i32_2 = arith.constant 0 : i32
    return %c0_i32, %c0_i32_0, %c0_i32_1 : i32, i32, i32
  }
  func.func @transform_4(%arg0: i32) -> (i32, i32) {
    %c0_i32 = arith.constant 0 : i32
    %c0_i32_0 = arith.constant 0 : i32
    %c0_i32_1 = arith.constant 0 : i32
    return %c0_i32, %c0_i32_0 : i32, i32
  }
  func.func @transform_5(%arg0: i32) -> (i32, i32) {
    %c0_i32 = arith.constant 0 : i32
    %c0_i32_0 = arith.constant 0 : i32
    %c0_i32_1 = arith.constant 0 : i32
    return %c0_i32, %c0_i32_0 : i32, i32
  }
  func.func @transform_6(%arg0: i32) -> (i32, i32, i32) {
    %c0_i32 = arith.constant 0 : i32
    %c0_i32_0 = arith.constant 0 : i32
    %c0_i32_1 = arith.constant 0 : i32
    %c0_i32_2 = arith.constant 0 : i32
    return %c0_i32, %c0_i32_0, %c0_i32_1 : i32, i32, i32
  }
  func.func @transform_7(%arg0: i32) -> (i32, i32, i32, i32) {
    %c0_i32 = arith.constant 0 : i32
    %c0_i32_0 = arith.constant 0 : i32
    %c0_i32_1 = arith.constant 0 : i32
    %c0_i32_2 = arith.constant 0 : i32
    return %arg0, %c0_i32, %c0_i32_0, %c0_i32_1 : i32, i32, i32, i32
  }
}

</mosaic_0001>

<bundles_post_ra>
// kernel: _lambda_.1
= control target key start
LH: loop header
LB: loop body
LE: loop exit
PB: predicated region body
PF: predicated region fallthrough
CT: control target
= control target key end

     0   :  { %12 = vsyncpa [#allocation3], 0  ;;  %s17433_s0 = inlined_call_operand.vmem [shape: f32[2,16,16,4], index: 0, kind: input, shape index: {}]   ;;  %s17434_s1 = inlined_call_operand.hbm [shape: f32[4,16], index: 1, kind: input, shape index: {}]   ;;  %s17435_s2 = inlined_call_operand.vmem [shape: f32[4,16], index: 2, kind: input, shape index: {}]   ;;  %s17436_s3 = inlined_call_operand.vmem [shape: f32[4,16,16], index: 3, kind: input, shape index: {}]   ;;  %s17437_s4 = inlined_call_operand.hbm [shape: f32[4,16], index: 4, kind: input, shape index: {}]   ;;  %s17438_s5 = inlined_call_operand.hbm [shape: f32[4,16], index: 5, kind: input, shape index: {}]   ;;  %s17439_s6 = inlined_call_operand.vmem [shape: f32[4,144,4], index: 6, kind: input, shape index: {}]   ;;  %s17440_s7 = inlined_call_operand.hbm [shape: f32[2,16,16,20], index: 7, kind: output, shape index: {}]  }
   0x1   :  { %13 = vsyncpa [#allocation6], 0 }
   0x2   :  { %14 = vsyncpa [#allocation4], 0 }
   0x3   :  { %16 = vsyncpa [#allocation4 + $0x1], 0  ;;  %s12006_s24 = smov 0   ;;  %s12008_s25 = smov 0  }
   0x4   :  { %s12010_s26 = smov 0   ;;  %s12012_s27 = smov 0  }
   0x5 LB: > { %s12027_s28 = sadd.s32 4294967295, %s11948_s27   ;;  %s8950_s29 = sadd.s32 4294967294, %s11948_s27   ;;  %s11948_s27 = sphi %s12012_s27, %s17874_s27   ;;  %s11944_s26 = sphi %s12010_s26, %s17873_s26   ;;  %s11940_s25 = sphi %s12008_s25, %s17872_s25   ;;  %s11936_s24 = sphi %s12006_s24, %s17871_s24  }
   0x6   : > { %s12031_s30 = sadd.s32 1, %s11948_s27   ;;  %s181_s8 = sadd.s32 1, %s11944_s26 }
   0x7   : > { %s178_s9 = ssub.s32 %s11948_s27, %s12031_s30  ;;  %p191_p0 = scmp.ne.s32.totalorder %s11944_s26, %s11940_s25 }
   0x8   : > { %p179_p1 = scmp.eq.s32.totalorder %s178_s9, 0  ;;  %p192_p2 = scmp.eq.s32.totalorder %s12027_s28, 1 }
   0x9   : > { %p197_p3 = scmp.ne.s32.totalorder %s11940_s25, %s11936_s24  ;;  %p198_p4 = scmp.eq.s32.totalorder %s8950_s29, 1 }
   0xa   : > { %s12042_s10 = scalar_select %p179_p1, %s11944_s26, %s181_s8  }
   0xb   : > { %p12044_p5 = por %p192_p2, %p191_p0  ;;  %p12048_p6 = por %p198_p4, %p197_p3 }
   0xc   : > { %p8951_p7 = scmp.ge.s32.totalorder %s11948_s27, 1  ;;  %p205_p8 = scmp.lt.s32.totalorder %s11948_s27, 3 }
   0xd   : > { %s17586_s11 = scalar_select %p12044_p5, 1, 0 }
   0xe   : > { %s17587_s12 = scalar_select %p12048_p6, 1, 0 }
   0xf   : > { %p17441_p9 = scmp.eq.s32.totalorder %s12027_s28, 0  ;;  %p12055_p10 = pnand %p8951_p7, %p205_p8 }
  0x10   : > { %s11950_s14 = smov [#allocation5]   ;;  %s11951_s16 = smov [#allocation2]  }
  0x11   : > { %s17588_s13 = scalar_select %p12055_p10, 1, 0 }
  0x12   : > { %s235_s15 = sshll.u32 %s11950_s14, 4  ;;  %p9580_p11 = pneg %p12055_p10  ;;  %s236_s15 = int_to_ptr.vmem [resolvable:$true] %s235_s15 }
  0x13   : > { %s218_s17 = sshll.u32 %s11951_s16, 4  ;;  %s11952_s19 = smov [#allocation7]   ;;  %s219_s17 = int_to_ptr.vmem [resolvable:$true] %s218_s17 }
  0x14   : > { %p12063_p12 = pnand %p17441_p9, %p9580_p11  ;;  %s246_s20 = sshll.u32 %s11952_s19, 4  ;;  %s12067_s20 = int_to_ptr.vmem [resolvable:$true] %s246_s20 }
  0x15   : > { %s11813_s21 = scalar_lea.vmem %s236_s15, 64  ;;  %p11821_p3 = scmp.lt.s32.totalorder %s236_s15, %s236_s15 }
  0x16   : > { %p11804_p13 = pneg %p12063_p12  ;;  %p11814_p0 = scmp.ne.s32.totalorder %s236_s15, %s11813_s21 }
  0x17   : > { %p11822_p4 = scmp.lt.s32.totalorder %s11813_s21, %s11813_s21 }
  0x18   : > { %p11816_p1 = pnand %p11814_p0, %p11804_p13 }
  0x19   : > { %p11823_p7 = por %p11822_p4, %p11821_p3 }
  0x1a   : > { %p11817_p2 = pneg %p11816_p1 }
  0x1c   : > { %p11824_p8 = pnand %p11823_p7, %p11817_p2 }
  0x1e   : > { %11827 = shalt.err (!%p11824_p8)
}
  0x1f   : > { %9586 = dma.hbm_to_vmem [thread:$0]  (!%p12063_p12), %s17437_s4, 64, %s236_s15, [#allocation6]  }
  0x20   : > { %s11839_s29 = scalar_lea.vmem %s219_s17, 64  ;;  %p11847_p0 = scmp.lt.s32.totalorder %s219_s17, %s219_s17 }
  0x21   : > { %p11840_p11 = scmp.ne.s32.totalorder %s219_s17, %s11839_s29  ;;  %p11848_p1 = scmp.lt.s32.totalorder %s11839_s29, %s11839_s29 }
  0x23   : > { %p11842_p9 = pnand %p11840_p11, %p11804_p13  ;;  %p11849_p5 = por %p11848_p1, %p11847_p0 }
  0x25   : > { %p11843_p6 = pneg %p11842_p9 }
  0x27   : > { %p11850_p10 = pnand %p11849_p5, %p11843_p6 }
  0x29   : > { %11853 = shalt.err (!%p11850_p10)
}
  0x2a   : > { %9583 = dma.hbm_to_vmem [thread:$0]  (!%p12063_p12), %s17434_s1, 64, %s219_s17, [#allocation3]  }
  0x2b   : > { %s11865_s14 = scalar_lea.vmem %s12067_s20, 64  ;;  %p11873_p4 = scmp.lt.s32.totalorder %s12067_s20, %s12067_s20 }
  0x2c   : > { %p11866_p2 = scmp.ne.s32.totalorder %s12067_s20, %s11865_s14  ;;  %p11874_p5 = scmp.lt.s32.totalorder %s11865_s14, %s11865_s14 }
  0x2e   : > { %p11868_p9 = pnand %p11866_p2, %p11804_p13  ;;  %p11875_p6 = por %p11874_p5, %p11873_p4 }
  0x30   : > { %p11869_p3 = pneg %p11868_p9 }
  0x32   : > { %p11876_p10 = pnand %p11875_p6, %p11869_p3 }
  0x34   : > { %11879 = shalt.err (!%p11876_p10)
}
  0x35   : > { %9589 = dma.hbm_to_vmem [thread:$0]  (!%p12063_p12), %s17438_s5, 64, %s12067_s20, [#allocation6]  }
  0x36   : > { %p17590_p7 = scmp.ne.s32.totalorder %s17588_s13, 0 }
  0x38   : > { %270 = sbr.rel (%p17590_p7) target bundleno = 2931 (0xb73), region = 48 }
  0x3d   : > { %p17591_p8 = scmp.eq.s32.totalorder %s12027_s28, 0 }
  0x3f   : > { %11923 = dma.done.wait (%p17591_p8), [#allocation3], 64   ;;  %p17592_p13 = pmov %p17591_p8 }
  0x40   : > { %p17593_p11 = pmov %p17591_p8 }
  0x41   : > { %11925 = vsyncadd (%p17592_p13), [#allocation3], 4294967232 }
  0x42   : > { %11927 = dma.done.wait (%p17593_p11), [#allocation6], 128   ;;  %p17594_p0 = pmov %p17591_p8 }
  0x43   : > { %p310_p1 = scmp.lt.s32.totalorder %s12027_s28, 1  ;;  %v429_v0 = vlaneseq  ;;  %vm630_vm0 = vcmask 1043456   ;;  %v317_v3 = vld [vmem:[%s17436_s3] sm:$0xff]  ;;  %vm533_vm1 = vcmask 31744   ;;  %vm1090_vm2 = vcmask 1046528   ;;  %s11954_s8 = smov 32  }
  0x44   : > { %11929 = vsyncadd (%p17594_p0), [#allocation6], 4294967168  ;;  %v315_v4 = vld [vmem:[#allocation2] sm:$0xf]  ;;  %9362 = vmatprep.subr.msk.mxu1 %vm630_vm0, %v317_v3  ;;  %vm994_vm3 = vcmask 1040384   ;;  %s17464_s9 = smov 96  }
  0x45   : > { %s311_s17 = scalar_select %p310_p1, %s12027_s28, 1  ;;  %v12112_v1 = vshrl.u32 %v429_v0, 7  ;;  %v316_v5 = vld [vmem:[%s17435_s2] sm:$0xf]  ;;  %9363 = vmatpush3.msk.msra.mxu1 %vm630_vm0, %v317_v3  ;;  %vm1882_vm4 = vcmask 130048   ;;  %vm1915_vm5 = vcmask 261120  }
  0x46   : > { %s11956_s22 = smov 64   ;;  %s11957_s23 = smov 16   ;;  %vm1948_vm6 = vcmask 392192   ;;  %vm1981_vm7 = vcmask 523264   ;;  %vm2014_vm8 = vcmask 654336   ;;  %vm2047_vm9 = vcmask 785408  }
  0x47   : > { %17595 = vst [vmem:[#allocation12_spill] sm:$0xff] %v12112_v1  ;;  %s9226_s13 = sshll.u32 %s311_s17, 8  ;;  %v12115_v2 = vsub.s32 0, %v12112_v1  ;;  %s11958_s15 = smov 48   ;;  %vm2080_vm10 = vcmask 916480   ;;  %vm2666_vm11 = vcmask 64512  }
  0x48   : > { %s12120_s20 = scalar_lea.vmem %s17433_s0, %s9226_s13  ;;  %s11959_s16 = smov 80   ;;  %vm4748_vm12 = vcmask 97280   ;;  %vm8810_vm13 = vcmask 162816  }
  0x49   : > { %v397_v6 = vld [vmem:[%s12120_s20] sm:$0xff]  ;;  %v12131_v7 = vrot.slane %v315_v4, %v12115_v2  ;;  %v12134_v8 = vrot.slane %v316_v5, %v12115_v2  ;;  %v398_v9 = vld [vmem:[%s12120_s20 + $0x8] sm:$0xff]  ;;  %v399_v10 = vld [vmem:[%s12120_s20 + $0x10] sm:$0xff]  ;;  %s17466_s21 = smov 112   ;;  %s11961_s17 = smov 4  }
  0x4a   : > { %v400_v11 = vld [vmem:[%s12120_s20 + $0x18] sm:$0xff]  ;;  %v401_v12 = vld [vmem:[%s12120_s20 + $0x20] sm:$0xff]  ;;  %v402_v17 = vld [vmem:[%s12120_s20 + $0x28] sm:$0xff]  ;;  %s17506_s19 = smov 8   ;;  %s11963_s29 = smov 12  }
  0x4b   : > { %v433_v13 = vmul.f32 %v12131_v7, %v397_v6  ;;  %v434_v14 = vmul.f32 %v12131_v7, %v398_v9  ;;  %v435_v15 = vmul.f32 %v12131_v7, %v399_v10  ;;  %v436_v16 = vmul.f32 %v12131_v7, %v400_v11  ;;  %v403_v18 = vld [vmem:[%s12120_s20 + $0x30] sm:$0xff]  ;;  %v404_v30 = vld [vmem:[%s12120_s20 + $0x38] sm:$0xff]  ;;  %v405_v31 = vld [vmem:[%s12120_s20 + $0x40] sm:$0xff]  ;;  %p17868_p2 = scmp.ne.s32.totalorder %s17586_s11, 0 }
  0x4c   : > { %v437_v19 = vmul.f32 %v12131_v7, %v401_v12  ;;  %v438_v24 = vmul.f32 %v12131_v7, %v402_v17  ;;  %v439_v25 = vmul.f32 %v12131_v7, %v403_v18  ;;  %v440_v34 = vmul.f32 %v12131_v7, %v404_v30  ;;  %v406_v38 = vld [vmem:[%s12120_s20 + $0x48] sm:$0xff]  ;;  %v407_v39 = vld [vmem:[%s12120_s20 + $0x50] sm:$0xff]  ;;  %v408_v46 = vld [vmem:[%s12120_s20 + $0x58] sm:$0xff] }
  0x4d   : > { %v469_v20 = vadd.f32 %v12134_v8, %v433_v13  ;;  %v470_v21 = vadd.f32 %v12134_v8, %v434_v14  ;;  %v471_v22 = vadd.f32 %v12134_v8, %v435_v15  ;;  %v472_v23 = vadd.f32 %v12134_v8, %v436_v16  ;;  %v409_v47 = vld [vmem:[%s12120_s20 + $0x60] sm:$0xff]  ;;  %v410_v54 = vld [vmem:[%s12120_s20 + $0x68] sm:$0xff]  ;;  %v411_v55 = vld [vmem:[%s12120_s20 + $0x70] sm:$0xff] }
  0x4e   : > { %v473_v29 = vadd.f32 %v12134_v8, %v437_v19  ;;  %v474_v33 = vadd.f32 %v12134_v8, %v438_v24  ;;  %v475_v36 = vadd.f32 %v12134_v8, %v439_v25  ;;  %v441_v37 = vmul.f32 %v12131_v7, %v405_v31  ;;  %v412_v62 = vld [vmem:[%s12120_s20 + $0x78] sm:$0xff]  ;;  %v413_v63 = vld [vmem:[%s12120_s20 + $0x80] sm:$0xff]  ;;  %v414_v10 = vld [vmem:[%s12120_s20 + $0x88] sm:$0xff] }
  0x4f   : > { %v501_v26 = vmax.f32 %v469_v20, 0.0  ;;  %v502_v27 = vmax.f32 %v470_v21, 0.0  ;;  %v503_v28 = vmax.f32 %v471_v22, 0.0  ;;  %v504_v32 = vmax.f32 %v472_v23, 0.0  ;;  %v415_v11 = vld [vmem:[%s12120_s20 + $0x90] sm:$0xff]  ;;  %v416_v18 = vld [vmem:[%s12120_s20 + $0x98] sm:$0xff] }
  0x50   : > { %v505_v35 = vmax.f32 %v473_v29, 0.0  ;;  %v506_v40 = vmax.f32 %v474_v33, 0.0  ;;  %v476_v41 = vadd.f32 %v12134_v8, %v440_v34  ;;  %v442_v42 = vmul.f32 %v12131_v7, %v406_v38  ;;  %v417_v19 = vld [vmem:[%s12120_s20 + $0xa0] sm:$0xff]  ;;  %v420_v34 = vld [vmem:[%s12120_s20 + $0xb8] sm:$0xff] }
  0x51   : > { %9364 = vmatprep.mubr.msk.f32.mxu1 %vm533_vm1, %v501_v26  ;;  %v507_v43 = vmax.f32 %v475_v36, 0.0  ;;  %v477_v44 = vadd.f32 %v12134_v8, %v441_v37  ;;  %v443_v45 = vmul.f32 %v12131_v7, %v407_v39  ;;  %v444_v50 = vmul.f32 %v12131_v7, %v408_v46  ;;  %v418_v26 = vld [vmem:[%s12120_s20 + $0xa8] sm:$0xff] }
  0x52   : > { %9365 = vmatmul.mubr.msk.f32.vlgmr.msra.gmra.mxu1 %vm533_vm1, %v502_v27  ;;  %v508_v48 = vmax.f32 %v476_v41, 0.0  ;;  %v478_v49 = vadd.f32 %v12134_v8, %v442_v42  ;;  %v445_v53 = vmul.f32 %v12131_v7, %v409_v47  ;;  %v446_v58 = vmul.f32 %v12131_v7, %v410_v54  ;;  %v419_v27 = vld [vmem:[%s12120_s20 + $0xb0] sm:$0xff]  ;;  %v422_v42 = vld [vmem:[%s12120_s20 + $0xc8] sm:$0xff] }
  0x53   : > { %9367 = vmatprep.mubr.msk.f32.mxu1 %vm533_vm1, %v503_v28  ;;  %v509_v51 = vmax.f32 %v477_v44, 0.0  ;;  %v479_v52 = vadd.f32 %v12134_v8, %v443_v45  ;;  %v480_v57 = vadd.f32 %v12134_v8, %v444_v50  ;;  %v447_v61 = vmul.f32 %v12131_v7, %v411_v55  ;;  %v424_v50 = vld [vmem:[%s12120_s20 + $0xd8] sm:$0xff] }
  0x54   : > { %v510_v56 = vmax.f32 %v478_v49, 0.0  ;;  %v481_v60 = vadd.f32 %v12134_v8, %v445_v53  ;;  %v482_v3 = vadd.f32 %v12134_v8, %v446_v58  ;;  %v448_v4 = vmul.f32 %v12131_v7, %v412_v62  ;;  %v426_v58 = vld [vmem:[%s12120_s20 + $0xe8] sm:$0xff] }
  0x55   : > { %v511_v59 = vmax.f32 %v479_v52, 0.0  ;;  %v512_v0 = vmax.f32 %v480_v57, 0.0  ;;  %v483_v6 = vadd.f32 %v12134_v8, %v447_v61  ;;  %v449_v9 = vmul.f32 %v12131_v7, %v413_v63 }
  0x56   : > { %9368 = vmatmul.mubr.msk.f32.gmra.mxu1 %vm533_vm1, %v504_v32  ;;  %v513_v5 = vmax.f32 %v481_v60, 0.0  ;;  %v514_v12 = vmax.f32 %v482_v3, 0.0  ;;  %v484_v13 = vadd.f32 %v12134_v8, %v448_v4  ;;  %v450_v14 = vmul.f32 %v12131_v7, %v414_v10 }
  0x57   : > { %9370 = vmatprep.mubr.msk.f32.mxu1 %vm533_vm1, %v505_v35  ;;  %v515_v15 = vmax.f32 %v483_v6, 0.0  ;;  %v485_v16 = vadd.f32 %v12134_v8, %v449_v9  ;;  %v451_v17 = vmul.f32 %v12131_v7, %v415_v11  ;;  %v452_v22 = vmul.f32 %v12131_v7, %v416_v18  ;;  %v421_v35 = vld [vmem:[%s12120_s20 + $0xc0] sm:$0xff] }
  0x58   : > { %v516_v20 = vmax.f32 %v484_v13, 0.0  ;;  %v486_v21 = vadd.f32 %v12134_v8, %v450_v14  ;;  %v453_v25 = vmul.f32 %v12131_v7, %v417_v19  ;;  %v454_v30 = vmul.f32 %v12131_v7, %v418_v26  ;;  %v427_v14 = vld [vmem:[%s12120_s20 + $0xf0] sm:$0xff]  ;;  %v334_v26 = vld [vmem:[%s17439_s6 + $0x48] sm:$0xff] }
  0x59   : > { %v517_v23 = vmax.f32 %v485_v16, 0.0  ;;  %v487_v24 = vadd.f32 %v12134_v8, %v451_v17  ;;  %v488_v29 = vadd.f32 %v12134_v8, %v452_v22  ;;  %v455_v33 = vmul.f32 %v12131_v7, %v419_v27  ;;  %v428_v16 = vld [vmem:[%s12120_s20 + $0xf8] sm:$0xff]  ;;  %v333_v27 = vld [vmem:[%s17439_s6 + $0x40] sm:$0xff] }
  0x5a   : > { %9371 = vmatmul.mubr.msk.f32.gmra.mxu1 %vm533_vm1, %v506_v40  ;;  %v518_v28 = vmax.f32 %v486_v21, 0.0  ;;  %v489_v32 = vadd.f32 %v12134_v8, %v453_v25  ;;  %v490_v37 = vadd.f32 %v12134_v8, %v454_v30  ;;  %v456_v38 = vmul.f32 %v12131_v7, %v420_v34  ;;  %v340_v22 = vld [vmem:[%s17439_s6 + $0x78] sm:$0xff]  ;;  %v335_v25 = vld [vmem:[%s17439_s6 + $0x50] sm:$0xff]  ;;  %v330_v30 = vld [vmem:[%s17439_s6 + $0x28] sm:$0xff] }
  0x5b   : > { %9373 = vmatprep.mubr.msk.f32.mxu1 %vm533_vm1, %v507_v43  ;;  %v519_v31 = vmax.f32 %v487_v24, 0.0  ;;  %v520_v36 = vmax.f32 %v488_v29, 0.0  ;;  %v491_v40 = vadd.f32 %v12134_v8, %v455_v33  ;;  %v457_v41 = vmul.f32 %v12131_v7, %v421_v35  ;;  %v423_v43 = vld [vmem:[%s12120_s20 + $0xd0] sm:$0xff]  ;;  %v336_v24 = vld [vmem:[%s17439_s6 + $0x58] sm:$0xff] }
  0x5c   : > { %v521_v39 = vmax.f32 %v489_v32, 0.0  ;;  %v522_v44 = vmax.f32 %v490_v37, 0.0  ;;  %v492_v45 = vadd.f32 %v12134_v8, %v456_v38  ;;  %v458_v46 = vmul.f32 %v12131_v7, %v422_v42  ;;  %v331_v29 = vld [vmem:[%s17439_s6 + $0x30] sm:$0xff]  ;;  %v324_v32 = vld [vmem:[#allocation7] sm:$0xf]  ;;  %v329_v38 = vld [vmem:[%s17439_s6 + $0x20] sm:$0xff] }
  0x5d   : > { %v523_v47 = vmax.f32 %v491_v40, 0.0  ;;  %v459_v49 = vmul.f32 %v12131_v7, %v423_v43  ;;  %v460_v54 = vmul.f32 %v12131_v7, %v424_v50  ;;  %v462_v61 = vmul.f32 %v12131_v7, %v426_v58 }
  0x5e   : > { %9374 = vmatmul.mubr.msk.f32.gmra.mxu1 %vm533_vm1, %v508_v48  ;;  %v493_v48 = vadd.f32 %v12134_v8, %v457_v41  ;;  %v524_v52 = vmax.f32 %v492_v45, 0.0  ;;  %v494_v53 = vadd.f32 %v12134_v8, %v458_v46  ;;  %v17444_v6 = vmov 0.0   ;;  %v327_v45 = vld [vmem:[%s17439_s6 + $0x10] sm:$0xff] }
  0x5f   : > { %9376 = vmatprep.mubr.msk.f32.mxu1 %vm533_vm1, %v509_v51  ;;  %v425_v51 = vld [vmem:[%s12120_s20 + $0xe0] sm:$0xff]  ;;  %v496_v60 = vadd.f32 %v12134_v8, %v460_v54  ;;  %v498_v3 = vadd.f32 %v12134_v8, %v462_v61  ;;  %v12257_v9 = vrot.slane %v17444_v6, 1  ;;  %2177 = vmatprep.subr.mxu1 %v17444_v6  ;;  %v464_v17 = vmul.f32 %v12131_v7, %v428_v16 }
  0x60   : > { %v525_v55 = vmax.f32 %v493_v48, 0.0  ;;  %v461_v57 = vmul.f32 %v12131_v7, %v425_v51  ;;  %2178 = vmatpush1.msra.mxu1 %v340_v22  ;;  %v12332_v34 = vrot.slane %v324_v32, %v12115_v2  ;;  %v326_v51 = vld [vmem:[%s17439_s6 + $0x8] sm:$0xff] }
  0x61   : > { %17596 = vst [vmem:[#allocation13_spill] sm:$0xff] %v12257_v9  ;;  %v12262_v10 = vsel %vm1090_vm2, %v12257_v9, 0.0  ;;  %v500_v19 = vadd.f32 %v12134_v8, %v464_v17  ;;  %2179 = vmatprep.subr.mxu1 %v17444_v6  ;;  %v342_v17 = vld [vmem:[%s17439_s6 + $0x88] sm:$0xff] }
  0x62   : > { %9377 = vmatmul.mubr.msk.f32.gmra.mxu1 %vm533_vm1, %v510_v56  ;;  %v495_v56 = vadd.f32 %v12134_v8, %v459_v49  ;;  %v497_v63 = vadd.f32 %v12134_v8, %v461_v57  ;;  %17597 = vst [vmem:[#allocation14_spill] sm:$0xff] %v12262_v10  ;;  %v9648_v11 = vpack.i.bf16 %v12262_v10, %v12257_v9 }
  0x63   : > { %9379 = vmatprep.mubr.msk.f32.mxu1 %vm533_vm1, %v511_v59  ;;  %v526_v59 = vmax.f32 %v494_v53, 0.0  ;;  %v532_v21 = vmax.f32 %v500_v19, 0.0 }
  0x64   : > { %v527_v62 = vmax.f32 %v495_v56, 0.0  ;;  %v529_v4 = vmax.f32 %v497_v63, 0.0  ;;  %9649 = vrot.lane.b32.xlu0 %v9648_v11, %s11954_s8 }
  0x66   : > { %9380 = vmatmul.mubr.msk.f32.gmra.mxu1 %vm533_vm1, %v512_v0  ;;  %v528_v0 = vmax.f32 %v496_v60, 0.0 }
  0x67   : > { %9382 = vmatprep.mubr.msk.f32.mxu1 %vm533_vm1, %v513_v5  ;;  %v530_v5 = vmax.f32 %v498_v3, 0.0 }
  0x6a   : > { %9383 = vmatmul.mubr.msk.f32.gmra.mxu1 %vm533_vm1, %v514_v12  ;;  %v12268_v12 = vrot.slane %v17444_v6, 7 }
  0x6b   : > { %9385 = vmatprep.mubr.msk.f32.mxu1 %vm533_vm1, %v515_v15  ;;  %v463_v15 = vmul.f32 %v12131_v7, %v427_v14  ;;  %v339_v7 = vld [vmem:[%s17439_s6 + $0x70] sm:$0xff] }
  0x6c   : > { %v12272_v13 = vsel %vm994_vm3, 0.0, %v12268_v12  ;;  %2180 = vmatpush1.msra.mxu1 %v339_v7 }
  0x6d   : > { %1753 = vrot.lane.b32.xlu0 %v12272_v13, %s17464_s9  ;;  %v499_v18 = vadd.f32 %v12134_v8, %v463_v15  ;;  %2181 = vmatprep.subr.mxu1 %v17444_v6  ;;  %v338_v8 = vld [vmem:[%s17439_s6 + $0x68] sm:$0xff] }
  0x6e   : > { %9386 = vmatmul.mubr.msk.f32.gmra.mxu1 %vm533_vm1, %v516_v20 }
  0x6f   : > { %9388 = vmatprep.mubr.msk.f32.mxu1 %vm533_vm1, %v517_v23  ;;  %v531_v20 = vmax.f32 %v499_v18, 0.0  ;;  %2182 = vmatpush1.msra.mxu1 %v338_v8  ;;  %v337_v23 = vld [vmem:[%s17439_s6 + $0x60] sm:$0xff] }
  0x70   : > { %2183 = vmatprep.subr.mxu1 %v17444_v6  ;;  %v341_v18 = vld [vmem:[%s17439_s6 + $0x80] sm:$0xff] }
  0x71   : > { %2184 = vmatpush1.msra.mxu1 %v337_v23 }
  0x72   : > { %9389 = vmatmul.mubr.msk.f32.gmra.mxu1 %vm533_vm1, %v518_v28  ;;  %2185 = vmatprep.subr.mxu1 %v17444_v6  ;;  %v332_v28 = vld [vmem:[%s17439_s6 + $0x38] sm:$0xff] }
  0x73   : > { %9391 = vmatprep.mubr.msk.f32.mxu1 %vm533_vm1, %v519_v31  ;;  %2186 = vmatpush1.msra.mxu1 %v336_v24  ;;  %v323_v31 = vld [vmem:[#allocation5] sm:$0xf] }
  0x74   : > { %2187 = vmatprep.subr.mxu1 %v17444_v6  ;;  %v12329_v33 = vrot.slane %v323_v31, %v12115_v2 }
  0x75   : > { %2188 = vmatpush1.msra.mxu1 %v335_v25 }
  0x76   : > { %9392 = vmatmul.mubr.msk.f32.gmra.mxu1 %vm533_vm1, %v520_v36  ;;  %2189 = vmatprep.subr.mxu1 %v17444_v6 }
  0x77   : > { %9394 = vmatprep.mubr.msk.f32.mxu1 %vm533_vm1, %v521_v39  ;;  %2190 = vmatpush1.msra.mxu1 %v334_v26  ;;  %v328_v39 = vld [vmem:[%s17439_s6 + $0x18] sm:$0xff] }
  0x78   : > { %2191 = vmatprep.subr.mxu1 %v17444_v6 }
  0x79   : > { %2192 = vmatpush1.msra.mxu1 %v333_v27 }
  0x7a   : > { %9395 = vmatmul.mubr.msk.f32.gmra.mxu1 %vm533_vm1, %v522_v44  ;;  %2193 = vmatprep.subr.mxu1 %v17444_v6 }
  0x7b   : > { %9397 = vmatprep.mubr.msk.f32.mxu1 %vm533_vm1, %v523_v47  ;;  %2194 = vmatpush1.msra.mxu1 %v332_v28 }
  0x7c   : > { %2195 = vmatprep.subr.mxu1 %v17444_v6 }
  0x7d   : > { %2196 = vmatpush1.msra.mxu1 %v331_v29 }
  0x7e   : > { %9398 = vmatmul.mubr.msk.f32.gmra.mxu1 %vm533_vm1, %v524_v52  ;;  %2197 = vmatprep.subr.mxu1 %v17444_v6 }
  0x7f   : > { %9400 = vmatprep.mubr.msk.f32.mxu1 %vm533_vm1, %v525_v55  ;;  %2198 = vmatpush1.msra.mxu1 %v330_v30 }
  0x80   : > { %2199 = vmatprep.subr.mxu1 %v17444_v6 }
  0x81   : > { %2200 = vmatpush1.msra.mxu1 %v329_v38 }
  0x82   : > { %9401 = vmatmul.mubr.msk.f32.gmra.mxu1 %vm533_vm1, %v526_v59  ;;  %2201 = vmatprep.subr.mxu1 %v17444_v6 }
  0x83   : > { %9403 = vmatprep.mubr.msk.f32.mxu1 %vm533_vm1, %v527_v62  ;;  %2202 = vmatpush1.msra.mxu1 %v328_v39 }
  0x84   : > { %2203 = vmatprep.subr.mxu1 %v17444_v6 }
  0x85   : > { %2204 = vmatpush1.msra.mxu1 %v327_v45 }
  0x86   : > { %9404 = vmatmul.mubr.msk.f32.gmra.mxu1 %vm533_vm1, %v528_v0  ;;  %2205 = vmatprep.subr.mxu1 %v17444_v6 }
  0x87   : > { %9406 = vmatprep.mubr.msk.f32.mxu1 %vm533_vm1, %v529_v4  ;;  %2206 = vmatpush1.msra.mxu1 %v326_v51 }
  0x88   : > { %2207 = vmatprep.subr.mxu1 %v17444_v6 }
  0x8a   : > { %9407 = vmatmul.mubr.msk.f32.gmra.mxu1 %vm533_vm1, %v530_v5  ;;  %v325_v5 = vld [vmem:[%s17439_s6] sm:$0xff] }
  0x8b   : > { %9409 = vmatprep.mubr.msk.f32.mxu1 %vm533_vm1, %v531_v20  ;;  %2208 = vmatpush1.msra.mxu1 %v325_v5 }
  0x8c   : > { %2237 = vmatprep.subr.mxu1 %v17444_v6 }
  0x8d   : > { %2238 = vmatpush2.msra.mxu1 %v342_v17 }
  0x8e   : > { %9410 = vmatmul.mubr.msk.f32.gmra.mxu1 %vm533_vm1, %v532_v21  ;;  %2239 = vmatprep.subr.mxu1 %v17444_v6 }
  0x8f   : > { %2240 = vmatpush2.msra.mxu1 %v341_v18 }
 0x112   : > { %v9366_v35 = vpop.f32.mrf.mxu1 }
 0x113   : > { %v864_v36 = vmul.f32 %v9366_v35, %v12329_v33 }
 0x114   : > { %v700_v37 = vpop.f32.mrf.mxu1 }
 0x115   : > { %v900_v40 = vadd.f32 %v12332_v34, %v864_v36  ;;  %v863_v41 = vmul.f32 %v12329_v33, %v700_v37 }
 0x116   : > { %v9369_v42 = vpop.f32.mrf.mxu1 }
 0x117   : > { %v12344_v2 = vmax.f32 %v900_v40, 0.0  ;;  %v899_v43 = vadd.f32 %v12332_v34, %v863_v41  ;;  %v866_v44 = vmul.f32 %v9369_v42, %v12329_v33 }
 0x118   : > { %v710_v46 = vpop.f32.mrf.mxu1 }
 0x119   : > { %v931_v47 = vmax.f32 %v899_v43, 0.0  ;;  %v902_v48 = vadd.f32 %v12332_v34, %v866_v44  ;;  %v865_v49 = vmul.f32 %v12329_v33, %v710_v46  ;;  %v1094_v50 = vrot.slane %v12344_v2, 1 }
 0x11a   : > { %v998_v58 = vrot.slane %v12344_v2, 7  ;;  %v9372_v11 = vpop.f32.mrf.mxu1 }
 0x11b   : > { %v12359_v52 = vmax.f32 %v902_v48, 0.0  ;;  %v901_v53 = vadd.f32 %v12332_v34, %v865_v49  ;;  %v9658_v54 = vpack.i.bf16 %v12344_v2, %v931_v47  ;;  %v9653_v55 = vpack.i.bf16 %v931_v47, %v17444_v6 }
 0x11c   : > { %v1093_v56 = vrot.slane %v931_v47, 1  ;;  %v997_v57 = vrot.slane %v931_v47, 7  ;;  %v1155_v60 = vsel %vm1090_vm2, %v1094_v50, 0.0  ;;  %v720_v19 = vpop.f32.mrf.mxu1  ;;  %v868_v22 = vmul.f32 %v9372_v11, %v12329_v33 }
 0x11d   : > { %v933_v59 = vmax.f32 %v901_v53, 0.0  ;;  %9659 = vrot.lane.b32.xlu1 %v9658_v54, %s11956_s22  ;;  %9654 = vrot.lane.b32.xlu0 %v9653_v55, %s11957_s23  ;;  %v1097_v0 = vrot.slane %v12359_v52, 1  ;;  %v1001_v21 = vrot.slane %v12359_v52, 7  ;;  %v867_v7 = vmul.f32 %v12329_v33, %v720_v19 }
 0x11e   : > { %v1095_v61 = vsel %vm1090_vm2, %v1093_v56, %v1094_v50  ;;  %v12371_v62 = vsel %vm994_vm3, %v997_v57, %v998_v58  ;;  %v12374_v63 = vsel %vm994_vm3, 0.0, %v997_v57  ;;  %v904_v25 = vadd.f32 %v12332_v34, %v868_v22  ;;  %v9375_v30 = vpop.f32.mrf.mxu1 }
 0x11f   : > { %v9668_v3 = vpack.i.bf16 %v1155_v60, %v1095_v61  ;;  %v9663_v4 = vpack.i.bf16 %v12371_v62, %v12374_v63  ;;  %v1096_v14 = vrot.slane %v933_v59, 1  ;;  %v9678_v15 = vpack.i.bf16 %v12359_v52, %v933_v59 }
 0x120   : > { %v1000_v20 = vrot.slane %v933_v59, 7  ;;  %v9688_v8 = vpack.i.bf16 %v933_v59, %v12344_v2  ;;  %v903_v26 = vadd.f32 %v12332_v34, %v867_v7  ;;  %v12414_v28 = vsel %vm1090_vm2, %v1097_v0, 0.0  ;;  %v730_v35 = vpop.f32.mrf.mxu1 }
 0x121   : > { %9664 = vrot.lane.b32.xlu1 %v9663_v4, %s11958_s15  ;;  %9669 = vrot.lane.b32.xlu0 %v9668_v3, %s11959_s16  ;;  %v1098_v16 = vsel %vm1090_vm2, %v1096_v14, %v1097_v0  ;;  %v936_v29 = vmax.f32 %v904_v25, 0.0  ;;  %v870_v38 = vmul.f32 %v9375_v30, %v12329_v33  ;;  %v869_v40 = vmul.f32 %v12329_v33, %v730_v35 }
 0x122   : > { %8996 = vmatprep.mubr.msk.f32.mxu1 %vm1882_vm4, %v1098_v16  ;;  %v12402_v23 = vsel %vm994_vm3, %v1000_v20, %v1001_v21  ;;  %v12405_v24 = vsel %vm994_vm3, 0.0, %v1000_v20  ;;  %v935_v31 = vmax.f32 %v903_v26, 0.0  ;;  %v9703_v32 = vpack.i.bf16 %v12414_v28, %v1098_v16  ;;  %v9378_v53 = vpop.f32.mrf.mxu1 }
 0x123   : > { %v9693_v27 = vpack.i.bf16 %v12402_v23, %v12405_v24  ;;  %v1004_v37 = vrot.slane %v936_v29, 7  ;;  %v1100_v43 = vrot.slane %v936_v29, 1  ;;  %v906_v44 = vadd.f32 %v12332_v34, %v870_v38 }
 0x124   : > { %v1003_v36 = vrot.slane %v935_v31, 7  ;;  %v9713_v39 = vpack.i.bf16 %v936_v29, %v935_v31  ;;  %v1099_v2 = vrot.slane %v935_v31, 1  ;;  %v9723_v45 = vpack.i.bf16 %v935_v31, %v12359_v52  ;;  %v740_v55 = vpop.f32.mrf.mxu1 }
 0x125   : > { %9674 = vrot.lane.b32.xlu1 %v9668_v3, %s11954_s8  ;;  %9679 = vrot.lane.b32.xlu0 %v9678_v15, %s17466_s21  ;;  %v905_v46 = vadd.f32 %v12332_v34, %v869_v40  ;;  %v12441_v49 = vsel %vm1090_vm2, %v1100_v43, 0.0  ;;  %v938_v50 = vmax.f32 %v906_v44, 0.0  ;;  %v872_v58 = vmul.f32 %v9378_v53, %v12329_v33 }
 0x126   : > { %v12425_v41 = vsel %vm994_vm3, %v1003_v36, %v1004_v37  ;;  %v12428_v42 = vsel %vm994_vm3, 0.0, %v1003_v36  ;;  %v12438_v48 = vsel %vm1090_vm2, %v1099_v2, %v1100_v43  ;;  %v871_v59 = vmul.f32 %v12329_v33, %v740_v55  ;;  %v9381_v18 = vpop.f32.mrf.mxu1 }
 0x127   : > { %v9728_v47 = vpack.i.bf16 %v12425_v41, %v12428_v42  ;;  %v937_v51 = vmax.f32 %v905_v46, 0.0  ;;  %v9738_v52 = vpack.i.bf16 %v12441_v49, %v12438_v48  ;;  %v1007_v57 = vrot.slane %v938_v50, 7 }
 0x128   : > { %v1103_v4 = vrot.slane %v938_v50, 1  ;;  %v908_v5 = vadd.f32 %v12332_v34, %v872_v58  ;;  %v907_v11 = vadd.f32 %v12332_v34, %v871_v59  ;;  %v750_v21 = vpop.f32.mrf.mxu1 }
 0x129   : > { %9684 = vrot.lane.b32.xlu1 %v9678_v15, %s11956_s22  ;;  %9689 = vrot.lane.b32.xlu0 %v9688_v8, %s11957_s23  ;;  %v9748_v54 = vpack.i.bf16 %v938_v50, %v937_v51  ;;  %v1006_v56 = vrot.slane %v937_v51, 7  ;;  %v9758_v60 = vpack.i.bf16 %v937_v51, %v936_v29  ;;  %v1102_v3 = vrot.slane %v937_v51, 1 }
 0x12a   : > { %v12468_v16 = vsel %vm1090_vm2, %v1103_v4, 0.0  ;;  %v940_v17 = vmax.f32 %v908_v5, 0.0  ;;  %v939_v19 = vmax.f32 %v907_v11, 0.0  ;;  %v874_v8 = vmul.f32 %v9381_v18, %v12329_v33  ;;  %v9384_v2 = vpop.f32.mrf.mxu1 }
 0x12b   : > { %v12453_v61 = vsel %vm994_vm3, %v1006_v56, %v1007_v57  ;;  %v12456_v0 = vsel %vm994_vm3, 0.0, %v1006_v56  ;;  %v12465_v15 = vsel %vm1090_vm2, %v1102_v3, %v1103_v4  ;;  %v873_v26 = vmul.f32 %v12329_v33, %v750_v21 }
 0x12c   : > { %v9763_v14 = vpack.i.bf16 %v12453_v61, %v12456_v0  ;;  %v9773_v20 = vpack.i.bf16 %v12468_v16, %v12465_v15  ;;  %v1009_v22 = vrot.slane %v939_v19, 7  ;;  %v1010_v7 = vrot.slane %v940_v17, 7 }
 0x12d   : > { %9694 = vrot.lane.b32.xlu1 %v9693_v27, %s17464_s9  ;;  %9699 = vrot.lane.b32.xlu0 %v9693_v27, %s11958_s15  ;;  %v9783_v25 = vpack.i.bf16 %v940_v17, %v939_v19  ;;  %v1105_v30 = vrot.slane %v939_v19, 1  ;;  %v1106_v31 = vrot.slane %v940_v17, 1  ;;  %v9793_v35 = vpack.i.bf16 %v939_v19, %v938_v50 }
 0x12e   : > { %v12480_v27 = vsel %vm994_vm3, %v1009_v22, %v1010_v7  ;;  %v12483_v29 = vsel %vm994_vm3, 0.0, %v1009_v22  ;;  %v909_v36 = vadd.f32 %v12332_v34, %v873_v26 }
 0x12f   : > { %v9798_v37 = vpack.i.bf16 %v12480_v27, %v12483_v29  ;;  %v12492_v38 = vsel %vm1090_vm2, %v1105_v30, %v1106_v31 }
 0x130   : > { %v941_v43 = vmax.f32 %v909_v36, 0.0 }
 0x131   : > { %9704 = vrot.lane.b32.xlu1 %v9703_v32, %s11959_s16  ;;  %9709 = vrot.lane.b32.xlu0 %v9703_v32, %s11954_s8  ;;  %v910_v32 = vadd.f32 %v12332_v34, %v874_v8 }
 0x132   : > { %v1012_v50 = vrot.slane %v941_v43, 7  ;;  %v1108_v57 = vrot.slane %v941_v43, 1 }
 0x133   : > { %v942_v40 = vmax.f32 %v910_v32, 0.0 }
 0x134   : > { %v12511_v56 = vsel %vm994_vm3, 0.0, %v1012_v50 }
 0x135   : > { %9714 = vrot.lane.b32.xlu1 %v9713_v39, %s17466_s21  ;;  %9719 = vrot.lane.b32.xlu0 %v9713_v39, %s11956_s22  ;;  %v12495_v39 = vsel %vm1090_vm2, %v1106_v31, 0.0  ;;  %v9818_v46 = vpack.i.bf16 %v942_v40, %v941_v43  ;;  %v1013_v51 = vrot.slane %v942_v40, 7  ;;  %v1109_v58 = vrot.slane %v942_v40, 1 }
 0x136   : > { %v9808_v44 = vpack.i.bf16 %v12495_v39, %v12492_v38 }
 0x137   : > { %v12508_v55 = vsel %vm994_vm3, %v1012_v50, %v1013_v51  ;;  %v12519_v4 = vsel %vm1090_vm2, %v1108_v57, %v1109_v58  ;;  %v12522_v5 = vsel %vm1090_vm2, %v1109_v58, 0.0 }
 0x138   : > { %v9833_v3 = vpack.i.bf16 %v12508_v55, %v12511_v56 }
 0x139   : > { %9724 = vrot.lane.b32.xlu1 %v9723_v45, %s11957_s23  ;;  %9729 = vrot.lane.b32.xlu0 %v9728_v47, %s17464_s9  ;;  %v760_v45 = vpop.f32.mrf.mxu1 }
 0x13a   : > { %v875_v53 = vmul.f32 %v12329_v33, %v760_v45 }
 0x13c   : > { %v911_v59 = vadd.f32 %v12332_v34, %v875_v53 }
 0x13d   : > { %9734 = vrot.lane.b32.xlu1 %v9728_v47, %s11958_s15  ;;  %9739 = vrot.lane.b32.xlu0 %v9738_v52, %s11959_s16  ;;  %v876_v47 = vmul.f32 %v9384_v2, %v12329_v33 }
 0x13e   : > { %v943_v11 = vmax.f32 %v911_v59, 0.0 }
 0x140   : > { %v1015_v18 = vrot.slane %v943_v11, 7  ;;  %v1111_v26 = vrot.slane %v943_v11, 1 }
 0x141   : > { %9744 = vrot.lane.b32.xlu1 %v9738_v52, %s11954_s8  ;;  %9749 = vrot.lane.b32.xlu0 %v9748_v54, %s17466_s21  ;;  %v912_v52 = vadd.f32 %v12332_v34, %v876_v47 }
 0x142   : > { %v12535_v8 = vsel %vm994_vm3, 0.0, %v1015_v18 }
 0x145   : > { %9754 = vrot.lane.b32.xlu1 %v9748_v54, %s11956_s22  ;;  %9759 = vrot.lane.b32.xlu0 %v9758_v60, %s11957_s23  ;;  %v9828_v54 = vpack.i.bf16 %v941_v43, %v940_v17  ;;  %v944_v60 = vmax.f32 %v912_v52, 0.0  ;;  %v9843_v17 = vpack.i.bf16 %v12522_v5, %v12519_v4 }
 0x147   : > { %v1016_v19 = vrot.slane %v944_v60, 7  ;;  %v9853_v21 = vpack.i.bf16 %v944_v60, %v943_v11  ;;  %v1112_v30 = vrot.slane %v944_v60, 1 }
 0x149   : > { %9764 = vrot.lane.b32.xlu1 %v9763_v14, %s17464_s9  ;;  %9769 = vrot.lane.b32.xlu0 %v9763_v14, %s11958_s15  ;;  %v9387_v14 = vpop.f32.mrf.mxu1  ;;  %v12532_v7 = vsel %vm994_vm3, %v1015_v18, %v1016_v19  ;;  %v12549_v2 = vsel %vm1090_vm2, %v1112_v30, 0.0 }
 0x14a   : > { %v878_v22 = vmul.f32 %v9387_v14, %v12329_v33  ;;  %v9868_v32 = vpack.i.bf16 %v12532_v7, %v12535_v8 }
 0x14c   : > { %v914_v31 = vadd.f32 %v12332_v34, %v878_v22 }
 0x14d   : > { %9774 = vrot.lane.b32.xlu1 %v9773_v20, %s11959_s16  ;;  %9779 = vrot.lane.b32.xlu0 %v9773_v20, %s11954_s8  ;;  %v770_v20 = vpop.f32.mrf.mxu1 }
 0x14e   : > { %v946_v43 = vmax.f32 %v914_v31, 0.0 }
 0x150   : > { %v1019_v53 = vrot.slane %v946_v43, 7 }
 0x151   : > { %9784 = vrot.lane.b32.xlu1 %v9783_v25, %s17466_s21  ;;  %9789 = vrot.lane.b32.xlu0 %v9783_v25, %s11956_s22  ;;  %v877_v25 = vmul.f32 %v12329_v33, %v770_v20 }
 0x153   : > { %v913_v36 = vadd.f32 %v12332_v34, %v877_v25 }
 0x155   : > { %9794 = vrot.lane.b32.xlu1 %v9793_v35, %s11957_s23  ;;  %9799 = vrot.lane.b32.xlu0 %v9798_v37, %s17464_s9  ;;  %v9863_v35 = vpack.i.bf16 %v943_v11, %v942_v40  ;;  %v945_v45 = vmax.f32 %v913_v36, 0.0  ;;  %v1115_v11 = vrot.slane %v946_v43, 1 }
 0x157   : > { %v9888_v47 = vpack.i.bf16 %v946_v43, %v945_v45  ;;  %v1018_v51 = vrot.slane %v945_v45, 7  ;;  %v9898_v57 = vpack.i.bf16 %v945_v45, %v944_v60  ;;  %v12578_v19 = vsel %vm1090_vm2, %v1115_v11, 0.0 }
 0x159   : > { %9804 = vrot.lane.b32.xlu1 %v9798_v37, %s11958_s15  ;;  %9809 = vrot.lane.b32.xlu0 %v9808_v44, %s11959_s16  ;;  %v12546_v37 = vsel %vm1090_vm2, %v1111_v26, %v1112_v30  ;;  %v12562_v58 = vsel %vm994_vm3, %v1018_v51, %v1019_v53  ;;  %v12565_v59 = vsel %vm994_vm3, 0.0, %v1018_v51  ;;  %v12585_v30 = vpop.permute.xlu0 %9649 }
 0x15a   : > { %v9903_v18 = vpack.i.bf16 %v12562_v58, %v12565_v59 }
 0x15d   : > { %9814 = vrot.lane.b32.xlu1 %v9808_v44, %s11954_s8  ;;  %9819 = vrot.lane.b32.xlu0 %v9818_v46, %s17466_s21  ;;  %v9390_v44 = vpop.f32.mrf.mxu1 }
 0x15e   : > { %v880_v50 = vmul.f32 %v9390_v44, %v12329_v33 }
 0x15f   : > { %v780_v40 = vpop.f32.mrf.mxu1 }
 0x160   : > { %v879_v52 = vmul.f32 %v12329_v33, %v780_v40 }
 0x161   : > { %9824 = vrot.lane.b32.xlu1 %v9818_v46, %s11956_s22  ;;  %9829 = vrot.lane.b32.xlu0 %v9828_v54, %s11957_s23  ;;  %v9878_v46 = vpack.i.bf16 %v12549_v2, %v12546_v37  ;;  %v916_v54 = vadd.f32 %v12332_v34, %v880_v50  ;;  %v12602_v50 = vpop.permute.xlu0 %1753 }
 0x162   : > { %v915_v14 = vadd.f32 %v12332_v34, %v879_v52  ;;  %17600 = vst [vmem:[#allocation17_spill] sm:$0xff] %v12602_v50 }
 0x164   : > { %v947_v20 = vmax.f32 %v915_v14, 0.0 }
 0x165   : > { %9834 = vrot.lane.b32.xlu1 %v9833_v3, %s17464_s9  ;;  %9839 = vrot.lane.b32.xlu0 %v9833_v3, %s11958_s15  ;;  %v1114_v3 = vrot.slane %v945_v45, 1 }
 0x166   : > { %v1021_v25 = vrot.slane %v947_v20, 7  ;;  %v9933_v53 = vpack.i.bf16 %v947_v20, %v946_v43 }
 0x167   : > { %v12575_v60 = vsel %vm1090_vm2, %v1114_v3, %v1115_v11 }
 0x168   : > { %v9913_v22 = vpack.i.bf16 %v12578_v19, %v12575_v60  ;;  %v12595_v44 = vsel %vm994_vm3, 0.0, %v1021_v25 }
 0x169   : > { %9844 = vrot.lane.b32.xlu1 %v9843_v17, %s11959_s16  ;;  %9849 = vrot.lane.b32.xlu0 %v9843_v17, %s11954_s8  ;;  %v12570_v17 = vmax.f32 %v916_v54, 0.0  ;;  %17599 = vst [vmem:[#allocation16_spill] sm:$0xff] %v12595_v44 }
 0x16b   : > { %v1022_v26 = vrot.slane %v12570_v17, 7  ;;  %v1118_v40 = vrot.slane %v12570_v17, 1 }
 0x16d   : > { %9854 = vrot.lane.b32.xlu1 %v9853_v21, %s17466_s21  ;;  %9859 = vrot.lane.b32.xlu0 %v9853_v21, %s11956_s22  ;;  %v9393_v21 = vpop.f32.mrf.mxu1  ;;  %v12592_v36 = vsel %vm994_vm3, %v1021_v25, %v1022_v26 }
 0x16e   : > { %17598 = vst [vmem:[#allocation15_spill] sm:$0xff] %v12592_v36  ;;  %v9938_v51 = vpack.i.bf16 %v12592_v36, %v12595_v44 }
 0x16f   : > { %v790_v31 = vpop.f32.mrf.mxu1 }
 0x170   : > { %v881_v45 = vmul.f32 %v12329_v33, %v790_v31 }
 0x171   : > { %9864 = vrot.lane.b32.xlu1 %v9863_v35, %s11957_s23  ;;  %9869 = vrot.lane.b32.xlu0 %v9868_v32, %s17464_s9  ;;  %v882_v35 = vmul.f32 %v9393_v21, %v12329_v33  ;;  %v9396_v11 = vpop.f32.mrf.mxu1 }
 0x172   : > { %v917_v52 = vadd.f32 %v12332_v34, %v881_v45  ;;  %v884_v25 = vmul.f32 %v9396_v11, %v12329_v33 }
 0x175   : > { %9874 = vrot.lane.b32.xlu1 %v9868_v32, %s11958_s15  ;;  %9879 = vrot.lane.b32.xlu0 %v9878_v46, %s11959_s16  ;;  %v9923_v32 = vpack.i.bf16 %v12570_v17, %v947_v20 }
 0x179   : > { %9884 = vrot.lane.b32.xlu1 %v9878_v46, %s11954_s8  ;;  %9889 = vrot.lane.b32.xlu0 %v9888_v47, %s17466_s21  ;;  %v1117_v46 = vrot.slane %v947_v20, 1  ;;  %v800_v20 = vpop.f32.mrf.mxu1 }
 0x17b   : > { %v12609_v54 = vsel %vm1090_vm2, %v1117_v46, %v1118_v40  ;;  %v883_v46 = vmul.f32 %v12329_v33, %v800_v20 }
 0x17d   : > { %9894 = vrot.lane.b32.xlu1 %v9888_v47, %s11956_s22  ;;  %9899 = vrot.lane.b32.xlu0 %v9898_v57, %s11957_s23  ;;  %v918_v47 = vadd.f32 %v12332_v34, %v882_v35  ;;  %v12612_v57 = vsel %vm1090_vm2, %v1118_v40, 0.0  ;;  %v9651_v40 = vunpack.i.l.bf16 %v12585_v30 }
 0x17e   : > { %v9948_v43 = vpack.i.bf16 %v12612_v57, %v12609_v54 }
 0x17f   : > { %v12614_v3 = vmax.f32 %v918_v47, 0.0  ;;  %v920_v47 = vadd.f32 %v12332_v34, %v884_v25 }
 0x181   : > { %9904 = vrot.lane.b32.xlu1 %v9903_v18, %s17464_s9  ;;  %9909 = vrot.lane.b32.xlu0 %v9903_v18, %s11958_s15  ;;  %v949_v18 = vmax.f32 %v917_v52, 0.0  ;;  %v1025_v45 = vrot.slane %v12614_v3, 7  ;;  %v1121_v10 = vrot.slane %v12614_v3, 1 }
 0x183   : > { %v1024_v35 = vrot.slane %v949_v18, 7  ;;  %v9968_v11 = vpack.i.bf16 %v949_v18, %v12570_v17  ;;  %v1120_v1 = vrot.slane %v949_v18, 1  ;;  %v9652_v17 = vunpack.i.h.bf16 %v12585_v30 }
 0x185   : > { %9914 = vrot.lane.b32.xlu1 %v9913_v22, %s11959_s16  ;;  %9919 = vrot.lane.b32.xlu0 %v9913_v22, %s11954_s8  ;;  %v9958_v22 = vpack.i.bf16 %v12614_v3, %v949_v18  ;;  %v12647_v20 = vsel %vm994_vm3, 0.0, %v1024_v35 }
 0x186   : > { %17602 = vst [vmem:[#allocation19_spill] sm:$0xff] %v12647_v20 }
 0x189   : > { %9924 = vrot.lane.b32.xlu1 %v9923_v32, %s17466_s21  ;;  %9929 = vrot.lane.b32.xlu0 %v9923_v32, %s11956_s22 }
 0x18d   : > { %9934 = vrot.lane.b32.xlu1 %v9933_v53, %s11957_s23  ;;  %9939 = vrot.lane.b32.xlu0 %v9938_v51, %s17464_s9 }
 0x18f   : > { %v12617_v14 = vpop.permute.xlu1 %9659  ;;  %v12619_v21 = vpop.permute.xlu0 %9654 }
 0x190   : > { %v9656_v26 = vunpack.i.l.bf16 %v12619_v21 }
 0x191   : > { %9944 = vrot.lane.b32.xlu1 %v9938_v51, %s11958_s15  ;;  %9949 = vrot.lane.b32.xlu0 %v9948_v43, %s11959_s16 }
 0x192   : > { %v1883_v51 = vsel %vm1882_vm4, %v12272_v13, %v9656_v26  ;;  %v1884_v25 = vsel %vm1882_vm4, %v12268_v12, %v9656_v26  ;;  %v919_v13 = vadd.f32 %v12332_v34, %v883_v46  ;;  %v12674_v46 = vsel %vm1090_vm2, %v1120_v1, %v1121_v10 }
 0x193   : > { %v9665_v31 = vpop.permute.xlu1 %9664  ;;  %v12628_v32 = vpop.permute.xlu0 %9669  ;;  %v12656_v9 = vsel %vm1915_vm5, %v1883_v51, %v9651_v40  ;;  %v12669_v30 = vsel %vm1915_vm5, %v1884_v25, %v9652_v17  ;;  %17605 = vst [vmem:[#allocation22_spill] sm:$0xff] %v12674_v46  ;;  %v12677_v40 = vsel %vm1090_vm2, %v1121_v10, 0.0 }
 0x194   : > { %v9666_v53 = vunpack.i.l.bf16 %v9665_v31  ;;  %v9667_v50 = vunpack.i.h.bf16 %v9665_v31  ;;  %17603 = vst [vmem:[#allocation20_spill] sm:$0xff] %v12656_v9  ;;  %17604 = vst [vmem:[#allocation21_spill] sm:$0xff] %v12669_v30  ;;  %v9671_v1 = vunpack.i.l.bf16 %v12628_v32 }
 0x195   : > { %9954 = vrot.lane.b32.xlu1 %v9948_v43, %s11954_s8  ;;  %9959 = vrot.lane.b32.xlu0 %v9958_v22, %s17466_s21  ;;  %v12644_v43 = vsel %vm994_vm3, %v1024_v35, %v1025_v45  ;;  %v12659_v35 = vmax.f32 %v920_v47, 0.0  ;;  %17606 = vst [vmem:[#allocation23_spill] sm:$0xff] %v12677_v40  ;;  %v12679_v47 = vmax.f32 %v919_v13, 0.0  ;;  %v9983_v13 = vpack.i.bf16 %v12677_v40, %v12674_v46 }
 0x196   : > { %17601 = vst [vmem:[#allocation18_spill] sm:$0xff] %v12644_v43  ;;  %v1949_v18 = vsel %vm1948_vm6, %v12656_v9, %v9666_v53  ;;  %v9978_v26 = vpack.i.bf16 %v12644_v43, %v12647_v20  ;;  %v1950_v51 = vsel %vm1948_vm6, %v12669_v30, %v9667_v50  ;;  %v9399_v53 = vpop.f32.mrf.mxu1 }
 0x197   : > { %v12638_v52 = vpop.permute.xlu1 %9674  ;;  %v12641_v6 = vpop.permute.xlu0 %9679  ;;  %v1027_v50 = vrot.slane %v12679_v47, 7  ;;  %v1028_v17 = vrot.slane %v12659_v35, 7  ;;  %v9993_v36 = vpack.i.bf16 %v12659_v35, %v12679_v47  ;;  %v886_v44 = vmul.f32 %v9399_v53, %v12329_v33 }
 0x199   : > { %9964 = vrot.lane.b32.xlu1 %v9958_v22, %s11956_s22  ;;  %9969 = vrot.lane.b32.xlu0 %v9968_v11, %s11957_s23  ;;  %v9661_v22 = vunpack.i.l.bf16 %v12617_v14  ;;  %v9662_v11 = vunpack.i.h.bf16 %v12617_v14 }
 0x19b   : > { %v12663_v45 = vpop.permute.xlu1 %9684  ;;  %v12671_v31 = vpop.permute.xlu0 %9689  ;;  %v1982_v25 = vsel %vm1981_vm7, %v1949_v18, %v9661_v22  ;;  %v1983_v14 = vsel %vm1981_vm7, %v1950_v51, %v9662_v11  ;;  %v9672_v18 = vunpack.i.h.bf16 %v12628_v32  ;;  %v12707_v11 = vsel %vm994_vm3, %v1027_v50, %v1028_v17 }
 0x19c   : > { %v810_v22 = vpop.f32.mrf.mxu1  ;;  %v2015_v20 = vsel %vm2014_vm8, %v1982_v25, %v9671_v1  ;;  %17607 = vst [vmem:[#allocation24_spill] sm:$0xff] %v12707_v11  ;;  %v12710_v25 = vsel %vm994_vm3, 0.0, %v1027_v50  ;;  %v9657_v1 = vunpack.i.h.bf16 %v12619_v21  ;;  %v9691_v53 = vunpack.i.l.bf16 %v12671_v31 }
 0x19d   : > { %9974 = vrot.lane.b32.xlu1 %v9978_v26, %s17464_s9  ;;  %9979 = vrot.lane.b32.xlu0 %v9978_v26, %s11958_s15  ;;  %v9681_v26 = vunpack.i.l.bf16 %v12641_v6  ;;  %v2016_v51 = vsel %vm2014_vm8, %v1983_v14, %v9672_v18  ;;  %v9682_v14 = vunpack.i.h.bf16 %v12641_v6  ;;  %v1123_v21 = vrot.slane %v12679_v47, 1 }
 0x19e   : > { %v1124_v50 = vrot.slane %v12659_v35, 1  ;;  %v922_v17 = vadd.f32 %v12332_v34, %v886_v44 }
 0x19f   : > { %v9695_v10 = vpop.permute.xlu1 %9694  ;;  %v9700_v30 = vpop.permute.xlu0 %9699 }
 0x1a0   : > { %v9697_v9 = vunpack.i.h.bf16 %v9695_v10  ;;  %v9696_v43 = vunpack.i.l.bf16 %v9695_v10  ;;  %v9701_v18 = vunpack.i.l.bf16 %v9700_v30  ;;  %v9702_v44 = vunpack.i.h.bf16 %v9700_v30 }
 0x1a1   : > { %9984 = vrot.lane.b32.xlu1 %v9983_v13, %s11959_s16  ;;  %9989 = vrot.lane.b32.xlu0 %v9983_v13, %s11954_s8  ;;  %v885_v13 = vmul.f32 %v12329_v33, %v810_v22  ;;  %v1885_v22 = vsel %vm1882_vm4, %v12374_v63, %v9657_v1  ;;  %v12747_v63 = vsel %vm1090_vm2, %v1123_v21, %v1124_v50  ;;  %v12752_v30 = vmax.f32 %v922_v17, 0.0 }
 0x1a2   : > { %v2048_v10 = vsel %vm2047_vm9, %v2015_v20, %v9696_v43  ;;  %v2049_v43 = vsel %vm2047_vm9, %v2016_v51, %v9697_v9  ;;  %v9676_v20 = vunpack.i.l.bf16 %v12638_v52  ;;  %v10008_v9 = vpack.i.bf16 %v12707_v11, %v12710_v25 }
 0x1a3   : > { %v12702_v40 = vpop.permute.xlu1 %9704  ;;  %v2081_v32 = vsel %vm2080_vm10, %v2048_v10, %v9681_v26  ;;  %v12715_v46 = vpop.permute.xlu0 %9709  ;;  %v2082_v6 = vsel %vm2080_vm10, %v2049_v43, %v9682_v14  ;;  %v1886_v10 = vsel %vm1882_vm4, %v12371_v62, %v9691_v53  ;;  %v9677_v51 = vunpack.i.h.bf16 %v12638_v52 }
 0x1a4   : > { %2242 = vmatmul.mubr.f32.vlgmr.msra.gmra.mxu1 %v2081_v32  ;;  %v921_v32 = vadd.f32 %v12332_v34, %v885_v13  ;;  %v1918_v11 = vsel %vm1915_vm5, %v1885_v22, %v9676_v20  ;;  %v12750_v62 = vsel %vm1090_vm2, %v1124_v50, 0.0  ;;  %v9706_v52 = vunpack.i.l.bf16 %v12702_v40 }
 0x1a5   : > { %8997 = vmatprep.mubr.msk.f32.mxu1 %vm1882_vm4, %v12414_v28  ;;  %9994 = vrot.lane.b32.xlu1 %v9993_v36, %s17466_s21  ;;  %v10003_v28 = vpack.i.bf16 %v12679_v47, %v12614_v3  ;;  %v9402_v3 = vpop.f32.mrf.mxu1  ;;  %v1951_v47 = vsel %vm1948_vm6, %v1918_v11, %v9701_v18  ;;  %v9686_v1 = vunpack.i.l.bf16 %v12663_v45  ;;  %v9707_v20 = vunpack.i.h.bf16 %v12702_v40 }
 0x1a6   : > { %9999 = vrot.lane.b32.xlu0 %v9993_v36, %s11956_s22  ;;  %v953_v43 = vmax.f32 %v921_v32, 0.0  ;;  %v10018_v21 = vpack.i.bf16 %v12750_v62, %v12747_v63  ;;  %v9687_v11 = vunpack.i.h.bf16 %v12663_v45  ;;  %v888_v22 = vmul.f32 %v9402_v3, %v12329_v33 }
 0x1a7   : > { %v12729_v26 = vpop.permute.xlu1 %9714  ;;  %v12739_v36 = vpop.permute.xlu0 %9719 }
 0x1a8   : > { %2247 = vmatmul.mubr.f32.gmra.mxu1 %v2082_v6  ;;  %v820_v18 = vpop.f32.mrf.mxu1  ;;  %v1984_v6 = vsel %vm1981_vm7, %v1951_v47, %v9686_v1  ;;  %v1031_v1 = vrot.slane %v12752_v30, 7 }
 0x1a9   : > { %8998 = vmatprep.mubr.msk.f32.mxu1 %vm1882_vm4, %v12438_v48  ;;  %10004 = vrot.lane.b32.xlu1 %v10003_v28, %s11957_s23  ;;  %v1919_v48 = vsel %vm1915_vm5, %v1886_v10, %v9677_v51  ;;  %v9716_v28 = vunpack.i.l.bf16 %v12729_v26  ;;  %v2017_v40 = vsel %vm2014_vm8, %v1984_v6, %v9706_v52  ;;  %v10028_v10 = vpack.i.bf16 %v12752_v30, %v953_v43 }
 0x1aa   : > { %10009 = vrot.lane.b32.xlu0 %v10008_v9, %s17464_s9  ;;  %v1952_v13 = vsel %vm1948_vm6, %v1919_v48, %v9702_v44  ;;  %v1030_v51 = vrot.slane %v953_v43, 7  ;;  %v9692_v52 = vunpack.i.h.bf16 %v12671_v31  ;;  %v10038_v6 = vpack.i.bf16 %v953_v43, %v12659_v35 }
 0x1ab   : > { %v12759_v53 = vpop.permute.xlu1 %9724  ;;  %v9730_v14 = vpop.permute.xlu0 %9729  ;;  %v1985_v32 = vsel %vm1981_vm7, %v1952_v13, %v9687_v11  ;;  %v9711_v11 = vunpack.i.l.bf16 %v12715_v46 }
 0x1ac   : > { %v9732_v50 = vunpack.i.h.bf16 %v9730_v14  ;;  %v9731_v17 = vunpack.i.l.bf16 %v9730_v14  ;;  %v2018_v3 = vsel %vm2014_vm8, %v1985_v32, %v9707_v20  ;;  %v9726_v14 = vunpack.i.l.bf16 %v12759_v53 }
 0x1ad   : > { %10014 = vrot.lane.b32.xlu1 %v10008_v9, %s11958_s15  ;;  %v887_v9 = vmul.f32 %v12329_v33, %v820_v18  ;;  %v924_v20 = vadd.f32 %v12332_v34, %v888_v22  ;;  %v1887_v22 = vsel %vm1882_vm4, %v12405_v24, %v9692_v52 }
 0x1ae   : > { %10019 = vrot.lane.b32.xlu0 %v10018_v21, %s11959_s16  ;;  %v2050_v45 = vsel %vm2047_vm9, %v2017_v40, %v9731_v17  ;;  %v2051_v13 = vsel %vm2047_vm9, %v2018_v3, %v9732_v50  ;;  %v9717_v17 = vunpack.i.h.bf16 %v12729_v26  ;;  %v12801_v26 = vsel %vm994_vm3, %v1030_v51, %v1031_v1 }
 0x1af   : > { %v9735_v44 = vpop.permute.xlu1 %9734  ;;  %v12776_v48 = vpop.permute.xlu0 %9739  ;;  %v2083_v47 = vsel %vm2080_vm10, %v2050_v45, %v9716_v28  ;;  %v1127_v40 = vrot.slane %v12752_v30, 1  ;;  %v1888_v45 = vsel %vm1882_vm4, %v12402_v23, %v9726_v14  ;;  %v923_v35 = vadd.f32 %v12332_v34, %v887_v9 }
 0x1b0   : > { %2252 = vmatmul.mubr.f32.gmra.mxu1 %v2083_v47  ;;  %v9736_v18 = vunpack.i.l.bf16 %v9735_v44  ;;  %v2084_v28 = vsel %vm2080_vm10, %v2051_v13, %v9717_v17  ;;  %v9737_v32 = vunpack.i.h.bf16 %v9735_v44  ;;  %v9712_v47 = vunpack.i.h.bf16 %v12715_v46  ;;  %v9405_v14 = vpop.f32.mrf.mxu1 }
 0x1b1   : > { %10024 = vrot.lane.b32.xlu1 %v10018_v21, %s11954_s8  ;;  %8999 = vmatprep.mubr.msk.f32.mxu1 %vm1882_vm4, %v12441_v49  ;;  %v12795_v21 = vsel %vm994_vm3, 0.0, %v1030_v51  ;;  %v1126_v49 = vrot.slane %v953_v43, 1  ;;  %v1920_v51 = vsel %vm1915_vm5, %v1887_v22, %v9711_v11  ;;  %v12815_v43 = vmax.f32 %v924_v20, 0.0 }
 0x1b2   : > { %10029 = vrot.lane.b32.xlu0 %v10028_v10, %s17466_s21  ;;  %v1953_v24 = vsel %vm1948_vm6, %v1920_v51, %v9736_v18  ;;  %v10048_v44 = vpack.i.bf16 %v12801_v26, %v12795_v21  ;;  %v1921_v46 = vsel %vm1915_vm5, %v1888_v45, %v9712_v47  ;;  %v955_v1 = vmax.f32 %v923_v35, 0.0 }
 0x1b3   : > { %v12791_v31 = vpop.permute.xlu1 %9744  ;;  %v12797_v50 = vpop.permute.xlu0 %9749  ;;  %v12827_v3 = vsel %vm1090_vm2, %v1126_v49, %v1127_v40  ;;  %v1954_v52 = vsel %vm1948_vm6, %v1921_v46, %v9737_v32  ;;  %v9722_v13 = vunpack.i.h.bf16 %v12739_v36  ;;  %v9741_v17 = vunpack.i.l.bf16 %v12776_v48 }
 0x1b4   : > { %2257 = vmatmul.mubr.f32.gmra.mxu1 %v2084_v28  ;;  %v1034_v28 = vrot.slane %v12815_v43, 7  ;;  %v9751_v35 = vunpack.i.l.bf16 %v12797_v50  ;;  %v830_v32 = vpop.f32.mrf.mxu1  ;;  %v10063_v51 = vpack.i.bf16 %v12815_v43, %v955_v1 }
 0x1b5   : > { %10034 = vrot.lane.b32.xlu1 %v10028_v10, %s11956_s22  ;;  %9000 = vmatprep.mubr.msk.f32.mxu1 %vm1882_vm4, %v12465_v15  ;;  %v9721_v10 = vunpack.i.l.bf16 %v12739_v36  ;;  %v12830_v15 = vsel %vm1090_vm2, %v1127_v40, 0.0  ;;  %v1987_v45 = vsel %vm1981_vm7, %v1954_v52, %v9722_v13  ;;  %v9742_v36 = vunpack.i.h.bf16 %v12776_v48 }
 0x1b6   : > { %10039 = vrot.lane.b32.xlu0 %v10038_v6, %s11957_s23  ;;  %v10053_v18 = vpack.i.bf16 %v12830_v15, %v12827_v3  ;;  %v1033_v6 = vrot.slane %v955_v1, 7 }
 0x1b7   : > { %v12818_v23 = vpop.permute.xlu1 %9754  ;;  %v12824_v9 = vpop.permute.xlu0 %9759  ;;  %v1986_v11 = vsel %vm1981_vm7, %v1953_v24, %v9721_v10  ;;  %v890_v24 = vmul.f32 %v9405_v14, %v12329_v33  ;;  %v2020_v48 = vsel %vm2014_vm8, %v1987_v45, %v9742_v36  ;;  %v9752_v45 = vunpack.i.h.bf16 %v12797_v50 }
 0x1b8   : > { %v2019_v47 = vsel %vm2014_vm8, %v1986_v11, %v9741_v17  ;;  %v12855_v52 = vsel %vm994_vm3, %v1033_v6, %v1034_v28  ;;  %v12858_v13 = vsel %vm994_vm3, 0.0, %v1033_v6  ;;  %v9727_v11 = vunpack.i.h.bf16 %v12759_v53 }
 0x1b9   : > { %10044 = vrot.lane.b32.xlu1 %v10048_v44, %s17464_s9  ;;  %v9761_v14 = vunpack.i.l.bf16 %v12824_v9  ;;  %v889_v17 = vmul.f32 %v12329_v33, %v830_v32  ;;  %v1129_v6 = vrot.slane %v955_v1, 1  ;;  %v1130_v53 = vrot.slane %v12815_v43, 1 }
 0x1ba   : > { %10049 = vrot.lane.b32.xlu0 %v10048_v44, %s11958_s15  ;;  %v926_v28 = vadd.f32 %v12332_v34, %v890_v24  ;;  %v10073_v32 = vpack.i.bf16 %v955_v1, %v12752_v30 }
 0x1bb   : > { %v9765_v20 = vpop.permute.xlu1 %9764  ;;  %v9770_v49 = vpop.permute.xlu0 %9769  ;;  %v925_v24 = vadd.f32 %v12332_v34, %v889_v17 }
 0x1bc   : > { %v9767_v40 = vunpack.i.h.bf16 %v9765_v20  ;;  %v9766_v22 = vunpack.i.l.bf16 %v9765_v20  ;;  %v9771_v36 = vunpack.i.l.bf16 %v9770_v49  ;;  %v12898_v30 = vmax.f32 %v926_v28, 0.0 }
 0x1bd   : > { %10054 = vrot.lane.b32.xlu1 %v10053_v18, %s11959_s16  ;;  %v12908_v17 = vmax.f32 %v925_v24, 0.0 }
 0x1be   : > { %10059 = vrot.lane.b32.xlu0 %v10053_v18, %s11954_s8  ;;  %v2052_v44 = vsel %vm2047_vm9, %v2019_v47, %v9766_v22  ;;  %v2053_v18 = vsel %vm2047_vm9, %v2020_v48, %v9767_v40  ;;  %v9746_v22 = vunpack.i.l.bf16 %v12791_v31  ;;  %v10078_v40 = vpack.i.bf16 %v12855_v52, %v12858_v13 }
 0x1bf   : > { %v12850_v10 = vpop.permute.xlu1 %9774  ;;  %v2085_v46 = vsel %vm2080_vm10, %v2052_v44, %v9751_v35  ;;  %v12863_v20 = vpop.permute.xlu0 %9779  ;;  %v2086_v50 = vsel %vm2080_vm10, %v2053_v18, %v9752_v45  ;;  %v1890_v47 = vsel %vm1882_vm4, %v12425_v41, %v9761_v14  ;;  %v9772_v44 = vunpack.i.h.bf16 %v9770_v49 }
 0x1c0   : > { %2262 = vmatmul.mubr.f32.gmra.mxu1 %v2085_v46  ;;  %v12896_v41 = vsel %vm1090_vm2, %v1130_v53, 0.0  ;;  %v9776_v49 = vunpack.i.l.bf16 %v12850_v10  ;;  %v9777_v18 = vunpack.i.h.bf16 %v12850_v10 }
 0x1c1   : > { %9001 = vmatprep.mubr.msk.f32.mxu1 %vm1882_vm4, %v12468_v16  ;;  %10064 = vrot.lane.b32.xlu1 %v10063_v51, %s17466_s21  ;;  %v1889_v16 = vsel %vm1882_vm4, %v12428_v42, %v9727_v11  ;;  %v12893_v42 = vsel %vm1090_vm2, %v1129_v6, %v1130_v53  ;;  %v9757_v53 = vunpack.i.h.bf16 %v12818_v23 }
 0x1c2   : > { %10069 = vrot.lane.b32.xlu0 %v10063_v51, %s11956_s22  ;;  %v9747_v51 = vunpack.i.h.bf16 %v12791_v31  ;;  %v1922_v48 = vsel %vm1915_vm5, %v1889_v16, %v9746_v22  ;;  %v9756_v31 = vunpack.i.l.bf16 %v12818_v23  ;;  %v9408_v22 = vpop.f32.mrf.mxu1  ;;  %v10088_v6 = vpack.i.bf16 %v12896_v41, %v12893_v42 }
 0x1c3   : > { %v12876_v35 = vpop.permute.xlu1 %9784  ;;  %v12885_v46 = vpop.permute.xlu0 %9789  ;;  %v1955_v1 = vsel %vm1948_vm6, %v1922_v48, %v9771_v36  ;;  %v892_v16 = vmul.f32 %v9408_v22, %v12329_v33 }
 0x1c4   : > { %2267 = vmatmul.mubr.f32.gmra.mxu1 %v2086_v50  ;;  %v1988_v50 = vsel %vm1981_vm7, %v1955_v1, %v9756_v31  ;;  %v1036_v31 = vrot.slane %v12908_v17, 7 }
 0x1c5   : > { %9002 = vmatprep.mubr.msk.f32.mxu1 %vm1882_vm4, %v12492_v38  ;;  %10074 = vrot.lane.b32.xlu1 %v10073_v32, %s11957_s23  ;;  %v1923_v38 = vsel %vm1915_vm5, %v1890_v47, %v9747_v51  ;;  %v9786_v32 = vunpack.i.l.bf16 %v12876_v35  ;;  %v2021_v10 = vsel %vm2014_vm8, %v1988_v50, %v9776_v49  ;;  %v10098_v47 = vpack.i.bf16 %v12898_v30, %v12908_v17  ;;  %v840_v51 = vpop.f32.mrf.mxu1 }
 0x1c6   : > { %10079 = vrot.lane.b32.xlu0 %v10078_v40, %s17464_s9  ;;  %v1956_v14 = vsel %vm1948_vm6, %v1923_v38, %v9772_v44  ;;  %v1037_v38 = vrot.slane %v12898_v30, 7  ;;  %v9762_v49 = vunpack.i.h.bf16 %v12824_v9  ;;  %v891_v9 = vmul.f32 %v12329_v33, %v840_v51 }
 0x1c7   : > { %v12905_v11 = vpop.permute.xlu1 %9794  ;;  %v9800_v45 = vpop.permute.xlu0 %9799  ;;  %v1989_v24 = vsel %vm1981_vm7, %v1956_v14, %v9757_v53  ;;  %v9787_v53 = vunpack.i.h.bf16 %v12876_v35 }
 0x1c8   : > { %v9802_v28 = vunpack.i.h.bf16 %v9800_v45  ;;  %v9801_v36 = vunpack.i.l.bf16 %v9800_v45  ;;  %v2022_v1 = vsel %vm2014_vm8, %v1989_v24, %v9777_v18  ;;  %v9796_v22 = vunpack.i.l.bf16 %v12905_v11 }
 0x1c9   : > { %10084 = vrot.lane.b32.xlu1 %v10078_v40, %s11958_s15  ;;  %v9781_v45 = vunpack.i.l.bf16 %v12863_v20 }
 0x1ca   : > { %10089 = vrot.lane.b32.xlu0 %v10088_v6, %s11959_s16  ;;  %v2054_v23 = vsel %vm2047_vm9, %v2021_v10, %v9801_v36  ;;  %v2055_v14 = vsel %vm2047_vm9, %v2022_v1, %v9802_v28  ;;  %v928_v36 = vadd.f32 %v12332_v34, %v892_v16  ;;  %v1132_v28 = vrot.slane %v12908_v17, 1 }
 0x1cb   : > { %v9805_v44 = vpop.permute.xlu1 %9804  ;;  %v12924_v40 = vpop.permute.xlu0 %9809  ;;  %v2087_v48 = vsel %vm2080_vm10, %v2054_v23, %v9786_v32  ;;  %v2088_v35 = vsel %vm2080_vm10, %v2055_v14, %v9787_v53  ;;  %v12950_v16 = vsel %vm994_vm3, %v1036_v31, %v1037_v38  ;;  %v1133_v10 = vrot.slane %v12898_v30, 1 }
 0x1cc   : > { %2272 = vmatmul.mubr.f32.gmra.mxu1 %v2087_v48  ;;  %v9806_v18 = vunpack.i.l.bf16 %v9805_v44  ;;  %v1891_v23 = vsel %vm1882_vm4, %v12456_v0, %v9762_v49  ;;  %v9807_v24 = vunpack.i.h.bf16 %v9805_v44  ;;  %v12963_v48 = vmax.f32 %v928_v36, 0.0  ;;  %v9411_v44 = vpop.f32.mrf.mxu1 }
 0x1cd   : > { %10094 = vrot.lane.b32.xlu1 %v10088_v6, %s11954_s8  ;;  %9003 = vmatprep.mubr.msk.f32.mxu1 %vm1882_vm4, %v12495_v39  ;;  %v10108_v6 = vpack.i.bf16 %v12908_v17, %v12815_v43  ;;  %v12953_v39 = vsel %vm994_vm3, 0.0, %v1036_v31  ;;  %v1892_v43 = vsel %vm1882_vm4, %v12453_v61, %v9796_v22  ;;  %v9782_v17 = vunpack.i.h.bf16 %v12863_v20 }
 0x1ce   : > { %10099 = vrot.lane.b32.xlu0 %v10098_v47, %s17466_s21  ;;  %v1924_v51 = vsel %vm1915_vm5, %v1891_v23, %v9781_v45  ;;  %v927_v0 = vadd.f32 %v12332_v34, %v891_v9  ;;  %v9791_v20 = vunpack.i.l.bf16 %v12885_v46  ;;  %v12982_v49 = vsel %vm1090_vm2, %v1133_v10, 0.0 }
 0x1cf   : > { %v12941_v50 = vpop.permute.xlu1 %9814  ;;  %v12946_v32 = vpop.permute.xlu0 %9819  ;;  %v1957_v1 = vsel %vm1948_vm6, %v1924_v51, %v9806_v18  ;;  %v1925_v31 = vsel %vm1915_vm5, %v1892_v43, %v9782_v17  ;;  %v9792_v14 = vunpack.i.h.bf16 %v12885_v46  ;;  %v9811_v36 = vunpack.i.l.bf16 %v12924_v40 }
 0x1d0   : > { %2277 = vmatmul.mubr.f32.gmra.mxu1 %v2088_v35  ;;  %v1958_v22 = vsel %vm1948_vm6, %v1925_v31, %v9807_v24  ;;  %v1990_v45 = vsel %vm1981_vm7, %v1957_v1, %v9791_v20  ;;  %v12990_v53 = vmax.f32 %v927_v0, 0.0  ;;  %v9812_v46 = vunpack.i.h.bf16 %v12924_v40 }
 0x1d1   : > { %10104 = vrot.lane.b32.xlu1 %v10098_v47, %s11956_s22  ;;  %9004 = vmatprep.mubr.msk.f32.mxu1 %vm1882_vm4, %v12519_v4  ;;  %v10113_v47 = vpack.i.bf16 %v12950_v16, %v12953_v39  ;;  %v12979_v4 = vsel %vm1090_vm2, %v1132_v28, %v1133_v10  ;;  %v1991_v23 = vsel %vm1981_vm7, %v1958_v22, %v9792_v14  ;;  %v9821_v43 = vunpack.i.l.bf16 %v12946_v32 }
 0x1d2   : > { %10109 = vrot.lane.b32.xlu0 %v10108_v6, %s11957_s23  ;;  %v10123_v18 = vpack.i.bf16 %v12982_v49, %v12979_v4  ;;  %v850_v6 = vpop.f32.mrf.mxu1  ;;  %v2023_v24 = vsel %vm2014_vm8, %v1990_v45, %v9811_v36  ;;  %v10133_v17 = vpack.i.bf16 %v12963_v48, %v12990_v53  ;;  %v894_v0 = vmul.f32 %v9411_v44, %v12329_v33 }
 0x1d3   : > { %v12970_v61 = vpop.permute.xlu1 %9824  ;;  %v12976_v38 = vpop.permute.xlu0 %9829  ;;  %v893_v1 = vmul.f32 %v12329_v33, %v850_v6  ;;  %v2024_v31 = vsel %vm2014_vm8, %v1991_v23, %v9812_v46  ;;  %v1039_v22 = vrot.slane %v12990_v53, 7  ;;  %v1040_v14 = vrot.slane %v12963_v48, 7 }
 0x1d4   : > { %v9797_v45 = vunpack.i.h.bf16 %v12905_v11  ;;  %v9816_v33 = vunpack.i.l.bf16 %v12941_v50  ;;  %v10143_v11 = vpack.i.bf16 %v12990_v53, %v12898_v30 }
 0x1d5   : > { %10114 = vrot.lane.b32.xlu1 %v10113_v47, %s17464_s9  ;;  %v929_v23 = vadd.f32 %v12332_v34, %v893_v1 }
 0x1d6   : > { %1242 = vrot.lane.b32.xlu0 %v12963_v48, %s11957_s23 }
 0x1d7   : > { %v9835_v9 = vpop.permute.xlu1 %9834  ;;  %v9840_v28 = vpop.permute.xlu0 %9839 }
 0x1d8   : > { %v9837_v35 = vunpack.i.h.bf16 %v9835_v9  ;;  %v9836_v10 = vunpack.i.l.bf16 %v9835_v9  ;;  %v9822_v9 = vunpack.i.h.bf16 %v12946_v32  ;;  %v9841_v6 = vunpack.i.l.bf16 %v9840_v28 }
 0x1d9   : > { %10124 = vrot.lane.b32.xlu1 %v10123_v18, %s11959_s16  ;;  %v13031_v32 = vsel %vm994_vm3, %v1039_v22, %v1040_v14 }
 0x1da   : > { %10119 = vrot.lane.b32.xlu0 %v10113_v47, %s11958_s15  ;;  %v2056_v51 = vsel %vm2047_vm9, %v2023_v24, %v9836_v10  ;;  %v9831_v47 = vunpack.i.l.bf16 %v12976_v38  ;;  %v2057_v44 = vsel %vm2047_vm9, %v2024_v31, %v9837_v35  ;;  %v930_v10 = vadd.f32 %v12332_v34, %v894_v0 }
 0x1db   : > { %v13006_v20 = vpop.permute.xlu1 %9844  ;;  %v2089_v40 = vsel %vm2080_vm10, %v2056_v51, %v9821_v43  ;;  %v13014_v36 = vpop.permute.xlu0 %9849  ;;  %v2090_v46 = vsel %vm2080_vm10, %v2057_v44, %v9822_v9  ;;  %v1135_v43 = vrot.slane %v12990_v53, 1  ;;  %v9842_v24 = vunpack.i.h.bf16 %v9840_v28 }
 0x1dc   : > { %2282 = vmatmul.mubr.f32.gmra.mxu1 %v2089_v40  ;;  %v1894_v30 = vsel %vm1882_vm4, %v12480_v27, %v9831_v47  ;;  %v1136_v51 = vrot.slane %v12963_v48, 1  ;;  %v9817_v0 = vunpack.i.h.bf16 %v12941_v50  ;;  %v9846_v53 = vunpack.i.l.bf16 %v13006_v20 }
 0x1dd   : > { %9005 = vmatprep.mubr.msk.f32.mxu1 %vm1882_vm4, %v12522_v5  ;;  %10134 = vrot.lane.b32.xlu1 %v10133_v17, %s17466_s21  ;;  %v13034_v5 = vsel %vm994_vm3, 0.0, %v1039_v22  ;;  %v13052_v27 = vmax.f32 %v930_v10, 0.0  ;;  %v13054_v28 = vmax.f32 %v929_v23, 0.0  ;;  %v9826_v48 = vunpack.i.l.bf16 %v12970_v61 }
 0x1de   : > { %10129 = vrot.lane.b32.xlu0 %v10123_v18, %s11954_s8  ;;  %v1893_v18 = vsel %vm1882_vm4, %v12483_v29, %v9797_v45  ;;  %v1927_v50 = vsel %vm1915_vm5, %v1894_v30, %v9817_v0  ;;  %v9847_v22 = vunpack.i.h.bf16 %v13006_v20  ;;  %v13068_v45 = vsel %vm1090_vm2, %v1136_v51, 0.0 }
 0x1df   : > { %v13027_v35 = vpop.permute.xlu1 %9854  ;;  %v13041_v34 = vpop.permute.xlu0 %9859  ;;  %v1926_v1 = vsel %vm1915_vm5, %v1893_v18, %v9816_v33  ;;  %v1960_v31 = vsel %vm1948_vm6, %v1927_v50, %v9842_v24  ;;  %v9827_v47 = vunpack.i.h.bf16 %v12970_v61  ;;  %v1172_v10 = vrot.slane %v13054_v28, 7 }
 0x1e0   : > { %2287 = vmatmul.mubr.f32.gmra.mxu1 %v2090_v46  ;;  %v1959_v29 = vsel %vm1948_vm6, %v1926_v1, %v9841_v6  ;;  %v9856_v6 = vunpack.i.l.bf16 %v13027_v35 }
 0x1e1   : > { %9006 = vmatprep.mubr.msk.f32.mxu1 %vm1882_vm4, %v12546_v37  ;;  %10144 = vrot.lane.b32.xlu1 %v10143_v11, %s11957_s23  ;;  %v10153_v37 = vpack.i.bf16 %v13031_v32, %v13034_v5  ;;  %v1992_v9 = vsel %vm1981_vm7, %v1959_v29, %v9826_v48  ;;  %v1173_v11 = vrot.slane %v13052_v27, 7  ;;  %v10168_v29 = vpack.i.bf16 %v13052_v27, %v13054_v28 }
 0x1e2   : > { %10139 = vrot.lane.b32.xlu0 %v10133_v17, %s11956_s22  ;;  %v13065_v17 = vsel %vm1090_vm2, %v1135_v43, %v1136_v51  ;;  %v2025_v20 = vsel %vm2014_vm8, %v1992_v9, %v9846_v53  ;;  %v1993_v43 = vsel %vm1981_vm7, %v1960_v31, %v9827_v47  ;;  %v9832_v51 = vunpack.i.h.bf16 %v12976_v38 }
 0x1e3   : > { %v13058_v40 = vpop.permute.xlu1 %9864  ;;  %v9870_v14 = vpop.permute.xlu0 %9869  ;;  %v10163_v61 = vpack.i.bf16 %v13068_v45, %v13065_v17  ;;  %v2026_v24 = vsel %vm2014_vm8, %v1993_v43, %v9847_v22  ;;  %v9851_v53 = vunpack.i.l.bf16 %v13014_v36  ;;  %v9857_v48 = vunpack.i.h.bf16 %v13027_v35 }
 0x1e4   : > { %v9872_v44 = vunpack.i.h.bf16 %v9870_v14  ;;  %v9871_v33 = vunpack.i.l.bf16 %v9870_v14  ;;  %v9866_v0 = vunpack.i.l.bf16 %v13058_v40  ;;  %v1174_v38 = vsel %vm994_vm3, %v1172_v10, %v1173_v11 }
 0x1e5   : > { %10154 = vrot.lane.b32.xlu1 %v10153_v37, %s11958_s15  ;;  %v1176_v50 = vsel %vm994_vm3, 0.0, %v1172_v10  ;;  %v1895_v47 = vsel %vm1882_vm4, %v12511_v56, %v9832_v51  ;;  %v1178_v51 = vrot.slane %v13052_v27, 1 }
 0x1e6   : > { %10149 = vrot.lane.b32.xlu0 %v10153_v37, %s17464_s9  ;;  %v2058_v46 = vsel %vm2047_vm9, %v2025_v20, %v9871_v33  ;;  %v2059_v1 = vsel %vm2047_vm9, %v2026_v24, %v9872_v44  ;;  %v1896_v35 = vsel %vm1882_vm4, %v12508_v55, %v9866_v0  ;;  %v9852_v33 = vunpack.i.h.bf16 %v13014_v36 }
 0x1e7   : > { %v9875_v23 = vpop.permute.xlu1 %9874  ;;  %v9880_v18 = vpop.permute.xlu0 %9879  ;;  %v2091_v30 = vsel %vm2080_vm10, %v2058_v46, %v9856_v6  ;;  %v2092_v14 = vsel %vm2080_vm10, %v2059_v1, %v9857_v48  ;;  %v1928_v9 = vsel %vm1915_vm5, %v1895_v47, %v9851_v53  ;;  %v9861_v55 = vunpack.i.l.bf16 %v13041_v34 }
 0x1e8   : > { %2292 = vmatmul.mubr.f32.gmra.mxu1 %v2091_v30  ;;  %v9876_v37 = vunpack.i.l.bf16 %v9875_v23  ;;  %v9877_v44 = vunpack.i.h.bf16 %v9875_v23  ;;  %v1929_v11 = vsel %vm1915_vm5, %v1896_v35, %v9852_v33  ;;  %v9862_v36 = vunpack.i.h.bf16 %v13041_v34 }
 0x1e9   : > { %10164 = vrot.lane.b32.xlu1 %v10163_v61, %s11954_s8  ;;  %9007 = vmatprep.mubr.msk.f32.mxu1 %vm1882_vm4, %v12549_v2  ;;  %v10173_v2 = vpack.i.bf16 %v1174_v38, %v1176_v50  ;;  %v9881_v23 = vunpack.i.l.bf16 %v9880_v18  ;;  %v9882_v1 = vunpack.i.h.bf16 %v9880_v18  ;;  %v17608_v53 = vmov 0.0  }
 0x1ea   : > { %10159 = vrot.lane.b32.xlu0 %v10163_v61, %s11959_s16  ;;  %v1961_v56 = vsel %vm1948_vm6, %v1928_v9, %v9876_v37  ;;  %v1962_v10 = vsel %vm1948_vm6, %v1929_v11, %v9877_v44  ;;  %v1177_v61 = vrot.slane %v13054_v28, 1  ;;  %v9867_v37 = vunpack.i.h.bf16 %v13058_v40 }
 0x1eb   : > { %v13097_v31 = vpop.permute.xlu1 %9884  ;;  %v9890_v22 = vpop.permute.xlu0 %9889  ;;  %v1995_v0 = vsel %vm1981_vm7, %v1962_v10, %v9862_v36 }
 0x1ec   : > { %2297 = vmatmul.mubr.f32.gmra.mxu1 %v2092_v14  ;;  %v2028_v50 = vsel %vm2014_vm8, %v1995_v0, %v9882_v1  ;;  %v13139_v47 = vsel %vm1090_vm2, %v1177_v61, %v1178_v51  ;;  %v9892_v44 = vunpack.i.h.bf16 %v9890_v22  ;;  %v1897_v9 = vsel %vm1882_vm4, %v12535_v8, %v9867_v37 }
 0x1ed   : > { %1559 = vrot.lane.b32.xlu1 %v13054_v28, %s11956_s22  ;;  %9008 = vmatprep.mubr.msk.f32.mxu1 %vm1882_vm4, %v12575_v60  ;;  %v1994_v60 = vsel %vm1981_vm7, %v1961_v56, %v9861_v55  ;;  %v9887_v11 = vunpack.i.h.bf16 %v13097_v31 }
 0x1ee   : > { %10169 = vrot.lane.b32.xlu0 %v10168_v29, %s17466_s21  ;;  %v9891_v29 = vunpack.i.l.bf16 %v9890_v22  ;;  %v2027_v34 = vsel %vm2014_vm8, %v1994_v60, %v9881_v23 }
 0x1ef   : > { %v13112_v6 = vpop.permute.xlu1 %9894  ;;  %v13116_v20 = vpop.permute.xlu0 %9899 }
 0x1f0   : > { %v9901_v18 = vunpack.i.l.bf16 %v13116_v20  ;;  %v9897_v61 = vunpack.i.h.bf16 %v13112_v6 }
 0x1f1   : > { %10174 = vrot.lane.b32.xlu1 %v10173_v2, %s17464_s9 }
 0x1f2   : > { %10179 = vrot.lane.b32.xlu0 %v10173_v2, %s11958_s15  ;;  %v1898_v56 = vsel %vm1882_vm4, %v12532_v7, %v9901_v18  ;;  %v9896_v7 = vunpack.i.l.bf16 %v13112_v6 }
 0x1f3   : > { %v9905_v46 = vpop.permute.xlu1 %9904  ;;  %v9910_v43 = vpop.permute.xlu0 %9909  ;;  %v1931_v36 = vsel %vm1915_vm5, %v1898_v56, %v9887_v11 }
 0x1f4   : > { %v9907_v30 = vunpack.i.h.bf16 %v9905_v46  ;;  %v9906_v24 = vunpack.i.l.bf16 %v9905_v46  ;;  %v9911_v40 = vunpack.i.l.bf16 %v9910_v43  ;;  %v9912_v22 = vunpack.i.h.bf16 %v9910_v43 }
 0x1f5   : > { %1849 = vrot.lane.b32.xlu1 %v17608_v53, %s17466_s21  ;;  %s11964_s21 = smov [#allocation8]  }
 0x1f6   : > { %1561 = vrot.lane.b32.xlu0 %v13052_v27, %s11956_s22  ;;  %v2060_v48 = vsel %vm2047_vm9, %v2027_v34, %v9906_v24  ;;  %v2061_v35 = vsel %vm2047_vm9, %v2028_v50, %v9907_v30  ;;  %v9886_v27 = vunpack.i.l.bf16 %v13097_v31  ;;  %v1964_v23 = vsel %vm1948_vm6, %v1931_v36, %v9912_v22  ;;  %v17609_v22 = vld [vmem:[#allocation22_spill] sm:$0xff] }
 0x1f7   : > { %v9915_v28 = vpop.permute.xlu1 %9914  ;;  %v2093_v38 = vsel %vm2080_vm10, %v2060_v48, %v9891_v29  ;;  %v13136_v14 = vpop.permute.xlu0 %9919  ;;  %v2094_v33 = vsel %vm2080_vm10, %v2061_v35, %v9892_v44  ;;  %v1997_v29 = vsel %vm1981_vm7, %v1964_v23, %v9897_v61 }
 0x1f8   : > { %2302 = vmatmul.mubr.f32.gmra.mxu1 %v2093_v38  ;;  %v1930_v10 = vsel %vm1915_vm5, %v1897_v9, %v9886_v27  ;;  %v9916_v8 = vunpack.i.l.bf16 %v9915_v28  ;;  %v9917_v31 = vunpack.i.h.bf16 %v9915_v28  ;;  %v9902_v38 = vunpack.i.h.bf16 %v13116_v20 }
 0x1f9   : > { %9009 = vmatprep.mubr.msk.f32.mxu1 %vm1882_vm4, %v12578_v19  ;;  %1656 = vrot.lane.b32.xlu1 %v13139_v47, %s11959_s16  ;;  %v13155_v19 = vsel %vm1090_vm2, %v1178_v51, 0.0  ;;  %v9921_v37 = vunpack.i.l.bf16 %v13136_v14  ;;  %v9922_v56 = vunpack.i.h.bf16 %v13136_v14 }
 0x1fa   : > { %1755 = vrot.lane.b32.xlu0 %v12268_v12, %s17464_s9  ;;  %v1963_v12 = vsel %vm1948_vm6, %v1930_v10, %v9911_v40  ;;  %v2030_v28 = vsel %vm2014_vm8, %v1997_v29, %v9917_v31 }
 0x1fb   : > { %v9925_v2 = vpop.permute.xlu1 %9924  ;;  %v9930_v55 = vpop.permute.xlu0 %9929  ;;  %v1996_v30 = vsel %vm1981_vm7, %v1963_v12, %v9896_v7 }
 0x1fc   : > { %2307 = vmatmul.mubr.f32.gmra.mxu1 %v2094_v33  ;;  %v9926_v24 = vunpack.i.l.bf16 %v9925_v2  ;;  %v2029_v51 = vsel %vm2014_vm8, %v1996_v30, %v9916_v8  ;;  %v9927_v18 = vunpack.i.h.bf16 %v9925_v2  ;;  %v1899_v33 = vsel %vm1882_vm4, %v12565_v59, %v9902_v38 }
 0x1fd   : > { %9010 = vmatprep.mubr.msk.f32.mxu1 %vm1882_vm4, %v12609_v54  ;;  %1658 = vrot.lane.b32.xlu1 %v13155_v19, %s11959_s16  ;;  %v1932_v2 = vsel %vm1915_vm5, %v1899_v33, %v9921_v37  ;;  %v9931_v10 = vunpack.i.l.bf16 %v9930_v55  ;;  %v17612_v33 = vld [vmem:[#allocation15_spill] sm:$0xff] }
 0x1ff   : > { %v13166_v60 = vpop.permute.xlu1 %9934  ;;  %v9940_v46 = vpop.permute.xlu0 %9939 }
 0x200   : > { %v9942_v43 = vunpack.i.h.bf16 %v9940_v46  ;;  %v9941_v54 = vunpack.i.l.bf16 %v9940_v46  ;;  %v9936_v6 = vunpack.i.l.bf16 %v13166_v60 }
 0x202   : > { %v2062_v1 = vsel %vm2047_vm9, %v2029_v51, %v9941_v54  ;;  %v2063_v50 = vsel %vm2047_vm9, %v2030_v28, %v9942_v43  ;;  %v1900_v20 = vsel %vm1882_vm4, %v12562_v58, %v9936_v6  ;;  %v9932_v58 = vunpack.i.h.bf16 %v9930_v55  ;;  %v17610_v6 = vld [vmem:[#allocation23_spill] sm:$0xff] }
 0x203   : > { %v9945_v0 = vpop.permute.xlu1 %9944  ;;  %v9950_v34 = vpop.permute.xlu0 %9949  ;;  %v2095_v48 = vsel %vm2080_vm10, %v2062_v1, %v9926_v24  ;;  %v2096_v40 = vsel %vm2080_vm10, %v2063_v50, %v9927_v18  ;;  %v1933_v12 = vsel %vm1915_vm5, %v1900_v20, %v9922_v56  ;;  %v9937_v1 = vunpack.i.h.bf16 %v13166_v60 }
 0x204   : > { %2312 = vmatmul.mubr.f32.gmra.mxu1 %v2095_v48  ;;  %v9946_v35 = vunpack.i.l.bf16 %v9945_v0  ;;  %v9947_v9 = vunpack.i.h.bf16 %v9945_v0  ;;  %v9951_v36 = vunpack.i.l.bf16 %v9950_v34  ;;  %v9952_v43 = vunpack.i.h.bf16 %v9950_v34 }
 0x205   : > { %9011 = vmatprep.mubr.msk.f32.mxu1 %vm1882_vm4, %v12612_v57 }
 0x206   : > { %v1965_v57 = vsel %vm1948_vm6, %v1932_v2, %v9946_v35  ;;  %v1966_v59 = vsel %vm1948_vm6, %v1933_v12, %v9947_v9  ;;  %v17611_v35 = vld [vmem:[#allocation16_spill] sm:$0xff] }
 0x207   : > { %v9955_v27 = vpop.permute.xlu1 %9954  ;;  %v9960_v44 = vpop.permute.xlu0 %9959  ;;  %v1998_v7 = vsel %vm1981_vm7, %v1965_v57, %v9931_v10  ;;  %v1999_v61 = vsel %vm1981_vm7, %v1966_v59, %v9932_v58 }
 0x208   : > { %2317 = vmatmul.mubr.f32.gmra.mxu1 %v2096_v40  ;;  %v9961_v54 = vunpack.i.l.bf16 %v9960_v44  ;;  %v2031_v30 = vsel %vm2014_vm8, %v1998_v7, %v9951_v36  ;;  %v2032_v55 = vsel %vm2014_vm8, %v1999_v61, %v9952_v43  ;;  %v9956_v38 = vunpack.i.l.bf16 %v9955_v27 }
 0x209   : > { %9012 = vmatprep.mubr.msk.f32.mxu1 %vm1882_vm4, %v17609_v22  ;;  %v9962_v34 = vunpack.i.h.bf16 %v9960_v44  ;;  %v1901_v40 = vsel %vm1882_vm4, %v17611_v35, %v9937_v1  ;;  %v9957_v56 = vunpack.i.h.bf16 %v9955_v27 }
 0x20a   : > { %v1934_v2 = vsel %vm1915_vm5, %v1901_v40, %v9956_v38 }
 0x20b   : > { %v9965_v11 = vpop.permute.xlu1 %9964  ;;  %v13193_v8 = vpop.permute.xlu0 %9969 }
 0x20c   : > { %v9971_v29 = vunpack.i.l.bf16 %v13193_v8  ;;  %v9966_v57 = vunpack.i.l.bf16 %v9965_v11  ;;  %v9967_v36 = vunpack.i.h.bf16 %v9965_v11 }
 0x20e   : > { %v1902_v60 = vsel %vm1882_vm4, %v17612_v33, %v9971_v29 }
 0x20f   : > { %v9975_v14 = vpop.permute.xlu1 %9974  ;;  %v9980_v23 = vpop.permute.xlu0 %9979  ;;  %v1935_v10 = vsel %vm1915_vm5, %v1902_v60, %v9957_v56 }
 0x210   : > { %v9977_v31 = vunpack.i.h.bf16 %v9975_v14  ;;  %v9976_v46 = vunpack.i.l.bf16 %v9975_v14  ;;  %v9981_v50 = vunpack.i.l.bf16 %v9980_v23  ;;  %v9982_v20 = vunpack.i.h.bf16 %v9980_v23 }
 0x212   : > { %v2064_v24 = vsel %vm2047_vm9, %v2031_v30, %v9976_v46  ;;  %v2065_v28 = vsel %vm2047_vm9, %v2032_v55, %v9977_v31  ;;  %v1967_v44 = vsel %vm1948_vm6, %v1934_v2, %v9981_v50  ;;  %v1968_v59 = vsel %vm1948_vm6, %v1935_v10, %v9982_v20 }
 0x213   : > { %v9985_v51 = vpop.permute.xlu1 %9984  ;;  %v2097_v0 = vsel %vm2080_vm10, %v2064_v24, %v9961_v54  ;;  %v9990_v48 = vpop.permute.xlu0 %9989  ;;  %v2098_v18 = vsel %vm2080_vm10, %v2065_v28, %v9962_v34  ;;  %v2000_v23 = vsel %vm1981_vm7, %v1967_v44, %v9966_v57  ;;  %v2001_v43 = vsel %vm1981_vm7, %v1968_v59, %v9967_v36 }
 0x214   : > { %2322 = vmatmul.mubr.f32.gmra.mxu1 %v2097_v0  ;;  %v9986_v22 = vunpack.i.l.bf16 %v9985_v51  ;;  %v9987_v58 = vunpack.i.h.bf16 %v9985_v51  ;;  %v9972_v51 = vunpack.i.h.bf16 %v13193_v8  ;;  %v9991_v55 = vunpack.i.l.bf16 %v9990_v48 }
 0x215   : > { %9013 = vmatprep.mubr.msk.f32.mxu1 %vm1882_vm4, %v17610_v6  ;;  %v17613_v6 = vld [vmem:[#allocation19_spill] sm:$0xff]  ;;  %v9992_v40 = vunpack.i.h.bf16 %v9990_v48 }
 0x216   : > { %v2034_v24 = vsel %vm2014_vm8, %v2001_v43, %v9987_v58  ;;  %v1903_v50 = vsel %vm1882_vm4, %v17613_v6, %v9972_v51 }
 0x217   : > { %v9995_v37 = vpop.permute.xlu1 %9994  ;;  %v1936_v33 = vsel %vm1915_vm5, %v1903_v50, %v9991_v55  ;;  %v17615_v55 = vld [vmem:[#allocation24_spill] sm:$0xff] }
 0x218   : > { %v10000_v9 = vpop.permute.xlu0 %9999  ;;  %2327 = vmatmul.mubr.f32.gmra.mxu1 %v2098_v18  ;;  %v9996_v31 = vunpack.i.l.bf16 %v9995_v37  ;;  %v9997_v1 = vunpack.i.h.bf16 %v9995_v37  ;;  %v17614_v18 = vld [vmem:[#allocation18_spill] sm:$0xff] }
 0x219   : > { %9014 = vmatprep.mubr.msk.f32.mxu1 %vm1882_vm4, %v12747_v63  ;;  %v2033_v63 = vsel %vm2014_vm8, %v2000_v23, %v9986_v22  ;;  %v10001_v60 = vunpack.i.l.bf16 %v10000_v9  ;;  %v10002_v44 = vunpack.i.h.bf16 %v10000_v9 }
 0x21b   : > { %v13217_v12 = vpop.permute.xlu1 %10004 }
 0x21c   : > { %v10010_v7 = vpop.permute.xlu0 %10009  ;;  %v10006_v11 = vunpack.i.l.bf16 %v13217_v12 }
 0x21d   : > { %v10012_v14 = vunpack.i.h.bf16 %v10010_v7  ;;  %v10011_v27 = vunpack.i.l.bf16 %v10010_v7 }
 0x21e   : > { %v1904_v8 = vsel %vm1882_vm4, %v17614_v18, %v10006_v11 }
 0x21f   : > { %v10015_v46 = vpop.permute.xlu1 %10014  ;;  %v2066_v61 = vsel %vm2047_vm9, %v2033_v63, %v10011_v27  ;;  %v2067_v0 = vsel %vm2047_vm9, %v2034_v24, %v10012_v14  ;;  %v1937_v20 = vsel %vm1915_vm5, %v1904_v8, %v9992_v40  ;;  %v10007_v63 = vunpack.i.h.bf16 %v13217_v12 }
 0x220   : > { %v10020_v54 = vpop.permute.xlu0 %10019  ;;  %v2099_v30 = vsel %vm2080_vm10, %v2066_v61, %v9996_v31  ;;  %v10016_v29 = vunpack.i.l.bf16 %v10015_v46  ;;  %v2100_v34 = vsel %vm2080_vm10, %v2067_v0, %v9997_v1  ;;  %v10017_v35 = vunpack.i.h.bf16 %v10015_v46 }
 0x221   : > { %2332 = vmatmul.mubr.f32.gmra.mxu1 %v2099_v30  ;;  %v10021_v57 = vunpack.i.l.bf16 %v10020_v54  ;;  %v10022_v7 = vunpack.i.h.bf16 %v10020_v54  ;;  %v1905_v0 = vsel %vm1882_vm4, %v12710_v25, %v10007_v63 }
 0x222   : > { %9015 = vmatprep.mubr.msk.f32.mxu1 %vm1882_vm4, %v12750_v62  ;;  %v1969_v62 = vsel %vm1948_vm6, %v1936_v33, %v10016_v29  ;;  %v1970_v2 = vsel %vm1948_vm6, %v1937_v20, %v10017_v35 }
 0x223   : > { %v10025_v28 = vpop.permute.xlu1 %10024  ;;  %v2002_v22 = vsel %vm1981_vm7, %v1969_v62, %v10001_v60 }
 0x224   : > { %v10030_v38 = vpop.permute.xlu0 %10029  ;;  %v2035_v14 = vsel %vm2014_vm8, %v2002_v22, %v10021_v57  ;;  %v10026_v30 = vunpack.i.l.bf16 %v10025_v28 }
 0x225   : > { %2337 = vmatmul.mubr.f32.gmra.mxu1 %v2100_v34  ;;  %v10031_v36 = vunpack.i.l.bf16 %v10030_v38  ;;  %v10032_v54 = vunpack.i.h.bf16 %v10030_v38  ;;  %v10027_v34 = vunpack.i.h.bf16 %v10025_v28 }
 0x226   : > { %9016 = vmatprep.mubr.msk.f32.mxu1 %vm1882_vm4, %v12827_v3  ;;  %v2003_v3 = vsel %vm1981_vm7, %v1970_v2, %v10002_v44  ;;  %v1938_v6 = vsel %vm1915_vm5, %v1905_v0, %v10026_v30 }
 0x227   : > { %v10035_v37 = vpop.permute.xlu1 %10034  ;;  %v2036_v9 = vsel %vm2014_vm8, %v2003_v3, %v10022_v7 }
 0x228   : > { %v13241_v56 = vpop.permute.xlu0 %10039  ;;  %v10036_v50 = vunpack.i.l.bf16 %v10035_v37  ;;  %v10037_v33 = vunpack.i.h.bf16 %v10035_v37 }
 0x229   : > { %v10041_v46 = vunpack.i.l.bf16 %v13241_v56 }
 0x22b   : > { %v10045_v48 = vpop.permute.xlu1 %10044  ;;  %v1906_v12 = vsel %vm1882_vm4, %v17615_v55, %v10041_v46 }
 0x22c   : > { %v10050_v10 = vpop.permute.xlu0 %10049  ;;  %v10047_v59 = vunpack.i.h.bf16 %v10045_v48  ;;  %v10046_v58 = vunpack.i.l.bf16 %v10045_v48  ;;  %v1939_v18 = vsel %vm1915_vm5, %v1906_v12, %v10027_v34 }
 0x22d   : > { %v10051_v24 = vunpack.i.l.bf16 %v10050_v10  ;;  %v10052_v1 = vunpack.i.h.bf16 %v10050_v10 }
 0x22e   : > { %v2068_v27 = vsel %vm2047_vm9, %v2035_v14, %v10046_v58  ;;  %v2069_v43 = vsel %vm2047_vm9, %v2036_v9, %v10047_v59  ;;  %v10042_v59 = vunpack.i.h.bf16 %v13241_v56 }
 0x22f   : > { %v10055_v23 = vpop.permute.xlu1 %10054  ;;  %v2101_v31 = vsel %vm2080_vm10, %v2068_v27, %v10031_v36  ;;  %v2102_v11 = vsel %vm2080_vm10, %v2069_v43, %v10032_v54  ;;  %v1972_v25 = vsel %vm1948_vm6, %v1939_v18, %v10052_v1 }
 0x230   : > { %v10060_v61 = vpop.permute.xlu0 %10059  ;;  %2342 = vmatmul.mubr.f32.gmra.mxu1 %v2101_v31  ;;  %v10056_v38 = vunpack.i.l.bf16 %v10055_v23  ;;  %v10057_v35 = vunpack.i.h.bf16 %v10055_v23  ;;  %v2005_v22 = vsel %vm1981_vm7, %v1972_v25, %v10037_v33  ;;  %v1907_v31 = vsel %vm1882_vm4, %v12795_v21, %v10042_v59 }
 0x231   : > { %9017 = vmatprep.mubr.msk.f32.mxu1 %vm1882_vm4, %v12830_v15  ;;  %v1971_v15 = vsel %vm1948_vm6, %v1938_v6, %v10051_v24  ;;  %v10061_v3 = vunpack.i.l.bf16 %v10060_v61  ;;  %v10062_v63 = vunpack.i.h.bf16 %v10060_v61 }
 0x232   : > { %v2004_v60 = vsel %vm1981_vm7, %v1971_v15, %v10036_v50  ;;  %v2038_v10 = vsel %vm2014_vm8, %v2005_v22, %v10057_v35 }
 0x233   : > { %v10065_v51 = vpop.permute.xlu1 %10064  ;;  %v1940_v46 = vsel %vm1915_vm5, %v1907_v31, %v10061_v3 }
 0x234   : > { %v10070_v29 = vpop.permute.xlu0 %10069  ;;  %2347 = vmatmul.mubr.f32.gmra.mxu1 %v2102_v11  ;;  %v10066_v20 = vunpack.i.l.bf16 %v10065_v51  ;;  %v10067_v7 = vunpack.i.h.bf16 %v10065_v51 }
 0x235   : > { %9018 = vmatprep.mubr.msk.f32.mxu1 %vm1882_vm4, %v12893_v42  ;;  %v2037_v42 = vsel %vm2014_vm8, %v2004_v60, %v10056_v38  ;;  %v10071_v30 = vunpack.i.l.bf16 %v10070_v29  ;;  %v10072_v51 = vunpack.i.h.bf16 %v10070_v29 }
 0x237   : > { %v13265_v8 = vpop.permute.xlu1 %10074 }
 0x238   : > { %v10080_v40 = vpop.permute.xlu0 %10079  ;;  %v10076_v37 = vunpack.i.l.bf16 %v13265_v8 }
 0x239   : > { %v10082_v62 = vunpack.i.h.bf16 %v10080_v40  ;;  %v10081_v28 = vunpack.i.l.bf16 %v10080_v40  ;;  %v10077_v40 = vunpack.i.h.bf16 %v13265_v8 }
 0x23a   : > { %v1908_v56 = vsel %vm1882_vm4, %v12801_v26, %v10076_v37 }
 0x23b   : > { %v10085_v2 = vpop.permute.xlu1 %10084  ;;  %v2070_v44 = vsel %vm2047_vm9, %v2037_v42, %v10081_v28  ;;  %v2071_v58 = vsel %vm2047_vm9, %v2038_v10, %v10082_v62  ;;  %v1941_v54 = vsel %vm1915_vm5, %v1908_v56, %v10062_v63 }
 0x23c   : > { %v10090_v57 = vpop.permute.xlu0 %10089  ;;  %v2103_v48 = vsel %vm2080_vm10, %v2070_v44, %v10066_v20  ;;  %v10086_v36 = vunpack.i.l.bf16 %v10085_v2  ;;  %v2104_v23 = vsel %vm2080_vm10, %v2071_v58, %v10067_v7  ;;  %v10087_v9 = vunpack.i.h.bf16 %v10085_v2 }
 0x23d   : > { %2352 = vmatmul.mubr.f32.gmra.mxu1 %v2103_v48  ;;  %v10091_v11 = vunpack.i.l.bf16 %v10090_v57  ;;  %v10092_v1 = vunpack.i.h.bf16 %v10090_v57  ;;  %v1909_v2 = vsel %vm1882_vm4, %v12858_v13, %v10077_v40 }
 0x23e   : > { %9019 = vmatprep.mubr.msk.f32.mxu1 %vm1882_vm4, %v12896_v41  ;;  %v1973_v41 = vsel %vm1948_vm6, %v1940_v46, %v10086_v36  ;;  %v1974_v21 = vsel %vm1948_vm6, %v1941_v54, %v10087_v9 }
 0x23f   : > { %v10095_v14 = vpop.permute.xlu1 %10094  ;;  %v2006_v26 = vsel %vm1981_vm7, %v1973_v41, %v10071_v30 }
 0x240   : > { %v10100_v27 = vpop.permute.xlu0 %10099  ;;  %v2039_v6 = vsel %vm2014_vm8, %v2006_v26, %v10091_v11  ;;  %v10096_v62 = vunpack.i.l.bf16 %v10095_v14  ;;  %v10097_v8 = vunpack.i.h.bf16 %v10095_v14 }
 0x241   : > { %2357 = vmatmul.mubr.f32.gmra.mxu1 %v2104_v23  ;;  %v10101_v34 = vunpack.i.l.bf16 %v10100_v27  ;;  %v10102_v35 = vunpack.i.h.bf16 %v10100_v27 }
 0x242   : > { %9020 = vmatprep.mubr.msk.f32.mxu1 %vm1882_vm4, %v12979_v4  ;;  %v2007_v4 = vsel %vm1981_vm7, %v1974_v21, %v10072_v51  ;;  %v1942_v22 = vsel %vm1915_vm5, %v1909_v2, %v10096_v62 }
 0x243   : > { %v10105_v43 = vpop.permute.xlu1 %10104  ;;  %v2040_v29 = vsel %vm2014_vm8, %v2007_v4, %v10092_v1 }
 0x244   : > { %v13289_v24 = vpop.permute.xlu0 %10109  ;;  %v10106_v59 = vunpack.i.l.bf16 %v10105_v43  ;;  %v10107_v58 = vunpack.i.h.bf16 %v10105_v43 }
 0x245   : > { %v10111_v33 = vunpack.i.l.bf16 %v13289_v24  ;;  %v10112_v9 = vunpack.i.h.bf16 %v13289_v24 }
 0x247   : > { %v10115_v61 = vpop.permute.xlu1 %10114  ;;  %v1911_v24 = vsel %vm1882_vm4, %v12953_v39, %v10112_v9 }
 0x248   : > { %v10117_v0 = vunpack.i.h.bf16 %v10115_v61  ;;  %v10116_v55 = vunpack.i.l.bf16 %v10115_v61  ;;  %v13293_v12 = vpop.permute.xlu0 %1242 }
 0x24a   : > { %v2072_v15 = vsel %vm2047_vm9, %v2039_v6, %v10116_v55  ;;  %v2073_v25 = vsel %vm2047_vm9, %v2040_v29, %v10117_v0 }
 0x24b   : > { %v10125_v38 = vpop.permute.xlu1 %10124  ;;  %v2105_v50 = vsel %vm2080_vm10, %v2072_v15, %v10101_v34  ;;  %v2106_v60 = vsel %vm2080_vm10, %v2073_v25, %v10102_v35 }
 0x24c   : > { %v10120_v18 = vpop.permute.xlu0 %10119  ;;  %2362 = vmatmul.mubr.f32.gmra.mxu1 %v2105_v50  ;;  %v10127_v23 = vunpack.i.h.bf16 %v10125_v38 }
 0x24d   : > { %9021 = vmatprep.mubr.msk.f32.mxu1 %vm1882_vm4, %v12982_v49  ;;  %v10121_v20 = vunpack.i.l.bf16 %v10120_v18  ;;  %v1910_v49 = vsel %vm1882_vm4, %v12855_v52, %v10111_v33  ;;  %v10122_v44 = vunpack.i.h.bf16 %v10120_v18  ;;  %v10126_v52 = vunpack.i.l.bf16 %v10125_v38 }
 0x24e   : > { %v1943_v37 = vsel %vm1915_vm5, %v1910_v49, %v10097_v8 }
 0x24f   : > { %v10135_v28 = vpop.permute.xlu1 %10134  ;;  %v1975_v48 = vsel %vm1948_vm6, %v1942_v22, %v10121_v20 }
 0x250   : > { %v10130_v42 = vpop.permute.xlu0 %10129  ;;  %2367 = vmatmul.mubr.f32.gmra.mxu1 %v2106_v60  ;;  %v2008_v3 = vsel %vm1981_vm7, %v1975_v48, %v10106_v59  ;;  %v10136_v31 = vunpack.i.l.bf16 %v10135_v28  ;;  %v10137_v11 = vunpack.i.h.bf16 %v10135_v28 }
 0x251   : > { %9022 = vmatprep.mubr.msk.f32.mxu1 %vm1882_vm4, %v13065_v17  ;;  %v1976_v17 = vsel %vm1948_vm6, %v1943_v37, %v10122_v44  ;;  %v2041_v56 = vsel %vm2014_vm8, %v2008_v3, %v10126_v52  ;;  %v10131_v43 = vunpack.i.l.bf16 %v10130_v42  ;;  %v10132_v4 = vunpack.i.h.bf16 %v10130_v42 }
 0x252   : > { %v2009_v27 = vsel %vm1981_vm7, %v1976_v17, %v10107_v58  ;;  %v1914_v52 = vsel %vm1882_vm4, %v13031_v32, %v13293_v12 }
 0x253   : > { %v13313_v57 = vpop.permute.xlu1 %10144  ;;  %v2042_v21 = vsel %vm2014_vm8, %v2009_v27, %v10127_v23  ;;  %v1944_v1 = vsel %vm1915_vm5, %v1911_v24, %v10131_v43 }
 0x254   : > { %v13316_v10 = vpop.permute.xlu0 %10139  ;;  %v10146_v63 = vunpack.i.l.bf16 %v13313_v57 }
 0x255   : > { %v10141_v39 = vunpack.i.l.bf16 %v13316_v10  ;;  %v10142_v33 = vunpack.i.h.bf16 %v13316_v10 }
 0x256   : > { %v1912_v61 = vsel %vm1882_vm4, %v12950_v16, %v10146_v63  ;;  %v10147_v16 = vunpack.i.h.bf16 %v13313_v57  ;;  %v17617_v63 = vld [vmem:[#allocation13_spill] sm:$0xff] }
 0x257   : > { %v10155_v13 = vpop.permute.xlu1 %10154  ;;  %v1945_v50 = vsel %vm1915_vm5, %v1912_v61, %v10132_v4 }
 0x258   : > { %v10150_v7 = vpop.permute.xlu0 %10149  ;;  %v10156_v51 = vunpack.i.l.bf16 %v10155_v13  ;;  %v10157_v0 = vunpack.i.h.bf16 %v10155_v13  ;;  %v1913_v49 = vsel %vm1882_vm4, %v13034_v5, %v10147_v16 }
 0x259   : > { %v10152_v36 = vunpack.i.h.bf16 %v10150_v7  ;;  %v10151_v14 = vunpack.i.l.bf16 %v10150_v7 }
 0x25a   : > { %v1977_v15 = vsel %vm1948_vm6, %v1944_v1, %v10156_v51  ;;  %v1978_v29 = vsel %vm1948_vm6, %v1945_v50, %v10157_v0 }
 0x25b   : > { %v13325_v46 = vpop.permute.xlu1 %10164  ;;  %v2074_v41 = vsel %vm2047_vm9, %v2041_v56, %v10151_v14  ;;  %v2075_v26 = vsel %vm2047_vm9, %v2042_v21, %v10152_v36  ;;  %v2010_v42 = vsel %vm1981_vm7, %v1977_v15, %v10141_v39  ;;  %v2011_v57 = vsel %vm1981_vm7, %v1978_v29, %v10142_v33  ;;  %v17620_v21 = vld [vmem:[#allocation14_spill] sm:$0xff] }
 0x25c   : > { %v10160_v30 = vpop.permute.xlu0 %10159  ;;  %v2107_v54 = vsel %vm2080_vm10, %v2074_v41, %v10136_v31  ;;  %v2108_v6 = vsel %vm2080_vm10, %v2075_v26, %v10137_v11  ;;  %v10166_v18 = vunpack.i.l.bf16 %v13325_v46  ;;  %v10167_v44 = vunpack.i.h.bf16 %v13325_v46 }
 0x25d   : > { %2372 = vmatmul.mubr.f32.gmra.mxu1 %v2107_v54  ;;  %v10161_v38 = vunpack.i.l.bf16 %v10160_v30  ;;  %v10162_v25 = vunpack.i.h.bf16 %v10160_v30 }
 0x25e   : > { %9023 = vmatprep.mubr.msk.f32.mxu1 %vm1882_vm4, %v13068_v45  ;;  %v318_v45 = vld [vmem:[%s17436_s3 + $0x10] sm:$0xff]  ;;  %v1946_v48 = vsel %vm1915_vm5, %v1913_v49, %v10166_v18  ;;  %v1947_v14 = vsel %vm1915_vm5, %v1914_v52, %v10167_v44 }
 0x25f   : > { %v1560_v55 = vpop.permute.xlu1 %1559  ;;  %9412 = vmatprep.subr.mxu0 %v318_v45  ;;  %v2043_v2 = vsel %vm2014_vm8, %v2010_v42, %v10161_v38  ;;  %v2044_v17 = vsel %vm2014_vm8, %v2011_v57, %v10162_v25 }
 0x260   : > { %v10170_v34 = vpop.permute.xlu0 %10169  ;;  %9413 = vmatpush3.msra.mxu0 %v318_v45 }
 0x261   : > { %2377 = vmatmul.mubr.f32.gmra.mxu1 %v2108_v6  ;;  %v10171_v35 = vunpack.i.l.bf16 %v10170_v34  ;;  %4259 = vmatprep.subr.mxu0 %v17608_v53  ;;  %v10172_v10 = vunpack.i.h.bf16 %v10170_v34 }
 0x262   : > { %9024 = vmatprep.mubr.msk.f32.mxu1 %vm1882_vm4, %v13139_v47 }
 0x263   : > { %v10175_v40 = vpop.permute.xlu1 %10174 }
 0x264   : > { %v10180_v62 = vpop.permute.xlu0 %10179  ;;  %v10177_v28 = vunpack.i.h.bf16 %v10175_v40  ;;  %v10176_v60 = vunpack.i.l.bf16 %v10175_v40  ;;  %v2243_v20 = vpop.f32.mrf.mxu1 }
 0x265   : > { %v10181_v47 = vunpack.i.l.bf16 %v10180_v62  ;;  %2434 = vrot.lane.b32.xlu1 %v2243_v20, %s11961_s17  ;;  %v10182_v58 = vunpack.i.h.bf16 %v10180_v62 }
 0x266   : > { %v2245_v8 = vpop.f32.mrf.mxu1  ;;  %v2076_v22 = vsel %vm2047_vm9, %v2043_v2, %v10176_v60  ;;  %v2077_v3 = vsel %vm2047_vm9, %v2044_v17, %v10177_v28  ;;  %v17621_v2 = vld [vmem:[#allocation12_spill] sm:$0xff]  ;;  %v11760_v17 = vld [vmem:[%s12120_s20] sm:$0xff] }
 0x267   : > { %v13361_v59 = vpop.permute.xlu1 %1849  ;;  %v2109_v37 = vsel %vm2080_vm10, %v2076_v22, %v10171_v35  ;;  %v1979_v5 = vsel %vm1948_vm6, %v1946_v48, %v10181_v47  ;;  %v2110_v31 = vsel %vm2080_vm10, %v2077_v3, %v10172_v10  ;;  %v1980_v56 = vsel %vm1948_vm6, %v1947_v14, %v10182_v58  ;;  %v11758_v8 = vld [vmem:[#allocation2] sm:$0xf] }
 0x268   : > { %17616 = vst [vmem:[#allocation22_spill] sm:$0xff] %v13361_v59  ;;  %v2248_v13 = vpop.f32.mrf.mxu1  ;;  %2382 = vmatmul.mubr.f32.gmra.mxu1 %v2109_v37  ;;  %v1562_v7 = vpop.permute.xlu0 %1561  ;;  %v2012_v27 = vsel %vm1981_vm7, %v1979_v5, %v1560_v55  ;;  %v13409_v49 = vsub.s32 1, %v17621_v2  ;;  %v11759_v10 = vld [vmem:[%s17435_s2] sm:$0xf]  ;;  %v17658_v2 = vld [vmem:[#allocation21_spill] sm:$0xff] }
 0x269   : > { %2436 = vrot.lane.b32.xlu0 %v2248_v13, %s11961_s17  ;;  %9025 = vmatprep.mubr.msk.f32.mxu1 %vm1882_vm4, %v13155_v19  ;;  %v17618_v19 = vld [vmem:[#allocation17_spill] sm:$0xff]  ;;  %v2013_v41 = vsel %vm1981_vm7, %v1980_v56, %v1562_v7 }
 0x26a   : > { %v2250_v36 = vpop.f32.mrf.mxu1  ;;  %v13413_v22 = vrot.slane %v11758_v8, %v13409_v49  ;;  %v13419_v37 = vrot.slane %v11759_v10, %v13409_v49 }
 0x26b   : > { %v1657_v23 = vpop.permute.xlu1 %1656  ;;  %v11761_v36 = vld [vmem:[%s12120_s20 + $0x8] sm:$0xff] }
 0x26c   : > { %v2045_v9 = vsel %vm2014_vm8, %v2012_v27, %v1657_v23  ;;  %2387 = vmatmul.mubr.f32.gmra.mxu1 %v2110_v31  ;;  %v13382_v12 = vpop.permute.xlu0 %1755 }
 0x26d   : > { %9026 = vmatprep.mubr.msk.f32.mxu1 %vm1882_vm4, %v17617_v63  ;;  %v2078_v32 = vsel %vm2047_vm9, %v2045_v9, %v17618_v19  ;;  %17619 = vst [vmem:[#allocation23_spill] sm:$0xff] %v13382_v12 }
 0x26e   : > { %v2111_v46 = vsel %vm2080_vm10, %v2078_v32, %v13361_v59 }
 0x26f   : > { %v1659_v43 = vpop.permute.xlu1 %1658 }
 0x270   : > { %v2046_v30 = vsel %vm2014_vm8, %v2013_v41, %v1659_v43  ;;  %2392 = vmatmul.mubr.f32.gmra.mxu1 %v2111_v46  ;;  %v2253_v54 = vpop.f32.mrf.mxu1  ;;  %v11762_v41 = vld [vmem:[%s12120_s20 + $0x10] sm:$0xff] }
 0x271   : > { %9027 = vmatprep.mubr.msk.f32.mxu1 %vm1882_vm4, %v17620_v21  ;;  %v2079_v51 = vsel %vm2047_vm9, %v2046_v30, %v13382_v12  ;;  %2438 = vrot.lane.b32.xlu1 %v2253_v54, %s11961_s17 }
 0x272   : > { %v2112_v26 = vsel %vm2080_vm10, %v2079_v51, %v13361_v59  ;;  %v2255_v11 = vpop.f32.mrf.mxu1 }
 0x274   : > { %2397 = vmatmul.mubr.f32.gmra.mxu1 %v2112_v26  ;;  %v2258_v24 = vpop.f32.mrf.mxu1 }
 0x275   : > { %2440 = vrot.lane.b32.xlu0 %v2258_v24, %s11961_s17  ;;  %v11763_v24 = vld [vmem:[%s12120_s20 + $0x18] sm:$0xff] }
 0x276   : > { %v2260_v61 = vpop.f32.mrf.mxu1 }
 0x280   : > { %v2263_v0 = vpop.f32.mrf.mxu1 }
 0x281   : > { %2442 = vrot.lane.b32.xlu1 %v2263_v0, %s11961_s17 }
 0x282   : > { %v2265_v55 = vpop.f32.mrf.mxu1 }
 0x284   : > { %v2268_v4 = vpop.f32.mrf.mxu1 }
 0x285   : > { %2444 = vrot.lane.b32.xlu0 %v2268_v4, %s11961_s17 }
 0x286   : > { %v2270_v1 = vpop.f32.mrf.mxu1 }
 0x28c   : > { %v2273_v34 = vpop.f32.mrf.mxu1 }
 0x28d   : > { %2446 = vrot.lane.b32.xlu1 %v2273_v34, %s11961_s17 }
 0x28e   : > { %v2275_v6 = vpop.f32.mrf.mxu1 }
 0x290   : > { %v2278_v15 = vpop.f32.mrf.mxu1 }
 0x291   : > { %2448 = vrot.lane.b32.xlu0 %v2278_v15, %s11961_s17 }
 0x292   : > { %v2280_v38 = vpop.f32.mrf.mxu1 }
 0x293   : > { %v11764_v38 = vld [vmem:[%s12120_s20 + $0x20] sm:$0xff] }
 0x29c   : > { %v2283_v45 = vpop.f32.mrf.mxu1 }
 0x29d   : > { %2450 = vrot.lane.b32.xlu1 %v2283_v45, %s11961_s17 }
 0x29e   : > { %v2285_v39 = vpop.f32.mrf.mxu1 }
 0x2a0   : > { %v2288_v16 = vpop.f32.mrf.mxu1 }
 0x2a1   : > { %2452 = vrot.lane.b32.xlu0 %v2288_v16, %s11961_s17 }
 0x2a2   : > { %v2290_v50 = vpop.f32.mrf.mxu1 }
 0x2a8   : > { %v2293_v29 = vpop.f32.mrf.mxu1 }
 0x2a9   : > { %2454 = vrot.lane.b32.xlu1 %v2293_v29, %s11961_s17 }
 0x2aa   : > { %v2295_v18 = vpop.f32.mrf.mxu1 }
 0x2ac   : > { %v2298_v25 = vpop.f32.mrf.mxu1 }
 0x2ad   : > { %2456 = vrot.lane.b32.xlu0 %v2298_v25, %s11961_s17  ;;  %v11765_v25 = vld [vmem:[%s12120_s20 + $0x28] sm:$0xff] }
 0x2ae   : > { %v2300_v35 = vpop.f32.mrf.mxu1 }
 0x2b8   : > { %v2303_v40 = vpop.f32.mrf.mxu1 }
 0x2b9   : > { %2458 = vrot.lane.b32.xlu1 %v2303_v40, %s11961_s17 }
 0x2ba   : > { %v2305_v33 = vpop.f32.mrf.mxu1 }
 0x2bc   : > { %v2308_v62 = vpop.f32.mrf.mxu1 }
 0x2bd   : > { %2460 = vrot.lane.b32.xlu0 %v2308_v62, %s11961_s17 }
 0x2be   : > { %v2310_v28 = vpop.f32.mrf.mxu1 }
 0x2c4   : > { %v2313_v60 = vpop.f32.mrf.mxu1 }
 0x2c5   : > { %2462 = vrot.lane.b32.xlu1 %v2313_v60, %s11961_s17 }
 0x2c6   : > { %v2315_v20 = vpop.f32.mrf.mxu1 }
 0x2c8   : > { %v2318_v42 = vpop.f32.mrf.mxu1 }
 0x2c9   : > { %2464 = vrot.lane.b32.xlu0 %v2318_v42, %s11961_s17 }
 0x2ca   : > { %v2320_v47 = vpop.f32.mrf.mxu1 }
 0x2cb   : > { %v11766_v47 = vld [vmem:[%s12120_s20 + $0x30] sm:$0xff] }
 0x2d4   : > { %v2323_v44 = vpop.f32.mrf.mxu1 }
 0x2d5   : > { %2466 = vrot.lane.b32.xlu1 %v2323_v44, %s11961_s17 }
 0x2d6   : > { %v2325_v57 = vpop.f32.mrf.mxu1 }
 0x2d7   : > { %v2435_v48 = vpop.permute.xlu1 %2434 }
 0x2d8   : > { %v13423_v58 = vsel %vm533_vm1, %v11760_v17, %v2435_v48  ;;  %v2328_v13 = vpop.f32.mrf.mxu1 }
 0x2d9   : > { %17622 = vst [vmem:[#allocation16_spill] sm:$0xff] %v13423_v58  ;;  %v2566_v5 = vmul.f32 %v13413_v22, %v13423_v58  ;;  %2468 = vrot.lane.b32.xlu0 %v2328_v13, %s11961_s17  ;;  %v11767_v13 = vld [vmem:[%s12120_s20 + $0x38] sm:$0xff] }
 0x2da   : > { %v2330_v3 = vpop.f32.mrf.mxu1 }
 0x2db   : > { %v2437_v52 = vpop.permute.xlu0 %2436  ;;  %v2602_v7 = vadd.f32 %v13419_v37, %v2566_v5 }
 0x2dc   : > { %v13431_v14 = vsel %vm533_vm1, %v11761_v36, %v2437_v52 }
 0x2dd   : > { %17623 = vst [vmem:[#allocation15_spill] sm:$0xff] %v13431_v14  ;;  %v2567_v27 = vmul.f32 %v13413_v22, %v13431_v14  ;;  %v2634_v23 = vmax.f32 %v2602_v7, 0.0 }
 0x2df   : > { %v2603_v31 = vadd.f32 %v13419_v37, %v2567_v27  ;;  %9414 = vmatprep.mubr.msk.f32.mxu0 %vm2666_vm11, %v2634_v23 }
 0x2e1   : > { %v2635_v56 = vmax.f32 %v2603_v31, 0.0  ;;  %v2333_v9 = vpop.f32.mrf.mxu1 }
 0x2e2   : > { %2470 = vrot.lane.b32.xlu1 %v2333_v9, %s11961_s17 }
 0x2e3   : > { %v2335_v32 = vpop.f32.mrf.mxu1  ;;  %9415 = vmatmul.mubr.msk.f32.vlgmr.msra.gmra.mxu0 %vm2666_vm11, %v2635_v56  ;;  %v2439_v46 = vpop.permute.xlu1 %2438  ;;  %v11768_v56 = vld [vmem:[%s12120_s20 + $0x40] sm:$0xff] }
 0x2e4   : > { %v13441_v43 = vsel %vm533_vm1, %v11762_v41, %v2439_v46 }
 0x2e5   : > { %17624 = vst [vmem:[#allocation19_spill] sm:$0xff] %v13441_v43  ;;  %v2338_v30 = vpop.f32.mrf.mxu1  ;;  %v2568_v54 = vmul.f32 %v13413_v22, %v13441_v43 }
 0x2e6   : > { %2472 = vrot.lane.b32.xlu0 %v2338_v30, %s11961_s17 }
 0x2e7   : > { %v2340_v51 = vpop.f32.mrf.mxu1  ;;  %v2604_v26 = vadd.f32 %v13419_v37, %v2568_v54  ;;  %v2441_v11 = vpop.permute.xlu0 %2440 }
 0x2e8   : > { %v13449_v61 = vsel %vm533_vm1, %v11763_v24, %v2441_v11  ;;  %v11769_v51 = vld [vmem:[%s12120_s20 + $0x48] sm:$0xff] }
 0x2e9   : > { %17625 = vst [vmem:[#allocation18_spill] sm:$0xff] %v13449_v61  ;;  %v2636_v0 = vmax.f32 %v2604_v26, 0.0  ;;  %v2569_v55 = vmul.f32 %v13413_v22, %v13449_v61 }
 0x2eb   : > { %v2605_v4 = vadd.f32 %v13419_v37, %v2569_v55  ;;  %9417 = vmatprep.mubr.msk.f32.mxu0 %vm2666_vm11, %v2636_v0 }
 0x2ed   : > { %v2637_v1 = vmax.f32 %v2605_v4, 0.0 }
 0x2ef   : > { %9418 = vmatmul.mubr.msk.f32.gmra.mxu0 %vm2666_vm11, %v2637_v1  ;;  %v11770_v1 = vld [vmem:[%s12120_s20 + $0x50] sm:$0xff] }
 0x2f0   : > { %v2343_v34 = vpop.f32.mrf.mxu1 }
 0x2f1   : > { %2474 = vrot.lane.b32.xlu1 %v2343_v34, %s11961_s17 }
 0x2f2   : > { %v2345_v6 = vpop.f32.mrf.mxu1 }
 0x2f3   : > { %v2443_v15 = vpop.permute.xlu1 %2442 }
 0x2f4   : > { %v13459_v45 = vsel %vm533_vm1, %v11764_v38, %v2443_v15  ;;  %v2348_v39 = vpop.f32.mrf.mxu1 }
 0x2f5   : > { %17626 = vst [vmem:[#allocation24_spill] sm:$0xff] %v13459_v45  ;;  %v2570_v16 = vmul.f32 %v13413_v22, %v13459_v45  ;;  %2476 = vrot.lane.b32.xlu0 %v2348_v39, %s11961_s17 }
 0x2f6   : > { %v2350_v50 = vpop.f32.mrf.mxu1 }
 0x2f7   : > { %v2606_v29 = vadd.f32 %v13419_v37, %v2570_v16  ;;  %v2445_v18 = vpop.permute.xlu0 %2444  ;;  %v11771_v50 = vld [vmem:[%s12120_s20 + $0x58] sm:$0xff] }
 0x2f8   : > { %v13467_v35 = vsel %vm533_vm1, %v11765_v25, %v2445_v18 }
 0x2f9   : > { %17627 = vst [vmem:[#allocation25_spill] sm:$0xff] %v13467_v35  ;;  %v2638_v40 = vmax.f32 %v2606_v29, 0.0  ;;  %v2571_v33 = vmul.f32 %v13413_v22, %v13467_v35  ;;  %v17657_v35 = vld [vmem:[#allocation20_spill] sm:$0xff] }
 0x2fb   : > { %v2607_v62 = vadd.f32 %v13419_v37, %v2571_v33  ;;  %9420 = vmatprep.mubr.msk.f32.mxu0 %vm2666_vm11, %v2638_v40 }
 0x2fd   : > { %v2639_v28 = vmax.f32 %v2607_v62, 0.0  ;;  %v2353_v60 = vpop.f32.mrf.mxu1 }
 0x2fe   : > { %2478 = vrot.lane.b32.xlu1 %v2353_v60, %s11961_s17 }
 0x2ff   : > { %v2355_v20 = vpop.f32.mrf.mxu1  ;;  %9421 = vmatmul.mubr.msk.f32.gmra.mxu0 %vm2666_vm11, %v2639_v28  ;;  %v2447_v42 = vpop.permute.xlu1 %2446 }
 0x300   : > { %v13477_v44 = vsel %vm533_vm1, %v11766_v47, %v2447_v42  ;;  %v11772_v47 = vld [vmem:[%s12120_s20 + $0x60] sm:$0xff] }
 0x301   : > { %17628 = vst [vmem:[#allocation26_spill] sm:$0xff] %v13477_v44  ;;  %v2358_v8 = vpop.f32.mrf.mxu1  ;;  %v2572_v57 = vmul.f32 %v13413_v22, %v13477_v44 }
 0x302   : > { %2480 = vrot.lane.b32.xlu0 %v2358_v8, %s11961_s17 }
 0x303   : > { %v2360_v48 = vpop.f32.mrf.mxu1  ;;  %v2608_v10 = vadd.f32 %v13419_v37, %v2572_v57  ;;  %v2449_v17 = vpop.permute.xlu0 %2448 }
 0x304   : > { %v13485_v5 = vsel %vm533_vm1, %v11767_v13, %v2449_v17 }
 0x305   : > { %17629 = vst [vmem:[#allocation27_spill] sm:$0xff] %v13485_v5  ;;  %v2640_v3 = vmax.f32 %v2608_v10, 0.0  ;;  %v2573_v52 = vmul.f32 %v13413_v22, %v13485_v5 }
 0x307   : > { %v2609_v7 = vadd.f32 %v13419_v37, %v2573_v52  ;;  %9423 = vmatprep.mubr.msk.f32.mxu0 %vm2666_vm11, %v2640_v3  ;;  %v11773_v3 = vld [vmem:[%s12120_s20 + $0x68] sm:$0xff] }
 0x309   : > { %v2641_v36 = vmax.f32 %v2609_v7, 0.0 }
 0x30b   : > { %9424 = vmatmul.mubr.msk.f32.gmra.mxu0 %vm2666_vm11, %v2641_v36 }
 0x30c   : > { %v2363_v27 = vpop.f32.mrf.mxu1 }
 0x30d   : > { %2482 = vrot.lane.b32.xlu1 %v2363_v27, %s11961_s17 }
 0x30e   : > { %v2365_v23 = vpop.f32.mrf.mxu1 }
 0x30f   : > { %v2451_v31 = vpop.permute.xlu1 %2450 }
 0x310   : > { %v13495_v9 = vsel %vm533_vm1, %v11768_v56, %v2451_v31  ;;  %v2368_v32 = vpop.f32.mrf.mxu1 }
 0x311   : > { %17630 = vst [vmem:[#allocation28_spill] sm:$0xff] %v13495_v9  ;;  %v2574_v46 = vmul.f32 %v13413_v22, %v13495_v9  ;;  %2484 = vrot.lane.b32.xlu0 %v2368_v32, %s11961_s17 }
 0x312   : > { %v2370_v41 = vpop.f32.mrf.mxu1 }
 0x313   : > { %v2610_v30 = vadd.f32 %v13419_v37, %v2574_v46  ;;  %v2453_v54 = vpop.permute.xlu0 %2452 }
 0x314   : > { %v13503_v26 = vsel %vm533_vm1, %v11769_v51, %v2453_v54 }
 0x315   : > { %17631 = vst [vmem:[#allocation29_spill] sm:$0xff] %v13503_v26  ;;  %v2642_v11 = vmax.f32 %v2610_v30, 0.0  ;;  %v2575_v24 = vmul.f32 %v13413_v22, %v13503_v26  ;;  %v11774_v30 = vld [vmem:[%s12120_s20 + $0x70] sm:$0xff] }
 0x317   : > { %v2611_v0 = vadd.f32 %v13419_v37, %v2575_v24  ;;  %9426 = vmatprep.mubr.msk.f32.mxu0 %vm2666_vm11, %v2642_v11 }
 0x319   : > { %v2643_v55 = vmax.f32 %v2611_v0, 0.0  ;;  %v11775_v0 = vld [vmem:[%s12120_s20 + $0x78] sm:$0xff] }
 0x31b   : > { %9427 = vmatmul.mubr.msk.f32.gmra.mxu0 %vm2666_vm11, %v2643_v55  ;;  %v2455_v4 = vpop.permute.xlu1 %2454 }
 0x31c   : > { %v13512_v34 = vsel %vm533_vm1, %v11770_v1, %v2455_v4 }
 0x31d   : > { %17632 = vst [vmem:[#allocation30_spill] sm:$0xff] %v13512_v34  ;;  %v2373_v6 = vpop.f32.mrf.mxu1  ;;  %v2576_v15 = vmul.f32 %v13413_v22, %v13512_v34 }
 0x31e   : > { %2486 = vrot.lane.b32.xlu1 %v2373_v6, %s11961_s17 }
 0x31f   : > { %v2375_v38 = vpop.f32.mrf.mxu1  ;;  %v2612_v39 = vadd.f32 %v13419_v37, %v2576_v15  ;;  %v2457_v16 = vpop.permute.xlu0 %2456 }
 0x320   : > { %v13520_v29 = vsel %vm533_vm1, %v11771_v50, %v2457_v16 }
 0x321   : > { %17633 = vst [vmem:[#allocation31_spill] sm:$0xff] %v13520_v29  ;;  %v2378_v18 = vpop.f32.mrf.mxu1  ;;  %v2644_v25 = vmax.f32 %v2612_v39, 0.0  ;;  %v2577_v40 = vmul.f32 %v13413_v22, %v13520_v29  ;;  %v11776_v39 = vld [vmem:[%s12120_s20 + $0x80] sm:$0xff] }
 0x322   : > { %2488 = vrot.lane.b32.xlu0 %v2378_v18, %s11961_s17 }
 0x323   : > { %v2380_v33 = vpop.f32.mrf.mxu1  ;;  %v2613_v62 = vadd.f32 %v13419_v37, %v2577_v40  ;;  %9429 = vmatprep.mubr.msk.f32.mxu0 %vm2666_vm11, %v2644_v25  ;;  %v11777_v40 = vld [vmem:[%s12120_s20 + $0x88] sm:$0xff] }
 0x325   : > { %v2645_v28 = vmax.f32 %v2613_v62, 0.0 }
 0x327   : > { %9430 = vmatmul.mubr.msk.f32.gmra.mxu0 %vm2666_vm11, %v2645_v28 }
 0x328   : > { %v2383_v60 = vpop.f32.mrf.mxu1 }
 0x329   : > { %2490 = vrot.lane.b32.xlu1 %v2383_v60, %s11961_s17 }
 0x32a   : > { %v2385_v20 = vpop.f32.mrf.mxu1 }
 0x32b   : > { %v2459_v42 = vpop.permute.xlu1 %2458 }
 0x32c   : > { %v13531_v8 = vsel %vm533_vm1, %v11772_v47, %v2459_v42  ;;  %v2388_v57 = vpop.f32.mrf.mxu1  ;;  %v11778_v47 = vld [vmem:[%s12120_s20 + $0x90] sm:$0xff] }
 0x32d   : > { %17634 = vst [vmem:[#allocation32_spill] sm:$0xff] %v13531_v8  ;;  %v2578_v48 = vmul.f32 %v13413_v22, %v13531_v8  ;;  %2492 = vrot.lane.b32.xlu0 %v2388_v57, %s11961_s17 }
 0x32e   : > { %v2390_v10 = vpop.f32.mrf.mxu1 }
 0x32f   : > { %v2614_v17 = vadd.f32 %v13419_v37, %v2578_v48  ;;  %v2461_v13 = vpop.permute.xlu0 %2460 }
 0x330   : > { %v13539_v52 = vsel %vm533_vm1, %v11773_v3, %v2461_v13  ;;  %v2393_v7 = vpop.f32.mrf.mxu1  ;;  %v11779_v13 = vld [vmem:[%s12120_s20 + $0x98] sm:$0xff] }
 0x331   : > { %17635 = vst [vmem:[#allocation33_spill] sm:$0xff] %v13539_v52  ;;  %v2646_v36 = vmax.f32 %v2614_v17, 0.0  ;;  %v2579_v27 = vmul.f32 %v13413_v22, %v13539_v52  ;;  %2494 = vrot.lane.b32.xlu1 %v2393_v7, %s11961_s17 }
 0x332   : > { %v2395_v23 = vpop.f32.mrf.mxu1 }
 0x333   : > { %v2615_v31 = vadd.f32 %v13419_v37, %v2579_v27  ;;  %9432 = vmatprep.mubr.msk.f32.mxu0 %vm2666_vm11, %v2646_v36 }
 0x334   : > { %v2398_v56 = vpop.f32.mrf.mxu1 }
 0x335   : > { %v2647_v32 = vmax.f32 %v2615_v31, 0.0  ;;  %2496 = vrot.lane.b32.xlu0 %v2398_v56, %s11961_s17  ;;  %v11780_v56 = vld [vmem:[%s12120_s20 + $0xa0] sm:$0xff]  ;;  %s17654_s17 = smov 112  }
 0x336   : > { %v2400_v46 = vpop.f32.mrf.mxu1 }
 0x337   : > { %9433 = vmatmul.mubr.msk.f32.gmra.mxu0 %vm2666_vm11, %v2647_v32  ;;  %v2463_v41 = vpop.permute.xlu1 %2462 }
 0x338   : > { %v13550_v54 = vsel %vm533_vm1, %v11774_v30, %v2463_v41 }
 0x339   : > { %17636 = vst [vmem:[#allocation34_spill] sm:$0xff] %v13550_v54  ;;  %v2580_v51 = vmul.f32 %v13413_v22, %v13550_v54 }
 0x33b   : > { %v2616_v11 = vadd.f32 %v13419_v37, %v2580_v51  ;;  %v2465_v24 = vpop.permute.xlu0 %2464  ;;  %v11781_v51 = vld [vmem:[%s12120_s20 + $0xa8] sm:$0xff] }
 0x33c   : > { %v13557_v55 = vsel %vm533_vm1, %v11775_v0, %v2465_v24 }
 0x33d   : > { %17637 = vst [vmem:[#allocation35_spill] sm:$0xff] %v13557_v55  ;;  %v2648_v4 = vmax.f32 %v2616_v11, 0.0  ;;  %v2581_v1 = vmul.f32 %v13413_v22, %v13557_v55 }
 0x33f   : > { %v2617_v6 = vadd.f32 %v13419_v37, %v2581_v1  ;;  %9435 = vmatprep.mubr.msk.f32.mxu0 %vm2666_vm11, %v2648_v4 }
 0x341   : > { %v2649_v15 = vmax.f32 %v2617_v6, 0.0 }
 0x343   : > { %9436 = vmatmul.mubr.msk.f32.gmra.mxu0 %vm2666_vm11, %v2649_v15  ;;  %v11782_v15 = vld [vmem:[%s12120_s20 + $0xb0] sm:$0xff] }
 0x347   : > { %v2467_v38 = vpop.permute.xlu1 %2466 }
 0x348   : > { %v13566_v16 = vsel %vm533_vm1, %v11776_v39, %v2467_v38 }
 0x349   : > { %17638 = vst [vmem:[#allocation36_spill] sm:$0xff] %v13566_v16  ;;  %v2582_v50 = vmul.f32 %v13413_v22, %v13566_v16 }
 0x34b   : > { %v2618_v18 = vadd.f32 %v13419_v37, %v2582_v50  ;;  %v2469_v25 = vpop.permute.xlu0 %2468 }
 0x34c   : > { %v13573_v33 = vsel %vm533_vm1, %v11777_v40, %v2469_v25  ;;  %v11783_v25 = vld [vmem:[%s12120_s20 + $0xb8] sm:$0xff] }
 0x34d   : > { %17639 = vst [vmem:[#allocation37_spill] sm:$0xff] %v13573_v33  ;;  %v2650_v62 = vmax.f32 %v2618_v18, 0.0  ;;  %v2583_v28 = vmul.f32 %v13413_v22, %v13573_v33 }
 0x34f   : > { %v2619_v60 = vadd.f32 %v13419_v37, %v2583_v28  ;;  %9438 = vmatprep.mubr.msk.f32.mxu0 %vm2666_vm11, %v2650_v62 }
 0x351   : > { %v2651_v20 = vmax.f32 %v2619_v60, 0.0 }
 0x353   : > { %9439 = vmatmul.mubr.msk.f32.gmra.mxu0 %vm2666_vm11, %v2651_v20 }
 0x354   : > { %v2471_v42 = vpop.permute.xlu1 %2470 }
 0x355   : > { %v13582_v57 = vsel %vm533_vm1, %v11778_v47, %v2471_v42  ;;  %v358_v42 = vld [vmem:[%s17439_s6 + $0x108] sm:$0xff]  ;;  %v357_v47 = vld [vmem:[%s17439_s6 + $0x100] sm:$0xff] }
 0x356   : > { %17640 = vst [vmem:[#allocation38_spill] sm:$0xff] %v13582_v57  ;;  %v2584_v48 = vmul.f32 %v13413_v22, %v13582_v57  ;;  %4260 = vmatpush1.msra.mxu0 %v358_v42  ;;  %v351_v42 = vld [vmem:[%s17439_s6 + $0xd0] sm:$0xff] }
 0x357   : > { %4261 = vmatprep.subr.mxu0 %v17608_v53 }
 0x358   : > { %v2620_v10 = vadd.f32 %v13419_v37, %v2584_v48  ;;  %v2473_v17 = vpop.permute.xlu0 %2472  ;;  %4262 = vmatpush1.msra.mxu0 %v357_v47 }
 0x359   : > { %v13589_v3 = vsel %vm533_vm1, %v11779_v13, %v2473_v17  ;;  %4263 = vmatprep.subr.mxu0 %v17608_v53 }
 0x35a   : > { %17641 = vst [vmem:[#allocation39_spill] sm:$0xff] %v13589_v3  ;;  %v2652_v7 = vmax.f32 %v2620_v10, 0.0  ;;  %v2585_v36 = vmul.f32 %v13413_v22, %v13589_v3  ;;  %v11784_v10 = vld [vmem:[%s12120_s20 + $0xc0] sm:$0xff] }
 0x35c   : > { %v2621_v27 = vadd.f32 %v13419_v37, %v2585_v36  ;;  %9441 = vmatprep.mubr.msk.f32.mxu0 %vm2666_vm11, %v2652_v7 }
 0x35e   : > { %v2653_v23 = vmax.f32 %v2621_v27, 0.0  ;;  %v11785_v27 = vld [vmem:[%s12120_s20 + $0xc8] sm:$0xff] }
 0x360   : > { %9442 = vmatmul.mubr.msk.f32.gmra.mxu0 %vm2666_vm11, %v2653_v23 }
 0x363   : > { %v2475_v31 = vpop.permute.xlu1 %2474 }
 0x364   : > { %v13598_v32 = vsel %vm533_vm1, %v11780_v56, %v2475_v31 }
 0x365   : > { %17642 = vst [vmem:[#allocation40_spill] sm:$0xff] %v13598_v32  ;;  %v2586_v46 = vmul.f32 %v13413_v22, %v13598_v32 }
 0x367   : > { %v2622_v41 = vadd.f32 %v13419_v37, %v2586_v46  ;;  %v2477_v30 = vpop.permute.xlu0 %2476 }
 0x368   : > { %v13605_v11 = vsel %vm533_vm1, %v11781_v51, %v2477_v30  ;;  %v356_v30 = vld [vmem:[%s17439_s6 + $0xf8] sm:$0xff]  ;;  %v355_v51 = vld [vmem:[%s17439_s6 + $0xf0] sm:$0xff] }
 0x369   : > { %17643 = vst [vmem:[#allocation41_spill] sm:$0xff] %v13605_v11  ;;  %v2654_v24 = vmax.f32 %v2622_v41, 0.0  ;;  %v2587_v0 = vmul.f32 %v13413_v22, %v13605_v11  ;;  %4264 = vmatpush1.msra.mxu0 %v356_v30  ;;  %v11790_v30 = vld [vmem:[#allocation5] sm:$0xf] }
 0x36a   : > { %4265 = vmatprep.subr.mxu0 %v17608_v53 }
 0x36b   : > { %v2623_v4 = vadd.f32 %v13419_v37, %v2587_v0  ;;  %9444 = vmatprep.mubr.msk.f32.mxu0 %vm2666_vm11, %v2654_v24  ;;  %v354_v24 = vld [vmem:[%s17439_s6 + $0xe8] sm:$0xff]  ;;  %4266 = vmatpush1.msra.mxu0 %v355_v51  ;;  %v353_v0 = vld [vmem:[%s17439_s6 + $0xe0] sm:$0xff]  ;;  %v13712_v51 = vrot.slane %v11790_v30, %v13409_v49 }
 0x36c   : > { %4267 = vmatprep.subr.mxu0 %v17608_v53 }
 0x36d   : > { %v2655_v1 = vmax.f32 %v2623_v4, 0.0  ;;  %4268 = vmatpush1.msra.mxu0 %v354_v24  ;;  %v352_v4 = vld [vmem:[%s17439_s6 + $0xd8] sm:$0xff] }
 0x36e   : > { %4269 = vmatprep.subr.mxu0 %v17608_v53 }
 0x36f   : > { %9445 = vmatmul.mubr.msk.f32.gmra.mxu0 %vm2666_vm11, %v2655_v1 }
 0x370   : > { %v2479_v6 = vpop.permute.xlu1 %2478  ;;  %4270 = vmatpush1.msra.mxu0 %v353_v0 }
 0x371   : > { %v13614_v38 = vsel %vm533_vm1, %v11782_v15, %v2479_v6  ;;  %v11786_v6 = vld [vmem:[%s12120_s20 + $0xd0] sm:$0xff]  ;;  %4271 = vmatprep.subr.mxu0 %v17608_v53 }
 0x372   : > { %17644 = vst [vmem:[#allocation42_spill] sm:$0xff] %v13614_v38  ;;  %v2588_v39 = vmul.f32 %v13413_v22, %v13614_v38  ;;  %4272 = vmatpush1.msra.mxu0 %v352_v4  ;;  %v11791_v4 = vld [vmem:[#allocation7] sm:$0xf] }
 0x373   : > { %4273 = vmatprep.subr.mxu0 %v17608_v53 }
 0x374   : > { %v2624_v50 = vadd.f32 %v13419_v37, %v2588_v39  ;;  %v2481_v18 = vpop.permute.xlu0 %2480  ;;  %4274 = vmatpush1.msra.mxu0 %v351_v42 }
 0x375   : > { %v13621_v40 = vsel %vm533_vm1, %v11783_v25, %v2481_v18  ;;  %v11787_v25 = vld [vmem:[%s12120_s20 + $0xd8] sm:$0xff]  ;;  %4275 = vmatprep.subr.mxu0 %v17608_v53 }
 0x376   : > { %17645 = vst [vmem:[#allocation43_spill] sm:$0xff] %v13621_v40  ;;  %v2656_v62 = vmax.f32 %v2624_v50, 0.0  ;;  %v2589_v28 = vmul.f32 %v13413_v22, %v13621_v40 }
 0x378   : > { %v2625_v60 = vadd.f32 %v13419_v37, %v2589_v28  ;;  %9447 = vmatprep.mubr.msk.f32.mxu0 %vm2666_vm11, %v2656_v62 }
 0x37a   : > { %v2657_v20 = vmax.f32 %v2625_v60, 0.0 }
 0x37c   : > { %9448 = vmatmul.mubr.msk.f32.gmra.mxu0 %vm2666_vm11, %v2657_v20 }
 0x37f   : > { %v2483_v48 = vpop.permute.xlu1 %2482 }
 0x380   : > { %v13636_v17 = vsel %vm533_vm1, %v11784_v10, %v2483_v48  ;;  %v350_v48 = vld [vmem:[%s17439_s6 + $0xc8] sm:$0xff]  ;;  %v349_v10 = vld [vmem:[%s17439_s6 + $0xc0] sm:$0xff] }
 0x381   : > { %17646 = vst [vmem:[#allocation44_spill] sm:$0xff] %v13636_v17  ;;  %v2590_v13 = vmul.f32 %v13413_v22, %v13636_v17  ;;  %4276 = vmatpush1.msra.mxu0 %v350_v48 }
 0x382   : > { %4277 = vmatprep.subr.mxu0 %v17608_v53 }
 0x383   : > { %v2626_v7 = vadd.f32 %v13419_v37, %v2590_v13  ;;  %v2485_v36 = vpop.permute.xlu0 %2484  ;;  %4278 = vmatpush1.msra.mxu0 %v349_v10 }
 0x384   : > { %v13645_v23 = vsel %vm533_vm1, %v11785_v27, %v2485_v36  ;;  %4279 = vmatprep.subr.mxu0 %v17608_v53 }
 0x385   : > { %17647 = vst [vmem:[#allocation45_spill] sm:$0xff] %v13645_v23  ;;  %v2658_v31 = vmax.f32 %v2626_v7, 0.0  ;;  %v2591_v56 = vmul.f32 %v13413_v22, %v13645_v23  ;;  %v11788_v7 = vld [vmem:[%s12120_s20 + $0xe0] sm:$0xff] }
 0x387   : > { %v2627_v46 = vadd.f32 %v13419_v37, %v2591_v56  ;;  %9450 = vmatprep.mubr.msk.f32.mxu0 %vm2666_vm11, %v2658_v31 }
 0x389   : > { %v2659_v41 = vmax.f32 %v2627_v46, 0.0  ;;  %v11789_v46 = vld [vmem:[%s12120_s20 + $0xe8] sm:$0xff] }
 0x38b   : > { %9451 = vmatmul.mubr.msk.f32.gmra.mxu0 %vm2666_vm11, %v2659_v41 }
 0x390   : > { %v2487_v1 = vpop.permute.xlu1 %2486 }
 0x391   : > { %v13672_v15 = vsel %vm533_vm1, %v11786_v6, %v2487_v1  ;;  %v13717_v1 = vrot.slane %v11791_v4, %v13409_v49  ;;  %v348_v49 = vld [vmem:[%s17439_s6 + $0xb8] sm:$0xff] }
 0x392   : > { %17648 = vst [vmem:[#allocation46_spill] sm:$0xff] %v13672_v15  ;;  %v2592_v39 = vmul.f32 %v13413_v22, %v13672_v15  ;;  %4280 = vmatpush1.msra.mxu0 %v348_v49  ;;  %v344_v49 = vld [vmem:[%s17439_s6 + $0x98] sm:$0xff] }
 0x393   : > { %4281 = vmatprep.subr.mxu0 %v17608_v53 }
 0x394   : > { %v2628_v50 = vadd.f32 %v13419_v37, %v2592_v39  ;;  %v2489_v18 = vpop.permute.xlu0 %2488 }
 0x395   : > { %v13681_v62 = vsel %vm533_vm1, %v11787_v25, %v2489_v18  ;;  %v11792_v25 = vld [vmem:[%s12120_s20 + $0xf0] sm:$0xff] }
 0x396   : > { %17649 = vst [vmem:[#allocation47_spill] sm:$0xff] %v13681_v62  ;;  %v2660_v28 = vmax.f32 %v2628_v50, 0.0  ;;  %v2593_v60 = vmul.f32 %v13413_v22, %v13681_v62 }
 0x398   : > { %v2629_v20 = vadd.f32 %v13419_v37, %v2593_v60  ;;  %9453 = vmatprep.mubr.msk.f32.mxu0 %vm2666_vm11, %v2660_v28 }
 0x39a   : > { %v2661_v47 = vmax.f32 %v2629_v20, 0.0 }
 0x39b   : > { %v2491_v13 = vpop.permute.xlu1 %2490 }
 0x39c   : > { %9454 = vmatmul.mubr.msk.f32.gmra.mxu0 %vm2666_vm11, %v2661_v47  ;;  %v13700_v36 = vsel %vm533_vm1, %v11788_v7, %v2491_v13  ;;  %v347_v7 = vld [vmem:[%s17439_s6 + $0xb0] sm:$0xff] }
 0x39d   : > { %17650 = vst [vmem:[#allocation48_spill] sm:$0xff] %v13700_v36  ;;  %v2594_v27 = vmul.f32 %v13413_v22, %v13700_v36  ;;  %4282 = vmatpush1.msra.mxu0 %v347_v7 }
 0x39e   : > { %4283 = vmatprep.subr.mxu0 %v17608_v53 }
 0x39f   : > { %v2630_v31 = vadd.f32 %v13419_v37, %v2594_v27  ;;  %v2493_v56 = vpop.permute.xlu0 %2492  ;;  %v346_v27 = vld [vmem:[%s17439_s6 + $0xa8] sm:$0xff] }
 0x3a0   : > { %v13709_v41 = vsel %vm533_vm1, %v11789_v46, %v2493_v56  ;;  %v11793_v46 = vld [vmem:[%s12120_s20 + $0xf8] sm:$0xff]  ;;  %4284 = vmatpush1.msra.mxu0 %v346_v27  ;;  %s17655_s20 = smov 96  }
 0x3a1   : > { %17651 = vst [vmem:[#allocation49_spill] sm:$0xff] %v13709_v41  ;;  %v2662_v24 = vmax.f32 %v2630_v31, 0.0  ;;  %v2595_v0 = vmul.f32 %v13413_v22, %v13709_v41  ;;  %4285 = vmatprep.subr.mxu0 %v17608_v53 }
 0x3a3   : > { %v2631_v6 = vadd.f32 %v13419_v37, %v2595_v0  ;;  %v9416_v39 = vpop.f32.mrf.mxu0  ;;  %9456 = vmatprep.mubr.msk.f32.mxu0 %vm2666_vm11, %v2662_v24  ;;  %v2495_v50 = vpop.permute.xlu1 %2494 }
 0x3a4   : > { %v2993_v18 = vmul.f32 %v9416_v39, %v13712_v51  ;;  %v13724_v28 = vsel %vm533_vm1, %v11792_v25, %v2495_v50 }
 0x3a5   : > { %17652 = vst [vmem:[#allocation50_spill] sm:$0xff] %v13724_v28  ;;  %v2663_v60 = vmax.f32 %v2631_v6, 0.0  ;;  %v2596_v20 = vmul.f32 %v13413_v22, %v13724_v28  ;;  %v2829_v42 = vpop.f32.mrf.mxu0  ;;  %v345_v6 = vld [vmem:[%s17439_s6 + $0xa0] sm:$0xff] }
 0x3a6   : > { %v3029_v47 = vadd.f32 %v13717_v1, %v2993_v18  ;;  %v2992_v48 = vmul.f32 %v13712_v51, %v2829_v42  ;;  %4286 = vmatpush1.msra.mxu0 %v345_v6 }
 0x3a7   : > { %v2632_v10 = vadd.f32 %v13419_v37, %v2596_v20  ;;  %9457 = vmatmul.mubr.msk.f32.gmra.mxu0 %vm2666_vm11, %v2663_v60  ;;  %v2497_v13 = vpop.permute.xlu0 %2496  ;;  %4287 = vmatprep.subr.mxu0 %v17608_v53 }
 0x3a8   : > { %v3061_v31 = vmax.f32 %v3029_v47, 0.0  ;;  %v3028_v56 = vadd.f32 %v13717_v1, %v2992_v48  ;;  %v13745_v30 = vsel %vm533_vm1, %v11793_v46, %v2497_v13  ;;  %4288 = vmatpush1.msra.mxu0 %v344_v49  ;;  %v343_v13 = vld [vmem:[%s17439_s6 + $0x90] sm:$0xff] }
 0x3a9   : > { %17653 = vst [vmem:[#allocation51_spill] sm:$0xff] %v13745_v30  ;;  %v2664_v24 = vmax.f32 %v2632_v10, 0.0  ;;  %v2597_v0 = vmul.f32 %v13413_v22, %v13745_v30  ;;  %4289 = vmatprep.subr.mxu0 %v17608_v53 }
 0x3aa   : > { %v3060_v4 = vmax.f32 %v3028_v56, 0.0  ;;  %v3123_v50 = vrot.slane %v3061_v31, 7  ;;  %4290 = vmatpush1.msra.mxu0 %v343_v13  ;;  %v360_v56 = vld [vmem:[%s17439_s6 + $0x118] sm:$0xff] }
 0x3ab   : > { %v2633_v39 = vadd.f32 %v13419_v37, %v2597_v0  ;;  %9459 = vmatprep.mubr.msk.f32.mxu0 %vm2666_vm11, %v2664_v24  ;;  %v3213_v37 = vrot.slane %v3061_v31, 1  ;;  %4319 = vmatprep.subr.mxu0 %v17608_v53 }
 0x3ac   : > { %v3212_v18 = vrot.slane %v3060_v4, 1  ;;  %v10183_v25 = vpack.i.bf16 %v3061_v31, %v3060_v4  ;;  %v3122_v60 = vrot.slane %v3060_v4, 7  ;;  %4320 = vmatpush2.msra.mxu0 %v360_v56  ;;  %v359_v4 = vld [vmem:[%s17439_s6 + $0x110] sm:$0xff] }
 0x3ad   : > { %v2665_v22 = vmax.f32 %v2633_v39, 0.0  ;;  %v3272_v31 = vsel %vm1090_vm2, %v3213_v37, 0.0  ;;  %4321 = vmatprep.subr.mxu0 %v17608_v53 }
 0x3ae   : > { %10184 = vrot.lane.b32.xlu0 %v10183_v25, %s11956_s22  ;;  %v13759_v20 = vsel %vm994_vm3, %v3122_v60, %v3123_v50  ;;  %v13762_v42 = vsel %vm994_vm3, 0.0, %v3122_v60  ;;  %v3214_v10 = vsel %vm1090_vm2, %v3212_v18, %v3213_v37  ;;  %4322 = vmatpush2.msra.mxu0 %v359_v4 }
 0x3af   : > { %9460 = vmatmul.mubr.msk.f32.gmra.mxu0 %vm2666_vm11, %v2665_v22  ;;  %v10193_v47 = vpack.i.bf16 %v13759_v20, %v13762_v42  ;;  %v9419_v48 = vpop.f32.mrf.mxu0  ;;  %v10198_v0 = vpack.i.bf16 %v3272_v31, %v3214_v10 }
 0x3b0   : > { %v2995_v7 = vmul.f32 %v9419_v48, %v13712_v51 }
 0x3b1   : > { %10194 = vrot.lane.b32.xlu1 %v10193_v47, %s11958_s15  ;;  %v2839_v27 = vpop.f32.mrf.mxu0 }
 0x3b2   : > { %10189 = vrot.lane.b32.xlu0 %v10183_v25, %s11957_s23  ;;  %v3031_v46 = vadd.f32 %v13717_v1, %v2995_v7  ;;  %v2994_v24 = vmul.f32 %v13712_v51, %v2839_v27 }
 0x3b4   : > { %v3063_v6 = vmax.f32 %v3031_v46, 0.0  ;;  %v3030_v39 = vadd.f32 %v13717_v1, %v2994_v24 }
 0x3b5   : > { %10199 = vrot.lane.b32.xlu1 %v10198_v0, %s11959_s16 }
 0x3b6   : > { %v3062_v50 = vmax.f32 %v3030_v39, 0.0  ;;  %v3216_v25 = vrot.slane %v3063_v6, 1  ;;  %v3126_v22 = vrot.slane %v3063_v6, 7 }
 0x3b8   : > { %v3215_v18 = vrot.slane %v3062_v50, 1  ;;  %v3125_v60 = vrot.slane %v3062_v50, 7  ;;  %v10208_v49 = vpack.i.bf16 %v3063_v6, %v3062_v50  ;;  %v13810_v46 = vsel %vm1090_vm2, %v3216_v25, 0.0 }
 0x3b9   : > { %10204 = vrot.lane.b32.xlu1 %v10198_v0, %s11954_s8 }
 0x3ba   : > { %v3217_v37 = vsel %vm1090_vm2, %v3215_v18, %v3216_v25  ;;  %v13794_v47 = vsel %vm994_vm3, %v3125_v60, %v3126_v22  ;;  %v13797_v48 = vsel %vm994_vm3, 0.0, %v3125_v60 }
 0x3bb   : > { %9060 = vmatprep.mubr.msk.f32.mxu0 %vm1882_vm4, %v3217_v37  ;;  %v10223_v10 = vpack.i.bf16 %v13794_v47, %v13797_v48  ;;  %v10233_v24 = vpack.i.bf16 %v13810_v46, %v3217_v37 }
 0x3bd   : > { %10209 = vrot.lane.b32.xlu1 %v10208_v49, %s17654_s17  ;;  %10224 = vrot.lane.b32.xlu0 %v10223_v10, %s17655_s20 }
 0x3bf   : > { %v9422_v13 = vpop.f32.mrf.mxu0 }
 0x3c0   : > { %v2997_v7 = vmul.f32 %v9422_v13, %v13712_v51 }
 0x3c1   : > { %v2849_v27 = vpop.f32.mrf.mxu0  ;;  %10214 = vrot.lane.b32.xlu1 %v10208_v49, %s11956_s22  ;;  %10229 = vrot.lane.b32.xlu0 %v10223_v10, %s11958_s15 }
 0x3c2   : > { %v3033_v31 = vadd.f32 %v13717_v1, %v2997_v7  ;;  %v2996_v56 = vmul.f32 %v13712_v51, %v2849_v27 }
 0x3c4   : > { %v3065_v0 = vmax.f32 %v3033_v31, 0.0  ;;  %v3032_v4 = vadd.f32 %v13717_v1, %v2996_v56 }
 0x3c5   : > { %10219 = vrot.lane.b32.xlu1 %v10208_v49, %s11957_s23  ;;  %10234 = vrot.lane.b32.xlu0 %v10233_v24, %s11959_s16 }
 0x3c6   : > { %v3064_v6 = vmax.f32 %v3032_v4, 0.0  ;;  %v3129_v50 = vrot.slane %v3065_v0, 7  ;;  %v3219_v7 = vrot.slane %v3065_v0, 1 }
 0x3c8   : > { %v3128_v39 = vrot.slane %v3064_v6, 7  ;;  %v10243_v37 = vpack.i.bf16 %v3065_v0, %v3064_v6  ;;  %v3218_v10 = vrot.slane %v3064_v6, 1  ;;  %v13837_v6 = vsel %vm1090_vm2, %v3219_v7, 0.0 }
 0x3c9   : > { %10239 = vrot.lane.b32.xlu0 %v10233_v24, %s11954_s8 }
 0x3ca   : > { %v13818_v18 = vsel %vm994_vm3, %v3128_v39, %v3129_v50  ;;  %v13821_v25 = vsel %vm994_vm3, 0.0, %v3128_v39  ;;  %v13831_v56 = vsel %vm1090_vm2, %v3218_v10, %v3219_v7 }
 0x3cb   : > { %v10258_v60 = vpack.i.bf16 %v13818_v18, %v13821_v25  ;;  %v9425_v22 = vpop.f32.mrf.mxu0  ;;  %v10268_v0 = vpack.i.bf16 %v13837_v6, %v13831_v56 }
 0x3cc   : > { %v2999_v49 = vmul.f32 %v9425_v22, %v13712_v51 }
 0x3cd   : > { %10259 = vrot.lane.b32.xlu1 %v10258_v60, %s17655_s20  ;;  %v2859_v13 = vpop.f32.mrf.mxu0  ;;  %10244 = vrot.lane.b32.xlu0 %v10243_v37, %s17654_s17 }
 0x3ce   : > { %v3035_v27 = vadd.f32 %v13717_v1, %v2999_v49  ;;  %v2998_v31 = vmul.f32 %v13712_v51, %v2859_v13 }
 0x3d0   : > { %v3067_v24 = vmax.f32 %v3035_v27, 0.0  ;;  %v3034_v4 = vadd.f32 %v13717_v1, %v2998_v31 }
 0x3d1   : > { %10264 = vrot.lane.b32.xlu1 %v10258_v60, %s11958_s15  ;;  %10249 = vrot.lane.b32.xlu0 %v10243_v37, %s11956_s22 }
 0x3d2   : > { %v3066_v39 = vmax.f32 %v3034_v4, 0.0  ;;  %v3132_v22 = vrot.slane %v3067_v24, 7  ;;  %v3222_v31 = vrot.slane %v3067_v24, 1 }
 0x3d4   : > { %v3131_v50 = vrot.slane %v3066_v39, 7  ;;  %v3221_v13 = vrot.slane %v3066_v39, 1  ;;  %v10278_v27 = vpack.i.bf16 %v3067_v24, %v3066_v39 }
 0x3d5   : > { %10269 = vrot.lane.b32.xlu1 %v10268_v0, %s11959_s16  ;;  %10254 = vrot.lane.b32.xlu0 %v10243_v37, %s11957_s23 }
 0x3d6   : > { %v13844_v10 = vsel %vm994_vm3, %v3131_v50, %v3132_v22  ;;  %v13847_v60 = vsel %vm994_vm3, 0.0, %v3131_v50  ;;  %v13856_v22 = vsel %vm1090_vm2, %v3221_v13, %v3222_v31 }
 0x3d7   : > { %v10293_v49 = vpack.i.bf16 %v13844_v10, %v13847_v60 }
 0x3d9   : > { %10274 = vrot.lane.b32.xlu1 %v10268_v0, %s11954_s8  ;;  %10294 = vrot.lane.b32.xlu0 %v10293_v49, %s17655_s20  ;;  %v13862_v0 = vsel %vm1090_vm2, %v3222_v31, 0.0 }
 0x3da   : > { %v10303_v39 = vpack.i.bf16 %v13862_v0, %v13856_v22 }
 0x3db   : > { %v9428_v7 = vpop.f32.mrf.mxu0 }
 0x3dc   : > { %v3001_v4 = vmul.f32 %v9428_v7, %v13712_v51 }
 0x3dd   : > { %v2869_v37 = vpop.f32.mrf.mxu0  ;;  %10279 = vrot.lane.b32.xlu1 %v10278_v27, %s17654_s17  ;;  %10299 = vrot.lane.b32.xlu0 %v10293_v49, %s11958_s15 }
 0x3de   : > { %v3037_v50 = vadd.f32 %v13717_v1, %v3001_v4  ;;  %v3000_v30 = vmul.f32 %v13712_v51, %v2869_v37 }
 0x3e0   : > { %v3069_v28 = vmax.f32 %v3037_v50, 0.0  ;;  %v3036_v24 = vadd.f32 %v13717_v1, %v3000_v30 }
 0x3e1   : > { %10284 = vrot.lane.b32.xlu1 %v10278_v27, %s11956_s22  ;;  %10304 = vrot.lane.b32.xlu0 %v10303_v39, %s11959_s16 }
 0x3e2   : > { %v3068_v7 = vmax.f32 %v3036_v24, 0.0  ;;  %v3135_v4 = vrot.slane %v3069_v28, 7 }
 0x3e4   : > { %v3134_v13 = vrot.slane %v3068_v7, 7  ;;  %v10313_v50 = vpack.i.bf16 %v3069_v28, %v3068_v7  ;;  %v3224_v24 = vrot.slane %v3068_v7, 1 }
 0x3e5   : > { %10289 = vrot.lane.b32.xlu1 %v10278_v27, %s11957_s23  ;;  %10309 = vrot.lane.b32.xlu0 %v10303_v39, %s11954_s8  ;;  %v3225_v27 = vrot.slane %v3069_v28, 1 }
 0x3e6   : > { %v13872_v49 = vsel %vm994_vm3, %v3134_v13, %v3135_v4  ;;  %v13875_v31 = vsel %vm994_vm3, 0.0, %v3134_v13 }
 0x3e7   : > { %v10328_v30 = vpack.i.bf16 %v13872_v49, %v13875_v31  ;;  %v9431_v37 = vpop.f32.mrf.mxu0  ;;  %v13885_v13 = vsel %vm1090_vm2, %v3224_v24, %v3225_v27  ;;  %v13891_v7 = vsel %vm1090_vm2, %v3225_v27, 0.0 }
 0x3e8   : > { %v3003_v41 = vmul.f32 %v9431_v37, %v13712_v51  ;;  %v10338_v28 = vpack.i.bf16 %v13891_v7, %v13885_v13 }
 0x3e9   : > { %10329 = vrot.lane.b32.xlu1 %v10328_v30, %s17655_s20  ;;  %v2879_v36 = vpop.f32.mrf.mxu0  ;;  %10314 = vrot.lane.b32.xlu0 %v10313_v50, %s17654_s17 }
 0x3ea   : > { %v3039_v39 = vadd.f32 %v13717_v1, %v3003_v41  ;;  %v3002_v4 = vmul.f32 %v13712_v51, %v2879_v36 }
 0x3ec   : > { %v3071_v62 = vmax.f32 %v3039_v39, 0.0  ;;  %v3038_v15 = vadd.f32 %v13717_v1, %v3002_v4 }
 0x3ed   : > { %10334 = vrot.lane.b32.xlu1 %v10328_v30, %s11958_s15  ;;  %10319 = vrot.lane.b32.xlu0 %v10313_v50, %s11956_s22 }
 0x3ee   : > { %v3070_v37 = vmax.f32 %v3038_v15, 0.0  ;;  %v3138_v41 = vrot.slane %v3071_v62, 7  ;;  %v3228_v23 = vrot.slane %v3071_v62, 1 }
 0x3f0   : > { %v3137_v36 = vrot.slane %v3070_v37, 7  ;;  %v3227_v15 = vrot.slane %v3070_v37, 1  ;;  %v10348_v4 = vpack.i.bf16 %v3071_v62, %v3070_v37 }
 0x3f1   : > { %10339 = vrot.lane.b32.xlu1 %v10338_v28, %s11959_s16  ;;  %10324 = vrot.lane.b32.xlu0 %v10313_v50, %s11957_s23 }
 0x3f2   : > { %v13898_v24 = vsel %vm994_vm3, %v3137_v36, %v3138_v41  ;;  %v13901_v30 = vsel %vm994_vm3, 0.0, %v3137_v36  ;;  %v13910_v41 = vsel %vm1090_vm2, %v3227_v15, %v3228_v23 }
 0x3f3   : > { %v10363_v27 = vpack.i.bf16 %v13898_v24, %v13901_v30 }
 0x3f5   : > { %10344 = vrot.lane.b32.xlu1 %v10338_v28, %s11954_s8  ;;  %10364 = vrot.lane.b32.xlu0 %v10363_v27, %s17655_s20  ;;  %v13916_v28 = vsel %vm1090_vm2, %v3228_v23, 0.0 }
 0x3f6   : > { %v10373_v37 = vpack.i.bf16 %v13916_v28, %v13910_v41 }
 0x3f7   : > { %v9434_v39 = vpop.f32.mrf.mxu0 }
 0x3f8   : > { %v3005_v17 = vmul.f32 %v9434_v39, %v13712_v51 }
 0x3f9   : > { %v2889_v50 = vpop.f32.mrf.mxu0  ;;  %10349 = vrot.lane.b32.xlu1 %v10348_v4, %s17654_s17  ;;  %10369 = vrot.lane.b32.xlu0 %v10363_v27, %s11958_s15 }
 0x3fa   : > { %v3041_v36 = vadd.f32 %v13717_v1, %v3005_v17  ;;  %v3004_v40 = vmul.f32 %v13712_v51, %v2889_v50 }
 0x3fc   : > { %v3073_v38 = vmax.f32 %v3041_v36, 0.0  ;;  %v3040_v62 = vadd.f32 %v13717_v1, %v3004_v40 }
 0x3fd   : > { %10354 = vrot.lane.b32.xlu1 %v10348_v4, %s11956_s22  ;;  %10374 = vrot.lane.b32.xlu0 %v10373_v37, %s11959_s16 }
 0x3fe   : > { %v3072_v39 = vmax.f32 %v3040_v62, 0.0  ;;  %v3141_v17 = vrot.slane %v3073_v38, 7 }
 0x400   : > { %v3140_v15 = vrot.slane %v3072_v39, 7  ;;  %v10383_v36 = vpack.i.bf16 %v3073_v38, %v3072_v39  ;;  %v3230_v62 = vrot.slane %v3072_v39, 1 }
 0x401   : > { %10359 = vrot.lane.b32.xlu1 %v10348_v4, %s11957_s23  ;;  %10379 = vrot.lane.b32.xlu0 %v10373_v37, %s11954_s8  ;;  %v3231_v4 = vrot.slane %v3073_v38, 1 }
 0x402   : > { %v13926_v23 = vsel %vm994_vm3, %v3140_v15, %v3141_v17  ;;  %v13929_v27 = vsel %vm994_vm3, 0.0, %v3140_v15 }
 0x403   : > { %v10398_v40 = vpack.i.bf16 %v13926_v23, %v13929_v27  ;;  %v9437_v50 = vpop.f32.mrf.mxu0  ;;  %v13939_v15 = vsel %vm1090_vm2, %v3230_v62, %v3231_v4  ;;  %v13945_v39 = vsel %vm1090_vm2, %v3231_v4, 0.0 }
 0x404   : > { %v3007_v11 = vmul.f32 %v9437_v50, %v13712_v51  ;;  %v10408_v38 = vpack.i.bf16 %v13945_v39, %v13939_v15 }
 0x405   : > { %10399 = vrot.lane.b32.xlu1 %v10398_v40, %s17655_s20  ;;  %v2899_v32 = vpop.f32.mrf.mxu0  ;;  %10384 = vrot.lane.b32.xlu0 %v10383_v36, %s17654_s17 }
 0x406   : > { %v3043_v37 = vadd.f32 %v13717_v1, %v3007_v11  ;;  %v3006_v17 = vmul.f32 %v13712_v51, %v2899_v32 }
 0x408   : > { %v3075_v3 = vmax.f32 %v3043_v37, 0.0  ;;  %v3042_v57 = vadd.f32 %v13717_v1, %v3006_v17 }
 0x409   : > { %10404 = vrot.lane.b32.xlu1 %v10398_v40, %s11958_s15  ;;  %10389 = vrot.lane.b32.xlu0 %v10383_v36, %s11956_s22 }
 0x40a   : > { %v3074_v50 = vmax.f32 %v3042_v57, 0.0  ;;  %v3144_v11 = vrot.slane %v3075_v3, 7  ;;  %v3234_v33 = vrot.slane %v3075_v3, 1 }
 0x40c   : > { %v3143_v32 = vrot.slane %v3074_v50, 7  ;;  %v3233_v57 = vrot.slane %v3074_v50, 1  ;;  %v10418_v17 = vpack.i.bf16 %v3075_v3, %v3074_v50 }
 0x40d   : > { %10409 = vrot.lane.b32.xlu1 %v10408_v38, %s11959_s16  ;;  %10394 = vrot.lane.b32.xlu0 %v10383_v36, %s11957_s23 }
 0x40e   : > { %v13952_v62 = vsel %vm994_vm3, %v3143_v32, %v3144_v11  ;;  %v13955_v40 = vsel %vm994_vm3, 0.0, %v3143_v32  ;;  %v13964_v11 = vsel %vm1090_vm2, %v3233_v57, %v3234_v33 }
 0x40f   : > { %v10433_v4 = vpack.i.bf16 %v13952_v62, %v13955_v40 }
 0x411   : > { %10414 = vrot.lane.b32.xlu1 %v10408_v38, %s11954_s8  ;;  %10434 = vrot.lane.b32.xlu0 %v10433_v4, %s17655_s20  ;;  %v13970_v38 = vsel %vm1090_vm2, %v3234_v33, 0.0 }
 0x412   : > { %v10443_v50 = vpack.i.bf16 %v13970_v38, %v13964_v11 }
 0x413   : > { %v9440_v37 = vpop.f32.mrf.mxu0 }
 0x414   : > { %v3009_v16 = vmul.f32 %v9440_v37, %v13712_v51 }
 0x415   : > { %v2909_v36 = vpop.f32.mrf.mxu0  ;;  %10419 = vrot.lane.b32.xlu1 %v10418_v17, %s17654_s17  ;;  %10439 = vrot.lane.b32.xlu0 %v10433_v4, %s11958_s15 }
 0x416   : > { %v3045_v32 = vadd.f32 %v13717_v1, %v3009_v16  ;;  %v3008_v55 = vmul.f32 %v13712_v51, %v2909_v36 }
 0x418   : > { %v3077_v54 = vmax.f32 %v3045_v32, 0.0  ;;  %v3044_v3 = vadd.f32 %v13717_v1, %v3008_v55 }
 0x419   : > { %10424 = vrot.lane.b32.xlu1 %v10418_v17, %s11956_s22  ;;  %10444 = vrot.lane.b32.xlu0 %v10443_v50, %s11959_s16 }
 0x41a   : > { %v3076_v37 = vmax.f32 %v3044_v3, 0.0  ;;  %v3147_v16 = vrot.slane %v3077_v54, 7 }
 0x41c   : > { %v3146_v57 = vrot.slane %v3076_v37, 7  ;;  %v10453_v32 = vpack.i.bf16 %v3077_v54, %v3076_v37  ;;  %v3236_v3 = vrot.slane %v3076_v37, 1 }
 0x41d   : > { %10429 = vrot.lane.b32.xlu1 %v10418_v17, %s11957_s23  ;;  %10449 = vrot.lane.b32.xlu0 %v10443_v50, %s11954_s8  ;;  %v3237_v17 = vrot.slane %v3077_v54, 1 }
 0x41e   : > { %v13980_v33 = vsel %vm994_vm3, %v3146_v57, %v3147_v16  ;;  %v13983_v4 = vsel %vm994_vm3, 0.0, %v3146_v57 }
 0x41f   : > { %v10468_v55 = vpack.i.bf16 %v13980_v33, %v13983_v4  ;;  %v13993_v29 = vsel %vm1090_vm2, %v3236_v3, %v3237_v17 }
 0x420   : > { %v9443_v36 = vpop.f32.mrf.mxu0  ;;  %v10185_v37 = vpop.permute.xlu0 %10184 }
 0x421   : > { %v3011_v52 = vmul.f32 %v9443_v36, %v13712_v51  ;;  %10469 = vrot.lane.b32.xlu1 %v10468_v55, %s17655_s20  ;;  %10454 = vrot.lane.b32.xlu0 %v10453_v32, %s17654_s17  ;;  %v13999_v36 = vsel %vm1090_vm2, %v3237_v17, 0.0  ;;  %v10186_v61 = vunpack.i.l.bf16 %v10185_v37 }
 0x422   : > { %v2919_v8 = vpop.f32.mrf.mxu0 }
 0x423   : > { %v3047_v50 = vadd.f32 %v13717_v1, %v3011_v52  ;;  %v3010_v16 = vmul.f32 %v13712_v51, %v2919_v8  ;;  %v10195_v57 = vpop.permute.xlu1 %10194  ;;  %v10478_v8 = vpack.i.bf16 %v13999_v36, %v13993_v29 }
 0x424   : > { %v10196_v52 = vunpack.i.l.bf16 %v10195_v57  ;;  %v14013_v5 = vpop.permute.xlu0 %10189 }
 0x425   : > { %v3079_v34 = vmax.f32 %v3047_v50, 0.0  ;;  %v3046_v26 = vadd.f32 %v13717_v1, %v3010_v16  ;;  %10474 = vrot.lane.b32.xlu1 %v10468_v55, %s11958_s15  ;;  %10459 = vrot.lane.b32.xlu0 %v10453_v32, %s11956_s22 }
 0x426   : > { %v4039_v45 = vsel %vm1948_vm6, %v17657_v35, %v10196_v52 }
 0x427   : > { %v3078_v54 = vmax.f32 %v3046_v26, 0.0  ;;  %v10200_v9 = vpop.permute.xlu1 %10199  ;;  %v3150_v50 = vrot.slane %v3079_v34, 7  ;;  %v10197_v26 = vunpack.i.h.bf16 %v10195_v57  ;;  %v3240_v57 = vrot.slane %v3079_v34, 1 }
 0x428   : > { %v10201_v43 = vunpack.i.l.bf16 %v10200_v9  ;;  %v4071_v21 = vsel %vm1981_vm7, %v4039_v45, %v10186_v61  ;;  %v10202_v35 = vunpack.i.h.bf16 %v10200_v9 }
 0x429   : > { %10479 = vrot.lane.b32.xlu1 %v10478_v8, %s11959_s16  ;;  %v3149_v3 = vrot.slane %v3078_v54, 7  ;;  %10464 = vrot.lane.b32.xlu0 %v10453_v32, %s11957_s23  ;;  %v3239_v32 = vrot.slane %v3078_v54, 1  ;;  %v10488_v58 = vpack.i.bf16 %v3079_v34, %v3078_v54  ;;  %v4040_v12 = vsel %vm1948_vm6, %v17658_v2, %v10197_v26 }
 0x42a   : > { %v4103_v54 = vsel %vm2014_vm8, %v4071_v21, %v10201_v43  ;;  %v14036_v45 = vsel %vm1090_vm2, %v3240_v57, 0.0 }
 0x42b   : > { %v14005_v16 = vpop.permute.xlu1 %10204  ;;  %v14008_v55 = vsel %vm994_vm3, %v3149_v3, %v3150_v50  ;;  %v14011_v17 = vsel %vm994_vm3, 0.0, %v3149_v3  ;;  %v10187_v50 = vunpack.i.h.bf16 %v10185_v37  ;;  %v14027_v37 = vsel %vm1090_vm2, %v3239_v32, %v3240_v57 }
 0x42c   : > { %17656 = vst [vmem:[#allocation52_spill] sm:$0xff] %v14008_v55  ;;  %v10503_v44 = vpack.i.bf16 %v14008_v55, %v14011_v17 }
 0x42d   : > { %10484 = vrot.lane.b32.xlu1 %v10478_v8, %s11954_s8  ;;  %v4072_v21 = vsel %vm1981_vm7, %v4040_v12, %v10187_v50 }
 0x42e   : > { %10504 = vrot.lane.b32.xlu0 %v10503_v44, %s17655_s20  ;;  %v4104_v57 = vsel %vm2014_vm8, %v4072_v21, %v10202_v35  ;;  %v10207_v35 = vunpack.i.h.bf16 %v14005_v16 }
 0x42f   : > { %v9446_v14 = vpop.f32.mrf.mxu0  ;;  %v10210_v3 = vpop.permute.xlu1 %10209 }
 0x430   : > { %v3013_v59 = vmul.f32 %v9446_v14, %v13712_v51  ;;  %v10225_v52 = vpop.permute.xlu0 %10224  ;;  %v10211_v8 = vunpack.i.l.bf16 %v10210_v3  ;;  %v10191_v14 = vunpack.i.l.bf16 %v14013_v5  ;;  %v10212_v43 = vunpack.i.h.bf16 %v10210_v3 }
 0x431   : > { %v10226_v19 = vunpack.i.l.bf16 %v10225_v52  ;;  %v2929_v63 = vpop.f32.mrf.mxu0  ;;  %10489 = vrot.lane.b32.xlu1 %v10488_v58, %s17654_s17  ;;  %v10227_v55 = vunpack.i.h.bf16 %v10225_v52 }
 0x432   : > { %v3049_v34 = vadd.f32 %v13717_v1, %v3013_v59  ;;  %v3012_v26 = vmul.f32 %v13712_v51, %v2929_v63  ;;  %10509 = vrot.lane.b32.xlu0 %v10503_v44, %s11958_s15  ;;  %v10513_v59 = vpack.i.bf16 %v14036_v45, %v14027_v37  ;;  %v10206_v63 = vunpack.i.l.bf16 %v14005_v16 }
 0x433   : > { %v4135_v61 = vsel %vm2047_vm9, %v4103_v54, %v10226_v19  ;;  %v14045_v44 = vpop.permute.xlu1 %10214  ;;  %v4136_v54 = vsel %vm2047_vm9, %v4104_v57, %v10227_v55  ;;  %v3979_v50 = vsel %vm1882_vm4, %v13762_v42, %v10191_v14 }
 0x434   : > { %v14038_v9 = vmax.f32 %v3049_v34, 0.0  ;;  %v3048_v32 = vadd.f32 %v13717_v1, %v3012_v26  ;;  %v10230_v2 = vpop.permute.xlu0 %10229  ;;  %v4167_v19 = vsel %vm2080_vm10, %v4135_v61, %v10211_v8  ;;  %v10192_v34 = vunpack.i.h.bf16 %v14013_v5 }
 0x435   : > { %10494 = vrot.lane.b32.xlu1 %v10488_v58, %s11956_s22  ;;  %4324 = vmatmul.mubr.f32.vlgmr.msra.gmra.mxu0 %v4167_v19  ;;  %v10231_v12 = vunpack.i.l.bf16 %v10230_v2  ;;  %v4009_v61 = vsel %vm1915_vm5, %v3979_v50, %v10206_v63  ;;  %v10216_v5 = vunpack.i.l.bf16 %v14045_v44  ;;  %v10232_v55 = vunpack.i.h.bf16 %v10230_v2 }
 0x436   : > { %v3080_v52 = vmax.f32 %v3048_v32, 0.0  ;;  %10514 = vrot.lane.b32.xlu0 %v10513_v59, %s11959_s16  ;;  %9061 = vmatprep.mubr.msk.f32.mxu0 %vm1882_vm4, %v13810_v46  ;;  %v3153_v26 = vrot.slane %v14038_v9, 7  ;;  %v4168_v32 = vsel %vm2080_vm10, %v4136_v54, %v10212_v43 }
 0x437   : > { %v4041_v16 = vsel %vm1948_vm6, %v4009_v61, %v10231_v12  ;;  %v14071_v14 = vpop.permute.xlu1 %10219  ;;  %v10217_v12 = vunpack.i.h.bf16 %v14045_v44 }
 0x438   : > { %v10235_v3 = vpop.permute.xlu0 %10234  ;;  %v3152_v8 = vrot.slane %v3080_v52, 7  ;;  %v3242_v2 = vrot.slane %v3080_v52, 1  ;;  %v10523_v19 = vpack.i.bf16 %v14038_v9, %v3080_v52 }
 0x439   : > { %10499 = vrot.lane.b32.xlu1 %v10488_v58, %s11957_s23  ;;  %4329 = vmatmul.mubr.f32.gmra.mxu0 %v4168_v32  ;;  %v10236_v21 = vunpack.i.l.bf16 %v10235_v3 }
 0x43a   : > { %10519 = vrot.lane.b32.xlu0 %v10513_v59, %s11954_s8  ;;  %v14065_v42 = vsel %vm994_vm3, %v3152_v8, %v3153_v26  ;;  %v14068_v46 = vsel %vm994_vm3, 0.0, %v3152_v8  ;;  %9062 = vmatprep.mubr.msk.f32.mxu0 %vm1882_vm4, %v13831_v56  ;;  %v3980_v59 = vsel %vm1882_vm4, %v13759_v20, %v10192_v34  ;;  %v3243_v56 = vrot.slane %v14038_v9, 1 }
 0x43b   : > { %v10538_v58 = vpack.i.bf16 %v14065_v42, %v14068_v46  ;;  %v4010_v57 = vsel %vm1915_vm5, %v3980_v59, %v10207_v35  ;;  %v10237_v8 = vunpack.i.h.bf16 %v10235_v3  ;;  %v4073_v34 = vsel %vm1981_vm7, %v4041_v16, %v10216_v5 }
 0x43c   : > { %v9449_v63 = vpop.f32.mrf.mxu0  ;;  %v14079_v43 = vpop.permute.xlu0 %10239  ;;  %v4042_v50 = vsel %vm1948_vm6, %v4010_v57, %v10232_v55  ;;  %v14093_v61 = vsel %vm1090_vm2, %v3242_v2, %v3243_v56  ;;  %v4105_v44 = vsel %vm2014_vm8, %v4073_v34, %v10236_v21  ;;  %v14099_v5 = vsel %vm1090_vm2, %v3243_v56, 0.0 }
 0x43d   : > { %v3015_v54 = vmul.f32 %v9449_v63, %v13712_v51  ;;  %10539 = vrot.lane.b32.xlu1 %v10538_v58, %s17655_s20  ;;  %v10548_v2 = vpack.i.bf16 %v14099_v5, %v14093_v61  ;;  %v4074_v57 = vsel %vm1981_vm7, %v4042_v50, %v10217_v12  ;;  %v10222_v50 = vunpack.i.h.bf16 %v14071_v14 }
 0x43e   : > { %v2939_v20 = vpop.f32.mrf.mxu0  ;;  %10524 = vrot.lane.b32.xlu0 %v10523_v19, %s17654_s17 }
 0x43f   : > { %v3051_v52 = vadd.f32 %v13717_v1, %v3015_v54  ;;  %v3014_v26 = vmul.f32 %v13712_v51, %v2939_v20  ;;  %v10260_v35 = vpop.permute.xlu1 %10259 }
 0x440   : > { %v10262_v32 = vunpack.i.h.bf16 %v10260_v35  ;;  %v10261_v9 = vunpack.i.l.bf16 %v10260_v35  ;;  %v10245_v59 = vpop.permute.xlu0 %10244 }
 0x441   : > { %v3083_v55 = vmax.f32 %v3051_v52, 0.0  ;;  %v3050_v3 = vadd.f32 %v13717_v1, %v3014_v26  ;;  %v10246_v63 = vunpack.i.l.bf16 %v10245_v59  ;;  %10544 = vrot.lane.b32.xlu1 %v10538_v58, %s11958_s15  ;;  %v10247_v21 = vunpack.i.h.bf16 %v10245_v59 }
 0x442   : > { %10529 = vrot.lane.b32.xlu0 %v10523_v19, %s11956_s22  ;;  %v4137_v16 = vsel %vm2047_vm9, %v4105_v44, %v10261_v9  ;;  %v4106_v52 = vsel %vm2014_vm8, %v4074_v57, %v10237_v8  ;;  %v10221_v26 = vunpack.i.l.bf16 %v14071_v14  ;;  %v10241_v9 = vunpack.i.l.bf16 %v14079_v43 }
 0x443   : > { %v3082_v54 = vmax.f32 %v3050_v3, 0.0  ;;  %v10265_v20 = vpop.permute.xlu1 %10264  ;;  %v4169_v34 = vsel %vm2080_vm10, %v4137_v16, %v10246_v63  ;;  %v4138_v56 = vsel %vm2047_vm9, %v4106_v52, %v10262_v32  ;;  %v3156_v12 = vrot.slane %v3083_v55, 7 }
 0x444   : > { %v10250_v58 = vpop.permute.xlu0 %10249  ;;  %4334 = vmatmul.mubr.f32.gmra.mxu0 %v4169_v34  ;;  %v10266_v8 = vunpack.i.l.bf16 %v10265_v20  ;;  %v4170_v44 = vsel %vm2080_vm10, %v4138_v56, %v10247_v21  ;;  %v10242_v16 = vunpack.i.h.bf16 %v14079_v43  ;;  %v10267_v21 = vunpack.i.h.bf16 %v10265_v20 }
 0x445   : > { %10549 = vrot.lane.b32.xlu1 %v10548_v2, %s11959_s16  ;;  %9063 = vmatprep.mubr.msk.f32.mxu0 %vm1882_vm4, %v13837_v6  ;;  %v3155_v35 = vrot.slane %v3082_v54, 7  ;;  %v3245_v14 = vrot.slane %v3082_v54, 1  ;;  %v3246_v34 = vrot.slane %v3083_v55, 1  ;;  %v3982_v52 = vsel %vm1882_vm4, %v13794_v47, %v10222_v50 }
 0x446   : > { %10534 = vrot.lane.b32.xlu0 %v10523_v19, %s11957_s23  ;;  %v3981_v19 = vsel %vm1882_vm4, %v13797_v48, %v10221_v26  ;;  %v10558_v43 = vpack.i.bf16 %v3083_v55, %v3082_v54  ;;  %v4012_v20 = vsel %vm1915_vm5, %v3982_v52, %v10242_v16 }
 0x447   : > { %v10270_v59 = vpop.permute.xlu1 %10269  ;;  %v14118_v32 = vsel %vm994_vm3, %v3155_v35, %v3156_v12  ;;  %v14121_v3 = vsel %vm994_vm3, 0.0, %v3155_v35  ;;  %v4011_v57 = vsel %vm1915_vm5, %v3981_v19, %v10241_v9  ;;  %v10251_v35 = vunpack.i.l.bf16 %v10250_v58 }
 0x448   : > { %17659 = vst [vmem:[#allocation53_spill] sm:$0xff] %v14118_v32  ;;  %v14123_v63 = vpop.permute.xlu0 %10254  ;;  %4339 = vmatmul.mubr.f32.gmra.mxu0 %v4170_v44  ;;  %v10573_v6 = vpack.i.bf16 %v14118_v32, %v14121_v3  ;;  %v4043_v56 = vsel %vm1948_vm6, %v4011_v57, %v10266_v8  ;;  %v14142_v9 = vsel %vm1090_vm2, %v3245_v14, %v3246_v34  ;;  %v10252_v44 = vunpack.i.h.bf16 %v10250_v58 }
 0x449   : > { %10554 = vrot.lane.b32.xlu1 %v10548_v2, %s11954_s8  ;;  %9064 = vmatprep.mubr.msk.f32.mxu0 %vm1882_vm4, %v13856_v22  ;;  %v10271_v2 = vunpack.i.l.bf16 %v10270_v59  ;;  %v4044_v47 = vsel %vm1948_vm6, %v4012_v20, %v10267_v21  ;;  %v14151_v54 = vsel %vm1090_vm2, %v3246_v34, 0.0  ;;  %v4075_v8 = vsel %vm1981_vm7, %v4043_v56, %v10251_v35 }
 0x44a   : > { %10574 = vrot.lane.b32.xlu0 %v10573_v6, %s17655_s20  ;;  %v10272_v14 = vunpack.i.h.bf16 %v10270_v59  ;;  %v10583_v58 = vpack.i.bf16 %v14151_v54, %v14142_v9  ;;  %v4076_v34 = vsel %vm1981_vm7, %v4044_v47, %v10252_v44  ;;  %v10257_v20 = vunpack.i.h.bf16 %v14123_v63 }
 0x44b   : > { %v9452_v48 = vpop.f32.mrf.mxu0  ;;  %v14138_v26 = vpop.permute.xlu1 %10274 }
 0x44c   : > { %v3017_v12 = vmul.f32 %v9452_v48, %v13712_v51  ;;  %v10295_v22 = vpop.permute.xlu0 %10294  ;;  %v4108_v44 = vsel %vm2014_vm8, %v4076_v34, %v10272_v14 }
 0x44d   : > { %v10296_v19 = vunpack.i.l.bf16 %v10295_v22  ;;  %v2949_v32 = vpop.f32.mrf.mxu0  ;;  %10559 = vrot.lane.b32.xlu1 %v10558_v43, %s17654_s17 }
 0x44e   : > { %v3053_v50 = vadd.f32 %v13717_v1, %v3017_v12  ;;  %v3016_v55 = vmul.f32 %v13712_v51, %v2949_v32  ;;  %10579 = vrot.lane.b32.xlu0 %v10573_v6, %s11958_s15  ;;  %v4107_v32 = vsel %vm2014_vm8, %v4075_v8, %v10271_v2  ;;  %v10297_v12 = vunpack.i.h.bf16 %v10295_v22 }
 0x44f   : > { %v10280_v16 = vpop.permute.xlu1 %10279  ;;  %v4139_v6 = vsel %vm2047_vm9, %v4107_v32, %v10296_v19  ;;  %v10276_v2 = vunpack.i.l.bf16 %v14138_v26  ;;  %v10277_v8 = vunpack.i.h.bf16 %v14138_v26 }
 0x450   : > { %v14156_v57 = vmax.f32 %v3053_v50, 0.0  ;;  %v3052_v21 = vadd.f32 %v13717_v1, %v3016_v55  ;;  %v10281_v52 = vunpack.i.l.bf16 %v10280_v16  ;;  %v10300_v48 = vpop.permute.xlu0 %10299  ;;  %v10282_v56 = vunpack.i.h.bf16 %v10280_v16 }
 0x451   : > { %10564 = vrot.lane.b32.xlu1 %v10558_v43, %s11956_s22  ;;  %v10256_v50 = vunpack.i.l.bf16 %v14123_v63  ;;  %v10302_v16 = vunpack.i.h.bf16 %v10300_v48  ;;  %v4140_v63 = vsel %vm2047_vm9, %v4108_v44, %v10297_v12 }
 0x452   : > { %v3084_v59 = vmax.f32 %v3052_v21, 0.0  ;;  %10584 = vrot.lane.b32.xlu0 %v10583_v58, %s11959_s16  ;;  %v4171_v35 = vsel %vm2080_vm10, %v4139_v6, %v10281_v52  ;;  %v3159_v47 = vrot.slane %v14156_v57, 7  ;;  %v10301_v21 = vunpack.i.l.bf16 %v10300_v48 }
 0x453   : > { %v10285_v55 = vpop.permute.xlu1 %10284  ;;  %4344 = vmatmul.mubr.f32.gmra.mxu0 %v4171_v35  ;;  %v4172_v32 = vsel %vm2080_vm10, %v4140_v63, %v10282_v56  ;;  %v3983_v26 = vsel %vm1882_vm4, %v13821_v25, %v10256_v50  ;;  %v3249_v44 = vrot.slane %v14156_v57, 1 }
 0x454   : > { %v10305_v22 = vpop.permute.xlu0 %10304  ;;  %9065 = vmatprep.mubr.msk.f32.mxu0 %vm1882_vm4, %v13862_v0  ;;  %v3158_v19 = vrot.slane %v3084_v59, 7  ;;  %v10286_v52 = vunpack.i.l.bf16 %v10285_v55  ;;  %v10287_v6 = vunpack.i.h.bf16 %v10285_v55  ;;  %v3248_v12 = vrot.slane %v3084_v59, 1 }
 0x455   : > { %10569 = vrot.lane.b32.xlu1 %v10558_v43, %s11957_s23  ;;  %v4013_v34 = vsel %vm1915_vm5, %v3983_v26, %v10276_v2  ;;  %v10593_v25 = vpack.i.bf16 %v14156_v57, %v3084_v59  ;;  %v10306_v55 = vunpack.i.l.bf16 %v10305_v22  ;;  %v10307_v2 = vunpack.i.h.bf16 %v10305_v22 }
 0x456   : > { %10589 = vrot.lane.b32.xlu0 %v10583_v58, %s11954_s8  ;;  %v14178_v0 = vsel %vm994_vm3, %v3158_v19, %v3159_v47  ;;  %v14181_v14 = vsel %vm994_vm3, 0.0, %v3158_v19  ;;  %v3984_v58 = vsel %vm1882_vm4, %v13818_v18, %v10257_v20  ;;  %v4045_v50 = vsel %vm1948_vm6, %v4013_v34, %v10301_v21 }
 0x457   : > { %v14185_v48 = vpop.permute.xlu1 %10289  ;;  %4349 = vmatmul.mubr.f32.gmra.mxu0 %v4172_v32  ;;  %v10608_v43 = vpack.i.bf16 %v14178_v0, %v14181_v14  ;;  %v4014_v35 = vsel %vm1915_vm5, %v3984_v58, %v10277_v8  ;;  %v4077_v20 = vsel %vm1981_vm7, %v4045_v50, %v10286_v52  ;;  %v14206_v59 = vsel %vm1090_vm2, %v3248_v12, %v3249_v44 }
 0x458   : > { %v14192_v56 = vpop.permute.xlu0 %10309  ;;  %9066 = vmatprep.mubr.msk.f32.mxu0 %vm1882_vm4, %v13885_v13  ;;  %v4046_v18 = vsel %vm1948_vm6, %v4014_v35, %v10302_v16  ;;  %v4109_v16 = vsel %vm2014_vm8, %v4077_v20, %v10306_v55  ;;  %v14212_v22 = vsel %vm1090_vm2, %v3249_v44, 0.0  ;;  %v10291_v52 = vunpack.i.l.bf16 %v14185_v48 }
 0x459   : > { %10609 = vrot.lane.b32.xlu1 %v10608_v43, %s17655_s20  ;;  %v4078_v13 = vsel %vm1981_vm7, %v4046_v18, %v10287_v6  ;;  %v10618_v12 = vpack.i.bf16 %v14212_v22, %v14206_v59 }
 0x45a   : > { %10594 = vrot.lane.b32.xlu0 %v10593_v25, %s17654_s17  ;;  %v4110_v58 = vsel %vm2014_vm8, %v4078_v13, %v10307_v2  ;;  %v10292_v2 = vunpack.i.h.bf16 %v14185_v48  ;;  %v3985_v13 = vsel %vm1882_vm4, %v13847_v60, %v10291_v52 }
 0x45b   : > { %v10330_v19 = vpop.permute.xlu1 %10329 }
 0x45c   : > { %v9455_v47 = vpop.f32.mrf.mxu0  ;;  %v10332_v8 = vunpack.i.h.bf16 %v10330_v19  ;;  %v10331_v21 = vunpack.i.l.bf16 %v10330_v19  ;;  %v10315_v63 = vpop.permute.xlu0 %10314 }
 0x45d   : > { %v3019_v32 = vmul.f32 %v9455_v47, %v13712_v51  ;;  %v10316_v57 = vunpack.i.l.bf16 %v10315_v63  ;;  %10614 = vrot.lane.b32.xlu1 %v10608_v43, %s11958_s15  ;;  %v10317_v43 = vunpack.i.h.bf16 %v10315_v63  ;;  %v10311_v47 = vunpack.i.l.bf16 %v14192_v56 }
 0x45e   : > { %v2959_v26 = vpop.f32.mrf.mxu0  ;;  %10599 = vrot.lane.b32.xlu0 %v10593_v25, %s11956_s22  ;;  %v4141_v6 = vsel %vm2047_vm9, %v4109_v16, %v10331_v21  ;;  %v4142_v18 = vsel %vm2047_vm9, %v4110_v58, %v10332_v8 }
 0x45f   : > { %v3055_v34 = vadd.f32 %v13717_v1, %v3019_v32  ;;  %v3018_v35 = vmul.f32 %v13712_v51, %v2959_v26  ;;  %v10335_v50 = vpop.permute.xlu1 %10334  ;;  %v4173_v55 = vsel %vm2080_vm10, %v4141_v6, %v10316_v57  ;;  %v4174_v32 = vsel %vm2080_vm10, %v4142_v18, %v10317_v43 }
 0x460   : > { %v14223_v44 = vpop.permute.xlu0 %10319  ;;  %4354 = vmatmul.mubr.f32.gmra.mxu0 %v4173_v55  ;;  %v10336_v8 = vunpack.i.l.bf16 %v10335_v50  ;;  %v4015_v16 = vsel %vm1915_vm5, %v3985_v13, %v10311_v47  ;;  %v10337_v52 = vunpack.i.h.bf16 %v10335_v50 }
 0x461   : > { %v14226_v20 = vmax.f32 %v3055_v34, 0.0  ;;  %v3054_v19 = vadd.f32 %v13717_v1, %v3018_v35  ;;  %10619 = vrot.lane.b32.xlu1 %v10618_v12, %s11959_s16  ;;  %9067 = vmatprep.mubr.msk.f32.mxu0 %vm1882_vm4, %v13891_v7  ;;  %v10312_v7 = vunpack.i.h.bf16 %v14192_v56  ;;  %v10321_v26 = vunpack.i.l.bf16 %v14223_v44 }
 0x462   : > { %10604 = vrot.lane.b32.xlu0 %v10593_v25, %s11957_s23  ;;  %v3986_v25 = vsel %vm1882_vm4, %v13844_v10, %v10292_v2  ;;  %v4047_v6 = vsel %vm1948_vm6, %v4015_v16, %v10336_v8  ;;  %v10322_v18 = vunpack.i.h.bf16 %v14223_v44 }
 0x463   : > { %v3086_v21 = vmax.f32 %v3054_v19, 0.0  ;;  %v14237_v63 = vpop.permute.xlu1 %10339  ;;  %v3162_v48 = vrot.slane %v14226_v20, 7  ;;  %v4016_v55 = vsel %vm1915_vm5, %v3986_v25, %v10312_v7  ;;  %v4079_v8 = vsel %vm1981_vm7, %v4047_v6, %v10321_v26 }
 0x464   : > { %v14240_v57 = vpop.permute.xlu0 %10324  ;;  %4359 = vmatmul.mubr.f32.gmra.mxu0 %v4174_v32  ;;  %v10341_v10 = vunpack.i.l.bf16 %v14237_v63  ;;  %v4048_v47 = vsel %vm1948_vm6, %v4016_v55, %v10337_v52  ;;  %v3252_v25 = vrot.slane %v14226_v20, 1 }
 0x465   : > { %10624 = vrot.lane.b32.xlu1 %v10618_v12, %s11954_s8  ;;  %9068 = vmatprep.mubr.msk.f32.mxu0 %vm1882_vm4, %v13910_v41  ;;  %v3161_v60 = vrot.slane %v3086_v21, 7  ;;  %v10628_v12 = vpack.i.bf16 %v14226_v20, %v3086_v21  ;;  %v3251_v13 = vrot.slane %v3086_v21, 1  ;;  %v10326_v7 = vunpack.i.l.bf16 %v14240_v57 }
 0x466   : > { %v4111_v52 = vsel %vm2014_vm8, %v4079_v8, %v10341_v10  ;;  %v10327_v10 = vunpack.i.h.bf16 %v14240_v57 }
 0x467   : > { %v9458_v58 = vpop.f32.mrf.mxu0  ;;  %v14252_v56 = vpop.permute.xlu1 %10344  ;;  %v14256_v41 = vsel %vm994_vm3, %v3161_v60, %v3162_v48  ;;  %v14259_v34 = vsel %vm994_vm3, 0.0, %v3161_v60  ;;  %v10342_v48 = vunpack.i.h.bf16 %v14237_v63  ;;  %v14283_v63 = vsel %vm1090_vm2, %v3251_v13, %v3252_v25 }
 0x468   : > { %v3021_v43 = vmul.f32 %v9458_v58, %v13712_v51  ;;  %v10365_v35 = vpop.permute.xlu0 %10364  ;;  %v10643_v50 = vpack.i.bf16 %v14256_v41, %v14259_v34  ;;  %v3987_v57 = vsel %vm1882_vm4, %v13875_v31, %v10326_v7 }
 0x469   : > { %v10366_v19 = vunpack.i.l.bf16 %v10365_v35  ;;  %v2969_v2 = vpop.f32.mrf.mxu0  ;;  %10629 = vrot.lane.b32.xlu1 %v10628_v12, %s17654_s17  ;;  %v10367_v6 = vunpack.i.h.bf16 %v10365_v35 }
 0x46a   : > { %v3057_v32 = vadd.f32 %v13717_v1, %v3021_v43  ;;  %v3020_v60 = vmul.f32 %v13712_v51, %v2969_v2  ;;  %10644 = vrot.lane.b32.xlu0 %v10643_v50, %s17655_s20 }
 0x46b   : > { %v10350_v44 = vpop.permute.xlu1 %10349  ;;  %v4143_v43 = vsel %vm2047_vm9, %v4111_v52, %v10366_v19  ;;  %v10346_v19 = vunpack.i.l.bf16 %v14252_v56 }
 0x46c   : > { %v3056_v16 = vadd.f32 %v13717_v1, %v3020_v60  ;;  %v10351_v21 = vunpack.i.l.bf16 %v10350_v44  ;;  %v10370_v58 = vpop.permute.xlu0 %10369  ;;  %v14278_v26 = vmax.f32 %v3057_v32, 0.0  ;;  %v10352_v2 = vunpack.i.h.bf16 %v10350_v44 }
 0x46d   : > { %10634 = vrot.lane.b32.xlu1 %v10628_v12, %s11956_s22  ;;  %v4080_v60 = vsel %vm1981_vm7, %v4048_v47, %v10322_v18  ;;  %v14292_v32 = vsel %vm1090_vm2, %v3252_v25, 0.0  ;;  %v10371_v47 = vunpack.i.l.bf16 %v10370_v58 }
 0x46e   : > { %v14285_v55 = vmax.f32 %v3056_v16, 0.0  ;;  %10649 = vrot.lane.b32.xlu0 %v10643_v50, %s11958_s15  ;;  %v4175_v20 = vsel %vm2080_vm10, %v4143_v43, %v10351_v21  ;;  %v10653_v50 = vpack.i.bf16 %v14292_v32, %v14283_v63  ;;  %v4112_v44 = vsel %vm2014_vm8, %v4080_v60, %v10342_v48 }
 0x46f   : > { %v10355_v8 = vpop.permute.xlu1 %10354  ;;  %v9461_v35 = vpop.f32.mrf.mxu0  ;;  %4364 = vmatmul.mubr.f32.gmra.mxu0 %v4175_v20  ;;  %v4144_v16 = vsel %vm2047_vm9, %v4112_v44, %v10367_v6  ;;  %v3165_v21 = vrot.slane %v14278_v26, 7  ;;  %v10372_v20 = vunpack.i.h.bf16 %v10370_v58  ;;  %v4017_v60 = vsel %vm1915_vm5, %v3987_v57, %v10346_v19 }
 0x470   : > { %v10375_v13 = vpop.permute.xlu0 %10374  ;;  %9069 = vmatprep.mubr.msk.f32.mxu0 %vm1882_vm4, %v13916_v28  ;;  %v3164_v18 = vrot.slane %v14285_v55, 7  ;;  %v10347_v28 = vunpack.i.h.bf16 %v14252_v56  ;;  %v10356_v52 = vunpack.i.l.bf16 %v10355_v8  ;;  %v4176_v43 = vsel %vm2080_vm10, %v4144_v16, %v10352_v2 }
 0x471   : > { %10639 = vrot.lane.b32.xlu1 %v10628_v12, %s11957_s23  ;;  %v2979_v25 = vpop.f32.mrf.mxu0  ;;  %v3023_v31 = vmul.f32 %v9461_v35, %v13712_v51  ;;  %v3988_v56 = vsel %vm1882_vm4, %v13872_v49, %v10327_v10  ;;  %v10357_v44 = vunpack.i.h.bf16 %v10355_v8  ;;  %v10376_v58 = vunpack.i.l.bf16 %v10375_v13 }
 0x472   : > { %10654 = vrot.lane.b32.xlu0 %v10653_v50, %s11959_s16  ;;  %v3022_v48 = vmul.f32 %v13712_v51, %v2979_v25  ;;  %v14314_v12 = vsel %vm994_vm3, %v3164_v18, %v3165_v21  ;;  %v14317_v6 = vsel %vm994_vm3, 0.0, %v3164_v18  ;;  %v4049_v51 = vsel %vm1948_vm6, %v4017_v60, %v10371_v47 }
 0x473   : > { %v14311_v7 = vpop.permute.xlu1 %10359  ;;  %4369 = vmatmul.mubr.f32.gmra.mxu0 %v4176_v43  ;;  %v10678_v35 = vpack.i.bf16 %v14314_v12, %v14317_v6  ;;  %v4018_v18 = vsel %vm1915_vm5, %v3988_v56, %v10347_v28  ;;  %v4081_v49 = vsel %vm1981_vm7, %v4049_v51, %v10356_v52  ;;  %v3254_v10 = vrot.slane %v14285_v55, 1 }
 0x474   : > { %v14322_v25 = vpop.permute.xlu0 %10379  ;;  %9070 = vmatprep.mubr.msk.f32.mxu0 %vm1882_vm4, %v13939_v15  ;;  %v3058_v2 = vadd.f32 %v13717_v1, %v3022_v48  ;;  %v4050_v8 = vsel %vm1948_vm6, %v4018_v18, %v10372_v20  ;;  %v3059_v15 = vadd.f32 %v13717_v1, %v3023_v31  ;;  %v10377_v19 = vunpack.i.h.bf16 %v10375_v13  ;;  %v320_v31 = vld [vmem:[%s17436_s3 + $0x28] sm:$0xff] }
 0x475   : > { %10679 = vrot.lane.b32.xlu1 %v10678_v35, %s17655_s20  ;;  %v3255_v47 = vrot.slane %v14278_v26, 1  ;;  %v4082_v16 = vsel %vm1981_vm7, %v4050_v8, %v10357_v44  ;;  %v4113_v20 = vsel %vm2014_vm8, %v4081_v49, %v10376_v58  ;;  %9462 = vmatprep.subr.msk.mxu1 %vm630_vm0, %v320_v31  ;;  %v10361_v51 = vunpack.i.l.bf16 %v14311_v7 }
 0x476   : > { %10659 = vrot.lane.b32.xlu0 %v10653_v50, %s11954_s8  ;;  %v10663_v50 = vpack.i.bf16 %v14278_v26, %v14285_v55  ;;  %v14341_v52 = vmax.f32 %v3058_v2, 0.0  ;;  %v14352_v56 = vmax.f32 %v3059_v15, 0.0  ;;  %v4114_v44 = vsel %vm2014_vm8, %v4082_v16, %v10377_v19  ;;  %9463 = vmatpush3.msk.msra.mxu1 %vm630_vm0, %v320_v31 }
 0x477   : > { %v10400_v57 = vpop.permute.xlu1 %10399  ;;  %v14347_v13 = vsel %vm1090_vm2, %v3254_v10, %v3255_v47  ;;  %v14360_v2 = vsel %vm1090_vm2, %v3255_v47, 0.0  ;;  %v10362_v8 = vunpack.i.h.bf16 %v14311_v7  ;;  %v10381_v15 = vunpack.i.l.bf16 %v14322_v25 }
 0x478   : > { %v10402_v21 = vunpack.i.h.bf16 %v10400_v57  ;;  %v10401_v28 = vunpack.i.l.bf16 %v10400_v57  ;;  %v10385_v48 = vpop.permute.xlu0 %10384  ;;  %v3289_v49 = vrot.slane %v14341_v52, 7  ;;  %v3290_v10 = vrot.slane %v14352_v56, 7 }
 0x479   : > { %v10386_v43 = vunpack.i.l.bf16 %v10385_v48  ;;  %v10387_v60 = vunpack.i.h.bf16 %v10385_v48  ;;  %10684 = vrot.lane.b32.xlu1 %v10678_v35, %s11958_s15  ;;  %v10688_v35 = vpack.i.bf16 %v14360_v2, %v14347_v13  ;;  %v3989_v47 = vsel %vm1882_vm4, %v13901_v30, %v10361_v51 }
 0x47a   : > { %10664 = vrot.lane.b32.xlu0 %v10663_v50, %s17654_s17  ;;  %v4145_v1 = vsel %vm2047_vm9, %v4113_v20, %v10401_v28  ;;  %v4146_v18 = vsel %vm2047_vm9, %v4114_v44, %v10402_v21  ;;  %v3291_v21 = vsel %vm994_vm3, %v3289_v49, %v3290_v10  ;;  %v3293_v7 = vsel %vm994_vm3, 0.0, %v3289_v49 }
 0x47b   : > { %v10405_v26 = vpop.permute.xlu1 %10404  ;;  %v4177_v55 = vsel %vm2080_vm10, %v4145_v1, %v10386_v43  ;;  %v4178_v57 = vsel %vm2080_vm10, %v4146_v18, %v10387_v60  ;;  %v3990_v28 = vsel %vm1882_vm4, %v13898_v24, %v10362_v8  ;;  %v10382_v48 = vunpack.i.h.bf16 %v14322_v25 }
 0x47c   : > { %v10390_v58 = vpop.permute.xlu0 %10389  ;;  %4374 = vmatmul.mubr.f32.gmra.mxu0 %v4177_v55  ;;  %v10406_v16 = vunpack.i.l.bf16 %v10405_v26  ;;  %v4019_v30 = vsel %vm1915_vm5, %v3989_v47, %v10381_v15  ;;  %v10407_v1 = vunpack.i.h.bf16 %v10405_v26  ;;  %v10703_v55 = vpack.i.bf16 %v3291_v21, %v3293_v7 }
 0x47d   : > { %9071 = vmatprep.mubr.msk.f32.mxu0 %vm1882_vm4, %v13945_v39  ;;  %10689 = vrot.lane.b32.xlu1 %v10688_v35, %s11959_s16  ;;  %v10391_v43 = vunpack.i.l.bf16 %v10390_v58  ;;  %v4020_v24 = vsel %vm1915_vm5, %v3990_v28, %v10382_v48  ;;  %v10392_v25 = vunpack.i.h.bf16 %v10390_v58  ;;  %v3294_v47 = vrot.slane %v14341_v52, 1 }
 0x47e   : > { %10669 = vrot.lane.b32.xlu0 %v10663_v50, %s11956_s22  ;;  %v4052_v26 = vsel %vm1948_vm6, %v4020_v24, %v10407_v1 }
 0x47f   : > { %v10410_v19 = vpop.permute.xlu1 %10409  ;;  %v4084_v28 = vsel %vm1981_vm7, %v4052_v26, %v10392_v25 }
 0x480   : > { %v14377_v39 = vpop.permute.xlu0 %10394  ;;  %4379 = vmatmul.mubr.f32.gmra.mxu0 %v4178_v57  ;;  %v10411_v31 = vunpack.i.l.bf16 %v10410_v19 }
 0x481   : > { %9072 = vmatprep.mubr.msk.f32.mxu0 %vm1882_vm4, %v13964_v11  ;;  %10694 = vrot.lane.b32.xlu1 %v10688_v35, %s11954_s8  ;;  %v4051_v11 = vsel %vm1948_vm6, %v4019_v30, %v10406_v16  ;;  %v10412_v35 = vunpack.i.h.bf16 %v10410_v19  ;;  %v10396_v48 = vunpack.i.l.bf16 %v14377_v39  ;;  %v3295_v30 = vrot.slane %v14352_v56, 1 }
 0x482   : > { %10674 = vrot.lane.b32.xlu0 %v10663_v50, %s11957_s23  ;;  %v10698_v50 = vpack.i.bf16 %v14352_v56, %v14341_v52  ;;  %v4083_v51 = vsel %vm1981_vm7, %v4051_v11, %v10391_v43  ;;  %v10397_v11 = vunpack.i.h.bf16 %v14377_v39 }
 0x483   : > { %v10415_v20 = vpop.permute.xlu1 %10414  ;;  %v4115_v8 = vsel %vm2014_vm8, %v4083_v51, %v10411_v31 }
 0x484   : > { %v10435_v60 = vpop.permute.xlu0 %10434  ;;  %v10416_v43 = vunpack.i.l.bf16 %v10415_v20 }
 0x485   : > { %v10436_v44 = vunpack.i.l.bf16 %v10435_v60  ;;  %10699 = vrot.lane.b32.xlu1 %v10698_v50, %s17654_s17  ;;  %v10437_v15 = vunpack.i.h.bf16 %v10435_v60  ;;  %v14412_v60 = vsel %vm1090_vm2, %v3294_v47, %v3295_v30 }
 0x486   : > { %10704 = vrot.lane.b32.xlu0 %v10703_v55, %s17655_s20 }
 0x487   : > { %v10420_v18 = vpop.permute.xlu1 %10419  ;;  %v4147_v57 = vsel %vm2047_vm9, %v4115_v8, %v10436_v44 }
 0x488   : > { %v10421_v49 = vunpack.i.l.bf16 %v10420_v18  ;;  %v10440_v10 = vpop.permute.xlu0 %10439  ;;  %v10422_v16 = vunpack.i.h.bf16 %v10420_v18 }
 0x489   : > { %3666 = vrot.lane.b32.xlu1 %v14341_v52, %s11956_s22  ;;  %v10441_v31 = vunpack.i.l.bf16 %v10440_v10  ;;  %v10417_v52 = vunpack.i.h.bf16 %v10415_v20  ;;  %v10442_v24 = vunpack.i.h.bf16 %v10440_v10  ;;  %v3992_v20 = vsel %vm1882_vm4, %v13926_v23, %v10397_v11 }
 0x48a   : > { %3570 = vrot.lane.b32.xlu0 %v3293_v7, %s11958_s15  ;;  %v4179_v58 = vsel %vm2080_vm10, %v4147_v57, %v10421_v49  ;;  %v4116_v7 = vsel %vm2014_vm8, %v4084_v28, %v10412_v35 }
 0x48b   : > { %v10425_v19 = vpop.permute.xlu1 %10424  ;;  %4384 = vmatmul.mubr.f32.gmra.mxu0 %v4179_v58  ;;  %v4148_v55 = vsel %vm2047_vm9, %v4116_v7, %v10437_v15 }
 0x48c   : > { %v10445_v1 = vpop.permute.xlu0 %10444  ;;  %9073 = vmatprep.mubr.msk.f32.mxu0 %vm1882_vm4, %v13970_v38  ;;  %v10426_v44 = vunpack.i.l.bf16 %v10425_v19  ;;  %v4180_v50 = vsel %vm2080_vm10, %v4148_v55, %v10422_v16  ;;  %v3991_v38 = vsel %vm1882_vm4, %v13929_v27, %v10396_v48  ;;  %v10427_v51 = vunpack.i.h.bf16 %v10425_v19 }
 0x48d   : > { %3572 = vrot.lane.b32.xlu1 %v3291_v21, %s11958_s15  ;;  %v4021_v25 = vsel %vm1915_vm5, %v3991_v38, %v10416_v43  ;;  %v10446_v35 = vunpack.i.l.bf16 %v10445_v1  ;;  %v4022_v27 = vsel %vm1915_vm5, %v3992_v20, %v10417_v52  ;;  %v14430_v21 = vsel %vm1090_vm2, %v3295_v30, 0.0 }
 0x48e   : > { %3763 = vrot.lane.b32.xlu0 %v14412_v60, %s11959_s16  ;;  %v4053_v26 = vsel %vm1948_vm6, %v4021_v25, %v10441_v31  ;;  %v4054_v10 = vsel %vm1948_vm6, %v4022_v27, %v10442_v24  ;;  %v10447_v8 = vunpack.i.h.bf16 %v10445_v1 }
 0x48f   : > { %v10430_v39 = vpop.permute.xlu1 %10429  ;;  %4389 = vmatmul.mubr.f32.gmra.mxu0 %v4180_v50  ;;  %v4085_v49 = vsel %vm1981_vm7, %v4053_v26, %v10426_v44  ;;  %v4086_v23 = vsel %vm1981_vm7, %v4054_v10, %v10427_v51 }
 0x490   : > { %v10450_v18 = vpop.permute.xlu0 %10449  ;;  %9074 = vmatprep.mubr.msk.f32.mxu0 %vm1882_vm4, %v13993_v29  ;;  %v4117_v58 = vsel %vm2014_vm8, %v4085_v49, %v10446_v35  ;;  %v4118_v30 = vsel %vm2014_vm8, %v4086_v23, %v10447_v8  ;;  %v10431_v43 = vunpack.i.l.bf16 %v10430_v39  ;;  %v10432_v52 = vunpack.i.h.bf16 %v10430_v39 }
 0x491   : > { %3765 = vrot.lane.b32.xlu1 %v14430_v21, %s11959_s16  ;;  %v10451_v11 = vunpack.i.l.bf16 %v10450_v18  ;;  %v10452_v24 = vunpack.i.h.bf16 %v10450_v18 }
 0x492   : > { %3668 = vrot.lane.b32.xlu0 %v14352_v56, %s11956_s22  ;;  %v3993_v44 = vsel %vm1882_vm4, %v13955_v40, %v10431_v43 }
 0x493   : > { %v10470_v29 = vpop.permute.xlu1 %10469  ;;  %v4023_v25 = vsel %vm1915_vm5, %v3993_v44, %v10451_v11 }
 0x494   : > { %v10472_v15 = vunpack.i.h.bf16 %v10470_v29  ;;  %v10471_v57 = vunpack.i.l.bf16 %v10470_v29  ;;  %v10455_v47 = vpop.permute.xlu0 %10454 }
 0x495   : > { %v10456_v16 = vunpack.i.l.bf16 %v10455_v47  ;;  %v10457_v48 = vunpack.i.h.bf16 %v10455_v47 }
 0x496   : > { %v4149_v28 = vsel %vm2047_vm9, %v4117_v58, %v10471_v57  ;;  %v4150_v7 = vsel %vm2047_vm9, %v4118_v30, %v10472_v15 }
 0x497   : > { %v10475_v19 = vpop.permute.xlu1 %10474  ;;  %v4181_v56 = vsel %vm2080_vm10, %v4149_v28, %v10456_v16  ;;  %v4182_v55 = vsel %vm2080_vm10, %v4150_v7, %v10457_v48 }
 0x498   : > { %v10460_v1 = vpop.permute.xlu0 %10459  ;;  %4394 = vmatmul.mubr.f32.gmra.mxu0 %v4181_v56  ;;  %v10476_v50 = vunpack.i.l.bf16 %v10475_v19  ;;  %v10477_v26 = vunpack.i.h.bf16 %v10475_v19 }
 0x499   : > { %9075 = vmatprep.mubr.msk.f32.mxu0 %vm1882_vm4, %v13999_v36  ;;  %v10461_v51 = vunpack.i.l.bf16 %v10460_v1  ;;  %v3994_v36 = vsel %vm1882_vm4, %v13952_v62, %v10432_v52  ;;  %v10462_v10 = vunpack.i.h.bf16 %v10460_v1 }
 0x49a   : > { %v4055_v39 = vsel %vm1948_vm6, %v4023_v25, %v10476_v50  ;;  %v4024_v49 = vsel %vm1915_vm5, %v3994_v36, %v10452_v24 }
 0x49b   : > { %v10480_v31 = vpop.permute.xlu1 %10479  ;;  %v4087_v8 = vsel %vm1981_vm7, %v4055_v39, %v10461_v51  ;;  %v4056_v18 = vsel %vm1948_vm6, %v4024_v49, %v10477_v26 }
 0x49c   : > { %v10465_v38 = vpop.permute.xlu0 %10464  ;;  %4399 = vmatmul.mubr.f32.gmra.mxu0 %v4182_v55  ;;  %v10481_v35 = vunpack.i.l.bf16 %v10480_v31  ;;  %v10482_v29 = vunpack.i.h.bf16 %v10480_v31  ;;  %v4088_v28 = vsel %vm1981_vm7, %v4056_v18, %v10462_v10 }
 0x49d   : > { %9076 = vmatprep.mubr.msk.f32.mxu0 %vm1882_vm4, %v14027_v37  ;;  %v10466_v48 = vunpack.i.l.bf16 %v10465_v38  ;;  %v10467_v1 = vunpack.i.h.bf16 %v10465_v38 }
 0x49e   : > { %v4119_v57 = vsel %vm2014_vm8, %v4087_v8, %v10481_v35  ;;  %v4120_v43 = vsel %vm2014_vm8, %v4088_v28, %v10482_v29 }
 0x49f   : > { %v10485_v20 = vpop.permute.xlu1 %10484  ;;  %v3995_v44 = vsel %vm1882_vm4, %v13983_v4, %v10466_v48  ;;  %v3996_v38 = vsel %vm1882_vm4, %v13980_v33, %v10467_v1 }
 0x4a0   : > { %v10505_v27 = vpop.permute.xlu0 %10504  ;;  %v10486_v56 = vunpack.i.l.bf16 %v10485_v20  ;;  %v10487_v31 = vunpack.i.h.bf16 %v10485_v20 }
 0x4a1   : > { %v10506_v40 = vunpack.i.l.bf16 %v10505_v27  ;;  %v10507_v62 = vunpack.i.h.bf16 %v10505_v27 }
 0x4a2   : > { %v4025_v25 = vsel %vm1915_vm5, %v3995_v44, %v10486_v56  ;;  %v4026_v26 = vsel %vm1915_vm5, %v3996_v38, %v10487_v31  ;;  %v17660_v31 = vld [vmem:[#allocation52_spill] sm:$0xff] }
 0x4a3   : > { %v10490_v37 = vpop.permute.xlu1 %10489  ;;  %v4151_v47 = vsel %vm2047_vm9, %v4119_v57, %v10506_v40  ;;  %v4152_v11 = vsel %vm2047_vm9, %v4120_v43, %v10507_v62 }
 0x4a4   : > { %v10491_v23 = vunpack.i.l.bf16 %v10490_v37  ;;  %v10510_v15 = vpop.permute.xlu0 %10509  ;;  %v10492_v16 = vunpack.i.h.bf16 %v10490_v37 }
 0x4a5   : > { %v10511_v7 = vunpack.i.l.bf16 %v10510_v15  ;;  %v10512_v50 = vunpack.i.h.bf16 %v10510_v15 }
 0x4a6   : > { %v4183_v58 = vsel %vm2080_vm10, %v4151_v47, %v10491_v23  ;;  %v4184_v52 = vsel %vm2080_vm10, %v4152_v11, %v10492_v16  ;;  %v319_v16 = vld [vmem:[%s17436_s3 + $0x20] sm:$0xff] }
 0x4a7   : > { %v10495_v19 = vpop.permute.xlu1 %10494  ;;  %4404 = vmatmul.mubr.f32.gmra.mxu0 %v4183_v58  ;;  %v4057_v20 = vsel %vm1948_vm6, %v4025_v25, %v10511_v7  ;;  %v4058_v39 = vsel %vm1948_vm6, %v4026_v26, %v10512_v50  ;;  %9464 = vmatprep.subr.mxu1 %v319_v16 }
 0x4a8   : > { %v10515_v30 = vpop.permute.xlu0 %10514  ;;  %9077 = vmatprep.mubr.msk.f32.mxu0 %vm1882_vm4, %v14036_v45  ;;  %v10496_v55 = vunpack.i.l.bf16 %v10495_v19  ;;  %v10497_v51 = vunpack.i.h.bf16 %v10495_v19  ;;  %9465 = vmatpush3.msra.mxu1 %v319_v16 }
 0x4a9   : > { %v10516_v36 = vunpack.i.l.bf16 %v10515_v30  ;;  %v10517_v35 = vunpack.i.h.bf16 %v10515_v30  ;;  %6344 = vmatprep.subr.mxu1 %v17608_v53 }
 0x4aa   : > { %v4089_v4 = vsel %vm1981_vm7, %v4057_v20, %v10496_v55  ;;  %v4090_v40 = vsel %vm1981_vm7, %v4058_v39, %v10497_v51 }
 0x4ab   : > { %v10500_v24 = vpop.permute.xlu1 %10499  ;;  %4409 = vmatmul.mubr.f32.gmra.mxu0 %v4184_v52  ;;  %v4121_v37 = vsel %vm2014_vm8, %v4089_v4, %v10516_v36  ;;  %v4122_v15 = vsel %vm2014_vm8, %v4090_v40, %v10517_v35 }
 0x4ac   : > { %v10520_v45 = vpop.permute.xlu0 %10519  ;;  %9078 = vmatprep.mubr.msk.f32.mxu0 %vm1882_vm4, %v14093_v61  ;;  %v10501_v57 = vunpack.i.l.bf16 %v10500_v24  ;;  %v10502_v19 = vunpack.i.h.bf16 %v10500_v24 }
 0x4ad   : > { %v10521_v58 = vunpack.i.l.bf16 %v10520_v45 }
 0x4ae   : > { %v3997_v56 = vsel %vm1882_vm4, %v14011_v17, %v10501_v57  ;;  %v3998_v55 = vsel %vm1882_vm4, %v17660_v31, %v10502_v19 }
 0x4af   : > { %v10540_v27 = vpop.permute.xlu1 %10539  ;;  %v4027_v1 = vsel %vm1915_vm5, %v3997_v56, %v10521_v58 }
 0x4b0   : > { %v10542_v49 = vunpack.i.h.bf16 %v10540_v27  ;;  %v10541_v10 = vunpack.i.l.bf16 %v10540_v27  ;;  %v10525_v8 = vpop.permute.xlu0 %10524 }
 0x4b1   : > { %v10526_v61 = vunpack.i.l.bf16 %v10525_v8  ;;  %v10527_v18 = vunpack.i.h.bf16 %v10525_v8 }
 0x4b2   : > { %v4153_v33 = vsel %vm2047_vm9, %v4121_v37, %v10541_v10  ;;  %v4154_v47 = vsel %vm2047_vm9, %v4122_v15, %v10542_v49 }
 0x4b3   : > { %v10545_v29 = vpop.permute.xlu1 %10544  ;;  %v4185_v23 = vsel %vm2080_vm10, %v4153_v33, %v10526_v61  ;;  %v4186_v48 = vsel %vm2080_vm10, %v4154_v47, %v10527_v18 }
 0x4b4   : > { %v10530_v62 = vpop.permute.xlu0 %10529  ;;  %4414 = vmatmul.mubr.f32.gmra.mxu0 %v4185_v23  ;;  %v10546_v30 = vunpack.i.l.bf16 %v10545_v29  ;;  %v10547_v52 = vunpack.i.h.bf16 %v10545_v29 }
 0x4b5   : > { %9079 = vmatprep.mubr.msk.f32.mxu0 %vm1882_vm4, %v14099_v5  ;;  %v10522_v5 = vunpack.i.h.bf16 %v10520_v45  ;;  %v10531_v7 = vunpack.i.l.bf16 %v10530_v62  ;;  %v10532_v51 = vunpack.i.h.bf16 %v10530_v62 }
 0x4b6   : > { %v4059_v44 = vsel %vm1948_vm6, %v4027_v1, %v10546_v30 }
 0x4b7   : > { %v10550_v28 = vpop.permute.xlu1 %10549  ;;  %v4028_v25 = vsel %vm1915_vm5, %v3998_v55, %v10522_v5  ;;  %v4091_v38 = vsel %vm1981_vm7, %v4059_v44, %v10531_v7 }
 0x4b8   : > { %v10535_v43 = vpop.permute.xlu0 %10534  ;;  %4419 = vmatmul.mubr.f32.gmra.mxu0 %v4186_v48  ;;  %v10551_v17 = vunpack.i.l.bf16 %v10550_v28  ;;  %v4060_v45 = vsel %vm1948_vm6, %v4028_v25, %v10547_v52  ;;  %v10552_v20 = vunpack.i.h.bf16 %v10550_v28 }
 0x4b9   : > { %9080 = vmatprep.mubr.msk.f32.mxu0 %vm1882_vm4, %v14142_v9  ;;  %v4092_v49 = vsel %vm1981_vm7, %v4060_v45, %v10532_v51  ;;  %v10536_v10 = vunpack.i.l.bf16 %v10535_v43  ;;  %v10537_v18 = vunpack.i.h.bf16 %v10535_v43 }
 0x4ba   : > { %v4123_v4 = vsel %vm2014_vm8, %v4091_v38, %v10551_v17  ;;  %v4124_v33 = vsel %vm2014_vm8, %v4092_v49, %v10552_v20 }
 0x4bb   : > { %v10555_v11 = vpop.permute.xlu1 %10554  ;;  %v3999_v47 = vsel %vm1882_vm4, %v14068_v46, %v10536_v10  ;;  %v4000_v19 = vsel %vm1882_vm4, %v14065_v42, %v10537_v18 }
 0x4bc   : > { %v10575_v50 = vpop.permute.xlu0 %10574  ;;  %v10556_v61 = vunpack.i.l.bf16 %v10555_v11  ;;  %v10557_v15 = vunpack.i.h.bf16 %v10555_v11 }
 0x4bd   : > { %v10576_v24 = vunpack.i.l.bf16 %v10575_v50  ;;  %v10577_v39 = vunpack.i.h.bf16 %v10575_v50 }
 0x4be   : > { %v4029_v28 = vsel %vm1915_vm5, %v3999_v47, %v10556_v61  ;;  %v4030_v43 = vsel %vm1915_vm5, %v4000_v19, %v10557_v15 }
 0x4bf   : > { %v10560_v9 = vpop.permute.xlu1 %10559  ;;  %v4155_v35 = vsel %vm2047_vm9, %v4123_v4, %v10576_v24  ;;  %v4156_v23 = vsel %vm2047_vm9, %v4124_v33, %v10577_v39 }
 0x4c0   : > { %v10561_v36 = vunpack.i.l.bf16 %v10560_v9  ;;  %v10580_v26 = vpop.permute.xlu0 %10579  ;;  %v10562_v27 = vunpack.i.h.bf16 %v10560_v9 }
 0x4c1   : > { %v10581_v29 = vunpack.i.l.bf16 %v10580_v26  ;;  %v10582_v16 = vunpack.i.h.bf16 %v10580_v26 }
 0x4c2   : > { %v4187_v40 = vsel %vm2080_vm10, %v4155_v35, %v10561_v36  ;;  %v4188_v62 = vsel %vm2080_vm10, %v4156_v23, %v10562_v27 }
 0x4c3   : > { %v10565_v8 = vpop.permute.xlu1 %10564  ;;  %4424 = vmatmul.mubr.f32.gmra.mxu0 %v4187_v40  ;;  %v4061_v56 = vsel %vm1948_vm6, %v4029_v28, %v10581_v29  ;;  %v4062_v5 = vsel %vm1948_vm6, %v4030_v43, %v10582_v16  ;;  %v17661_v40 = vld [vmem:[#allocation53_spill] sm:$0xff] }
 0x4c4   : > { %v10585_v37 = vpop.permute.xlu0 %10584  ;;  %9081 = vmatprep.mubr.msk.f32.mxu0 %vm1882_vm4, %v14151_v54  ;;  %v10566_v57 = vunpack.i.l.bf16 %v10565_v8  ;;  %v10567_v48 = vunpack.i.h.bf16 %v10565_v8 }
 0x4c5   : > { %v10586_v30 = vunpack.i.l.bf16 %v10585_v37  ;;  %v10587_v1 = vunpack.i.h.bf16 %v10585_v37 }
 0x4c6   : > { %v4093_v46 = vsel %vm1981_vm7, %v4061_v56, %v10566_v57  ;;  %v4094_v11 = vsel %vm1981_vm7, %v4062_v5, %v10567_v48 }
 0x4c7   : > { %v10570_v58 = vpop.permute.xlu1 %10569  ;;  %4429 = vmatmul.mubr.f32.gmra.mxu0 %v4188_v62  ;;  %v4125_v44 = vsel %vm2014_vm8, %v4093_v46, %v10586_v30  ;;  %v4126_v25 = vsel %vm2014_vm8, %v4094_v11, %v10587_v1 }
 0x4c8   : > { %v10590_v54 = vpop.permute.xlu0 %10589  ;;  %9082 = vmatprep.mubr.msk.f32.mxu0 %vm1882_vm4, %v14206_v59  ;;  %v10571_v38 = vunpack.i.l.bf16 %v10570_v58  ;;  %v10572_v36 = vunpack.i.h.bf16 %v10570_v58 }
 0x4c9   : > { %v10591_v26 = vunpack.i.l.bf16 %v10590_v54  ;;  %v10592_v35 = vunpack.i.h.bf16 %v10590_v54 }
 0x4ca   : > { %v4001_v4 = vsel %vm1882_vm4, %v14121_v3, %v10571_v38 }
 0x4cb   : > { %v10610_v7 = vpop.permute.xlu1 %10609  ;;  %v4031_v8 = vsel %vm1915_vm5, %v4001_v4, %v10591_v26 }
 0x4cc   : > { %v10612_v31 = vunpack.i.h.bf16 %v10610_v7  ;;  %v10611_v55 = vunpack.i.l.bf16 %v10610_v7  ;;  %v10595_v52 = vpop.permute.xlu0 %10594 }
 0x4cd   : > { %v10596_v59 = vunpack.i.l.bf16 %v10595_v52  ;;  %v10597_v17 = vunpack.i.h.bf16 %v10595_v52 }
 0x4ce   : > { %v4157_v42 = vsel %vm2047_vm9, %v4125_v44, %v10611_v55  ;;  %v4158_v51 = vsel %vm2047_vm9, %v4126_v25, %v10612_v31 }
 0x4cf   : > { %v10615_v50 = vpop.permute.xlu1 %10614  ;;  %v4189_v24 = vsel %vm2080_vm10, %v4157_v42, %v10596_v59  ;;  %v4190_v20 = vsel %vm2080_vm10, %v4158_v51, %v10597_v17 }
 0x4d0   : > { %4434 = vmatmul.mubr.f32.gmra.mxu0 %v4189_v24  ;;  %v10600_v9 = vpop.permute.xlu0 %10599  ;;  %v10616_v39 = vunpack.i.l.bf16 %v10615_v50  ;;  %v10617_v49 = vunpack.i.h.bf16 %v10615_v50 }
 0x4d1   : > { %9083 = vmatprep.mubr.msk.f32.mxu0 %vm1882_vm4, %v14212_v22  ;;  %v4002_v22 = vsel %vm1882_vm4, %v17661_v40, %v10572_v36  ;;  %v10601_v61 = vunpack.i.l.bf16 %v10600_v9 }
 0x4d2   : > { %v4063_v37 = vsel %vm1948_vm6, %v4031_v8, %v10616_v39  ;;  %v4032_v18 = vsel %vm1915_vm5, %v4002_v22, %v10592_v35 }
 0x4d3   : > { %v10620_v45 = vpop.permute.xlu1 %10619  ;;  %v4064_v3 = vsel %vm1948_vm6, %v4032_v18, %v10617_v49  ;;  %v4095_v62 = vsel %vm1981_vm7, %v4063_v37, %v10601_v61 }
 0x4d4   : > { %4439 = vmatmul.mubr.f32.gmra.mxu0 %v4190_v20  ;;  %v10605_v10 = vpop.permute.xlu0 %10604  ;;  %v10621_v33 = vunpack.i.l.bf16 %v10620_v45  ;;  %v10622_v23 = vunpack.i.h.bf16 %v10620_v45 }
 0x4d5   : > { %9084 = vmatprep.mubr.msk.f32.mxu0 %vm1882_vm4, %v14283_v63  ;;  %v10602_v63 = vunpack.i.h.bf16 %v10600_v9  ;;  %v10606_v5 = vunpack.i.l.bf16 %v10605_v10  ;;  %v10607_v52 = vunpack.i.h.bf16 %v10605_v10 }
 0x4d6   : > { %v4127_v58 = vsel %vm2014_vm8, %v4095_v62, %v10621_v33 }
 0x4d7   : > { %v10625_v27 = vpop.permute.xlu1 %10624  ;;  %v4096_v28 = vsel %vm1981_vm7, %v4064_v3, %v10602_v63  ;;  %v4003_v59 = vsel %vm1882_vm4, %v14181_v14, %v10606_v5  ;;  %v4004_v9 = vsel %vm1882_vm4, %v14178_v0, %v10607_v52 }
 0x4d8   : > { %v4128_v43 = vsel %vm2014_vm8, %v4096_v28, %v10622_v23  ;;  %v10626_v7 = vunpack.i.l.bf16 %v10625_v27  ;;  %v10627_v44 = vunpack.i.h.bf16 %v10625_v27 }
 0x4da   : > { %v4033_v42 = vsel %vm1915_vm5, %v4003_v59, %v10626_v7 }
 0x4db   : > { %v10630_v29 = vpop.permute.xlu1 %10629 }
 0x4dc   : > { %v10631_v15 = vunpack.i.l.bf16 %v10630_v29  ;;  %v10645_v57 = vpop.permute.xlu0 %10644  ;;  %v10632_v19 = vunpack.i.h.bf16 %v10630_v29 }
 0x4dd   : > { %v10647_v47 = vunpack.i.h.bf16 %v10645_v57  ;;  %v10646_v16 = vunpack.i.l.bf16 %v10645_v57 }
 0x4df   : > { %v10635_v48 = vpop.permute.xlu1 %10634  ;;  %v4159_v54 = vsel %vm2047_vm9, %v4127_v58, %v10646_v16  ;;  %v4160_v46 = vsel %vm2047_vm9, %v4128_v43, %v10647_v47 }
 0x4e0   : > { %v10650_v56 = vpop.permute.xlu0 %10649  ;;  %v4191_v30 = vsel %vm2080_vm10, %v4159_v54, %v10631_v15  ;;  %v4192_v31 = vsel %vm2080_vm10, %v4160_v46, %v10632_v19  ;;  %v10636_v17 = vunpack.i.l.bf16 %v10635_v48  ;;  %v10637_v45 = vunpack.i.h.bf16 %v10635_v48 }
 0x4e1   : > { %4444 = vmatmul.mubr.f32.gmra.mxu0 %v4191_v30  ;;  %v10651_v55 = vunpack.i.l.bf16 %v10650_v56  ;;  %v10652_v50 = vunpack.i.h.bf16 %v10650_v56 }
 0x4e2   : > { %9085 = vmatprep.mubr.msk.f32.mxu0 %vm1882_vm4, %v14292_v32 }
 0x4e3   : > { %v10640_v1 = vpop.permute.xlu1 %10639  ;;  %v4065_v24 = vsel %vm1948_vm6, %v4033_v42, %v10651_v55 }
 0x4e4   : > { %v10655_v11 = vpop.permute.xlu0 %10654  ;;  %v4097_v14 = vsel %vm1981_vm7, %v4065_v24, %v10636_v17  ;;  %v10641_v0 = vunpack.i.l.bf16 %v10640_v1  ;;  %v10642_v61 = vunpack.i.h.bf16 %v10640_v1 }
 0x4e5   : > { %4449 = vmatmul.mubr.f32.gmra.mxu0 %v4192_v31  ;;  %v10656_v25 = vunpack.i.l.bf16 %v10655_v11  ;;  %v10657_v26 = vunpack.i.h.bf16 %v10655_v11 }
 0x4e6   : > { %9086 = vmatprep.mubr.msk.f32.mxu0 %vm1882_vm4, %v14347_v13  ;;  %v4034_v13 = vsel %vm1915_vm5, %v4004_v9, %v10627_v44  ;;  %v4005_v62 = vsel %vm1882_vm4, %v14259_v34, %v10641_v0  ;;  %v4006_v58 = vsel %vm1882_vm4, %v14256_v41, %v10642_v61 }
 0x4e7   : > { %v10680_v51 = vpop.permute.xlu1 %10679  ;;  %v4066_v36 = vsel %vm1948_vm6, %v4034_v13, %v10652_v50  ;;  %v4129_v35 = vsel %vm2014_vm8, %v4097_v14, %v10656_v25 }
 0x4e8   : > { %v10660_v32 = vpop.permute.xlu0 %10659  ;;  %v10681_v38 = vunpack.i.l.bf16 %v10680_v51  ;;  %v10682_v27 = vunpack.i.h.bf16 %v10680_v51  ;;  %v4098_v8 = vsel %vm1981_vm7, %v4066_v36, %v10637_v45 }
 0x4e9   : > { %v10661_v37 = vunpack.i.l.bf16 %v10660_v32  ;;  %v4130_v18 = vsel %vm2014_vm8, %v4098_v8, %v10657_v26  ;;  %v10662_v63 = vunpack.i.h.bf16 %v10660_v32 }
 0x4ea   : > { %v4161_v40 = vsel %vm2047_vm9, %v4129_v35, %v10681_v38  ;;  %v4162_v3 = vsel %vm2047_vm9, %v4130_v18, %v10682_v27  ;;  %v17662_v35 = vld [vmem:[#allocation13_spill] sm:$0xff]  ;;  %v17665_v18 = vld [vmem:[#allocation14_spill] sm:$0xff] }
 0x4eb   : > { %v10685_v4 = vpop.permute.xlu1 %10684  ;;  %v4036_v54 = vsel %vm1915_vm5, %v4006_v58, %v10662_v63  ;;  %v17663_v27 = vld [vmem:[#allocation17_spill] sm:$0xff]  ;;  %v17666_v63 = vld [vmem:[#allocation23_spill] sm:$0xff] }
 0x4ec   : > { %v10665_v20 = vpop.permute.xlu0 %10664  ;;  %v10686_v29 = vunpack.i.l.bf16 %v10685_v4  ;;  %v10687_v23 = vunpack.i.h.bf16 %v10685_v4 }
 0x4ed   : > { %v10666_v39 = vunpack.i.l.bf16 %v10665_v20  ;;  %v10667_v22 = vunpack.i.h.bf16 %v10665_v20 }
 0x4ee   : > { %v4068_v34 = vsel %vm1948_vm6, %v4036_v54, %v10687_v23 }
 0x4ef   : > { %v4193_v49 = vsel %vm2080_vm10, %v4161_v40, %v10666_v39  ;;  %v10690_v33 = vpop.permute.xlu1 %10689  ;;  %v4194_v57 = vsel %vm2080_vm10, %v4162_v3, %v10667_v22  ;;  %v17664_v22 = vld [vmem:[#allocation22_spill] sm:$0xff] }
 0x4f0   : > { %v10670_v10 = vpop.permute.xlu0 %10669  ;;  %4454 = vmatmul.mubr.f32.gmra.mxu0 %v4193_v49  ;;  %v10691_v56 = vunpack.i.l.bf16 %v10690_v33  ;;  %v10692_v43 = vunpack.i.h.bf16 %v10690_v33 }
 0x4f1   : > { %9087 = vmatprep.mubr.msk.f32.mxu0 %vm1882_vm4, %v14360_v2  ;;  %v10671_v15 = vunpack.i.l.bf16 %v10670_v10  ;;  %v10672_v47 = vunpack.i.h.bf16 %v10670_v10  ;;  %v4035_v2 = vsel %vm1915_vm5, %v4005_v62, %v10661_v37 }
 0x4f2   : > { %v4067_v19 = vsel %vm1948_vm6, %v4035_v2, %v10686_v29 }
 0x4f3   : > { %v10695_v28 = vpop.permute.xlu1 %10694  ;;  %v4099_v46 = vsel %vm1981_vm7, %v4067_v19, %v10671_v15  ;;  %v4100_v41 = vsel %vm1981_vm7, %v4068_v34, %v10672_v47 }
 0x4f4   : > { %v10675_v16 = vpop.permute.xlu0 %10674  ;;  %4459 = vmatmul.mubr.f32.gmra.mxu0 %v4194_v57  ;;  %v10696_v5 = vunpack.i.l.bf16 %v10695_v28  ;;  %v4131_v44 = vsel %vm2014_vm8, %v4099_v46, %v10691_v56  ;;  %v4132_v17 = vsel %vm2014_vm8, %v4100_v41, %v10692_v43  ;;  %v10697_v45 = vunpack.i.h.bf16 %v10695_v28 }
 0x4f5   : > { %v10676_v48 = vunpack.i.l.bf16 %v10675_v16  ;;  %9088 = vmatprep.mubr.msk.f32.mxu0 %vm1882_vm4, %v14412_v60  ;;  %v4325_v30 = vpop.f32.mrf.mxu0  ;;  %v10677_v32 = vunpack.i.h.bf16 %v10675_v16 }
 0x4f6   : > { %4516 = vrot.lane.b32.xlu0 %v4325_v30, %s17506_s19 }
 0x4f7   : > { %v4327_v1 = vpop.f32.mrf.mxu0  ;;  %v10700_v60 = vpop.permute.xlu1 %10699  ;;  %v4007_v55 = vsel %vm1882_vm4, %v14317_v6, %v10676_v48  ;;  %v4008_v20 = vsel %vm1882_vm4, %v14314_v12, %v10677_v32 }
 0x4f8   : > { %v10705_v7 = vpop.permute.xlu0 %10704  ;;  %v10701_v52 = vunpack.i.l.bf16 %v10700_v60  ;;  %v10702_v50 = vunpack.i.h.bf16 %v10700_v60  ;;  %v4037_v51 = vsel %vm1915_vm5, %v4007_v55, %v10696_v5 }
 0x4f9   : > { %v10707_v11 = vunpack.i.h.bf16 %v10705_v7  ;;  %v10706_v31 = vunpack.i.l.bf16 %v10705_v7  ;;  %v4330_v59 = vpop.f32.mrf.mxu0 }
 0x4fa   : > { %4518 = vrot.lane.b32.xlu1 %v4330_v59, %s17506_s19  ;;  %v17667_v59 = vld [vmem:[#allocation12_spill] sm:$0xff] }
 0x4fb   : > { %v4163_v42 = vsel %vm2047_vm9, %v4131_v44, %v10706_v31  ;;  %v4332_v24 = vpop.f32.mrf.mxu0  ;;  %v3667_v9 = vpop.permute.xlu1 %3666  ;;  %v4164_v13 = vsel %vm2047_vm9, %v4132_v17, %v10707_v11  ;;  %v14631_v44 = vsub.s32 2, %v17667_v59 }
 0x4fc   : > { %v3571_v25 = vpop.permute.xlu0 %3570  ;;  %v4195_v38 = vsel %vm2080_vm10, %v4163_v42, %v10701_v52  ;;  %v4196_v26 = vsel %vm2080_vm10, %v4164_v13, %v10702_v50  ;;  %v11794_v42 = vld [vmem:[#allocation2] sm:$0xf] }
 0x4fd   : > { %v4069_v6 = vsel %vm1948_vm6, %v4037_v51, %v3571_v25  ;;  %4464 = vmatmul.mubr.f32.gmra.mxu0 %v4195_v38  ;;  %v14634_v17 = vrot.slane %v11794_v42, %v14631_v44  ;;  %v11795_v50 = vld [vmem:[%s17435_s2] sm:$0xf]  ;;  %v17668_v38 = vld [vmem:[#allocation16_spill] sm:$0xff] }
 0x4fe   : > { %9089 = vmatprep.mubr.msk.f32.mxu0 %vm1882_vm4, %v14430_v21  ;;  %v4101_v36 = vsel %vm1981_vm7, %v4069_v6, %v3667_v9  ;;  %v4038_v21 = vsel %vm1915_vm5, %v4008_v20, %v10697_v45  ;;  %v14641_v24 = vrot.slane %v11795_v50, %v14631_v44 }
 0x4ff   : > { %v3573_v4 = vpop.permute.xlu1 %3572 }
 0x500   : > { %v3764_v14 = vpop.permute.xlu0 %3763  ;;  %v4070_v49 = vsel %vm1948_vm6, %v4038_v21, %v3573_v4 }
 0x501   : > { %v4133_v39 = vsel %vm2014_vm8, %v4101_v36, %v3764_v14  ;;  %4469 = vmatmul.mubr.f32.gmra.mxu0 %v4196_v26  ;;  %v17670_v36 = vld [vmem:[#allocation15_spill] sm:$0xff] }
 0x502   : > { %9090 = vmatprep.mubr.msk.f32.mxu0 %vm1882_vm4, %v17662_v35  ;;  %v4165_v40 = vsel %vm2047_vm9, %v4133_v39, %v17663_v27 }
 0x503   : > { %v4197_v12 = vsel %vm2080_vm10, %v4165_v40, %v17664_v22  ;;  %v3766_v8 = vpop.permute.xlu1 %3765 }
 0x504   : > { %v3669_v0 = vpop.permute.xlu0 %3668  ;;  %v4335_v10 = vpop.f32.mrf.mxu0 }
 0x505   : > { %v4102_v61 = vsel %vm1981_vm7, %v4070_v49, %v3669_v0  ;;  %4474 = vmatmul.mubr.f32.gmra.mxu0 %v4197_v12  ;;  %4520 = vrot.lane.b32.xlu0 %v4335_v10, %s17506_s19  ;;  %v17672_v10 = vld [vmem:[#allocation19_spill] sm:$0xff] }
 0x506   : > { %v4134_v37 = vsel %vm2014_vm8, %v4102_v61, %v3766_v8  ;;  %v4337_v33 = vpop.f32.mrf.mxu0  ;;  %9091 = vmatprep.mubr.msk.f32.mxu0 %vm1882_vm4, %v17665_v18 }
 0x507   : > { %v4166_v29 = vsel %vm2047_vm9, %v4134_v37, %v17666_v63 }
 0x508   : > { %v4340_v3 = vpop.f32.mrf.mxu0  ;;  %v4198_v23 = vsel %vm2080_vm10, %v4166_v29, %v17664_v22 }
 0x509   : > { %4479 = vmatmul.mubr.f32.gmra.mxu0 %v4198_v23  ;;  %4522 = vrot.lane.b32.xlu1 %v4340_v3, %s17506_s19  ;;  %v17674_v23 = vld [vmem:[#allocation18_spill] sm:$0xff] }
 0x50a   : > { %v4342_v15 = vpop.f32.mrf.mxu0 }
 0x513   : > { %v4345_v57 = vpop.f32.mrf.mxu0 }
 0x514   : > { %4524 = vrot.lane.b32.xlu0 %v4345_v57, %s17506_s19 }
 0x515   : > { %v4347_v62 = vpop.f32.mrf.mxu0 }
 0x517   : > { %v4350_v47 = vpop.f32.mrf.mxu0 }
 0x518   : > { %4526 = vrot.lane.b32.xlu1 %v4350_v47, %s17506_s19 }
 0x519   : > { %v4352_v16 = vpop.f32.mrf.mxu0 }
 0x520   : > { %v4355_v58 = vpop.f32.mrf.mxu0 }
 0x521   : > { %4528 = vrot.lane.b32.xlu0 %v4355_v58, %s17506_s19 }
 0x522   : > { %v4357_v2 = vpop.f32.mrf.mxu0 }
 0x524   : > { %v4360_v28 = vpop.f32.mrf.mxu0 }
 0x525   : > { %4530 = vrot.lane.b32.xlu1 %v4360_v28, %s17506_s19 }
 0x526   : > { %v4362_v48 = vpop.f32.mrf.mxu0 }
 0x527   : > { %v17676_v48 = vld [vmem:[#allocation24_spill] sm:$0xff] }
 0x52f   : > { %v4365_v54 = vpop.f32.mrf.mxu0 }
 0x530   : > { %4532 = vrot.lane.b32.xlu0 %v4365_v54, %s17506_s19 }
 0x531   : > { %v4367_v19 = vpop.f32.mrf.mxu0 }
 0x533   : > { %v4370_v56 = vpop.f32.mrf.mxu0 }
 0x534   : > { %4534 = vrot.lane.b32.xlu1 %v4370_v56, %s17506_s19 }
 0x535   : > { %v4372_v30 = vpop.f32.mrf.mxu0 }
 0x53c   : > { %v4375_v34 = vpop.f32.mrf.mxu0 }
 0x53d   : > { %4536 = vrot.lane.b32.xlu0 %v4375_v34, %s17506_s19 }
 0x53e   : > { %v4377_v43 = vpop.f32.mrf.mxu0 }
 0x540   : > { %v4380_v46 = vpop.f32.mrf.mxu0 }
 0x541   : > { %4538 = vrot.lane.b32.xlu1 %v4380_v46, %s17506_s19  ;;  %v17678_v46 = vld [vmem:[#allocation25_spill] sm:$0xff] }
 0x542   : > { %v4382_v41 = vpop.f32.mrf.mxu0 }
 0x54b   : > { %v4385_v5 = vpop.f32.mrf.mxu0 }
 0x54c   : > { %4540 = vrot.lane.b32.xlu0 %v4385_v5, %s17506_s19 }
 0x54d   : > { %v4387_v1 = vpop.f32.mrf.mxu0 }
 0x54f   : > { %v4390_v7 = vpop.f32.mrf.mxu0 }
 0x550   : > { %4542 = vrot.lane.b32.xlu1 %v4390_v7, %s17506_s19 }
 0x551   : > { %v4392_v60 = vpop.f32.mrf.mxu0 }
 0x558   : > { %v4395_v11 = vpop.f32.mrf.mxu0 }
 0x559   : > { %4544 = vrot.lane.b32.xlu0 %v4395_v11, %s17506_s19 }
 0x55a   : > { %v4397_v31 = vpop.f32.mrf.mxu0 }
 0x55c   : > { %v4400_v55 = vpop.f32.mrf.mxu0 }
 0x55d   : > { %4546 = vrot.lane.b32.xlu1 %v4400_v55, %s17506_s19 }
 0x55e   : > { %v4402_v52 = vpop.f32.mrf.mxu0 }
 0x55f   : > { %v17680_v52 = vld [vmem:[#allocation26_spill] sm:$0xff] }
 0x567   : > { %v4405_v32 = vpop.f32.mrf.mxu0 }
 0x568   : > { %4548 = vrot.lane.b32.xlu0 %v4405_v32, %s17506_s19  ;;  %v4517_v25 = vpop.permute.xlu0 %4516 }
 0x569   : > { %v4407_v51 = vpop.f32.mrf.mxu0  ;;  %v14645_v9 = vsel %vm2666_vm11, %v17668_v38, %v4517_v25 }
 0x56a   : > { %17669 = vst [vmem:[#allocation52_spill] sm:$0xff] %v14645_v9  ;;  %v4648_v6 = vmul.f32 %v14634_v17, %v14645_v9 }
 0x56b   : > { %v4410_v13 = vpop.f32.mrf.mxu0 }
 0x56c   : > { %4550 = vrot.lane.b32.xlu1 %v4410_v13, %s17506_s19  ;;  %v4684_v45 = vadd.f32 %v14641_v24, %v4648_v6  ;;  %v4519_v20 = vpop.permute.xlu1 %4518  ;;  %v17682_v6 = vld [vmem:[#allocation27_spill] sm:$0xff] }
 0x56d   : > { %v4412_v14 = vpop.f32.mrf.mxu0  ;;  %v14653_v26 = vsel %vm2666_vm11, %v17670_v36, %v4519_v20 }
 0x56e   : > { %17671 = vst [vmem:[#allocation53_spill] sm:$0xff] %v14653_v26  ;;  %v4716_v4 = vmax.f32 %v4684_v45, 0.0  ;;  %v4649_v39 = vmul.f32 %v14634_v17, %v14653_v26 }
 0x570   : > { %v4685_v40 = vadd.f32 %v14641_v24, %v4649_v39  ;;  %9466 = vmatprep.mubr.msk.f32.mxu1 %vm4748_vm12, %v4716_v4 }
 0x572   : > { %v4717_v21 = vmax.f32 %v4685_v40, 0.0  ;;  %v17684_v40 = vld [vmem:[#allocation28_spill] sm:$0xff] }
 0x574   : > { %v4415_v12 = vpop.f32.mrf.mxu0  ;;  %9467 = vmatmul.mubr.msk.f32.vlgmr.msra.gmra.mxu1 %vm4748_vm12, %v4717_v21 }
 0x575   : > { %4552 = vrot.lane.b32.xlu0 %v4415_v12, %s17506_s19 }
 0x576   : > { %v4417_v49 = vpop.f32.mrf.mxu0 }
 0x577   : > { %v4521_v0 = vpop.permute.xlu0 %4520 }
 0x578   : > { %v14663_v8 = vsel %vm2666_vm11, %v17672_v10, %v4521_v0  ;;  %v4420_v61 = vpop.f32.mrf.mxu0 }
 0x579   : > { %17673 = vst [vmem:[#allocation16_spill] sm:$0xff] %v14663_v8  ;;  %v4650_v37 = vmul.f32 %v14634_v17, %v14663_v8  ;;  %4554 = vrot.lane.b32.xlu1 %v4420_v61, %s17506_s19 }
 0x57a   : > { %v4422_v33 = vpop.f32.mrf.mxu0 }
 0x57b   : > { %v4686_v29 = vadd.f32 %v14641_v24, %v4650_v37  ;;  %v4523_v3 = vpop.permute.xlu1 %4522  ;;  %v17686_v37 = vld [vmem:[#allocation29_spill] sm:$0xff] }
 0x57c   : > { %v14671_v15 = vsel %vm2666_vm11, %v17674_v23, %v4523_v3 }
 0x57d   : > { %17675 = vst [vmem:[#allocation15_spill] sm:$0xff] %v14671_v15  ;;  %v4718_v57 = vmax.f32 %v4686_v29, 0.0  ;;  %v4651_v62 = vmul.f32 %v14634_v17, %v14671_v15 }
 0x57f   : > { %v4687_v47 = vadd.f32 %v14641_v24, %v4651_v62  ;;  %9469 = vmatprep.mubr.msk.f32.mxu1 %vm4748_vm12, %v4718_v57 }
 0x581   : > { %v4719_v16 = vmax.f32 %v4687_v47, 0.0 }
 0x583   : > { %v4425_v58 = vpop.f32.mrf.mxu0  ;;  %9470 = vmatmul.mubr.msk.f32.gmra.mxu1 %vm4748_vm12, %v4719_v16  ;;  %v17688_v16 = vld [vmem:[#allocation30_spill] sm:$0xff] }
 0x584   : > { %4556 = vrot.lane.b32.xlu0 %v4425_v58, %s17506_s19 }
 0x585   : > { %v4427_v2 = vpop.f32.mrf.mxu0 }
 0x586   : > { %v4525_v28 = vpop.permute.xlu0 %4524 }
 0x587   : > { %v14681_v54 = vsel %vm2666_vm11, %v17676_v48, %v4525_v28  ;;  %v4430_v19 = vpop.f32.mrf.mxu0 }
 0x588   : > { %17677 = vst [vmem:[#allocation19_spill] sm:$0xff] %v14681_v54  ;;  %v4652_v56 = vmul.f32 %v14634_v17, %v14681_v54  ;;  %4558 = vrot.lane.b32.xlu1 %v4430_v19, %s17506_s19 }
 0x589   : > { %v4432_v30 = vpop.f32.mrf.mxu0 }
 0x58a   : > { %v4688_v34 = vadd.f32 %v14641_v24, %v4652_v56  ;;  %v4527_v43 = vpop.permute.xlu1 %4526  ;;  %v17690_v30 = vld [vmem:[#allocation31_spill] sm:$0xff] }
 0x58b   : > { %v14689_v41 = vsel %vm2666_vm11, %v17678_v46, %v4527_v43 }
 0x58c   : > { %17679 = vst [vmem:[#allocation18_spill] sm:$0xff] %v14689_v41  ;;  %v4720_v5 = vmax.f32 %v4688_v34, 0.0  ;;  %v4653_v1 = vmul.f32 %v14634_v17, %v14689_v41 }
 0x58e   : > { %v4689_v7 = vadd.f32 %v14641_v24, %v4653_v1  ;;  %9472 = vmatprep.mubr.msk.f32.mxu1 %vm4748_vm12, %v4720_v5 }
 0x590   : > { %v4721_v60 = vmax.f32 %v4689_v7, 0.0  ;;  %v4435_v11 = vpop.f32.mrf.mxu0 }
 0x591   : > { %4560 = vrot.lane.b32.xlu0 %v4435_v11, %s17506_s19 }
 0x592   : > { %v4437_v31 = vpop.f32.mrf.mxu0  ;;  %9473 = vmatmul.mubr.msk.f32.gmra.mxu1 %vm4748_vm12, %v4721_v60 }
 0x593   : > { %v4529_v55 = vpop.permute.xlu0 %4528 }
 0x594   : > { %v14699_v42 = vsel %vm2666_vm11, %v17680_v52, %v4529_v55  ;;  %v4440_v32 = vpop.f32.mrf.mxu0  ;;  %v17692_v55 = vld [vmem:[#allocation32_spill] sm:$0xff] }
 0x595   : > { %17681 = vst [vmem:[#allocation24_spill] sm:$0xff] %v14699_v42  ;;  %v4654_v50 = vmul.f32 %v14634_v17, %v14699_v42  ;;  %4562 = vrot.lane.b32.xlu1 %v4440_v32, %s17506_s19 }
 0x596   : > { %v4442_v25 = vpop.f32.mrf.mxu0 }
 0x597   : > { %v4690_v51 = vadd.f32 %v14641_v24, %v4654_v50  ;;  %v4531_v38 = vpop.permute.xlu1 %4530 }
 0x598   : > { %v14707_v13 = vsel %vm2666_vm11, %v17682_v6, %v4531_v38  ;;  %v17694_v6 = vld [vmem:[#allocation33_spill] sm:$0xff] }
 0x599   : > { %17683 = vst [vmem:[#allocation25_spill] sm:$0xff] %v14707_v13  ;;  %v4722_v45 = vmax.f32 %v4690_v51, 0.0  ;;  %v4655_v20 = vmul.f32 %v14634_v17, %v14707_v13 }
 0x59b   : > { %v4691_v14 = vadd.f32 %v14641_v24, %v4655_v20  ;;  %9475 = vmatprep.mubr.msk.f32.mxu1 %vm4748_vm12, %v4722_v45 }
 0x59d   : > { %v4723_v36 = vmax.f32 %v4691_v14, 0.0 }
 0x59f   : > { %9476 = vmatmul.mubr.msk.f32.gmra.mxu1 %vm4748_vm12, %v4723_v36 }
 0x5a1   : > { %v4445_v4 = vpop.f32.mrf.mxu0 }
 0x5a2   : > { %4564 = vrot.lane.b32.xlu0 %v4445_v4, %s17506_s19  ;;  %v4533_v39 = vpop.permute.xlu0 %4532 }
 0x5a3   : > { %v14717_v21 = vsel %vm2666_vm11, %v17684_v40, %v4533_v39  ;;  %v4447_v12 = vpop.f32.mrf.mxu0 }
 0x5a4   : > { %17685 = vst [vmem:[#allocation26_spill] sm:$0xff] %v14717_v21  ;;  %v4656_v49 = vmul.f32 %v14634_v17, %v14717_v21 }
 0x5a5   : > { %v4450_v0 = vpop.f32.mrf.mxu0 }
 0x5a6   : > { %v4692_v10 = vadd.f32 %v14641_v24, %v4656_v49  ;;  %4566 = vrot.lane.b32.xlu1 %v4450_v0, %s17506_s19  ;;  %v4535_v61 = vpop.permute.xlu1 %4534 }
 0x5a7   : > { %v14725_v33 = vsel %vm2666_vm11, %v17686_v37, %v4535_v61  ;;  %v4452_v29 = vpop.f32.mrf.mxu0  ;;  %v17696_v61 = vld [vmem:[#allocation34_spill] sm:$0xff] }
 0x5a8   : > { %17687 = vst [vmem:[#allocation27_spill] sm:$0xff] %v14725_v33  ;;  %v4724_v3 = vmax.f32 %v4692_v10, 0.0  ;;  %v4657_v23 = vmul.f32 %v14634_v17, %v14725_v33 }
 0x5aa   : > { %v4693_v57 = vadd.f32 %v14641_v24, %v4657_v23  ;;  %9478 = vmatprep.mubr.msk.f32.mxu1 %vm4748_vm12, %v4724_v3 }
 0x5ac   : > { %v4725_v62 = vmax.f32 %v4693_v57, 0.0  ;;  %v17698_v57 = vld [vmem:[#allocation35_spill] sm:$0xff] }
 0x5ae   : > { %9479 = vmatmul.mubr.msk.f32.gmra.mxu1 %vm4748_vm12, %v4725_v62 }
 0x5af   : > { %v4537_v47 = vpop.permute.xlu0 %4536 }
 0x5b0   : > { %v14734_v58 = vsel %vm2666_vm11, %v17688_v16, %v4537_v47  ;;  %v4455_v2 = vpop.f32.mrf.mxu0 }
 0x5b1   : > { %17689 = vst [vmem:[#allocation28_spill] sm:$0xff] %v14734_v58  ;;  %v4658_v28 = vmul.f32 %v14634_v17, %v14734_v58  ;;  %4568 = vrot.lane.b32.xlu0 %v4455_v2, %s17506_s19 }
 0x5b2   : > { %v4457_v48 = vpop.f32.mrf.mxu0 }
 0x5b3   : > { %v4694_v19 = vadd.f32 %v14641_v24, %v4658_v28  ;;  %v4539_v56 = vpop.permute.xlu1 %4538 }
 0x5b4   : > { %v14742_v34 = vsel %vm2666_vm11, %v17690_v30, %v4539_v56  ;;  %v4460_v43 = vpop.f32.mrf.mxu0 }
 0x5b5   : > { %17691 = vst [vmem:[#allocation29_spill] sm:$0xff] %v14742_v34  ;;  %v4726_v46 = vmax.f32 %v4694_v19, 0.0  ;;  %v4659_v5 = vmul.f32 %v14634_v17, %v14742_v34  ;;  %4570 = vrot.lane.b32.xlu1 %v4460_v43, %s17506_s19  ;;  %v17700_v19 = vld [vmem:[#allocation36_spill] sm:$0xff] }
 0x5b6   : > { %v4462_v1 = vpop.f32.mrf.mxu0 }
 0x5b7   : > { %v4695_v7 = vadd.f32 %v14641_v24, %v4659_v5  ;;  %9481 = vmatprep.mubr.msk.f32.mxu1 %vm4748_vm12, %v4726_v46  ;;  %v17702_v5 = vld [vmem:[#allocation37_spill] sm:$0xff] }
 0x5b9   : > { %v4727_v60 = vmax.f32 %v4695_v7, 0.0 }
 0x5bb   : > { %9482 = vmatmul.mubr.msk.f32.gmra.mxu1 %vm4748_vm12, %v4727_v60 }
 0x5bd   : > { %v4465_v11 = vpop.f32.mrf.mxu0 }
 0x5be   : > { %4572 = vrot.lane.b32.xlu0 %v4465_v11, %s17506_s19  ;;  %v4541_v31 = vpop.permute.xlu0 %4540 }
 0x5bf   : > { %v14753_v52 = vsel %vm2666_vm11, %v17692_v55, %v4541_v31  ;;  %v4467_v32 = vpop.f32.mrf.mxu0 }
 0x5c0   : > { %17693 = vst [vmem:[#allocation30_spill] sm:$0xff] %v14753_v52  ;;  %v4660_v50 = vmul.f32 %v14634_v17, %v14753_v52  ;;  %v17704_v32 = vld [vmem:[#allocation38_spill] sm:$0xff] }
 0x5c1   : > { %v4470_v25 = vpop.f32.mrf.mxu0 }
 0x5c2   : > { %v4696_v51 = vadd.f32 %v14641_v24, %v4660_v50  ;;  %4574 = vrot.lane.b32.xlu1 %v4470_v25, %s17506_s19  ;;  %v4543_v38 = vpop.permute.xlu1 %4542 }
 0x5c3   : > { %v14761_v45 = vsel %vm2666_vm11, %v17694_v6, %v4543_v38  ;;  %v4472_v20 = vpop.f32.mrf.mxu0  ;;  %v17706_v6 = vld [vmem:[#allocation39_spill] sm:$0xff] }
 0x5c4   : > { %17695 = vst [vmem:[#allocation31_spill] sm:$0xff] %v14761_v45  ;;  %v4728_v14 = vmax.f32 %v4696_v51, 0.0  ;;  %v4661_v36 = vmul.f32 %v14634_v17, %v14761_v45 }
 0x5c5   : > { %v4475_v4 = vpop.f32.mrf.mxu0 }
 0x5c6   : > { %v4697_v39 = vadd.f32 %v14641_v24, %v4661_v36  ;;  %4576 = vrot.lane.b32.xlu0 %v4475_v4, %s17506_s19  ;;  %9484 = vmatprep.mubr.msk.f32.mxu1 %vm4748_vm12, %v4728_v14 }
 0x5c7   : > { %v4477_v40 = vpop.f32.mrf.mxu0 }
 0x5c8   : > { %v4729_v12 = vmax.f32 %v4697_v39, 0.0 }
 0x5c9   : > { %v4480_v49 = vpop.f32.mrf.mxu0 }
 0x5ca   : > { %4578 = vrot.lane.b32.xlu1 %v4480_v49, %s17506_s19  ;;  %9485 = vmatmul.mubr.msk.f32.gmra.mxu1 %vm4748_vm12, %v4729_v12  ;;  %v17708_v12 = vld [vmem:[#allocation40_spill] sm:$0xff] }
 0x5cb   : > { %v4482_v0 = vpop.f32.mrf.mxu0  ;;  %v4545_v10 = vpop.permute.xlu0 %4544 }
 0x5cc   : > { %v14772_v37 = vsel %vm2666_vm11, %v17696_v61, %v4545_v10 }
 0x5cd   : > { %17697 = vst [vmem:[#allocation32_spill] sm:$0xff] %v14772_v37  ;;  %v4662_v29 = vmul.f32 %v14634_v17, %v14772_v37 }
 0x5cf   : > { %v4698_v3 = vadd.f32 %v14641_v24, %v4662_v29  ;;  %v4547_v23 = vpop.permute.xlu1 %4546  ;;  %v17710_v29 = vld [vmem:[#allocation41_spill] sm:$0xff] }
 0x5d0   : > { %v14779_v62 = vsel %vm2666_vm11, %v17698_v57, %v4547_v23 }
 0x5d1   : > { %17699 = vst [vmem:[#allocation33_spill] sm:$0xff] %v14779_v62  ;;  %v4730_v47 = vmax.f32 %v4698_v3, 0.0  ;;  %v4663_v16 = vmul.f32 %v14634_v17, %v14779_v62 }
 0x5d3   : > { %v4699_v2 = vadd.f32 %v14641_v24, %v4663_v16  ;;  %9487 = vmatprep.mubr.msk.f32.mxu1 %vm4748_vm12, %v4730_v47 }
 0x5d5   : > { %v4731_v28 = vmax.f32 %v4699_v2, 0.0 }
 0x5d7   : > { %9488 = vmatmul.mubr.msk.f32.gmra.mxu1 %vm4748_vm12, %v4731_v28  ;;  %v17712_v28 = vld [vmem:[#allocation42_spill] sm:$0xff] }
 0x5da   : > { %v4549_v48 = vpop.permute.xlu0 %4548 }
 0x5db   : > { %v14788_v56 = vsel %vm2666_vm11, %v17700_v19, %v4549_v48 }
 0x5dc   : > { %17701 = vst [vmem:[#allocation34_spill] sm:$0xff] %v14788_v56  ;;  %v4664_v30 = vmul.f32 %v14634_v17, %v14788_v56 }
 0x5de   : > { %v4700_v43 = vadd.f32 %v14641_v24, %v4664_v30  ;;  %v4551_v46 = vpop.permute.xlu1 %4550 }
 0x5df   : > { %v14795_v1 = vsel %vm2666_vm11, %v17702_v5, %v4551_v46  ;;  %v17714_v46 = vld [vmem:[#allocation43_spill] sm:$0xff] }
 0x5e0   : > { %17703 = vst [vmem:[#allocation35_spill] sm:$0xff] %v14795_v1  ;;  %v4732_v7 = vmax.f32 %v4700_v43, 0.0  ;;  %v4665_v60 = vmul.f32 %v14634_v17, %v14795_v1 }
 0x5e2   : > { %v4701_v11 = vadd.f32 %v14641_v24, %v4665_v60  ;;  %9490 = vmatprep.mubr.msk.f32.mxu1 %vm4748_vm12, %v4732_v7 }
 0x5e4   : > { %v4733_v31 = vmax.f32 %v4701_v11, 0.0 }
 0x5e6   : > { %9491 = vmatmul.mubr.msk.f32.gmra.mxu1 %vm4748_vm12, %v4733_v31 }
 0x5e7   : > { %v4553_v55 = vpop.permute.xlu0 %4552 }
 0x5e8   : > { %v14804_v50 = vsel %vm2666_vm11, %v17704_v32, %v4553_v55  ;;  %v376_v55 = vld [vmem:[%s17439_s6 + $0x198] sm:$0xff] }
 0x5e9   : > { %17705 = vst [vmem:[#allocation36_spill] sm:$0xff] %v14804_v50  ;;  %v4666_v25 = vmul.f32 %v14634_v17, %v14804_v50  ;;  %6345 = vmatpush1.msra.mxu1 %v376_v55  ;;  %v370_v55 = vld [vmem:[%s17439_s6 + $0x168] sm:$0xff] }
 0x5ea   : > { %6346 = vmatprep.subr.mxu1 %v17608_v53 }
 0x5eb   : > { %v4702_v51 = vadd.f32 %v14641_v24, %v4666_v25  ;;  %v4555_v38 = vpop.permute.xlu1 %4554  ;;  %v17716_v25 = vld [vmem:[#allocation44_spill] sm:$0xff] }
 0x5ec   : > { %v14811_v20 = vsel %vm2666_vm11, %v17706_v6, %v4555_v38 }
 0x5ed   : > { %17707 = vst [vmem:[#allocation37_spill] sm:$0xff] %v14811_v20  ;;  %v4734_v14 = vmax.f32 %v4702_v51, 0.0  ;;  %v4667_v36 = vmul.f32 %v14634_v17, %v14811_v20 }
 0x5ef   : > { %v4703_v4 = vadd.f32 %v14641_v24, %v4667_v36  ;;  %9493 = vmatprep.mubr.msk.f32.mxu1 %vm4748_vm12, %v4734_v14  ;;  %v17718_v36 = vld [vmem:[#allocation45_spill] sm:$0xff] }
 0x5f1   : > { %v4735_v39 = vmax.f32 %v4703_v4, 0.0 }
 0x5f3   : > { %9494 = vmatmul.mubr.msk.f32.gmra.mxu1 %vm4748_vm12, %v4735_v39 }
 0x5f6   : > { %v4557_v40 = vpop.permute.xlu0 %4556 }
 0x5f7   : > { %v14820_v49 = vsel %vm2666_vm11, %v17708_v12, %v4557_v40 }
 0x5f8   : > { %17709 = vst [vmem:[#allocation38_spill] sm:$0xff] %v14820_v49  ;;  %v4668_v0 = vmul.f32 %v14634_v17, %v14820_v49 }
 0x5fa   : > { %v4704_v10 = vadd.f32 %v14641_v24, %v4668_v0  ;;  %v4559_v61 = vpop.permute.xlu1 %4558  ;;  %v375_v0 = vld [vmem:[%s17439_s6 + $0x190] sm:$0xff] }
 0x5fb   : > { %v14827_v3 = vsel %vm2666_vm11, %v17710_v29, %v4559_v61  ;;  %6347 = vmatpush1.msra.mxu1 %v375_v0  ;;  %v374_v61 = vld [vmem:[%s17439_s6 + $0x188] sm:$0xff]  ;;  %v373_v29 = vld [vmem:[%s17439_s6 + $0x180] sm:$0xff] }
 0x5fc   : > { %17711 = vst [vmem:[#allocation39_spill] sm:$0xff] %v14827_v3  ;;  %v4736_v23 = vmax.f32 %v4704_v10, 0.0  ;;  %v4669_v57 = vmul.f32 %v14634_v17, %v14827_v3  ;;  %6348 = vmatprep.subr.mxu1 %v17608_v53  ;;  %v11797_v0 = vld [vmem:[#allocation7] sm:$0xf] }
 0x5fd   : > { %6349 = vmatpush1.msra.mxu1 %v374_v61  ;;  %v17726_v61 = vld [vmem:[#allocation49_spill] sm:$0xff] }
 0x5fe   : > { %v4705_v47 = vadd.f32 %v14641_v24, %v4669_v57  ;;  %9496 = vmatprep.mubr.msk.f32.mxu1 %vm4748_vm12, %v4736_v23  ;;  %6350 = vmatprep.subr.mxu1 %v17608_v53  ;;  %v372_v23 = vld [vmem:[%s17439_s6 + $0x178] sm:$0xff] }
 0x5ff   : > { %6351 = vmatpush1.msra.mxu1 %v373_v29 }
 0x600   : > { %v4737_v16 = vmax.f32 %v4705_v47, 0.0  ;;  %6352 = vmatprep.subr.mxu1 %v17608_v53  ;;  %v17720_v47 = vld [vmem:[#allocation46_spill] sm:$0xff] }
 0x601   : > { %6353 = vmatpush1.msra.mxu1 %v372_v23 }
 0x602   : > { %9497 = vmatmul.mubr.msk.f32.gmra.mxu1 %vm4748_vm12, %v4737_v16  ;;  %6354 = vmatprep.subr.mxu1 %v17608_v53 }
 0x603   : > { %v4561_v2 = vpop.permute.xlu0 %4560 }
 0x604   : > { %v14836_v48 = vsel %vm2666_vm11, %v17712_v28, %v4561_v2 }
 0x605   : > { %17713 = vst [vmem:[#allocation40_spill] sm:$0xff] %v14836_v48  ;;  %v4670_v19 = vmul.f32 %v14634_v17, %v14836_v48 }
 0x607   : > { %v4706_v30 = vadd.f32 %v14641_v24, %v4670_v19  ;;  %v4563_v43 = vpop.permute.xlu1 %4562 }
 0x608   : > { %v14843_v5 = vsel %vm2666_vm11, %v17714_v46, %v4563_v43 }
 0x609   : > { %17715 = vst [vmem:[#allocation41_spill] sm:$0xff] %v14843_v5  ;;  %v4738_v7 = vmax.f32 %v4706_v30, 0.0  ;;  %v4671_v60 = vmul.f32 %v14634_v17, %v14843_v5  ;;  %v17722_v30 = vld [vmem:[#allocation47_spill] sm:$0xff] }
 0x60b   : > { %v4707_v11 = vadd.f32 %v14641_v24, %v4671_v60  ;;  %9499 = vmatprep.mubr.msk.f32.mxu1 %vm4748_vm12, %v4738_v7 }
 0x60d   : > { %v4739_v31 = vmax.f32 %v4707_v11, 0.0  ;;  %v371_v11 = vld [vmem:[%s17439_s6 + $0x170] sm:$0xff] }
 0x60e   : > { %6355 = vmatpush1.msra.mxu1 %v371_v11 }
 0x60f   : > { %9500 = vmatmul.mubr.msk.f32.gmra.mxu1 %vm4748_vm12, %v4739_v31  ;;  %6356 = vmatprep.subr.mxu1 %v17608_v53 }
 0x610   : > { %6357 = vmatpush1.msra.mxu1 %v370_v55 }
 0x611   : > { %6358 = vmatprep.subr.mxu1 %v17608_v53 }
 0x614   : > { %v4565_v32 = vpop.permute.xlu0 %4564 }
 0x615   : > { %v14856_v51 = vsel %vm2666_vm11, %v17716_v25, %v4565_v32  ;;  %v369_v32 = vld [vmem:[%s17439_s6 + $0x160] sm:$0xff] }
 0x616   : > { %17717 = vst [vmem:[#allocation42_spill] sm:$0xff] %v14856_v51  ;;  %v4672_v38 = vmul.f32 %v14634_v17, %v14856_v51  ;;  %6359 = vmatpush1.msra.mxu1 %v369_v32 }
 0x617   : > { %6360 = vmatprep.subr.mxu1 %v17608_v53 }
 0x618   : > { %v4708_v6 = vadd.f32 %v14641_v24, %v4672_v38  ;;  %v4567_v14 = vpop.permute.xlu1 %4566  ;;  %v17724_v38 = vld [vmem:[#allocation48_spill] sm:$0xff] }
 0x619   : > { %v14863_v4 = vsel %vm2666_vm11, %v17718_v36, %v4567_v14  ;;  %v11796_v36 = vld [vmem:[#allocation5] sm:$0xf] }
 0x61a   : > { %17719 = vst [vmem:[#allocation43_spill] sm:$0xff] %v14863_v4  ;;  %v4740_v39 = vmax.f32 %v4708_v6, 0.0  ;;  %v4673_v40 = vmul.f32 %v14634_v17, %v14863_v4 }
 0x61c   : > { %v4709_v12 = vadd.f32 %v14641_v24, %v4673_v40  ;;  %9502 = vmatprep.mubr.msk.f32.mxu1 %vm4748_vm12, %v4740_v39  ;;  %v14921_v39 = vrot.slane %v11796_v36, %v14631_v44 }
 0x61e   : > { %v4741_v10 = vmax.f32 %v4709_v12, 0.0 }
 0x620   : > { %9503 = vmatmul.mubr.msk.f32.gmra.mxu1 %vm4748_vm12, %v4741_v10  ;;  %v14925_v10 = vrot.slane %v11797_v0, %v14631_v44 }
 0x623   : > { %v4569_v57 = vpop.permute.xlu0 %4568 }
 0x624   : > { %v14887_v16 = vsel %vm2666_vm11, %v17720_v47, %v4569_v57  ;;  %v368_v57 = vld [vmem:[%s17439_s6 + $0x158] sm:$0xff] }
 0x625   : > { %17721 = vst [vmem:[#allocation44_spill] sm:$0xff] %v14887_v16  ;;  %v4674_v2 = vmul.f32 %v14634_v17, %v14887_v16  ;;  %6361 = vmatpush1.msra.mxu1 %v368_v57 }
 0x626   : > { %6362 = vmatprep.subr.mxu1 %v17608_v53 }
 0x627   : > { %v4710_v28 = vadd.f32 %v14641_v24, %v4674_v2  ;;  %v4571_v19 = vpop.permute.xlu1 %4570 }
 0x628   : > { %v14895_v43 = vsel %vm2666_vm11, %v17722_v30, %v4571_v19 }
 0x629   : > { %17723 = vst [vmem:[#allocation45_spill] sm:$0xff] %v14895_v43  ;;  %v4742_v46 = vmax.f32 %v4710_v28, 0.0  ;;  %v4675_v7 = vmul.f32 %v14634_v17, %v14895_v43 }
 0x62b   : > { %v4711_v60 = vadd.f32 %v14641_v24, %v4675_v7  ;;  %9505 = vmatprep.mubr.msk.f32.mxu1 %vm4748_vm12, %v4742_v46 }
 0x62d   : > { %v4743_v31 = vmax.f32 %v4711_v60, 0.0  ;;  %v17728_v60 = vld [vmem:[#allocation50_spill] sm:$0xff] }
 0x62f   : > { %9506 = vmatmul.mubr.msk.f32.gmra.mxu1 %vm4748_vm12, %v4743_v31  ;;  %v367_v31 = vld [vmem:[%s17439_s6 + $0x150] sm:$0xff] }
 0x630   : > { %v4573_v25 = vpop.permute.xlu0 %4572  ;;  %6363 = vmatpush1.msra.mxu1 %v367_v31 }
 0x631   : > { %v14915_v6 = vsel %vm2666_vm11, %v17724_v38, %v4573_v25  ;;  %6364 = vmatprep.subr.mxu1 %v17608_v53 }
 0x632   : > { %17725 = vst [vmem:[#allocation46_spill] sm:$0xff] %v14915_v6  ;;  %v4676_v14 = vmul.f32 %v14634_v17, %v14915_v6 }
 0x634   : > { %v4712_v40 = vadd.f32 %v14641_v24, %v4676_v14  ;;  %v4575_v12 = vpop.permute.xlu1 %4574  ;;  %v9468_v23 = vpop.f32.mrf.mxu1 }
 0x635   : > { %v14929_v29 = vsel %vm2666_vm11, %v17726_v61, %v4575_v12  ;;  %v5078_v28 = vmul.f32 %v9468_v23, %v14921_v39  ;;  %v17730_v12 = vld [vmem:[#allocation51_spill] sm:$0xff] }
 0x636   : > { %17727 = vst [vmem:[#allocation47_spill] sm:$0xff] %v14929_v29  ;;  %v4744_v47 = vmax.f32 %v4712_v40, 0.0  ;;  %v4677_v2 = vmul.f32 %v14634_v17, %v14929_v29  ;;  %v4914_v19 = vpop.f32.mrf.mxu1  ;;  %v366_v61 = vld [vmem:[%s17439_s6 + $0x148] sm:$0xff] }
 0x637   : > { %v5114_v30 = vadd.f32 %v14925_v10, %v5078_v28  ;;  %v5077_v46 = vmul.f32 %v14921_v39, %v4914_v19  ;;  %6365 = vmatpush1.msra.mxu1 %v366_v61 }
 0x638   : > { %v4713_v44 = vadd.f32 %v14641_v24, %v4677_v2  ;;  %9508 = vmatprep.mubr.msk.f32.mxu1 %vm4748_vm12, %v4744_v47  ;;  %v4577_v7 = vpop.permute.xlu0 %4576  ;;  %v365_v2 = vld [vmem:[%s17439_s6 + $0x140] sm:$0xff]  ;;  %6366 = vmatprep.subr.mxu1 %v17608_v53 }
 0x639   : > { %v14944_v11 = vsel %vm2666_vm11, %v17728_v60, %v4577_v7  ;;  %v5113_v32 = vadd.f32 %v14925_v10, %v5077_v46  ;;  %v5146_v38 = vmax.f32 %v5114_v30, 0.0  ;;  %6367 = vmatpush1.msra.mxu1 %v365_v2  ;;  %v361_v2 = vld [vmem:[%s17439_s6 + $0x120] sm:$0xff] }
 0x63a   : > { %17729 = vst [vmem:[#allocation48_spill] sm:$0xff] %v14944_v11  ;;  %v4745_v55 = vmax.f32 %v4713_v44, 0.0  ;;  %v4678_v25 = vmul.f32 %v14634_v17, %v14944_v11  ;;  %6368 = vmatprep.subr.mxu1 %v17608_v53 }
 0x63b   : > { %v5145_v14 = vmax.f32 %v5113_v32, 0.0  ;;  %v5208_v28 = vrot.slane %v5146_v38, 7  ;;  %v5298_v60 = vrot.slane %v5146_v38, 1 }
 0x63c   : > { %v4714_v36 = vadd.f32 %v14641_v24, %v4678_v25  ;;  %9509 = vmatmul.mubr.msk.f32.gmra.mxu1 %vm4748_vm12, %v4745_v55  ;;  %v4579_v40 = vpop.permute.xlu1 %4578  ;;  %v363_v25 = vld [vmem:[%s17439_s6 + $0x130] sm:$0xff] }
 0x63d   : > { %v14957_v0 = vsel %vm2666_vm11, %v17730_v12, %v4579_v40  ;;  %v10708_v47 = vpack.i.bf16 %v5146_v38, %v5145_v14  ;;  %v5297_v19 = vrot.slane %v5145_v14, 1  ;;  %v5207_v44 = vrot.slane %v5145_v14, 7 }
 0x63e   : > { %17731 = vst [vmem:[#allocation49_spill] sm:$0xff] %v14957_v0  ;;  %v4746_v23 = vmax.f32 %v4714_v36, 0.0  ;;  %v4679_v57 = vmul.f32 %v14634_v17, %v14957_v0  ;;  %v364_v17 = vld [vmem:[%s17439_s6 + $0x138] sm:$0xff]  ;;  %v5357_v14 = vsel %vm1090_vm2, %v5298_v60, 0.0 }
 0x63f   : > { %10709 = vrot.lane.b32.xlu0 %v10708_v47, %s11957_s23  ;;  %v14975_v46 = vsel %vm994_vm3, %v5207_v44, %v5208_v28  ;;  %v14978_v7 = vsel %vm994_vm3, 0.0, %v5207_v44  ;;  %v5299_v32 = vsel %vm1090_vm2, %v5297_v19, %v5298_v60  ;;  %6369 = vmatpush1.msra.mxu1 %v364_v17  ;;  %v378_v19 = vld [vmem:[%s17439_s6 + $0x1a8] sm:$0xff] }
 0x640   : > { %v4715_v30 = vadd.f32 %v14641_v24, %v4679_v57  ;;  %9511 = vmatprep.mubr.msk.f32.mxu1 %vm4748_vm12, %v4746_v23  ;;  %v10718_v24 = vpack.i.bf16 %v14975_v46, %v14978_v7  ;;  %6370 = vmatprep.subr.mxu1 %v17608_v53  ;;  %v10723_v12 = vpack.i.bf16 %v5357_v14, %v5299_v32  ;;  %v362_v23 = vld [vmem:[%s17439_s6 + $0x128] sm:$0xff] }
 0x641   : > { %6371 = vmatpush1.msra.mxu1 %v363_v25 }
 0x642   : > { %v4747_v31 = vmax.f32 %v4715_v30, 0.0  ;;  %10719 = vrot.lane.b32.xlu1 %v10718_v24, %s11958_s15  ;;  %6372 = vmatprep.subr.mxu1 %v17608_v53  ;;  %v377_v24 = vld [vmem:[%s17439_s6 + $0x1a0] sm:$0xff] }
 0x643   : > { %v9471_v55 = vpop.f32.mrf.mxu1  ;;  %10714 = vrot.lane.b32.xlu0 %v10708_v47, %s11956_s22  ;;  %6373 = vmatpush1.msra.mxu1 %v362_v23 }
 0x644   : > { %v5080_v38 = vmul.f32 %v9471_v55, %v14921_v39  ;;  %9512 = vmatmul.mubr.msk.f32.gmra.mxu1 %vm4748_vm12, %v4747_v31  ;;  %6374 = vmatprep.subr.mxu1 %v17608_v53 }
 0x645   : > { %v4924_v36 = vpop.f32.mrf.mxu1  ;;  %6375 = vmatpush1.msra.mxu1 %v361_v2 }
 0x646   : > { %v5116_v40 = vadd.f32 %v14925_v10, %v5080_v38  ;;  %v5079_v61 = vmul.f32 %v14921_v39, %v4924_v36  ;;  %10724 = vrot.lane.b32.xlu1 %v10723_v12, %s11959_s16  ;;  %6404 = vmatprep.subr.mxu1 %v17608_v53 }
 0x647   : > { %10729 = vrot.lane.b32.xlu0 %v10723_v12, %s11954_s8  ;;  %6405 = vmatpush2.msra.mxu1 %v378_v19 }
 0x648   : > { %v5148_v57 = vmax.f32 %v5116_v40, 0.0  ;;  %v5115_v47 = vadd.f32 %v14925_v10, %v5079_v61  ;;  %6406 = vmatprep.subr.mxu1 %v17608_v53 }
 0x649   : > { %6407 = vmatpush2.msra.mxu1 %v377_v24 }
 0x64a   : > { %v5147_v28 = vmax.f32 %v5115_v47, 0.0  ;;  %v5301_v17 = vrot.slane %v5148_v57, 1  ;;  %v5211_v31 = vrot.slane %v5148_v57, 7 }
 0x64c   : > { %v10743_v44 = vpack.i.bf16 %v5148_v57, %v5147_v28  ;;  %v5300_v30 = vrot.slane %v5147_v28, 1  ;;  %v5210_v60 = vrot.slane %v5147_v28, 7  ;;  %v15029_v36 = vsel %vm1090_vm2, %v5301_v17, 0.0 }
 0x64e   : > { %10744 = vrot.lane.b32.xlu0 %v10743_v44, %s11956_s22  ;;  %10734 = vrot.lane.b32.xlu1 %v10743_v44, %s11957_s23  ;;  %v5302_v55 = vsel %vm1090_vm2, %v5300_v30, %v5301_v17  ;;  %v15018_v32 = vsel %vm994_vm3, %v5210_v60, %v5211_v31  ;;  %v15021_v25 = vsel %vm994_vm3, 0.0, %v5210_v60 }
 0x64f   : > { %9125 = vmatprep.mubr.msk.f32.mxu1 %vm1882_vm4, %v5302_v55  ;;  %v10748_v38 = vpack.i.bf16 %v15018_v32, %v15021_v25  ;;  %v10763_v12 = vpack.i.bf16 %v15029_v36, %v5302_v55 }
 0x652   : > { %10739 = vrot.lane.b32.xlu1 %v10743_v44, %s17654_s17  ;;  %10749 = vrot.lane.b32.xlu0 %v10748_v38, %s17655_s20  ;;  %v9474_v14 = vpop.f32.mrf.mxu1 }
 0x653   : > { %v5082_v40 = vmul.f32 %v9474_v14, %v14921_v39 }
 0x654   : > { %v4934_v61 = vpop.f32.mrf.mxu1 }
 0x655   : > { %v5118_v23 = vadd.f32 %v14925_v10, %v5082_v40  ;;  %v5081_v57 = vmul.f32 %v14921_v39, %v4934_v61 }
 0x656   : > { %10754 = vrot.lane.b32.xlu1 %v10748_v38, %s11958_s15  ;;  %10764 = vrot.lane.b32.xlu0 %v10763_v12, %s11954_s8 }
 0x657   : > { %v5150_v47 = vmax.f32 %v5118_v23, 0.0  ;;  %v5117_v2 = vadd.f32 %v14925_v10, %v5081_v57 }
 0x659   : > { %v5149_v28 = vmax.f32 %v5117_v2, 0.0  ;;  %v5214_v30 = vrot.slane %v5150_v47, 7  ;;  %v5304_v55 = vrot.slane %v5150_v47, 1 }
 0x65a   : > { %10759 = vrot.lane.b32.xlu1 %v10763_v12, %s11959_s16 }
 0x65b   : > { %v10768_v19 = vpack.i.bf16 %v5150_v47, %v5149_v28  ;;  %v5213_v44 = vrot.slane %v5149_v28, 7  ;;  %v5303_v31 = vrot.slane %v5149_v28, 1  ;;  %v15058_v57 = vsel %vm1090_vm2, %v5304_v55, 0.0 }
 0x65d   : > { %10769 = vrot.lane.b32.xlu0 %v10768_v19, %s11957_s23  ;;  %v15041_v17 = vsel %vm994_vm3, %v5213_v44, %v5214_v30  ;;  %v15044_v60 = vsel %vm994_vm3, 0.0, %v5213_v44  ;;  %v15052_v12 = vsel %vm1090_vm2, %v5303_v31, %v5304_v55 }
 0x65e   : > { %10774 = vrot.lane.b32.xlu1 %v10768_v19, %s17654_s17  ;;  %v10788_v14 = vpack.i.bf16 %v15041_v17, %v15044_v60  ;;  %v10793_v2 = vpack.i.bf16 %v15058_v57, %v15052_v12 }
 0x65f   : > { %v9477_v24 = vpop.f32.mrf.mxu1 }
 0x660   : > { %v5084_v38 = vmul.f32 %v9477_v24, %v14921_v39 }
 0x661   : > { %10779 = vrot.lane.b32.xlu0 %v10768_v19, %s11956_s22  ;;  %v4944_v40 = vpop.f32.mrf.mxu1 }
 0x662   : > { %v5120_v61 = vadd.f32 %v14925_v10, %v5084_v38  ;;  %v5083_v23 = vmul.f32 %v14921_v39, %v4944_v40  ;;  %10789 = vrot.lane.b32.xlu1 %v10788_v14, %s11958_s15 }
 0x664   : > { %v5119_v47 = vadd.f32 %v14925_v10, %v5083_v23  ;;  %v5152_v28 = vmax.f32 %v5120_v61, 0.0 }
 0x665   : > { %10784 = vrot.lane.b32.xlu0 %v10788_v14, %s17655_s20 }
 0x666   : > { %v5151_v19 = vmax.f32 %v5119_v47, 0.0  ;;  %10794 = vrot.lane.b32.xlu1 %v10793_v2, %s11959_s16  ;;  %v5217_v31 = vrot.slane %v5152_v28, 7  ;;  %v5307_v40 = vrot.slane %v5152_v28, 1 }
 0x668   : > { %v10803_v44 = vpack.i.bf16 %v5152_v28, %v5151_v19  ;;  %v5216_v30 = vrot.slane %v5151_v19, 7  ;;  %v5306_v38 = vrot.slane %v5151_v19, 1  ;;  %v15086_v19 = vsel %vm1090_vm2, %v5307_v40, 0.0 }
 0x669   : > { %10799 = vrot.lane.b32.xlu0 %v10793_v2, %s11954_s8 }
 0x66a   : > { %10804 = vrot.lane.b32.xlu1 %v10803_v44, %s11957_s23  ;;  %v15068_v24 = vsel %vm994_vm3, %v5216_v30, %v5217_v31  ;;  %v15071_v55 = vsel %vm994_vm3, 0.0, %v5216_v30  ;;  %v15079_v2 = vsel %vm1090_vm2, %v5306_v38, %v5307_v40 }
 0x66b   : > { %v10818_v23 = vpack.i.bf16 %v15068_v24, %v15071_v55 }
 0x66d   : > { %10814 = vrot.lane.b32.xlu0 %v10803_v44, %s11956_s22 }
 0x66e   : > { %10809 = vrot.lane.b32.xlu1 %v10803_v44, %s17654_s17  ;;  %v9480_v14 = vpop.f32.mrf.mxu1 }
 0x66f   : > { %v5086_v61 = vmul.f32 %v9480_v14, %v14921_v39  ;;  %v10833_v14 = vpack.i.bf16 %v15086_v19, %v15079_v2 }
 0x670   : > { %v4954_v47 = vpop.f32.mrf.mxu1 }
 0x671   : > { %v5122_v31 = vadd.f32 %v14925_v10, %v5086_v61  ;;  %v5085_v30 = vmul.f32 %v14921_v39, %v4954_v47  ;;  %10819 = vrot.lane.b32.xlu0 %v10818_v23, %s17655_s20 }
 0x672   : > { %10824 = vrot.lane.b32.xlu1 %v10818_v23, %s11958_s15 }
 0x673   : > { %v5154_v28 = vmax.f32 %v5122_v31, 0.0  ;;  %v5121_v44 = vadd.f32 %v14925_v10, %v5085_v30 }
 0x675   : > { %v5153_v0 = vmax.f32 %v5121_v44, 0.0  ;;  %10834 = vrot.lane.b32.xlu0 %v10833_v14, %s11954_s8  ;;  %v5220_v47 = vrot.slane %v5154_v28, 7  ;;  %v5310_v44 = vrot.slane %v5154_v28, 1 }
 0x676   : > { %10829 = vrot.lane.b32.xlu1 %v10833_v14, %s11959_s16 }
 0x677   : > { %v10838_v38 = vpack.i.bf16 %v5154_v28, %v5153_v0  ;;  %v5219_v61 = vrot.slane %v5153_v0, 7  ;;  %v5309_v31 = vrot.slane %v5153_v0, 1  ;;  %v15112_v0 = vsel %vm1090_vm2, %v5310_v44, 0.0 }
 0x679   : > { %10839 = vrot.lane.b32.xlu0 %v10838_v38, %s11957_s23  ;;  %v15095_v23 = vsel %vm994_vm3, %v5219_v61, %v5220_v47  ;;  %v15098_v40 = vsel %vm994_vm3, 0.0, %v5219_v61  ;;  %v15106_v6 = vsel %vm1090_vm2, %v5309_v31, %v5310_v44 }
 0x67a   : > { %10844 = vrot.lane.b32.xlu1 %v10838_v38, %s17654_s17  ;;  %v10858_v14 = vpack.i.bf16 %v15095_v23, %v15098_v40  ;;  %v10863_v43 = vpack.i.bf16 %v15112_v0, %v15106_v6 }
 0x67b   : > { %v9483_v30 = vpop.f32.mrf.mxu1 }
 0x67c   : > { %v5088_v11 = vmul.f32 %v9483_v30, %v14921_v39 }
 0x67d   : > { %10849 = vrot.lane.b32.xlu0 %v10838_v38, %s11956_s22  ;;  %v4964_v29 = vpop.f32.mrf.mxu1 }
 0x67e   : > { %v5124_v47 = vadd.f32 %v14925_v10, %v5088_v11  ;;  %v5087_v61 = vmul.f32 %v14921_v39, %v4964_v29  ;;  %10859 = vrot.lane.b32.xlu1 %v10858_v14, %s11958_s15 }
 0x680   : > { %v5156_v28 = vmax.f32 %v5124_v47, 0.0  ;;  %v5123_v30 = vadd.f32 %v14925_v10, %v5087_v61 }
 0x681   : > { %10854 = vrot.lane.b32.xlu0 %v10858_v14, %s17655_s20 }
 0x682   : > { %v5155_v38 = vmax.f32 %v5123_v30, 0.0  ;;  %10864 = vrot.lane.b32.xlu1 %v10863_v43, %s11959_s16  ;;  %v5223_v16 = vrot.slane %v5156_v28, 7  ;;  %v5313_v61 = vrot.slane %v5156_v28, 1 }
 0x684   : > { %v10873_v31 = vpack.i.bf16 %v5156_v28, %v5155_v38  ;;  %v5222_v11 = vrot.slane %v5155_v38, 7  ;;  %v5312_v29 = vrot.slane %v5155_v38, 1 }
 0x685   : > { %10869 = vrot.lane.b32.xlu0 %v10863_v43, %s11954_s8 }
 0x686   : > { %10874 = vrot.lane.b32.xlu1 %v10873_v31, %s17654_s17  ;;  %v15122_v44 = vsel %vm994_vm3, %v5222_v11, %v5223_v16  ;;  %v15125_v47 = vsel %vm994_vm3, 0.0, %v5222_v11  ;;  %v15131_v30 = vsel %vm1090_vm2, %v5312_v29, %v5313_v61  ;;  %v15136_v16 = vsel %vm1090_vm2, %v5313_v61, 0.0 }
 0x687   : > { %v10893_v14 = vpack.i.bf16 %v15122_v44, %v15125_v47  ;;  %v10898_v11 = vpack.i.bf16 %v15136_v16, %v15131_v30 }
 0x689   : > { %10879 = vrot.lane.b32.xlu0 %v10873_v31, %s11956_s22 }
 0x68a   : > { %10894 = vrot.lane.b32.xlu1 %v10893_v14, %s11958_s15  ;;  %v9486_v43 = vpop.f32.mrf.mxu1 }
 0x68b   : > { %v5090_v38 = vmul.f32 %v9486_v43, %v14921_v39 }
 0x68c   : > { %v4974_v4 = vpop.f32.mrf.mxu1 }
 0x68d   : > { %v5126_v51 = vadd.f32 %v14925_v10, %v5090_v38  ;;  %v5089_v28 = vmul.f32 %v14921_v39, %v4974_v4  ;;  %10884 = vrot.lane.b32.xlu0 %v10873_v31, %s11957_s23 }
 0x68e   : > { %10899 = vrot.lane.b32.xlu1 %v10898_v11, %s11959_s16 }
 0x68f   : > { %v5158_v29 = vmax.f32 %v5126_v51, 0.0  ;;  %v5125_v5 = vadd.f32 %v14925_v10, %v5089_v28 }
 0x691   : > { %v5157_v48 = vmax.f32 %v5125_v5, 0.0  ;;  %10889 = vrot.lane.b32.xlu0 %v10893_v14, %s17655_s20  ;;  %v5226_v3 = vrot.slane %v5158_v29, 7 }
 0x692   : > { %10904 = vrot.lane.b32.xlu1 %v10898_v11, %s11954_s8  ;;  %v5316_v11 = vrot.slane %v5158_v29, 1 }
 0x693   : > { %v10908_v61 = vpack.i.bf16 %v5158_v29, %v5157_v48  ;;  %v5225_v43 = vrot.slane %v5157_v48, 7  ;;  %v5315_v5 = vrot.slane %v5157_v48, 1 }
 0x694   : > { %v15167_v48 = vsel %vm1090_vm2, %v5316_v11, 0.0 }
 0x695   : > { %v15148_v49 = vsel %vm994_vm3, %v5225_v43, %v5226_v3  ;;  %v15151_v4 = vsel %vm994_vm3, 0.0, %v5225_v43  ;;  %v15162_v43 = vsel %vm1090_vm2, %v5315_v5, %v5316_v11 }
 0x696   : > { %10909 = vrot.lane.b32.xlu1 %v10908_v61, %s17654_s17  ;;  %v10923_v51 = vpack.i.bf16 %v15148_v49, %v15151_v4  ;;  %v10933_v29 = vpack.i.bf16 %v15167_v48, %v15162_v43 }
 0x697   : > { %v9489_v31 = vpop.f32.mrf.mxu1 }
 0x698   : > { %v5092_v14 = vmul.f32 %v9489_v31, %v14921_v39  ;;  %10924 = vrot.lane.b32.xlu0 %v10923_v51, %s17655_s20 }
 0x699   : > { %v4984_v38 = vpop.f32.mrf.mxu1 }
 0x69a   : > { %v5128_v28 = vadd.f32 %v14925_v10, %v5092_v14  ;;  %v5091_v3 = vmul.f32 %v14921_v39, %v4984_v38  ;;  %10914 = vrot.lane.b32.xlu1 %v10908_v61, %s11956_s22 }
 0x69c   : > { %v5160_v20 = vmax.f32 %v5128_v28, 0.0  ;;  %v5127_v50 = vadd.f32 %v14925_v10, %v5091_v3  ;;  %10929 = vrot.lane.b32.xlu0 %v10923_v51, %s11958_s15 }
 0x69e   : > { %v5159_v31 = vmax.f32 %v5127_v50, 0.0  ;;  %10919 = vrot.lane.b32.xlu1 %v10908_v61, %s11957_s23  ;;  %v5229_v38 = vrot.slane %v5160_v20, 7  ;;  %v5319_v3 = vrot.slane %v5160_v20, 1 }
 0x6a0   : > { %10934 = vrot.lane.b32.xlu0 %v10933_v29, %s11959_s16  ;;  %v5228_v14 = vrot.slane %v5159_v31, 7  ;;  %v5318_v50 = vrot.slane %v5159_v31, 1  ;;  %v10943_v11 = vpack.i.bf16 %v5160_v20, %v5159_v31 }
 0x6a2   : > { %v15174_v5 = vsel %vm994_vm3, %v5228_v14, %v5229_v38  ;;  %v15177_v28 = vsel %vm994_vm3, 0.0, %v5228_v14  ;;  %v15186_v56 = vsel %vm1090_vm2, %v5318_v50, %v5319_v3 }
 0x6a3   : > { %v10958_v51 = vpack.i.bf16 %v15174_v5, %v15177_v28 }
 0x6a4   : > { %10939 = vrot.lane.b32.xlu0 %v10933_v29, %s11954_s8  ;;  %v15192_v29 = vsel %vm1090_vm2, %v5319_v3, 0.0 }
 0x6a5   : > { %10959 = vrot.lane.b32.xlu1 %v10958_v51, %s17655_s20  ;;  %v10968_v31 = vpack.i.bf16 %v15192_v29, %v15186_v56 }
 0x6a6   : > { %v9492_v61 = vpop.f32.mrf.mxu1 }
 0x6a7   : > { %v5094_v1 = vmul.f32 %v9492_v61, %v14921_v39 }
 0x6a8   : > { %10944 = vrot.lane.b32.xlu0 %v10943_v11, %s17654_s17  ;;  %v4994_v38 = vpop.f32.mrf.mxu1 }
 0x6a9   : > { %v5130_v14 = vadd.f32 %v14925_v10, %v5094_v1  ;;  %v5093_v62 = vmul.f32 %v14921_v39, %v4994_v38  ;;  %10964 = vrot.lane.b32.xlu1 %v10958_v51, %s11958_s15 }
 0x6ab   : > { %v5162_v37 = vmax.f32 %v5130_v14, 0.0  ;;  %v5129_v20 = vadd.f32 %v14925_v10, %v5093_v62 }
 0x6ac   : > { %10949 = vrot.lane.b32.xlu0 %v10943_v11, %s11956_s22 }
 0x6ad   : > { %v5161_v61 = vmax.f32 %v5129_v20, 0.0  ;;  %10969 = vrot.lane.b32.xlu1 %v10968_v31, %s11959_s16  ;;  %v5232_v1 = vrot.slane %v5162_v37, 7 }
 0x6af   : > { %v5231_v50 = vrot.slane %v5161_v61, 7  ;;  %v10978_v20 = vpack.i.bf16 %v5162_v37, %v5161_v61  ;;  %v5321_v45 = vrot.slane %v5161_v61, 1 }
 0x6b0   : > { %10954 = vrot.lane.b32.xlu0 %v10943_v11, %s11957_s23 }
 0x6b1   : > { %10974 = vrot.lane.b32.xlu1 %v10968_v31, %s11954_s8  ;;  %v15202_v51 = vsel %vm994_vm3, %v5231_v50, %v5232_v1  ;;  %v15205_v3 = vsel %vm994_vm3, 0.0, %v5231_v50  ;;  %v15207_v62 = vpop.permute.xlu0 %10709  ;;  %v5322_v31 = vrot.slane %v5162_v37, 1 }
 0x6b2   : > { %v10993_v38 = vpack.i.bf16 %v15202_v51, %v15205_v3 }
 0x6b3   : > { %v9495_v14 = vpop.f32.mrf.mxu1  ;;  %v15217_v33 = vsel %vm1090_vm2, %v5321_v45, %v5322_v31 }
 0x6b4   : > { %v5096_v52 = vmul.f32 %v9495_v14, %v14921_v39  ;;  %10994 = vrot.lane.b32.xlu0 %v10993_v38, %s17655_s20  ;;  %v10720_v1 = vpop.permute.xlu1 %10719  ;;  %v15223_v14 = vsel %vm1090_vm2, %v5322_v31, 0.0 }
 0x6b5   : > { %10979 = vrot.lane.b32.xlu1 %v10978_v20, %s17654_s17  ;;  %v5004_v11 = vpop.f32.mrf.mxu1  ;;  %v10715_v34 = vpop.permute.xlu0 %10714 }
 0x6b6   : > { %v5132_v50 = vadd.f32 %v14925_v10, %v5096_v52  ;;  %v5095_v58 = vmul.f32 %v14921_v39, %v5004_v11  ;;  %v11003_v52 = vpack.i.bf16 %v15223_v14, %v15217_v33  ;;  %v10716_v8 = vunpack.i.l.bf16 %v10715_v34 }
 0x6b7   : > { %v10717_v22 = vunpack.i.h.bf16 %v10715_v34 }
 0x6b8   : > { %v5164_v21 = vmax.f32 %v5132_v50, 0.0  ;;  %v5131_v61 = vadd.f32 %v14925_v10, %v5095_v58  ;;  %10999 = vrot.lane.b32.xlu0 %v10993_v38, %s11958_s15  ;;  %v10725_v13 = vpop.permute.xlu1 %10724  ;;  %v10721_v58 = vunpack.i.l.bf16 %v10720_v1 }
 0x6b9   : > { %10984 = vrot.lane.b32.xlu1 %v10978_v20, %s11956_s22  ;;  %v15227_v42 = vpop.permute.xlu0 %10729  ;;  %v10726_v59 = vunpack.i.l.bf16 %v10725_v13 }
 0x6ba   : > { %v5163_v37 = vmax.f32 %v5131_v61, 0.0  ;;  %v5235_v11 = vrot.slane %v5164_v21, 7  ;;  %v10722_v61 = vunpack.i.h.bf16 %v10720_v1  ;;  %v5325_v9 = vrot.slane %v5164_v21, 1  ;;  %v17735_v1 = vld [vmem:[#allocation21_spill] sm:$0xff] }
 0x6bc   : > { %11004 = vrot.lane.b32.xlu0 %v11003_v52, %s11959_s16  ;;  %v5234_v45 = vrot.slane %v5163_v37, 7  ;;  %v5324_v15 = vrot.slane %v5163_v37, 1  ;;  %v6125_v18 = vsel %vm1948_vm6, %v17735_v1, %v10722_v61  ;;  %v15259_v34 = vsel %vm1090_vm2, %v5325_v9, 0.0 }
 0x6bd   : > { %10989 = vrot.lane.b32.xlu1 %v10978_v20, %s11957_s23  ;;  %v17734_v20 = vld [vmem:[#allocation20_spill] sm:$0xff] }
 0x6be   : > { %v15232_v38 = vsel %vm994_vm3, %v5234_v45, %v5235_v11  ;;  %v15235_v31 = vsel %vm994_vm3, 0.0, %v5234_v45  ;;  %v6124_v11 = vsel %vm1948_vm6, %v17734_v20, %v10721_v58  ;;  %v11013_v45 = vpack.i.bf16 %v5164_v21, %v5163_v37 }
 0x6bf   : > { %17732 = vst [vmem:[#allocation50_spill] sm:$0xff] %v15232_v38  ;;  %17733 = vst [vmem:[#allocation51_spill] sm:$0xff] %v15235_v31  ;;  %v11028_v50 = vpack.i.bf16 %v15232_v38, %v15235_v31  ;;  %v6156_v53 = vsel %vm1981_vm7, %v6124_v11, %v10716_v8  ;;  %v10727_v58 = vunpack.i.h.bf16 %v10725_v13 }
 0x6c0   : > { %v15239_v41 = vpop.permute.xlu0 %10744  ;;  %v15241_v54 = vpop.permute.xlu1 %10734  ;;  %11009 = vrot.lane.b32.xlu0 %v11003_v52, %s11954_s8  ;;  %v15252_v52 = vsel %vm1090_vm2, %v5324_v15, %v5325_v9  ;;  %v6188_v1 = vsel %vm2014_vm8, %v6156_v53, %v10726_v59 }
 0x6c1   : > { %11029 = vrot.lane.b32.xlu1 %v11028_v50, %s17655_s20  ;;  %v11038_v15 = vpack.i.bf16 %v15259_v34, %v15252_v52 }
 0x6c2   : > { %v9498_v26 = vpop.f32.mrf.mxu1 }
 0x6c3   : > { %v5098_v63 = vmul.f32 %v9498_v26, %v14921_v39 }
 0x6c4   : > { %v10740_v35 = vpop.permute.xlu1 %10739  ;;  %v10750_v27 = vpop.permute.xlu0 %10749  ;;  %11014 = vrot.lane.b32.xlu0 %v11013_v45, %s17654_s17 }
 0x6c5   : > { %v5134_v37 = vadd.f32 %v14925_v10, %v5098_v63  ;;  %v5014_v21 = vpop.f32.mrf.mxu1  ;;  %11034 = vrot.lane.b32.xlu1 %v11028_v50, %s11958_s15  ;;  %v10741_v26 = vunpack.i.l.bf16 %v10740_v35  ;;  %v10751_v20 = vunpack.i.l.bf16 %v10750_v27  ;;  %v10752_v38 = vunpack.i.h.bf16 %v10750_v27 }
 0x6c6   : > { %v5097_v61 = vmul.f32 %v14921_v39, %v5014_v21  ;;  %v6157_v50 = vsel %vm1981_vm7, %v6125_v18, %v10717_v22  ;;  %v10742_v9 = vunpack.i.h.bf16 %v10740_v35  ;;  %v10711_v35 = vunpack.i.l.bf16 %v15207_v62 }
 0x6c7   : > { %v5166_v8 = vmax.f32 %v5134_v37, 0.0  ;;  %v6220_v13 = vsel %vm2047_vm9, %v6188_v1, %v10751_v20  ;;  %v6189_v27 = vsel %vm2014_vm8, %v6157_v50, %v10727_v58 }
 0x6c8   : > { %v5133_v63 = vadd.f32 %v14925_v10, %v5097_v61  ;;  %v10755_v11 = vpop.permute.xlu1 %10754  ;;  %11019 = vrot.lane.b32.xlu0 %v11013_v45, %s11956_s22  ;;  %v6252_v53 = vsel %vm2080_vm10, %v6220_v13, %v10741_v26  ;;  %v15271_v59 = vpop.permute.xlu0 %10764  ;;  %v6221_v20 = vsel %vm2047_vm9, %v6189_v27, %v10752_v38  ;;  %v10731_v26 = vunpack.i.l.bf16 %v15227_v42 }
 0x6c9   : > { %11039 = vrot.lane.b32.xlu1 %v11038_v15, %s11959_s16  ;;  %6409 = vmatmul.mubr.f32.vlgmr.msra.gmra.mxu1 %v6252_v53  ;;  %v5238_v18 = vrot.slane %v5166_v8, 7  ;;  %v6253_v58 = vsel %vm2080_vm10, %v6221_v20, %v10742_v9  ;;  %v10732_v27 = vunpack.i.h.bf16 %v15227_v42 }
 0x6ca   : > { %v5165_v21 = vmax.f32 %v5133_v63, 0.0  ;;  %9126 = vmatprep.mubr.msk.f32.mxu1 %vm1882_vm4, %v15029_v36  ;;  %v10712_v36 = vunpack.i.h.bf16 %v15207_v62  ;;  %v10756_v63 = vunpack.i.l.bf16 %v10755_v11  ;;  %v6064_v62 = vsel %vm1882_vm4, %v14978_v7, %v10711_v35 }
 0x6cc   : > { %v15276_v1 = vpop.permute.xlu1 %10759  ;;  %11024 = vrot.lane.b32.xlu0 %v11013_v45, %s11957_s23  ;;  %v5237_v22 = vrot.slane %v5165_v21, 7  ;;  %v5327_v53 = vrot.slane %v5165_v21, 1 }
 0x6cd   : > { %11044 = vrot.lane.b32.xlu1 %v11038_v15, %s11954_s8  ;;  %6414 = vmatmul.mubr.f32.gmra.mxu1 %v6253_v58  ;;  %v11048_v15 = vpack.i.bf16 %v5166_v8, %v5165_v21  ;;  %v5328_v58 = vrot.slane %v5166_v8, 1  ;;  %v6094_v21 = vsel %vm1915_vm5, %v6064_v62, %v10731_v26 }
 0x6ce   : > { %v15283_v37 = vsel %vm994_vm3, %v5237_v22, %v5238_v18  ;;  %v15286_v38 = vsel %vm994_vm3, 0.0, %v5237_v22  ;;  %9127 = vmatprep.mubr.msk.f32.mxu1 %vm1882_vm4, %v15052_v12  ;;  %v10757_v22 = vunpack.i.h.bf16 %v10755_v11  ;;  %v6126_v42 = vsel %vm1948_vm6, %v6094_v21, %v10756_v63 }
 0x6cf   : > { %17736 = vst [vmem:[#allocation54_spill] sm:$0xff] %v15283_v37  ;;  %17737 = vst [vmem:[#allocation55_spill] sm:$0xff] %v15286_v38  ;;  %v15290_v45 = vpop.permute.xlu0 %10769  ;;  %v9501_v61 = vpop.f32.mrf.mxu1  ;;  %v11063_v13 = vpack.i.bf16 %v15283_v37, %v15286_v38  ;;  %v15318_v11 = vsel %vm1090_vm2, %v5327_v53, %v5328_v58  ;;  %v15328_v62 = vsel %vm1090_vm2, %v5328_v58, 0.0  ;;  %v10762_v53 = vunpack.i.h.bf16 %v15276_v1 }
 0x6d0   : > { %v5100_v50 = vmul.f32 %v9501_v61, %v14921_v39  ;;  %v15297_v9 = vpop.permute.xlu1 %10774  ;;  %v6065_v61 = vsel %vm1882_vm4, %v14975_v46, %v10712_v36  ;;  %v10761_v46 = vunpack.i.l.bf16 %v15276_v1  ;;  %v10747_v36 = vunpack.i.h.bf16 %v15239_v41  ;;  %17738 = vst [vmem:[#allocation56_spill] sm:$0xff] %v15328_v62 }
 0x6d1   : > { %11064 = vrot.lane.b32.xlu0 %v11063_v13, %s17655_s20  ;;  %11049 = vrot.lane.b32.xlu1 %v11048_v15, %s17654_s17  ;;  %v5024_v20 = vpop.f32.mrf.mxu1  ;;  %v6095_v8 = vsel %vm1915_vm5, %v6065_v61, %v10732_v27  ;;  %v11073_v27 = vpack.i.bf16 %v15328_v62, %v15318_v11  ;;  %v10736_v58 = vunpack.i.l.bf16 %v15241_v54 }
 0x6d2   : > { %v5136_v18 = vadd.f32 %v14925_v10, %v5100_v50  ;;  %v5099_v12 = vmul.f32 %v14921_v39, %v5024_v20  ;;  %v10746_v50 = vunpack.i.l.bf16 %v15239_v41  ;;  %v6127_v26 = vsel %vm1948_vm6, %v6095_v8, %v10757_v22 }
 0x6d3   : > { %v15309_v37 = vpop.permute.xlu0 %10779  ;;  %v10737_v22 = vunpack.i.h.bf16 %v15241_v54 }
 0x6d4   : > { %v15312_v7 = vmax.f32 %v5136_v18, 0.0  ;;  %v5135_v35 = vadd.f32 %v14925_v10, %v5099_v12  ;;  %v15315_v38 = vpop.permute.xlu1 %10789  ;;  %v6158_v18 = vsel %vm1981_vm7, %v6126_v42, %v10746_v50 }
 0x6d5   : > { %11069 = vrot.lane.b32.xlu0 %v11063_v13, %s11958_s15  ;;  %11054 = vrot.lane.b32.xlu1 %v11048_v15, %s11956_s22  ;;  %v6190_v1 = vsel %vm2014_vm8, %v6158_v18, %v10761_v46  ;;  %v10767_v46 = vunpack.i.h.bf16 %v15271_v59  ;;  %v10766_v18 = vunpack.i.l.bf16 %v15271_v59  ;;  %v10792_v59 = vunpack.i.h.bf16 %v15315_v38 }
 0x6d6   : > { %v5167_v63 = vmax.f32 %v5135_v35, 0.0  ;;  %v5241_v41 = vrot.slane %v15312_v7, 7  ;;  %v10776_v35 = vunpack.i.l.bf16 %v15297_v9 }
 0x6d7   : > { %v10785_v20 = vpop.permute.xlu0 %10784 }
 0x6d8   : > { %v10787_v12 = vunpack.i.h.bf16 %v10785_v20  ;;  %v10786_v13 = vunpack.i.l.bf16 %v10785_v20  ;;  %v15334_v61 = vpop.permute.xlu1 %10794  ;;  %v5240_v21 = vrot.slane %v5167_v63, 7  ;;  %v6159_v20 = vsel %vm1981_vm7, %v6127_v26, %v10747_v36 }
 0x6d9   : > { %11074 = vrot.lane.b32.xlu0 %v11073_v27, %s11959_s16  ;;  %11059 = vrot.lane.b32.xlu1 %v11048_v15, %s11957_s23  ;;  %v6191_v15 = vsel %vm2014_vm8, %v6159_v20, %v10762_v53  ;;  %v10777_v36 = vunpack.i.h.bf16 %v15297_v9  ;;  %v10791_v26 = vunpack.i.l.bf16 %v15315_v38  ;;  %v6066_v53 = vsel %vm1882_vm4, %v15021_v25, %v10736_v58 }
 0x6da   : > { %v6222_v42 = vsel %vm2047_vm9, %v6190_v1, %v10786_v13  ;;  %v15345_v8 = vsel %vm994_vm3, %v5240_v21, %v5241_v41  ;;  %v15348_v50 = vsel %vm994_vm3, 0.0, %v5240_v21  ;;  %v6223_v21 = vsel %vm2047_vm9, %v6191_v15, %v10787_v12 }
 0x6db   : > { %v15351_v31 = vpop.permute.xlu0 %10799  ;;  %v6254_v54 = vsel %vm2080_vm10, %v6222_v42, %v10776_v35  ;;  %v11098_v62 = vpack.i.bf16 %v15345_v8, %v15348_v50  ;;  %v5330_v41 = vrot.slane %v5167_v63, 1  ;;  %v6067_v12 = vsel %vm1882_vm4, %v15018_v32, %v10737_v22 }
 0x6dc   : > { %6419 = vmatmul.mubr.f32.gmra.mxu1 %v6254_v54  ;;  %v15359_v13 = vpop.permute.xlu1 %10804  ;;  %v6255_v9 = vsel %vm2080_vm10, %v6223_v21, %v10777_v36  ;;  %v5331_v1 = vrot.slane %v15312_v7, 1  ;;  %v6097_v42 = vsel %vm1915_vm5, %v6067_v12, %v10767_v46  ;;  %v10796_v20 = vunpack.i.l.bf16 %v15334_v61 }
 0x6dd   : > { %11079 = vrot.lane.b32.xlu0 %v11073_v27, %s11954_s8  ;;  %9128 = vmatprep.mubr.msk.f32.mxu1 %vm1882_vm4, %v15058_v57  ;;  %v11083_v27 = vpack.i.bf16 %v15312_v7, %v5167_v63  ;;  %v6096_v57 = vsel %vm1915_vm5, %v6066_v53, %v10766_v18  ;;  %v10782_v63 = vunpack.i.h.bf16 %v15309_v37  ;;  %v10781_v22 = vunpack.i.l.bf16 %v15309_v37 }
 0x6de   : > { %11099 = vrot.lane.b32.xlu1 %v11098_v62, %s17655_s20  ;;  %v6128_v58 = vsel %vm1948_vm6, %v6096_v57, %v10791_v26  ;;  %v15387_v7 = vsel %vm1090_vm2, %v5330_v41, %v5331_v1  ;;  %v6129_v54 = vsel %vm1948_vm6, %v6097_v42, %v10792_v59  ;;  %v10797_v15 = vunpack.i.h.bf16 %v15334_v61 }
 0x6df   : > { %v15373_v35 = vpop.permute.xlu0 %10814  ;;  %v6160_v59 = vsel %vm1981_vm7, %v6128_v58, %v10781_v22  ;;  %v6161_v57 = vsel %vm1981_vm7, %v6129_v54, %v10782_v63 }
 0x6e0   : > { %v9504_v25 = vpop.f32.mrf.mxu1  ;;  %6424 = vmatmul.mubr.f32.gmra.mxu1 %v6255_v9  ;;  %v10810_v38 = vpop.permute.xlu1 %10809  ;;  %v6192_v9 = vsel %vm2014_vm8, %v6160_v59, %v10796_v20  ;;  %v6193_v58 = vsel %vm2014_vm8, %v6161_v57, %v10797_v15  ;;  %v10771_v20 = vunpack.i.l.bf16 %v15290_v45 }
 0x6e1   : > { %v5102_v32 = vmul.f32 %v9504_v25, %v14921_v39  ;;  %11084 = vrot.lane.b32.xlu0 %v11083_v27, %s17654_s17  ;;  %9129 = vmatprep.mubr.msk.f32.mxu1 %vm1882_vm4, %v15079_v2  ;;  %v15397_v2 = vsel %vm1090_vm2, %v5331_v1, 0.0  ;;  %v10811_v12 = vunpack.i.l.bf16 %v10810_v38 }
 0x6e2   : > { %11104 = vrot.lane.b32.xlu1 %v11098_v62, %s11958_s15  ;;  %v5034_v46 = vpop.f32.mrf.mxu1  ;;  %v11108_v37 = vpack.i.bf16 %v15397_v2, %v15387_v7 }
 0x6e3   : > { %v5138_v18 = vadd.f32 %v14925_v10, %v5102_v32  ;;  %v5101_v21 = vmul.f32 %v14921_v39, %v5034_v46  ;;  %v10820_v36 = vpop.permute.xlu0 %10819 }
 0x6e4   : > { %v10822_v26 = vunpack.i.h.bf16 %v10820_v36  ;;  %v10821_v41 = vunpack.i.l.bf16 %v10820_v36  ;;  %v10825_v53 = vpop.permute.xlu1 %10824  ;;  %v10801_v36 = vunpack.i.l.bf16 %v15351_v31 }
 0x6e5   : > { %v5170_v61 = vmax.f32 %v5138_v18, 0.0  ;;  %v5137_v62 = vadd.f32 %v14925_v10, %v5101_v21  ;;  %11089 = vrot.lane.b32.xlu0 %v11083_v27, %s11956_s22  ;;  %v10812_v18 = vunpack.i.h.bf16 %v10810_v38  ;;  %v10772_v21 = vunpack.i.h.bf16 %v15290_v45 }
 0x6e6   : > { %11109 = vrot.lane.b32.xlu1 %v11108_v37, %s11959_s16  ;;  %v6224_v1 = vsel %vm2047_vm9, %v6192_v9, %v10821_v41  ;;  %v6225_v46 = vsel %vm2047_vm9, %v6193_v58, %v10822_v26  ;;  %v10826_v15 = vunpack.i.l.bf16 %v10825_v53 }
 0x6e7   : > { %v5169_v42 = vmax.f32 %v5137_v62, 0.0  ;;  %v15408_v25 = vpop.permute.xlu0 %10834  ;;  %v6256_v32 = vsel %vm2080_vm10, %v6224_v1, %v10811_v12  ;;  %v5244_v54 = vrot.slane %v5170_v61, 7  ;;  %v6257_v26 = vsel %vm2080_vm10, %v6225_v46, %v10812_v18 }
 0x6e8   : > { %v15412_v22 = vpop.permute.xlu1 %10829  ;;  %6429 = vmatmul.mubr.f32.gmra.mxu1 %v6256_v32  ;;  %v10802_v62 = vunpack.i.h.bf16 %v15351_v31  ;;  %v10827_v1 = vunpack.i.h.bf16 %v10825_v53  ;;  %v5334_v57 = vrot.slane %v5170_v61, 1  ;;  %v6069_v32 = vsel %vm1882_vm4, %v15041_v17, %v10772_v21 }
 0x6e9   : > { %11094 = vrot.lane.b32.xlu0 %v11083_v27, %s11957_s23  ;;  %9130 = vmatprep.mubr.msk.f32.mxu1 %vm1882_vm4, %v15086_v19  ;;  %v5243_v63 = vrot.slane %v5169_v42, 7  ;;  %v11118_v59 = vpack.i.bf16 %v5170_v61, %v5169_v42  ;;  %v5333_v12 = vrot.slane %v5169_v42, 1  ;;  %v10816_v61 = vunpack.i.l.bf16 %v15373_v35 }
 0x6ea   : > { %11114 = vrot.lane.b32.xlu1 %v11108_v37, %s11954_s8  ;;  %v6068_v37 = vsel %vm1882_vm4, %v15044_v60, %v10771_v20  ;;  %v6099_v53 = vsel %vm1915_vm5, %v6069_v32, %v10802_v62  ;;  %v10817_v20 = vunpack.i.h.bf16 %v15373_v35  ;;  %v10831_v17 = vunpack.i.l.bf16 %v15412_v22 }
 0x6eb   : > { %v15422_v41 = vpop.permute.xlu0 %10839  ;;  %v15426_v38 = vsel %vm994_vm3, %v5243_v63, %v5244_v54  ;;  %v15429_v27 = vsel %vm994_vm3, 0.0, %v5243_v63  ;;  %v6098_v9 = vsel %vm1915_vm5, %v6068_v37, %v10801_v36  ;;  %v6131_v63 = vsel %vm1948_vm6, %v6099_v53, %v10827_v1 }
 0x6ec   : > { %6434 = vmatmul.mubr.f32.gmra.mxu1 %v6257_v26  ;;  %v15431_v19 = vpop.permute.xlu1 %10844  ;;  %v11133_v45 = vpack.i.bf16 %v15426_v38, %v15429_v27  ;;  %v6130_v42 = vsel %vm1948_vm6, %v6098_v9, %v10826_v15  ;;  %v15464_v36 = vsel %vm1090_vm2, %v5334_v57, 0.0  ;;  %v10832_v15 = vunpack.i.h.bf16 %v15412_v22 }
 0x6ed   : > { %9131 = vmatprep.mubr.msk.f32.mxu1 %vm1882_vm4, %v15106_v6  ;;  %v15452_v6 = vsel %vm1090_vm2, %v5333_v12, %v5334_v57  ;;  %v6162_v12 = vsel %vm1981_vm7, %v6130_v42, %v10816_v61  ;;  %v10846_v57 = vunpack.i.l.bf16 %v15431_v19  ;;  %v6163_v53 = vsel %vm1981_vm7, %v6131_v63, %v10817_v20 }
 0x6ee   : > { %11119 = vrot.lane.b32.xlu1 %v11118_v59, %s17654_s17  ;;  %11134 = vrot.lane.b32.xlu0 %v11133_v45, %s17655_s20  ;;  %v11143_v35 = vpack.i.bf16 %v15464_v36, %v15452_v6  ;;  %v6194_v22 = vsel %vm2014_vm8, %v6162_v12, %v10831_v17  ;;  %v10837_v61 = vunpack.i.h.bf16 %v15408_v25  ;;  %v6195_v17 = vsel %vm2014_vm8, %v6163_v53, %v10832_v15 }
 0x6ef   : > { %v9507_v58 = vpop.f32.mrf.mxu1  ;;  %v15446_v60 = vpop.permute.xlu0 %10849  ;;  %v10842_v20 = vunpack.i.h.bf16 %v15422_v41  ;;  %v10841_v63 = vunpack.i.l.bf16 %v15422_v41 }
 0x6f0   : > { %v5104_v31 = vmul.f32 %v9507_v58, %v14921_v39  ;;  %v15449_v46 = vpop.permute.xlu1 %10859  ;;  %v10806_v58 = vunpack.i.l.bf16 %v15359_v13 }
 0x6f1   : > { %v5044_v18 = vpop.f32.mrf.mxu1  ;;  %v10861_v15 = vunpack.i.l.bf16 %v15449_v46 }
 0x6f2   : > { %v5140_v54 = vadd.f32 %v14925_v10, %v5104_v31  ;;  %v5103_v21 = vmul.f32 %v14921_v39, %v5044_v18  ;;  %11124 = vrot.lane.b32.xlu1 %v11118_v59, %s11956_s22  ;;  %11139 = vrot.lane.b32.xlu0 %v11133_v45, %s11958_s15  ;;  %v10807_v45 = vunpack.i.h.bf16 %v15359_v13  ;;  %v10836_v18 = vunpack.i.l.bf16 %v15408_v25 }
 0x6f3   : > { %v10855_v26 = vpop.permute.xlu0 %10854  ;;  %v10847_v25 = vunpack.i.h.bf16 %v15431_v19  ;;  %v6070_v41 = vsel %vm1882_vm4, %v15071_v55, %v10806_v58 }
 0x6f4   : > { %v15470_v37 = vmax.f32 %v5140_v54, 0.0  ;;  %v5139_v62 = vadd.f32 %v14925_v10, %v5103_v21  ;;  %v10857_v9 = vunpack.i.h.bf16 %v10855_v26  ;;  %v10856_v1 = vunpack.i.l.bf16 %v10855_v26  ;;  %v15473_v32 = vpop.permute.xlu1 %10864 }
 0x6f5   : > { %v6071_v19 = vsel %vm1882_vm4, %v15068_v24, %v10807_v45  ;;  %v6072_v24 = vsel %vm1882_vm4, %v15098_v40, %v10841_v63  ;;  %v6073_v45 = vsel %vm1882_vm4, %v15095_v23, %v10842_v20 }
 0x6f6   : > { %v5171_v31 = vmax.f32 %v5139_v62, 0.0  ;;  %11129 = vrot.lane.b32.xlu1 %v11118_v59, %s11957_s23  ;;  %11144 = vrot.lane.b32.xlu0 %v11143_v35, %s11959_s16  ;;  %v6226_v42 = vsel %vm2047_vm9, %v6194_v22, %v10856_v1  ;;  %v6227_v59 = vsel %vm2047_vm9, %v6195_v17, %v10857_v9  ;;  %v5247_v12 = vrot.slane %v15470_v37, 7 }
 0x6f7   : > { %v15485_v54 = vpop.permute.xlu0 %10869  ;;  %v6258_v21 = vsel %vm2080_vm10, %v6226_v42, %v10846_v57  ;;  %v10862_v62 = vunpack.i.h.bf16 %v15449_v46  ;;  %v6101_v22 = vsel %vm1915_vm5, %v6071_v19, %v10837_v61  ;;  %v5337_v23 = vrot.slane %v15470_v37, 1 }
 0x6f8   : > { %6439 = vmatmul.mubr.f32.gmra.mxu1 %v6258_v21  ;;  %v15489_v13 = vpop.permute.xlu1 %10874  ;;  %v5246_v26 = vrot.slane %v5171_v31, 7  ;;  %v11153_v55 = vpack.i.bf16 %v15470_v37, %v5171_v31  ;;  %v5336_v58 = vrot.slane %v5171_v31, 1  ;;  %v10852_v21 = vunpack.i.h.bf16 %v15446_v60 }
 0x6f9   : > { %9132 = vmatprep.mubr.msk.f32.mxu1 %vm1882_vm4, %v15112_v0  ;;  %v6259_v0 = vsel %vm2080_vm10, %v6227_v59, %v10847_v25  ;;  %v6133_v61 = vsel %vm1948_vm6, %v6101_v22, %v10862_v62  ;;  %v10866_v31 = vunpack.i.l.bf16 %v15473_v32  ;;  %v10851_v59 = vunpack.i.l.bf16 %v15446_v60 }
 0x6fa   : > { %11149 = vrot.lane.b32.xlu0 %v11143_v35, %s11954_s8  ;;  %v15502_v9 = vsel %vm994_vm3, %v5246_v26, %v5247_v12  ;;  %v15505_v1 = vsel %vm994_vm3, 0.0, %v5246_v26  ;;  %v6100_v35 = vsel %vm1915_vm5, %v6070_v41, %v10836_v18  ;;  %v10871_v63 = vunpack.i.l.bf16 %v15485_v54 }
 0x6fb   : > { %17739 = vst [vmem:[#allocation57_spill] sm:$0xff] %v15502_v9  ;;  %v15511_v57 = vpop.permute.xlu0 %10879  ;;  %v11168_v46 = vpack.i.bf16 %v15502_v9, %v15505_v1  ;;  %v6132_v18 = vsel %vm1948_vm6, %v6100_v35, %v10861_v15  ;;  %v15545_v62 = vsel %vm1090_vm2, %v5336_v58, %v5337_v23  ;;  %v6165_v41 = vsel %vm1981_vm7, %v6133_v61, %v10852_v21 }
 0x6fc   : > { %v9510_v42 = vpop.f32.mrf.mxu1  ;;  %6444 = vmatmul.mubr.f32.gmra.mxu1 %v6259_v0  ;;  %v15518_v53 = vpop.permute.xlu1 %10894  ;;  %v6164_v60 = vsel %vm1981_vm7, %v6132_v18, %v10851_v59  ;;  %v10872_v19 = vunpack.i.h.bf16 %v15485_v54  ;;  %v15557_v0 = vsel %vm1090_vm2, %v5337_v23, 0.0  ;;  %v10877_v22 = vunpack.i.h.bf16 %v15489_v13 }
 0x6fd   : > { %v5106_v17 = vmul.f32 %v9510_v42, %v14921_v39  ;;  %11169 = vrot.lane.b32.xlu1 %v11168_v46, %s17655_s20  ;;  %9133 = vmatprep.mubr.msk.f32.mxu1 %vm1882_vm4, %v15131_v30  ;;  %v10867_v30 = vunpack.i.h.bf16 %v15473_v32  ;;  %v10896_v32 = vunpack.i.l.bf16 %v15518_v53  ;;  %v6196_v35 = vsel %vm2014_vm8, %v6164_v60, %v10866_v31 }
 0x6fe   : > { %11154 = vrot.lane.b32.xlu0 %v11153_v55, %s17654_s17  ;;  %v5054_v40 = vpop.f32.mrf.mxu1  ;;  %v10876_v42 = vunpack.i.l.bf16 %v15489_v13  ;;  %v11178_v21 = vpack.i.bf16 %v15557_v0, %v15545_v62  ;;  %v6102_v54 = vsel %vm1915_vm5, %v6072_v24, %v10871_v63  ;;  %v10897_v23 = vunpack.i.h.bf16 %v15518_v53 }
 0x6ff   : > { %v5142_v26 = vadd.f32 %v14925_v10, %v5106_v17  ;;  %v5105_v12 = vmul.f32 %v14921_v39, %v5054_v40  ;;  %v15538_v20 = vpop.permute.xlu0 %10884  ;;  %v10881_v40 = vunpack.i.l.bf16 %v15511_v57  ;;  %v6103_v9 = vsel %vm1915_vm5, %v6073_v45, %v10872_v19 }
 0x700   : > { %v15542_v25 = vpop.permute.xlu1 %10899 }
 0x701   : > { %v15547_v15 = vmax.f32 %v5142_v26, 0.0  ;;  %v5141_v37 = vadd.f32 %v14925_v10, %v5105_v12  ;;  %11174 = vrot.lane.b32.xlu1 %v11168_v46, %s11958_s15  ;;  %v6134_v26 = vsel %vm1948_vm6, %v6102_v54, %v10896_v32  ;;  %v10901_v63 = vunpack.i.l.bf16 %v15542_v25 }
 0x702   : > { %11159 = vrot.lane.b32.xlu0 %v11153_v55, %s11956_s22 }
 0x703   : > { %v5173_v46 = vmax.f32 %v5141_v37, 0.0  ;;  %v10890_v58 = vpop.permute.xlu0 %10889  ;;  %v5250_v13 = vrot.slane %v15547_v15, 7 }
 0x704   : > { %v10892_v17 = vunpack.i.h.bf16 %v10890_v58  ;;  %v10891_v61 = vunpack.i.l.bf16 %v10890_v58  ;;  %v15565_v18 = vpop.permute.xlu1 %10904  ;;  %v9513_v31 = vpop.f32.mrf.mxu1  ;;  %v6197_v58 = vsel %vm2014_vm8, %v6165_v41, %v10867_v30  ;;  %v10902_v30 = vunpack.i.h.bf16 %v15542_v25 }
 0x705   : > { %11179 = vrot.lane.b32.xlu1 %v11178_v21, %s11959_s16  ;;  %v5249_v59 = vrot.slane %v5173_v46, 7  ;;  %v5108_v12 = vmul.f32 %v9513_v31, %v14921_v39  ;;  %v5340_v25 = vrot.slane %v15547_v15, 1 }
 0x706   : > { %11164 = vrot.lane.b32.xlu0 %v11153_v55, %s11957_s23  ;;  %v6228_v24 = vsel %vm2047_vm9, %v6196_v35, %v10891_v61  ;;  %v5064_v37 = vpop.f32.mrf.mxu1  ;;  %v6229_v35 = vsel %vm2047_vm9, %v6197_v58, %v10892_v17  ;;  %v10882_v61 = vunpack.i.h.bf16 %v15511_v57  ;;  %v5339_v57 = vrot.slane %v5173_v46, 1 }
 0x707   : > { %v6260_v60 = vsel %vm2080_vm10, %v6228_v24, %v10876_v42  ;;  %v15578_v53 = vsel %vm994_vm3, %v5249_v59, %v5250_v13  ;;  %v5107_v32 = vmul.f32 %v14921_v39, %v5064_v37  ;;  %v15584_v55 = vsel %vm994_vm3, 0.0, %v5249_v59 }
 0x708   : > { %6449 = vmatmul.mubr.f32.gmra.mxu1 %v6260_v60  ;;  %v10910_v54 = vpop.permute.xlu1 %10909  ;;  %v6135_v42 = vsel %vm1948_vm6, %v6103_v9, %v10897_v23  ;;  %v11203_v45 = vpack.i.bf16 %v15578_v53, %v15584_v55  ;;  %v6166_v39 = vsel %vm1981_vm7, %v6134_v26, %v10881_v40  ;;  %v5144_v41 = vadd.f32 %v14925_v10, %v5108_v12 }
 0x709   : > { %11184 = vrot.lane.b32.xlu1 %v11178_v21, %s11954_s8  ;;  %9134 = vmatprep.mubr.msk.f32.mxu1 %vm1882_vm4, %v15136_v16  ;;  %v5143_v19 = vadd.f32 %v14925_v10, %v5107_v32  ;;  %v6261_v21 = vsel %vm2080_vm10, %v6229_v35, %v10877_v22  ;;  %v11188_v16 = vpack.i.bf16 %v15547_v15, %v5173_v46  ;;  %v10911_v40 = vunpack.i.l.bf16 %v10910_v54 }
 0x70a   : > { %v10925_v17 = vpop.permute.xlu0 %10924  ;;  %11204 = vrot.lane.b32.xlu0 %v11203_v45, %s17655_s20  ;;  %v6198_v23 = vsel %vm2014_vm8, %v6166_v39, %v10901_v63  ;;  %v15611_v22 = vmax.f32 %v5144_v41, 0.0  ;;  %v15615_v12 = vsel %vm1090_vm2, %v5339_v57, %v5340_v25  ;;  %v6167_v24 = vsel %vm1981_vm7, %v6135_v42, %v10882_v61 }
 0x70b   : > { %v10926_v9 = vunpack.i.l.bf16 %v10925_v17  ;;  %v15602_v31 = vmax.f32 %v5143_v19, 0.0  ;;  %v10927_v59 = vunpack.i.h.bf16 %v10925_v17  ;;  %v6199_v15 = vsel %vm2014_vm8, %v6167_v24, %v10902_v30 }
 0x70c   : > { %6454 = vmatmul.mubr.f32.gmra.mxu1 %v6261_v21  ;;  %v15605_v13 = vpop.permute.xlu1 %10914  ;;  %v15621_v63 = vsel %vm1090_vm2, %v5340_v25, 0.0  ;;  %v10886_v60 = vunpack.i.l.bf16 %v15538_v20  ;;  %v10912_v58 = vunpack.i.h.bf16 %v10910_v54  ;;  %v5375_v35 = vrot.slane %v15611_v22, 7 }
 0x70d   : > { %11189 = vrot.lane.b32.xlu1 %v11188_v16, %s17654_s17  ;;  %9135 = vmatprep.mubr.msk.f32.mxu1 %vm1882_vm4, %v15162_v43  ;;  %v6230_v10 = vsel %vm2047_vm9, %v6198_v23, %v10926_v9  ;;  %v6231_v43 = vsel %vm2047_vm9, %v6199_v15, %v10927_v59  ;;  %v5374_v37 = vrot.slane %v15602_v31, 7  ;;  %v11213_v32 = vpack.i.bf16 %v15621_v63, %v15615_v12 }
 0x70e   : > { %v10930_v46 = vpop.permute.xlu0 %10929  ;;  %v6262_v26 = vsel %vm2080_vm10, %v6230_v10, %v10911_v40  ;;  %11209 = vrot.lane.b32.xlu0 %v11203_v45, %s11958_s15  ;;  %v10906_v61 = vunpack.i.l.bf16 %v15565_v18  ;;  %v322_v45 = vld [vmem:[%s17436_s3 + $0x38] sm:$0xff]  ;;  %v6263_v54 = vsel %vm2080_vm10, %v6231_v43, %v10912_v58  ;;  %v10887_v19 = vunpack.i.h.bf16 %v15538_v20 }
 0x70f   : > { %v10931_v39 = vunpack.i.l.bf16 %v10930_v46  ;;  %9514 = vmatprep.subr.mxu0 %v322_v45  ;;  %v5378_v41 = vsel %vm994_vm3, 0.0, %v5374_v37  ;;  %v6074_v17 = vsel %vm1882_vm4, %v15125_v47, %v10886_v60  ;;  %v10907_v57 = vunpack.i.h.bf16 %v15565_v18 }
 0x710   : > { %6459 = vmatmul.mubr.f32.gmra.mxu1 %v6262_v26  ;;  %v15636_v30 = vpop.permute.xlu1 %10919  ;;  %9515 = vmatpush3.msra.mxu0 %v322_v45  ;;  %v6104_v9 = vsel %vm1915_vm5, %v6074_v17, %v10906_v61  ;;  %v10932_v23 = vunpack.i.h.bf16 %v10930_v46  ;;  %v10916_v47 = vunpack.i.l.bf16 %v15605_v13 }
 0x711   : > { %11194 = vrot.lane.b32.xlu1 %v11188_v16, %s11956_s22  ;;  %9136 = vmatprep.mubr.msk.f32.mxu1 %vm1882_vm4, %v15167_v48  ;;  %v5376_v48 = vsel %vm994_vm3, %v5374_v37, %v5375_v35  ;;  %v6136_v40 = vsel %vm1948_vm6, %v6104_v9, %v10931_v39  ;;  %v5379_v35 = vrot.slane %v15602_v31, 1 }
 0x712   : > { %v10935_v42 = vpop.permute.xlu0 %10934  ;;  %11214 = vrot.lane.b32.xlu0 %v11213_v32, %s11959_s16  ;;  %v11228_v25 = vpack.i.bf16 %v5376_v48, %v5378_v41  ;;  %v6168_v26 = vsel %vm1981_vm7, %v6136_v40, %v10916_v47 }
 0x713   : > { %v10936_v59 = vunpack.i.l.bf16 %v10935_v42  ;;  %v10937_v15 = vunpack.i.h.bf16 %v10935_v42  ;;  %v10921_v42 = vunpack.i.l.bf16 %v15636_v30 }
 0x714   : > { %6464 = vmatmul.mubr.f32.gmra.mxu1 %v6263_v54  ;;  %v5380_v54 = vrot.slane %v15611_v22, 1 }
 0x715   : > { %11199 = vrot.lane.b32.xlu1 %v11188_v16, %s11957_s23  ;;  %9137 = vmatprep.mubr.msk.f32.mxu1 %vm1882_vm4, %v15186_v56  ;;  %v6075_v16 = vsel %vm1882_vm4, %v15122_v44, %v10887_v19  ;;  %v11223_v56 = vpack.i.bf16 %v15611_v22, %v15602_v31  ;;  %v6200_v60 = vsel %vm2014_vm8, %v6168_v26, %v10936_v59  ;;  %v10917_v44 = vunpack.i.h.bf16 %v15605_v13 }
 0x716   : > { %v10940_v21 = vpop.permute.xlu0 %10939  ;;  %11219 = vrot.lane.b32.xlu0 %v11213_v32, %s11954_s8  ;;  %v6105_v18 = vsel %vm1915_vm5, %v6075_v16, %v10907_v57  ;;  %v10922_v57 = vunpack.i.h.bf16 %v15636_v30 }
 0x717   : > { %v10960_v20 = vpop.permute.xlu1 %10959  ;;  %v6137_v24 = vsel %vm1948_vm6, %v6105_v18, %v10932_v23  ;;  %v10941_v17 = vunpack.i.l.bf16 %v10940_v21  ;;  %v15678_v23 = vsel %vm1090_vm2, %v5379_v35, %v5380_v54  ;;  %v10942_v59 = vunpack.i.h.bf16 %v10940_v21 }
 0x718   : > { %v10961_v10 = vunpack.i.l.bf16 %v10960_v20  ;;  %v10962_v58 = vunpack.i.h.bf16 %v10960_v20  ;;  %v6169_v19 = vsel %vm1981_vm7, %v6137_v24, %v10917_v44  ;;  %v6077_v21 = vsel %vm1882_vm4, %v15148_v49, %v10922_v57 }
 0x719   : > { %11229 = vrot.lane.b32.xlu1 %v11228_v25, %s17655_s20  ;;  %v15699_v24 = vsel %vm1090_vm2, %v5380_v54, 0.0 }
 0x71a   : > { %v10945_v46 = vpop.permute.xlu0 %10944  ;;  %11224 = vrot.lane.b32.xlu0 %v11223_v56, %s17654_s17  ;;  %v6232_v32 = vsel %vm2047_vm9, %v6200_v60, %v10961_v10 }
 0x71b   : > { %v10946_v43 = vunpack.i.l.bf16 %v10945_v46  ;;  %v10965_v37 = vpop.permute.xlu1 %10964  ;;  %v10947_v61 = vunpack.i.h.bf16 %v10945_v46 }
 0x71c   : > { %v10966_v9 = vunpack.i.l.bf16 %v10965_v37  ;;  %v10967_v25 = vunpack.i.h.bf16 %v10965_v37 }
 0x71d   : > { %5655 = vrot.lane.b32.xlu1 %v5378_v41, %s11958_s15  ;;  %v6264_v45 = vsel %vm2080_vm10, %v6232_v32, %v10946_v43  ;;  %v6201_v41 = vsel %vm2014_vm8, %v6169_v19, %v10937_v15 }
 0x71e   : > { %v10950_v39 = vpop.permute.xlu0 %10949  ;;  %6469 = vmatmul.mubr.f32.gmra.mxu1 %v6264_v45  ;;  %5751 = vrot.lane.b32.xlu0 %v15602_v31, %s11956_s22  ;;  %v6233_v40 = vsel %vm2047_vm9, %v6201_v41, %v10962_v58 }
 0x71f   : > { %v10970_v13 = vpop.permute.xlu1 %10969  ;;  %9138 = vmatprep.mubr.msk.f32.mxu1 %vm1882_vm4, %v15192_v29  ;;  %v10951_v20 = vunpack.i.l.bf16 %v10950_v39  ;;  %v6265_v31 = vsel %vm2080_vm10, %v6233_v40, %v10947_v61  ;;  %v6076_v29 = vsel %vm1882_vm4, %v15151_v4, %v10921_v42  ;;  %v10952_v10 = vunpack.i.h.bf16 %v10950_v39 }
 0x720   : > { %v6106_v30 = vsel %vm1915_vm5, %v6076_v29, %v10941_v17  ;;  %v10971_v18 = vunpack.i.l.bf16 %v10970_v13  ;;  %v6107_v4 = vsel %vm1915_vm5, %v6077_v21, %v10942_v59 }
 0x721   : > { %5848 = vrot.lane.b32.xlu1 %v15678_v23, %s11959_s16  ;;  %v6138_v56 = vsel %vm1948_vm6, %v6106_v30, %v10966_v9  ;;  %v6139_v26 = vsel %vm1948_vm6, %v6107_v4, %v10967_v25 }
 0x722   : > { %v10955_v47 = vpop.permute.xlu0 %10954  ;;  %6474 = vmatmul.mubr.f32.gmra.mxu1 %v6265_v31  ;;  %5657 = vrot.lane.b32.xlu0 %v5376_v48, %s11958_s15  ;;  %v6170_v46 = vsel %vm1981_vm7, %v6138_v56, %v10951_v20  ;;  %v10972_v48 = vunpack.i.h.bf16 %v10970_v13  ;;  %v6171_v15 = vsel %vm1981_vm7, %v6139_v26, %v10952_v10 }
 0x723   : > { %v10975_v16 = vpop.permute.xlu1 %10974  ;;  %9139 = vmatprep.mubr.msk.f32.mxu1 %vm1882_vm4, %v15217_v33  ;;  %v6202_v44 = vsel %vm2014_vm8, %v6170_v46, %v10971_v18  ;;  %v10956_v45 = vunpack.i.l.bf16 %v10955_v47  ;;  %v10957_v13 = vunpack.i.h.bf16 %v10955_v47 }
 0x724   : > { %v6203_v61 = vsel %vm2014_vm8, %v6171_v15, %v10972_v48  ;;  %v10976_v54 = vunpack.i.l.bf16 %v10975_v16  ;;  %v10977_v40 = vunpack.i.h.bf16 %v10975_v16 }
 0x725   : > { %5753 = vrot.lane.b32.xlu1 %v15611_v22, %s11956_s22  ;;  %v6078_v41 = vsel %vm1882_vm4, %v15177_v28, %v10956_v45 }
 0x726   : > { %v10995_v33 = vpop.permute.xlu0 %10994  ;;  %5850 = vrot.lane.b32.xlu0 %v15699_v24, %s11959_s16  ;;  %v6108_v59 = vsel %vm1915_vm5, %v6078_v41, %v10976_v54 }
 0x727   : > { %v10997_v49 = vunpack.i.h.bf16 %v10995_v33  ;;  %v10996_v43 = vunpack.i.l.bf16 %v10995_v33  ;;  %v10980_v37 = vpop.permute.xlu1 %10979 }
 0x728   : > { %v10981_v60 = vunpack.i.l.bf16 %v10980_v37  ;;  %v10982_v58 = vunpack.i.h.bf16 %v10980_v37 }
 0x729   : > { %v6234_v22 = vsel %vm2047_vm9, %v6202_v44, %v10996_v43  ;;  %v6235_v39 = vsel %vm2047_vm9, %v6203_v61, %v10997_v49 }
 0x72a   : > { %v11000_v32 = vpop.permute.xlu0 %10999  ;;  %v6266_v35 = vsel %vm2080_vm10, %v6234_v22, %v10981_v60  ;;  %v6267_v17 = vsel %vm2080_vm10, %v6235_v39, %v10982_v58 }
 0x72b   : > { %v10985_v42 = vpop.permute.xlu1 %10984  ;;  %6479 = vmatmul.mubr.f32.gmra.mxu1 %v6266_v35  ;;  %v11001_v57 = vunpack.i.l.bf16 %v11000_v32  ;;  %v11002_v29 = vunpack.i.h.bf16 %v11000_v32 }
 0x72c   : > { %9140 = vmatprep.mubr.msk.f32.mxu1 %vm1882_vm4, %v15223_v14  ;;  %v10986_v20 = vunpack.i.l.bf16 %v10985_v42  ;;  %v6079_v14 = vsel %vm1882_vm4, %v15174_v5, %v10957_v13  ;;  %v10987_v21 = vunpack.i.h.bf16 %v10985_v42 }
 0x72d   : > { %v6140_v25 = vsel %vm1948_vm6, %v6108_v59, %v11001_v57  ;;  %v6109_v10 = vsel %vm1915_vm5, %v6079_v14, %v10977_v40 }
 0x72e   : > { %v11005_v19 = vpop.permute.xlu0 %11004  ;;  %v6172_v56 = vsel %vm1981_vm7, %v6140_v25, %v10986_v20  ;;  %v6141_v16 = vsel %vm1948_vm6, %v6109_v10, %v11002_v29 }
 0x72f   : > { %v10990_v9 = vpop.permute.xlu1 %10989  ;;  %6484 = vmatmul.mubr.f32.gmra.mxu1 %v6267_v17  ;;  %v11006_v47 = vunpack.i.l.bf16 %v11005_v19  ;;  %v11007_v18 = vunpack.i.h.bf16 %v11005_v19  ;;  %v6173_v49 = vsel %vm1981_vm7, %v6141_v16, %v10987_v21 }
 0x730   : > { %9141 = vmatprep.mubr.msk.f32.mxu1 %vm1882_vm4, %v15252_v52  ;;  %v10991_v37 = vunpack.i.l.bf16 %v10990_v9  ;;  %v10992_v32 = vunpack.i.h.bf16 %v10990_v9 }
 0x731   : > { %v6204_v26 = vsel %vm2014_vm8, %v6172_v56, %v11006_v47  ;;  %v6205_v44 = vsel %vm2014_vm8, %v6173_v49, %v11007_v18 }
 0x732   : > { %v11010_v31 = vpop.permute.xlu0 %11009  ;;  %v6080_v54 = vsel %vm1882_vm4, %v15205_v3, %v10991_v37  ;;  %v6081_v41 = vsel %vm1882_vm4, %v15202_v51, %v10992_v32 }
 0x733   : > { %v11030_v30 = vpop.permute.xlu1 %11029  ;;  %v11011_v22 = vunpack.i.l.bf16 %v11010_v31  ;;  %v11012_v45 = vunpack.i.h.bf16 %v11010_v31 }
 0x734   : > { %v11031_v28 = vunpack.i.l.bf16 %v11030_v30  ;;  %v11032_v5 = vunpack.i.h.bf16 %v11030_v30 }
 0x735   : > { %v6111_v40 = vsel %vm1915_vm5, %v6081_v41, %v11012_v45 }
 0x736   : > { %v11015_v52 = vpop.permute.xlu0 %11014  ;;  %v6236_v48 = vsel %vm2047_vm9, %v6204_v26, %v11031_v28  ;;  %v6237_v58 = vsel %vm2047_vm9, %v6205_v44, %v11032_v5 }
 0x737   : > { %v11016_v4 = vunpack.i.l.bf16 %v11015_v52  ;;  %v11035_v46 = vpop.permute.xlu1 %11034  ;;  %v11017_v33 = vunpack.i.h.bf16 %v11015_v52 }
 0x738   : > { %v11036_v35 = vunpack.i.l.bf16 %v11035_v46  ;;  %v11037_v19 = vunpack.i.h.bf16 %v11035_v46 }
 0x739   : > { %v6268_v15 = vsel %vm2080_vm10, %v6236_v48, %v11016_v4  ;;  %v6269_v61 = vsel %vm2080_vm10, %v6237_v58, %v11017_v33  ;;  %v17740_v4 = vld [vmem:[#allocation56_spill] sm:$0xff]  ;;  %v17742_v58 = vld [vmem:[#allocation50_spill] sm:$0xff] }
 0x73a   : > { %v11020_v43 = vpop.permute.xlu0 %11019  ;;  %6489 = vmatmul.mubr.f32.gmra.mxu1 %v6268_v15  ;;  %v6143_v3 = vsel %vm1948_vm6, %v6111_v40, %v11037_v19  ;;  %v17741_v15 = vld [vmem:[#allocation51_spill] sm:$0xff] }
 0x73b   : > { %v11040_v60 = vpop.permute.xlu1 %11039  ;;  %9142 = vmatprep.mubr.msk.f32.mxu1 %vm1882_vm4, %v15259_v34  ;;  %v11021_v42 = vunpack.i.l.bf16 %v11020_v43  ;;  %v6110_v34 = vsel %vm1915_vm5, %v6080_v54, %v11011_v22  ;;  %v11022_v13 = vunpack.i.h.bf16 %v11020_v43  ;;  %v321_v54 = vld [vmem:[%s17436_s3 + $0x30] sm:$0xff] }
 0x73c   : > { %v6142_v57 = vsel %vm1948_vm6, %v6110_v34, %v11036_v35  ;;  %v11041_v9 = vunpack.i.l.bf16 %v11040_v60  ;;  %v11042_v20 = vunpack.i.h.bf16 %v11040_v60  ;;  %9516 = vmatprep.subr.mxu0 %v321_v54 }
 0x73d   : > { %v6174_v59 = vsel %vm1981_vm7, %v6142_v57, %v11021_v42  ;;  %9517 = vmatpush3.msra.mxu0 %v321_v54 }
 0x73e   : > { %v11025_v39 = vpop.permute.xlu0 %11024  ;;  %6494 = vmatmul.mubr.f32.gmra.mxu1 %v6269_v61  ;;  %v6206_v30 = vsel %vm2014_vm8, %v6174_v59, %v11041_v9 }
 0x73f   : > { %v11045_v17 = vpop.permute.xlu1 %11044  ;;  %9143 = vmatprep.mubr.msk.f32.mxu1 %vm1882_vm4, %v15318_v11  ;;  %v6175_v11 = vsel %vm1981_vm7, %v6143_v3, %v11022_v13  ;;  %v11026_v16 = vunpack.i.l.bf16 %v11025_v39  ;;  %v11027_v33 = vunpack.i.h.bf16 %v11025_v39 }
 0x740   : > { %v6207_v52 = vsel %vm2014_vm8, %v6175_v11, %v11042_v20  ;;  %v11046_v46 = vunpack.i.l.bf16 %v11045_v17  ;;  %v11047_v37 = vunpack.i.h.bf16 %v11045_v17  ;;  %v17743_v20 = vmov 0.0  }
 0x741   : > { %v6082_v49 = vsel %vm1882_vm4, %v17741_v15, %v11026_v16  ;;  %v6083_v32 = vsel %vm1882_vm4, %v17742_v58, %v11027_v33  ;;  %8425 = vmatprep.subr.mxu0 %v17743_v20  ;;  %v17745_v15 = vld [vmem:[#allocation54_spill] sm:$0xff] }
 0x742   : > { %v6112_v60 = vsel %vm1915_vm5, %v6082_v49, %v11046_v46 }
 0x743   : > { %v11065_v31 = vpop.permute.xlu0 %11064  ;;  %v11050_v14 = vpop.permute.xlu1 %11049 }
 0x744   : > { %v11067_v29 = vunpack.i.h.bf16 %v11065_v31  ;;  %v11066_v25 = vunpack.i.l.bf16 %v11065_v31  ;;  %v11051_v47 = vunpack.i.l.bf16 %v11050_v14  ;;  %v11052_v28 = vunpack.i.h.bf16 %v11050_v14 }
 0x746   : > { %v6238_v51 = vsel %vm2047_vm9, %v6206_v30, %v11066_v25  ;;  %v6239_v18 = vsel %vm2047_vm9, %v6207_v52, %v11067_v29 }
 0x747   : > { %v11070_v10 = vpop.permute.xlu0 %11069  ;;  %v11055_v21 = vpop.permute.xlu1 %11054  ;;  %v6270_v56 = vsel %vm2080_vm10, %v6238_v51, %v11051_v47  ;;  %v6271_v48 = vsel %vm2080_vm10, %v6239_v18, %v11052_v28 }
 0x748   : > { %6499 = vmatmul.mubr.f32.gmra.mxu1 %v6270_v56  ;;  %v11071_v43 = vunpack.i.l.bf16 %v11070_v10  ;;  %v11056_v44 = vunpack.i.l.bf16 %v11055_v21  ;;  %v11072_v35 = vunpack.i.h.bf16 %v11070_v10  ;;  %v11057_v19 = vunpack.i.h.bf16 %v11055_v21 }
 0x749   : > { %9144 = vmatprep.mubr.msk.f32.mxu1 %vm1882_vm4, %v17740_v4  ;;  %v17744_v4 = vld [vmem:[#allocation55_spill] sm:$0xff] }
 0x74a   : > { %v6144_v61 = vsel %vm1948_vm6, %v6112_v60, %v11071_v43 }
 0x74b   : > { %v11075_v26 = vpop.permute.xlu0 %11074  ;;  %v11060_v5 = vpop.permute.xlu1 %11059  ;;  %v6176_v17 = vsel %vm1981_vm7, %v6144_v61, %v11056_v44 }
 0x74c   : > { %6504 = vmatmul.mubr.f32.gmra.mxu1 %v6271_v48  ;;  %v11076_v45 = vunpack.i.l.bf16 %v11075_v26  ;;  %v11077_v41 = vunpack.i.h.bf16 %v11075_v26  ;;  %v11061_v25 = vunpack.i.l.bf16 %v11060_v5  ;;  %v11062_v10 = vunpack.i.h.bf16 %v11060_v5 }
 0x74d   : > { %9145 = vmatprep.mubr.msk.f32.mxu1 %vm1882_vm4, %v15387_v7  ;;  %v6113_v7 = vsel %vm1915_vm5, %v6083_v32, %v11047_v37 }
 0x74e   : > { %v6145_v13 = vsel %vm1948_vm6, %v6113_v7, %v11072_v35  ;;  %v6208_v40 = vsel %vm2014_vm8, %v6176_v17, %v11076_v45  ;;  %v6084_v46 = vsel %vm1882_vm4, %v17744_v4, %v11061_v25  ;;  %v6085_v5 = vsel %vm1882_vm4, %v17745_v15, %v11062_v10 }
 0x74f   : > { %v11080_v22 = vpop.permute.xlu0 %11079  ;;  %v6177_v11 = vsel %vm1981_vm7, %v6145_v13, %v11057_v19 }
 0x750   : > { %v11100_v42 = vpop.permute.xlu1 %11099  ;;  %v6209_v30 = vsel %vm2014_vm8, %v6177_v11, %v11077_v41  ;;  %v11081_v51 = vunpack.i.l.bf16 %v11080_v22  ;;  %v11082_v52 = vunpack.i.h.bf16 %v11080_v22 }
 0x751   : > { %v11101_v39 = vunpack.i.l.bf16 %v11100_v42  ;;  %v11102_v59 = vunpack.i.h.bf16 %v11100_v42 }
 0x752   : > { %v6115_v37 = vsel %vm1915_vm5, %v6085_v5, %v11082_v52 }
 0x753   : > { %v11085_v34 = vpop.permute.xlu0 %11084  ;;  %v6240_v3 = vsel %vm2047_vm9, %v6208_v40, %v11101_v39  ;;  %v6241_v28 = vsel %vm2047_vm9, %v6209_v30, %v11102_v59 }
 0x754   : > { %v11086_v57 = vunpack.i.l.bf16 %v11085_v34  ;;  %v11105_v9 = vpop.permute.xlu1 %11104  ;;  %v11087_v31 = vunpack.i.h.bf16 %v11085_v34 }
 0x755   : > { %v11106_v21 = vunpack.i.l.bf16 %v11105_v9  ;;  %v11107_v26 = vunpack.i.h.bf16 %v11105_v9 }
 0x756   : > { %v6272_v14 = vsel %vm2080_vm10, %v6240_v3, %v11086_v57  ;;  %v6273_v56 = vsel %vm2080_vm10, %v6241_v28, %v11087_v31 }
 0x757   : > { %v11090_v29 = vpop.permute.xlu0 %11089  ;;  %6509 = vmatmul.mubr.f32.gmra.mxu1 %v6272_v14  ;;  %v6147_v44 = vsel %vm1948_vm6, %v6115_v37, %v11107_v26 }
 0x758   : > { %v11110_v47 = vpop.permute.xlu1 %11109  ;;  %9146 = vmatprep.mubr.msk.f32.mxu1 %vm1882_vm4, %v15397_v2  ;;  %v11091_v16 = vunpack.i.l.bf16 %v11090_v29  ;;  %v6114_v2 = vsel %vm1915_vm5, %v6084_v46, %v11081_v51  ;;  %v11092_v33 = vunpack.i.h.bf16 %v11090_v29 }
 0x759   : > { %v6146_v49 = vsel %vm1948_vm6, %v6114_v2, %v11106_v21  ;;  %v11111_v43 = vunpack.i.l.bf16 %v11110_v47  ;;  %v11112_v22 = vunpack.i.h.bf16 %v11110_v47 }
 0x75a   : > { %v6178_v60 = vsel %vm1981_vm7, %v6146_v49, %v11091_v16 }
 0x75b   : > { %v11095_v18 = vpop.permute.xlu0 %11094  ;;  %6514 = vmatmul.mubr.f32.gmra.mxu1 %v6273_v56  ;;  %v6210_v42 = vsel %vm2014_vm8, %v6178_v60, %v11111_v43 }
 0x75c   : > { %v11115_v48 = vpop.permute.xlu1 %11114  ;;  %9147 = vmatprep.mubr.msk.f32.mxu1 %vm1882_vm4, %v15452_v6  ;;  %v6179_v6 = vsel %vm1981_vm7, %v6147_v44, %v11092_v33  ;;  %v11096_v34 = vunpack.i.l.bf16 %v11095_v18  ;;  %v11097_v57 = vunpack.i.h.bf16 %v11095_v18 }
 0x75d   : > { %v6211_v17 = vsel %vm2014_vm8, %v6179_v6, %v11112_v22  ;;  %v11116_v9 = vunpack.i.l.bf16 %v11115_v48  ;;  %v11117_v14 = vunpack.i.h.bf16 %v11115_v48 }
 0x75e   : > { %v6086_v3 = vsel %vm1882_vm4, %v15348_v50, %v11096_v34  ;;  %v6087_v11 = vsel %vm1882_vm4, %v15345_v8, %v11097_v57 }
 0x75f   : > { %v6117_v50 = vsel %vm1915_vm5, %v6087_v11, %v11117_v14 }
 0x760   : > { %v11120_v58 = vpop.permute.xlu1 %11119  ;;  %v11135_v32 = vpop.permute.xlu0 %11134 }
 0x761   : > { %v11121_v35 = vunpack.i.l.bf16 %v11120_v58  ;;  %v11137_v61 = vunpack.i.h.bf16 %v11135_v32  ;;  %v11136_v45 = vunpack.i.l.bf16 %v11135_v32  ;;  %v11122_v54 = vunpack.i.h.bf16 %v11120_v58 }
 0x763   : > { %v6242_v39 = vsel %vm2047_vm9, %v6210_v42, %v11136_v45  ;;  %v6243_v41 = vsel %vm2047_vm9, %v6211_v17, %v11137_v61 }
 0x764   : > { %v11140_v7 = vpop.permute.xlu0 %11139  ;;  %v6274_v19 = vsel %vm2080_vm10, %v6242_v39, %v11121_v35  ;;  %v11125_v13 = vpop.permute.xlu1 %11124  ;;  %v6275_v59 = vsel %vm2080_vm10, %v6243_v41, %v11122_v54 }
 0x765   : > { %6519 = vmatmul.mubr.f32.gmra.mxu1 %v6274_v19  ;;  %v11141_v31 = vunpack.i.l.bf16 %v11140_v7  ;;  %v11142_v29 = vunpack.i.h.bf16 %v11140_v7  ;;  %v11126_v47 = vunpack.i.l.bf16 %v11125_v13  ;;  %v11127_v10 = vunpack.i.h.bf16 %v11125_v13 }
 0x766   : > { %9148 = vmatprep.mubr.msk.f32.mxu1 %vm1882_vm4, %v15464_v36  ;;  %v6116_v36 = vsel %vm1915_vm5, %v6086_v3, %v11116_v9 }
 0x767   : > { %v6148_v51 = vsel %vm1948_vm6, %v6116_v36, %v11141_v31  ;;  %v6149_v21 = vsel %vm1948_vm6, %v6117_v50, %v11142_v29 }
 0x768   : > { %v11145_v40 = vpop.permute.xlu0 %11144  ;;  %v11130_v25 = vpop.permute.xlu1 %11129  ;;  %v6180_v8 = vsel %vm1981_vm7, %v6148_v51, %v11126_v47  ;;  %v6181_v48 = vsel %vm1981_vm7, %v6149_v21, %v11127_v10 }
 0x769   : > { %6524 = vmatmul.mubr.f32.gmra.mxu1 %v6275_v59  ;;  %v11146_v28 = vunpack.i.l.bf16 %v11145_v40  ;;  %v11147_v56 = vunpack.i.h.bf16 %v11145_v40  ;;  %v11131_v37 = vunpack.i.l.bf16 %v11130_v25  ;;  %v11132_v6 = vunpack.i.h.bf16 %v11130_v25 }
 0x76a   : > { %9149 = vmatprep.mubr.msk.f32.mxu1 %vm1882_vm4, %v15545_v62 }
 0x76b   : > { %v6212_v46 = vsel %vm2014_vm8, %v6180_v8, %v11146_v28  ;;  %v6213_v5 = vsel %vm2014_vm8, %v6181_v48, %v11147_v56  ;;  %v6088_v35 = vsel %vm1882_vm4, %v15429_v27, %v11131_v37  ;;  %v6089_v17 = vsel %vm1882_vm4, %v15426_v38, %v11132_v6 }
 0x76c   : > { %v11150_v30 = vpop.permute.xlu0 %11149 }
 0x76d   : > { %v11151_v60 = vunpack.i.l.bf16 %v11150_v30  ;;  %v11152_v61 = vunpack.i.h.bf16 %v11150_v30 }
 0x76f   : > { %v11170_v52 = vpop.permute.xlu1 %11169  ;;  %v6118_v45 = vsel %vm1915_vm5, %v6088_v35, %v11151_v60 }
 0x770   : > { %v11172_v62 = vunpack.i.h.bf16 %v11170_v52  ;;  %v11171_v16 = vunpack.i.l.bf16 %v11170_v52  ;;  %v11155_v18 = vpop.permute.xlu0 %11154 }
 0x771   : > { %v11156_v4 = vunpack.i.l.bf16 %v11155_v18  ;;  %v11157_v2 = vunpack.i.h.bf16 %v11155_v18 }
 0x772   : > { %v6244_v26 = vsel %vm2047_vm9, %v6212_v46, %v11171_v16  ;;  %v6245_v43 = vsel %vm2047_vm9, %v6213_v5, %v11172_v62 }
 0x773   : > { %v11175_v33 = vpop.permute.xlu1 %11174  ;;  %v6276_v15 = vsel %vm2080_vm10, %v6244_v26, %v11156_v4  ;;  %v6277_v22 = vsel %vm2080_vm10, %v6245_v43, %v11157_v2  ;;  %v17746_v2 = vld [vmem:[#allocation57_spill] sm:$0xff] }
 0x774   : > { %v11160_v49 = vpop.permute.xlu0 %11159  ;;  %6529 = vmatmul.mubr.f32.gmra.mxu1 %v6276_v15  ;;  %v11176_v58 = vunpack.i.l.bf16 %v11175_v33  ;;  %v11177_v39 = vunpack.i.h.bf16 %v11175_v33 }
 0x775   : > { %9150 = vmatprep.mubr.msk.f32.mxu1 %vm1882_vm4, %v15557_v0  ;;  %v11161_v42 = vunpack.i.l.bf16 %v11160_v49  ;;  %v11162_v13 = vunpack.i.h.bf16 %v11160_v49 }
 0x776   : > { %v6150_v54 = vsel %vm1948_vm6, %v6118_v45, %v11176_v58 }
 0x777   : > { %v11180_v44 = vpop.permute.xlu1 %11179  ;;  %v6182_v41 = vsel %vm1981_vm7, %v6150_v54, %v11161_v42 }
 0x778   : > { %v11165_v32 = vpop.permute.xlu0 %11164  ;;  %6534 = vmatmul.mubr.f32.gmra.mxu1 %v6277_v22  ;;  %v11181_v7 = vunpack.i.l.bf16 %v11180_v44  ;;  %v11182_v9 = vunpack.i.h.bf16 %v11180_v44 }
 0x779   : > { %9151 = vmatprep.mubr.msk.f32.mxu1 %vm1882_vm4, %v15615_v12  ;;  %v6119_v12 = vsel %vm1915_vm5, %v6089_v17, %v11152_v61  ;;  %v11166_v25 = vunpack.i.l.bf16 %v11165_v32  ;;  %v11167_v10 = vunpack.i.h.bf16 %v11165_v32 }
 0x77a   : > { %v6151_v57 = vsel %vm1948_vm6, %v6119_v12, %v11177_v39  ;;  %v6214_v59 = vsel %vm2014_vm8, %v6182_v41, %v11181_v7 }
 0x77b   : > { %v11185_v0 = vpop.permute.xlu1 %11184  ;;  %v6183_v29 = vsel %vm1981_vm7, %v6151_v57, %v11162_v13  ;;  %v6090_v52 = vsel %vm1882_vm4, %v15505_v1, %v11166_v25  ;;  %v6091_v33 = vsel %vm1882_vm4, %v17746_v2, %v11167_v10 }
 0x77c   : > { %v11205_v19 = vpop.permute.xlu0 %11204  ;;  %v11186_v47 = vunpack.i.l.bf16 %v11185_v0  ;;  %v6215_v30 = vsel %vm2014_vm8, %v6183_v29, %v11182_v9  ;;  %v11187_v62 = vunpack.i.h.bf16 %v11185_v0 }
 0x77d   : > { %v11206_v34 = vunpack.i.l.bf16 %v11205_v19  ;;  %v11207_v3 = vunpack.i.h.bf16 %v11205_v19 }
 0x77e   : > { %v6120_v18 = vsel %vm1915_vm5, %v6090_v52, %v11186_v47  ;;  %v6121_v15 = vsel %vm1915_vm5, %v6091_v33, %v11187_v62 }
 0x77f   : > { %v11190_v27 = vpop.permute.xlu1 %11189  ;;  %v6246_v14 = vsel %vm2047_vm9, %v6214_v59, %v11206_v34  ;;  %v6247_v50 = vsel %vm2047_vm9, %v6215_v30, %v11207_v3  ;;  %v17747_v3 = vld [vmem:[#allocation17_spill] sm:$0xff] }
 0x780   : > { %v11191_v40 = vunpack.i.l.bf16 %v11190_v27  ;;  %v11210_v31 = vpop.permute.xlu0 %11209  ;;  %v11192_v11 = vunpack.i.h.bf16 %v11190_v27 }
 0x781   : > { %v11211_v51 = vunpack.i.l.bf16 %v11210_v31  ;;  %v11212_v8 = vunpack.i.h.bf16 %v11210_v31 }
 0x782   : > { %v6278_v38 = vsel %vm2080_vm10, %v6246_v14, %v11191_v40  ;;  %v6279_v56 = vsel %vm2080_vm10, %v6247_v50, %v11192_v11 }
 0x783   : > { %v11195_v36 = vpop.permute.xlu1 %11194  ;;  %6539 = vmatmul.mubr.f32.gmra.mxu1 %v6278_v38  ;;  %v6152_v4 = vsel %vm1948_vm6, %v6120_v18, %v11211_v51  ;;  %v6153_v37 = vsel %vm1948_vm6, %v6121_v15, %v11212_v8  ;;  %v17748_v38 = vld [vmem:[#allocation13_spill] sm:$0xff]  ;;  %v17750_v51 = vld [vmem:[#allocation14_spill] sm:$0xff] }
 0x784   : > { %9152 = vmatprep.mubr.msk.f32.mxu1 %vm1882_vm4, %v15621_v63  ;;  %v11215_v28 = vpop.permute.xlu0 %11214  ;;  %v11196_v21 = vunpack.i.l.bf16 %v11195_v36  ;;  %v11197_v46 = vunpack.i.h.bf16 %v11195_v36 }
 0x785   : > { %v11216_v26 = vunpack.i.l.bf16 %v11215_v28  ;;  %v11217_v60 = vunpack.i.h.bf16 %v11215_v28  ;;  %v17751_v28 = vld [vmem:[#allocation23_spill] sm:$0xff] }
 0x786   : > { %v6184_v1 = vsel %vm1981_vm7, %v6152_v4, %v11196_v21  ;;  %v6185_v22 = vsel %vm1981_vm7, %v6153_v37, %v11197_v46 }
 0x787   : > { %v11200_v16 = vpop.permute.xlu1 %11199  ;;  %6544 = vmatmul.mubr.f32.gmra.mxu1 %v6279_v56  ;;  %v6216_v35 = vsel %vm2014_vm8, %v6184_v1, %v11216_v26  ;;  %v6217_v17 = vsel %vm2014_vm8, %v6185_v22, %v11217_v60 }
 0x788   : > { %v11201_v63 = vunpack.i.l.bf16 %v11200_v16  ;;  %9153 = vmatprep.mubr.msk.f32.mxu1 %vm1882_vm4, %v15678_v23  ;;  %v11220_v48 = vpop.permute.xlu0 %11219  ;;  %v11202_v42 = vunpack.i.h.bf16 %v11200_v16 }
 0x789   : > { %v11221_v5 = vunpack.i.l.bf16 %v11220_v48  ;;  %v6410_v49 = vpop.f32.mrf.mxu1  ;;  %v11222_v41 = vunpack.i.h.bf16 %v11220_v48 }
 0x78a   : > { %6601 = vrot.lane.b32.xlu1 %v6410_v49, %s11963_s29  ;;  %v6092_v44 = vsel %vm1882_vm4, %v15584_v55, %v11201_v63  ;;  %v6093_v9 = vsel %vm1882_vm4, %v15578_v53, %v11202_v42 }
 0x78b   : > { %v11230_v43 = vpop.permute.xlu1 %11229  ;;  %v6412_v32 = vpop.f32.mrf.mxu1  ;;  %v6122_v39 = vsel %vm1915_vm5, %v6092_v44, %v11221_v5  ;;  %v6123_v11 = vsel %vm1915_vm5, %v6093_v9, %v11222_v41  ;;  %v17755_v9 = vld [vmem:[#allocation53_spill] sm:$0xff] }
 0x78c   : > { %v11231_v23 = vunpack.i.l.bf16 %v11230_v43  ;;  %v11232_v58 = vunpack.i.h.bf16 %v11230_v43  ;;  %v11225_v6 = vpop.permute.xlu0 %11224 }
 0x78d   : > { %v11226_v61 = vunpack.i.l.bf16 %v11225_v6  ;;  %v6415_v0 = vpop.f32.mrf.mxu1  ;;  %v11227_v7 = vunpack.i.h.bf16 %v11225_v6 }
 0x78e   : > { %v6248_v45 = vsel %vm2047_vm9, %v6216_v35, %v11231_v23  ;;  %6603 = vrot.lane.b32.xlu0 %v6415_v0, %s11963_s29  ;;  %v6249_v13 = vsel %vm2047_vm9, %v6217_v17, %v11232_v58 }
 0x78f   : > { %v5656_v54 = vpop.permute.xlu1 %5655  ;;  %v6280_v19 = vsel %vm2080_vm10, %v6248_v45, %v11226_v61  ;;  %v6417_v34 = vpop.f32.mrf.mxu1  ;;  %v6281_v59 = vsel %vm2080_vm10, %v6249_v13, %v11227_v7  ;;  %v17752_v61 = vld [vmem:[#allocation12_spill] sm:$0xff]  ;;  %v11799_v7 = vld [vmem:[%s17435_s2] sm:$0xf] }
 0x790   : > { %v6154_v55 = vsel %vm1948_vm6, %v6122_v39, %v5656_v54  ;;  %v5752_v12 = vpop.permute.xlu0 %5751  ;;  %6549 = vmatmul.mubr.f32.gmra.mxu1 %v6280_v19  ;;  %v15897_v45 = vsub.s32 3, %v17752_v61  ;;  %v11798_v39 = vld [vmem:[#allocation2] sm:$0xf]  ;;  %v17753_v34 = vld [vmem:[#allocation52_spill] sm:$0xff] }
 0x791   : > { %9154 = vmatprep.mubr.msk.f32.mxu1 %vm1882_vm4, %v15699_v24  ;;  %v6186_v27 = vsel %vm1981_vm7, %v6154_v55, %v5752_v12  ;;  %v17749_v24 = vld [vmem:[#allocation22_spill] sm:$0xff] }
 0x792   : > { %v15901_v54 = vrot.slane %v11798_v39, %v15897_v45  ;;  %v15907_v55 = vrot.slane %v11799_v7, %v15897_v45 }
 0x793   : > { %v5849_v57 = vpop.permute.xlu1 %5848 }
 0x794   : > { %v6218_v40 = vsel %vm2014_vm8, %v6186_v27, %v5849_v57  ;;  %v5658_v14 = vpop.permute.xlu0 %5657  ;;  %6554 = vmatmul.mubr.f32.gmra.mxu1 %v6281_v59 }
 0x795   : > { %v6250_v31 = vsel %vm2047_vm9, %v6218_v40, %v17747_v3  ;;  %9155 = vmatprep.mubr.msk.f32.mxu1 %vm1882_vm4, %v17748_v38  ;;  %v6155_v25 = vsel %vm1948_vm6, %v6123_v11, %v5658_v14 }
 0x796   : > { %v6282_v29 = vsel %vm2080_vm10, %v6250_v31, %v17749_v24 }
 0x797   : > { %v5754_v53 = vpop.permute.xlu1 %5753 }
 0x798   : > { %v6187_v36 = vsel %vm1981_vm7, %v6155_v25, %v5754_v53  ;;  %v5851_v47 = vpop.permute.xlu0 %5850  ;;  %6559 = vmatmul.mubr.f32.gmra.mxu1 %v6282_v29 }
 0x799   : > { %v6219_v30 = vsel %vm2014_vm8, %v6187_v36, %v5851_v47  ;;  %9156 = vmatprep.mubr.msk.f32.mxu1 %vm1882_vm4, %v17750_v51 }
 0x79a   : > { %v6251_v50 = vsel %vm2047_vm9, %v6219_v30, %v17751_v28  ;;  %v17757_v30 = vld [vmem:[#allocation16_spill] sm:$0xff] }
 0x79b   : > { %v6283_v10 = vsel %vm2080_vm10, %v6251_v50, %v17749_v24  ;;  %v17824_v24 = vld [vmem:[#allocation21_spill] sm:$0xff] }
 0x79c   : > { %v6420_v21 = vpop.f32.mrf.mxu1  ;;  %6564 = vmatmul.mubr.f32.gmra.mxu1 %v6283_v10 }
 0x79d   : > { %6605 = vrot.lane.b32.xlu1 %v6420_v21, %s11963_s29 }
 0x79e   : > { %v6422_v56 = vpop.f32.mrf.mxu1 }
 0x7a0   : > { %v6425_v52 = vpop.f32.mrf.mxu1 }
 0x7a1   : > { %6607 = vrot.lane.b32.xlu0 %v6425_v52, %s11963_s29  ;;  %v17759_v52 = vld [vmem:[#allocation15_spill] sm:$0xff] }
 0x7a2   : > { %v6427_v62 = vpop.f32.mrf.mxu1 }
 0x7a8   : > { %v6430_v16 = vpop.f32.mrf.mxu1 }
 0x7a9   : > { %6609 = vrot.lane.b32.xlu1 %v6430_v16, %s11963_s29 }
 0x7aa   : > { %v6432_v18 = vpop.f32.mrf.mxu1 }
 0x7ac   : > { %v6435_v8 = vpop.f32.mrf.mxu1 }
 0x7ad   : > { %6611 = vrot.lane.b32.xlu0 %v6435_v8, %s11963_s29 }
 0x7ae   : > { %v6437_v63 = vpop.f32.mrf.mxu1 }
 0x7b8   : > { %v6440_v4 = vpop.f32.mrf.mxu1 }
 0x7b9   : > { %6613 = vrot.lane.b32.xlu1 %v6440_v4, %s11963_s29 }
 0x7ba   : > { %v6442_v46 = vpop.f32.mrf.mxu1 }
 0x7bc   : > { %v6445_v26 = vpop.f32.mrf.mxu1 }
 0x7bd   : > { %6615 = vrot.lane.b32.xlu0 %v6445_v26, %s11963_s29 }
 0x7be   : > { %v6447_v48 = vpop.f32.mrf.mxu1 }
 0x7c8   : > { %v6450_v2 = vpop.f32.mrf.mxu1 }
 0x7c9   : > { %6617 = vrot.lane.b32.xlu1 %v6450_v2, %s11963_s29  ;;  %v17761_v2 = vld [vmem:[#allocation19_spill] sm:$0xff] }
 0x7ca   : > { %v6452_v33 = vpop.f32.mrf.mxu1 }
 0x7cc   : > { %v6455_v1 = vpop.f32.mrf.mxu1 }
 0x7cd   : > { %6619 = vrot.lane.b32.xlu0 %v6455_v1, %s11963_s29 }
 0x7ce   : > { %v6457_v15 = vpop.f32.mrf.mxu1 }
 0x7d0   : > { %v6460_v5 = vpop.f32.mrf.mxu1 }
 0x7d1   : > { %6621 = vrot.lane.b32.xlu1 %v6460_v5, %s11963_s29 }
 0x7d2   : > { %v6462_v49 = vpop.f32.mrf.mxu1 }
 0x7d4   : > { %v6465_v43 = vpop.f32.mrf.mxu1 }
 0x7d5   : > { %6623 = vrot.lane.b32.xlu0 %v6465_v43, %s11963_s29  ;;  %v17763_v43 = vld [vmem:[#allocation18_spill] sm:$0xff] }
 0x7d6   : > { %v6467_v37 = vpop.f32.mrf.mxu1 }
 0x7de   : > { %v6470_v60 = vpop.f32.mrf.mxu1 }
 0x7df   : > { %6625 = vrot.lane.b32.xlu1 %v6470_v60, %s11963_s29 }
 0x7e0   : > { %v6472_v23 = vpop.f32.mrf.mxu1 }
 0x7e2   : > { %v6475_v44 = vpop.f32.mrf.mxu1 }
 0x7e3   : > { %6627 = vrot.lane.b32.xlu0 %v6475_v44, %s11963_s29 }
 0x7e4   : > { %v6477_v22 = vpop.f32.mrf.mxu1 }
 0x7eb   : > { %v6480_v58 = vpop.f32.mrf.mxu1 }
 0x7ec   : > { %6629 = vrot.lane.b32.xlu1 %v6480_v58, %s11963_s29 }
 0x7ed   : > { %v6482_v32 = vpop.f32.mrf.mxu1 }
 0x7ef   : > { %v6485_v6 = vpop.f32.mrf.mxu1 }
 0x7f0   : > { %6631 = vrot.lane.b32.xlu0 %v6485_v6, %s11963_s29 }
 0x7f1   : > { %v6487_v35 = vpop.f32.mrf.mxu1 }
 0x7fa   : > { %v6490_v42 = vpop.f32.mrf.mxu1 }
 0x7fb   : > { %6633 = vrot.lane.b32.xlu1 %v6490_v42, %s11963_s29  ;;  %v17765_v42 = vld [vmem:[#allocation24_spill] sm:$0xff] }
 0x7fc   : > { %v6492_v0 = vpop.f32.mrf.mxu1  ;;  %v6602_v19 = vpop.permute.xlu1 %6601 }
 0x7fd   : > { %v15911_v12 = vsel %vm4748_vm12, %v17753_v34, %v6602_v19 }
 0x7fe   : > { %v6495_v17 = vpop.f32.mrf.mxu1  ;;  %17754 = vst [vmem:[#allocation56_spill] sm:$0xff] %v15911_v12  ;;  %v6733_v13 = vmul.f32 %v15901_v54, %v15911_v12 }
 0x7ff   : > { %6635 = vrot.lane.b32.xlu0 %v6495_v17, %s11963_s29  ;;  %v17767_v17 = vld [vmem:[#allocation25_spill] sm:$0xff] }
 0x800   : > { %v6497_v41 = vpop.f32.mrf.mxu1  ;;  %v6769_v27 = vadd.f32 %v15907_v55, %v6733_v13  ;;  %v6604_v57 = vpop.permute.xlu0 %6603 }
 0x801   : > { %v15919_v40 = vsel %vm4748_vm12, %v17755_v9, %v6604_v57 }
 0x802   : > { %17756 = vst [vmem:[#allocation51_spill] sm:$0xff] %v15919_v40  ;;  %v6801_v59 = vmax.f32 %v6769_v27, 0.0  ;;  %v6734_v31 = vmul.f32 %v15901_v54, %v15919_v40 }
 0x804   : > { %v6770_v14 = vadd.f32 %v15907_v55, %v6734_v31  ;;  %9518 = vmatprep.mubr.msk.f32.mxu0 %vm1882_vm4, %v6801_v59 }
 0x806   : > { %v6802_v11 = vmax.f32 %v6770_v14, 0.0 }
 0x808   : > { %v6500_v29 = vpop.f32.mrf.mxu1  ;;  %9519 = vmatmul.mubr.msk.f32.vlgmr.msra.gmra.mxu0 %vm1882_vm4, %v6802_v11 }
 0x809   : > { %6637 = vrot.lane.b32.xlu1 %v6500_v29, %s11963_s29  ;;  %v17769_v29 = vld [vmem:[#allocation26_spill] sm:$0xff] }
 0x80a   : > { %v6502_v25 = vpop.f32.mrf.mxu1 }
 0x80c   : > { %v6505_v53 = vpop.f32.mrf.mxu1 }
 0x80d   : > { %6639 = vrot.lane.b32.xlu0 %v6505_v53, %s11963_s29 }
 0x80e   : > { %v6507_v36 = vpop.f32.mrf.mxu1 }
 0x80f   : > { %v6606_v47 = vpop.permute.xlu1 %6605 }
 0x810   : > { %v15930_v50 = vsel %vm4748_vm12, %v17757_v30, %v6606_v47  ;;  %v17771_v30 = vld [vmem:[#allocation27_spill] sm:$0xff] }
 0x811   : > { %17758 = vst [vmem:[#allocation50_spill] sm:$0xff] %v15930_v50  ;;  %v6735_v10 = vmul.f32 %v15901_v54, %v15930_v50 }
 0x813   : > { %v6771_v21 = vadd.f32 %v15907_v55, %v6735_v10  ;;  %v6608_v56 = vpop.permute.xlu0 %6607 }
 0x814   : > { %v15937_v62 = vsel %vm4748_vm12, %v17759_v52, %v6608_v56 }
 0x815   : > { %17760 = vst [vmem:[#allocation55_spill] sm:$0xff] %v15937_v62  ;;  %v6803_v16 = vmax.f32 %v6771_v21, 0.0  ;;  %v6736_v18 = vmul.f32 %v15901_v54, %v15937_v62 }
 0x817   : > { %v6772_v8 = vadd.f32 %v15907_v55, %v6736_v18  ;;  %v6510_v63 = vpop.f32.mrf.mxu1  ;;  %9521 = vmatprep.mubr.msk.f32.mxu0 %vm1882_vm4, %v6803_v16 }
 0x818   : > { %6641 = vrot.lane.b32.xlu1 %v6510_v63, %s11963_s29 }
 0x819   : > { %v6804_v4 = vmax.f32 %v6772_v8, 0.0  ;;  %v6512_v46 = vpop.f32.mrf.mxu1  ;;  %v17773_v8 = vld [vmem:[#allocation28_spill] sm:$0xff] }
 0x81b   : > { %v6515_v26 = vpop.f32.mrf.mxu1  ;;  %9522 = vmatmul.mubr.msk.f32.gmra.mxu0 %vm1882_vm4, %v6804_v4  ;;  %v6610_v48 = vpop.permute.xlu1 %6609 }
 0x81c   : > { %6643 = vrot.lane.b32.xlu0 %v6515_v26, %s11963_s29  ;;  %v15948_v33 = vsel %vm4748_vm12, %v17761_v2, %v6610_v48 }
 0x81d   : > { %17762 = vst [vmem:[#allocation54_spill] sm:$0xff] %v15948_v33  ;;  %v6737_v1 = vmul.f32 %v15901_v54, %v15948_v33  ;;  %v6517_v15 = vpop.f32.mrf.mxu1 }
 0x81e   : > { %v17775_v15 = vld [vmem:[#allocation29_spill] sm:$0xff] }
 0x81f   : > { %v6773_v5 = vadd.f32 %v15907_v55, %v6737_v1  ;;  %v6612_v49 = vpop.permute.xlu0 %6611 }
 0x820   : > { %v15955_v37 = vsel %vm4748_vm12, %v17763_v43, %v6612_v49 }
 0x821   : > { %17764 = vst [vmem:[#allocation57_spill] sm:$0xff] %v15955_v37  ;;  %v6805_v60 = vmax.f32 %v6773_v5, 0.0  ;;  %v6738_v23 = vmul.f32 %v15901_v54, %v15955_v37 }
 0x823   : > { %v6774_v44 = vadd.f32 %v15907_v55, %v6738_v23  ;;  %9524 = vmatprep.mubr.msk.f32.mxu0 %vm1882_vm4, %v6805_v60 }
 0x825   : > { %v6806_v22 = vmax.f32 %v6774_v44, 0.0  ;;  %v6520_v58 = vpop.f32.mrf.mxu1 }
 0x826   : > { %6645 = vrot.lane.b32.xlu1 %v6520_v58, %s11963_s29 }
 0x827   : > { %v6522_v32 = vpop.f32.mrf.mxu1  ;;  %9525 = vmatmul.mubr.msk.f32.gmra.mxu0 %vm1882_vm4, %v6806_v22 }
 0x828   : > { %v17777_v32 = vld [vmem:[#allocation30_spill] sm:$0xff] }
 0x829   : > { %v6525_v6 = vpop.f32.mrf.mxu1 }
 0x82a   : > { %6647 = vrot.lane.b32.xlu0 %v6525_v6, %s11963_s29 }
 0x82b   : > { %v6527_v35 = vpop.f32.mrf.mxu1  ;;  %v6614_v61 = vpop.permute.xlu1 %6613 }
 0x82c   : > { %v15966_v0 = vsel %vm4748_vm12, %v17765_v42, %v6614_v61 }
 0x82d   : > { %17766 = vst [vmem:[#allocation12_spill] sm:$0xff] %v15966_v0  ;;  %v6739_v39 = vmul.f32 %v15901_v54, %v15966_v0 }
 0x82f   : > { %v6775_v7 = vadd.f32 %v15907_v55, %v6739_v39  ;;  %v6616_v19 = vpop.permute.xlu0 %6615 }
 0x830   : > { %v15973_v34 = vsel %vm4748_vm12, %v17767_v17, %v6616_v19  ;;  %v17779_v19 = vld [vmem:[#allocation31_spill] sm:$0xff] }
 0x831   : > { %17768 = vst [vmem:[#allocation52_spill] sm:$0xff] %v15973_v34  ;;  %v6807_v13 = vmax.f32 %v6775_v7, 0.0  ;;  %v6740_v41 = vmul.f32 %v15901_v54, %v15973_v34 }
 0x833   : > { %v6776_v27 = vadd.f32 %v15907_v55, %v6740_v41  ;;  %9527 = vmatprep.mubr.msk.f32.mxu0 %vm1882_vm4, %v6807_v13 }
 0x834   : > { %v6530_v57 = vpop.f32.mrf.mxu1 }
 0x835   : > { %v6808_v9 = vmax.f32 %v6776_v27, 0.0  ;;  %6649 = vrot.lane.b32.xlu1 %v6530_v57, %s11963_s29 }
 0x836   : > { %v6532_v59 = vpop.f32.mrf.mxu1 }
 0x837   : > { %9528 = vmatmul.mubr.msk.f32.gmra.mxu0 %vm1882_vm4, %v6808_v9 }
 0x838   : > { %v6535_v31 = vpop.f32.mrf.mxu1 }
 0x839   : > { %6651 = vrot.lane.b32.xlu0 %v6535_v31, %s11963_s29 }
 0x83a   : > { %v6537_v14 = vpop.f32.mrf.mxu1 }
 0x83b   : > { %v6618_v11 = vpop.permute.xlu1 %6617 }
 0x83c   : > { %v15984_v25 = vsel %vm4748_vm12, %v17769_v29, %v6618_v11 }
 0x83d   : > { %17770 = vst [vmem:[#allocation53_spill] sm:$0xff] %v15984_v25  ;;  %v6741_v53 = vmul.f32 %v15901_v54, %v15984_v25 }
 0x83f   : > { %v6777_v36 = vadd.f32 %v15907_v55, %v6741_v53  ;;  %v6620_v47 = vpop.permute.xlu0 %6619  ;;  %v17781_v53 = vld [vmem:[#allocation32_spill] sm:$0xff] }
 0x840   : > { %v15991_v10 = vsel %vm4748_vm12, %v17771_v30, %v6620_v47 }
 0x841   : > { %17772 = vst [vmem:[#allocation16_spill] sm:$0xff] %v15991_v10  ;;  %v6809_v21 = vmax.f32 %v6777_v36, 0.0  ;;  %v6742_v56 = vmul.f32 %v15901_v54, %v15991_v10 }
 0x843   : > { %v6778_v52 = vadd.f32 %v15907_v55, %v6742_v56  ;;  %v6540_v16 = vpop.f32.mrf.mxu1  ;;  %9530 = vmatprep.mubr.msk.f32.mxu0 %vm1882_vm4, %v6809_v21  ;;  %v6622_v18 = vpop.permute.xlu1 %6621  ;;  %v17783_v56 = vld [vmem:[#allocation33_spill] sm:$0xff] }
 0x844   : > { %6653 = vrot.lane.b32.xlu1 %v6540_v16, %s11963_s29  ;;  %v16000_v63 = vsel %vm4748_vm12, %v17773_v8, %v6622_v18 }
 0x845   : > { %17774 = vst [vmem:[#allocation15_spill] sm:$0xff] %v16000_v63  ;;  %v6810_v4 = vmax.f32 %v6778_v52, 0.0  ;;  %v6743_v46 = vmul.f32 %v15901_v54, %v16000_v63  ;;  %v6542_v26 = vpop.f32.mrf.mxu1 }
 0x846   : > { %v17785_v26 = vld [vmem:[#allocation34_spill] sm:$0xff] }
 0x847   : > { %v6779_v48 = vadd.f32 %v15907_v55, %v6743_v46  ;;  %v6545_v2 = vpop.f32.mrf.mxu1  ;;  %v6624_v1 = vpop.permute.xlu0 %6623  ;;  %9531 = vmatmul.mubr.msk.f32.gmra.mxu0 %vm1882_vm4, %v6810_v4 }
 0x848   : > { %6655 = vrot.lane.b32.xlu0 %v6545_v2, %s11963_s29  ;;  %v16009_v5 = vsel %vm4748_vm12, %v17775_v15, %v6624_v1 }
 0x849   : > { %17776 = vst [vmem:[#allocation19_spill] sm:$0xff] %v16009_v5  ;;  %v6811_v49 = vmax.f32 %v6779_v48, 0.0  ;;  %v6744_v43 = vmul.f32 %v15901_v54, %v16009_v5  ;;  %v6547_v60 = vpop.f32.mrf.mxu1 }
 0x84b   : > { %v6780_v23 = vadd.f32 %v15907_v55, %v6744_v43  ;;  %9533 = vmatprep.mubr.msk.f32.mxu0 %vm1882_vm4, %v6811_v49  ;;  %v17787_v49 = vld [vmem:[#allocation35_spill] sm:$0xff] }
 0x84d   : > { %v6812_v44 = vmax.f32 %v6780_v23, 0.0 }
 0x84f   : > { %9534 = vmatmul.mubr.msk.f32.gmra.mxu0 %vm1882_vm4, %v6812_v44 }
 0x850   : > { %v6550_v22 = vpop.f32.mrf.mxu1 }
 0x851   : > { %v6626_v58 = vpop.permute.xlu1 %6625  ;;  %6657 = vrot.lane.b32.xlu1 %v6550_v22, %s11963_s29 }
 0x852   : > { %v16019_v6 = vsel %vm4748_vm12, %v17777_v32, %v6626_v58  ;;  %v6552_v61 = vpop.f32.mrf.mxu1  ;;  %v17789_v32 = vld [vmem:[#allocation36_spill] sm:$0xff] }
 0x853   : > { %17778 = vst [vmem:[#allocation18_spill] sm:$0xff] %v16019_v6  ;;  %v6745_v35 = vmul.f32 %v15901_v54, %v16019_v6 }
 0x854   : > { %v6555_v39 = vpop.f32.mrf.mxu1 }
 0x855   : > { %v6781_v42 = vadd.f32 %v15907_v55, %v6745_v35  ;;  %v6628_v7 = vpop.permute.xlu0 %6627  ;;  %6659 = vrot.lane.b32.xlu0 %v6555_v39, %s11963_s29 }
 0x856   : > { %v16027_v17 = vsel %vm4748_vm12, %v17779_v19, %v6628_v7  ;;  %v6557_v27 = vpop.f32.mrf.mxu1  ;;  %v17791_v7 = vld [vmem:[#allocation37_spill] sm:$0xff] }
 0x857   : > { %17780 = vst [vmem:[#allocation24_spill] sm:$0xff] %v16027_v17  ;;  %v6813_v13 = vmax.f32 %v6781_v42, 0.0  ;;  %v6746_v41 = vmul.f32 %v15901_v54, %v16027_v17 }
 0x858   : > { %v6560_v9 = vpop.f32.mrf.mxu1 }
 0x859   : > { %v6782_v57 = vadd.f32 %v15907_v55, %v6746_v41  ;;  %9536 = vmatprep.mubr.msk.f32.mxu0 %vm1882_vm4, %v6813_v13  ;;  %6661 = vrot.lane.b32.xlu1 %v6560_v9, %s11963_s29 }
 0x85a   : > { %v6562_v31 = vpop.f32.mrf.mxu1 }
 0x85b   : > { %v6814_v59 = vmax.f32 %v6782_v57, 0.0 }
 0x85c   : > { %v6565_v14 = vpop.f32.mrf.mxu1 }
 0x85d   : > { %9537 = vmatmul.mubr.msk.f32.gmra.mxu0 %vm1882_vm4, %v6814_v59  ;;  %6663 = vrot.lane.b32.xlu0 %v6565_v14, %s11963_s29  ;;  %v17793_v59 = vld [vmem:[#allocation38_spill] sm:$0xff]  ;;  %s11884_s29 = sshll.u32 %s11964_s21, 4  ;;  %s11885_s29 = int_to_ptr.vmem [resolvable:$false] %s11884_s29 }
 0x85e   : > { %v6630_v11 = vpop.permute.xlu1 %6629  ;;  %v6567_v29 = vpop.f32.mrf.mxu1  ;;  %s11886_s14 = scalar_lea.vmem %s11885_s29, 8192 }
 0x85f   : > { %v16038_v36 = vsel %vm4748_vm12, %v17781_v53, %v6630_v11  ;;  %v17795_v53 = vld [vmem:[#allocation39_spill] sm:$0xff] }
 0x860   : > { %17782 = vst [vmem:[#allocation25_spill] sm:$0xff] %v16038_v36  ;;  %v6747_v47 = vmul.f32 %v15901_v54, %v16038_v36 }
 0x862   : > { %v6783_v30 = vadd.f32 %v15907_v55, %v6747_v47  ;;  %v6632_v21 = vpop.permute.xlu0 %6631 }
 0x863   : > { %v16045_v52 = vsel %vm4748_vm12, %v17783_v56, %v6632_v21 }
 0x864   : > { %17784 = vst [vmem:[#allocation26_spill] sm:$0xff] %v16045_v52  ;;  %v6815_v16 = vmax.f32 %v6783_v30, 0.0  ;;  %v6748_v18 = vmul.f32 %v15901_v54, %v16045_v52 }
 0x866   : > { %v6784_v8 = vadd.f32 %v15907_v55, %v6748_v18  ;;  %9539 = vmatprep.mubr.msk.f32.mxu0 %vm1882_vm4, %v6815_v16 }
 0x868   : > { %v6816_v4 = vmax.f32 %v6784_v8, 0.0  ;;  %v17797_v8 = vld [vmem:[#allocation40_spill] sm:$0xff] }
 0x86a   : > { %9540 = vmatmul.mubr.msk.f32.gmra.mxu0 %vm1882_vm4, %v6816_v4 }
 0x86d   : > { %v6634_v46 = vpop.permute.xlu1 %6633 }
 0x86e   : > { %v16054_v48 = vsel %vm4748_vm12, %v17785_v26, %v6634_v46 }
 0x86f   : > { %17786 = vst [vmem:[#allocation27_spill] sm:$0xff] %v16054_v48  ;;  %v6749_v2 = vmul.f32 %v15901_v54, %v16054_v48 }
 0x871   : > { %v6785_v1 = vadd.f32 %v15907_v55, %v6749_v2  ;;  %v6636_v15 = vpop.permute.xlu0 %6635 }
 0x872   : > { %v16061_v43 = vsel %vm4748_vm12, %v17787_v49, %v6636_v15 }
 0x873   : > { %17788 = vst [vmem:[#allocation28_spill] sm:$0xff] %v16061_v43  ;;  %v6817_v60 = vmax.f32 %v6785_v1, 0.0  ;;  %v6750_v23 = vmul.f32 %v15901_v54, %v16061_v43  ;;  %v17799_v1 = vld [vmem:[#allocation41_spill] sm:$0xff] }
 0x875   : > { %v6786_v44 = vadd.f32 %v15907_v55, %v6750_v23  ;;  %9542 = vmatprep.mubr.msk.f32.mxu0 %vm1882_vm4, %v6817_v60 }
 0x877   : > { %v6818_v22 = vmax.f32 %v6786_v44, 0.0 }
 0x879   : > { %9543 = vmatmul.mubr.msk.f32.gmra.mxu0 %vm1882_vm4, %v6818_v22 }
 0x87b   : > { %v6638_v58 = vpop.permute.xlu1 %6637 }
 0x87c   : > { %v16070_v35 = vsel %vm4748_vm12, %v17789_v32, %v6638_v58  ;;  %v17801_v58 = vld [vmem:[#allocation42_spill] sm:$0xff] }
 0x87d   : > { %17790 = vst [vmem:[#allocation29_spill] sm:$0xff] %v16070_v35  ;;  %v6751_v61 = vmul.f32 %v15901_v54, %v16070_v35 }
 0x87f   : > { %v6787_v42 = vadd.f32 %v15907_v55, %v6751_v61  ;;  %v6640_v39 = vpop.permute.xlu0 %6639 }
 0x880   : > { %v16077_v19 = vsel %vm4748_vm12, %v17791_v7, %v6640_v39  ;;  %v17803_v7 = vld [vmem:[#allocation43_spill] sm:$0xff] }
 0x881   : > { %17792 = vst [vmem:[#allocation30_spill] sm:$0xff] %v16077_v19  ;;  %v6819_v13 = vmax.f32 %v6787_v42, 0.0  ;;  %v6752_v41 = vmul.f32 %v15901_v54, %v16077_v19 }
 0x883   : > { %v6788_v27 = vadd.f32 %v15907_v55, %v6752_v41  ;;  %9545 = vmatprep.mubr.msk.f32.mxu0 %vm1882_vm4, %v6819_v13 }
 0x885   : > { %v6820_v57 = vmax.f32 %v6788_v27, 0.0 }
 0x887   : > { %9546 = vmatmul.mubr.msk.f32.gmra.mxu0 %vm1882_vm4, %v6820_v57 }
 0x88a   : > { %v6642_v9 = vpop.permute.xlu1 %6641 }
 0x88b   : > { %v16086_v31 = vsel %vm4748_vm12, %v17793_v59, %v6642_v9 }
 0x88c   : > { %17794 = vst [vmem:[#allocation31_spill] sm:$0xff] %v16086_v31  ;;  %v6753_v14 = vmul.f32 %v15901_v54, %v16086_v31 }
 0x88e   : > { %v6789_v11 = vadd.f32 %v15907_v55, %v6753_v14  ;;  %v6644_v29 = vpop.permute.xlu0 %6643  ;;  %v17805_v14 = vld [vmem:[#allocation44_spill] sm:$0xff] }
 0x88f   : > { %v16093_v47 = vsel %vm4748_vm12, %v17795_v53, %v6644_v29 }
 0x890   : > { %17796 = vst [vmem:[#allocation32_spill] sm:$0xff] %v16093_v47  ;;  %v6821_v30 = vmax.f32 %v6789_v11, 0.0  ;;  %v6754_v21 = vmul.f32 %v15901_v54, %v16093_v47 }
 0x892   : > { %v6790_v56 = vadd.f32 %v15907_v55, %v6754_v21  ;;  %9548 = vmatprep.mubr.msk.f32.mxu0 %vm1882_vm4, %v6821_v30  ;;  %v17807_v21 = vld [vmem:[#allocation45_spill] sm:$0xff] }
 0x894   : > { %v6822_v16 = vmax.f32 %v6790_v56, 0.0 }
 0x896   : > { %9549 = vmatmul.mubr.msk.f32.gmra.mxu0 %vm1882_vm4, %v6822_v16 }
 0x898   : > { %v6646_v18 = vpop.permute.xlu1 %6645 }
 0x899   : > { %v16102_v4 = vsel %vm4748_vm12, %v17797_v8, %v6646_v18 }
 0x89a   : > { %17798 = vst [vmem:[#allocation33_spill] sm:$0xff] %v16102_v4  ;;  %v6755_v46 = vmul.f32 %v15901_v54, %v16102_v4 }
 0x89c   : > { %v6791_v26 = vadd.f32 %v15907_v55, %v6755_v46  ;;  %v6648_v2 = vpop.permute.xlu0 %6647 }
 0x89d   : > { %v16109_v15 = vsel %vm4748_vm12, %v17799_v1, %v6648_v2  ;;  %v393_v2 = vld [vmem:[%s17439_s6 + $0x220] sm:$0xff] }
 0x89e   : > { %17800 = vst [vmem:[#allocation34_spill] sm:$0xff] %v16109_v15  ;;  %v6823_v49 = vmax.f32 %v6791_v26, 0.0  ;;  %v6756_v60 = vmul.f32 %v15901_v54, %v16109_v15  ;;  %v394_v26 = vld [vmem:[%s17439_s6 + $0x228] sm:$0xff] }
 0x89f   : > { %8426 = vmatpush1.msra.mxu0 %v394_v26 }
 0x8a0   : > { %v6792_v23 = vadd.f32 %v15907_v55, %v6756_v60  ;;  %9551 = vmatprep.mubr.msk.f32.mxu0 %vm1882_vm4, %v6823_v49  ;;  %8427 = vmatprep.subr.mxu0 %v17743_v20  ;;  %v17809_v49 = vld [vmem:[#allocation46_spill] sm:$0xff] }
 0x8a1   : > { %8428 = vmatpush1.msra.mxu0 %v393_v2 }
 0x8a2   : > { %v6824_v44 = vmax.f32 %v6792_v23, 0.0  ;;  %8429 = vmatprep.subr.mxu0 %v17743_v20 }
 0x8a4   : > { %9552 = vmatmul.mubr.msk.f32.gmra.mxu0 %vm1882_vm4, %v6824_v44  ;;  %v11800_v44 = vld [vmem:[#allocation5] sm:$0xf] }
 0x8a7   : > { %v6650_v22 = vpop.permute.xlu1 %6649 }
 0x8a8   : > { %v16118_v32 = vsel %vm4748_vm12, %v17801_v58, %v6650_v22  ;;  %v16163_v22 = vrot.slane %v11800_v44, %v15897_v45  ;;  %v390_v44 = vld [vmem:[%s17439_s6 + $0x208] sm:$0xff] }
 0x8a9   : > { %17802 = vst [vmem:[#allocation35_spill] sm:$0xff] %v16118_v32  ;;  %v6757_v61 = vmul.f32 %v15901_v54, %v16118_v32 }
 0x8ab   : > { %v6793_v42 = vadd.f32 %v15907_v55, %v6757_v61  ;;  %v6652_v39 = vpop.permute.xlu0 %6651 }
 0x8ac   : > { %v16125_v13 = vsel %vm4748_vm12, %v17803_v7, %v6652_v39  ;;  %v11801_v7 = vld [vmem:[#allocation7] sm:$0xf] }
 0x8ad   : > { %17804 = vst [vmem:[#allocation36_spill] sm:$0xff] %v16125_v13  ;;  %v6825_v41 = vmax.f32 %v6793_v42, 0.0  ;;  %v6758_v27 = vmul.f32 %v15901_v54, %v16125_v13  ;;  %v17811_v42 = vld [vmem:[#allocation47_spill] sm:$0xff] }
 0x8af   : > { %v6794_v57 = vadd.f32 %v15907_v55, %v6758_v27  ;;  %9554 = vmatprep.mubr.msk.f32.mxu0 %vm1882_vm4, %v6825_v41  ;;  %v16171_v41 = vrot.slane %v11801_v7, %v15897_v45 }
 0x8b1   : > { %v6826_v9 = vmax.f32 %v6794_v57, 0.0 }
 0x8b3   : > { %9555 = vmatmul.mubr.msk.f32.gmra.mxu0 %vm1882_vm4, %v6826_v9 }
 0x8b6   : > { %v6654_v59 = vpop.permute.xlu1 %6653 }
 0x8b7   : > { %v16134_v11 = vsel %vm4748_vm12, %v17805_v14, %v6654_v59 }
 0x8b8   : > { %17806 = vst [vmem:[#allocation37_spill] sm:$0xff] %v16134_v11  ;;  %v6759_v29 = vmul.f32 %v15901_v54, %v16134_v11 }
 0x8ba   : > { %v6795_v53 = vadd.f32 %v15907_v55, %v6759_v29  ;;  %v6656_v30 = vpop.permute.xlu0 %6655 }
 0x8bb   : > { %v16141_v56 = vsel %vm4748_vm12, %v17807_v21, %v6656_v30 }
 0x8bc   : > { %17808 = vst [vmem:[#allocation38_spill] sm:$0xff] %v16141_v56  ;;  %v6827_v16 = vmax.f32 %v6795_v53, 0.0  ;;  %v6760_v18 = vmul.f32 %v15901_v54, %v16141_v56 }
 0x8be   : > { %v6796_v8 = vadd.f32 %v15907_v55, %v6760_v18  ;;  %9557 = vmatprep.mubr.msk.f32.mxu0 %vm1882_vm4, %v6827_v16  ;;  %v17813_v16 = vld [vmem:[#allocation48_spill] sm:$0xff]  ;;  %v392_v18 = vld [vmem:[%s17439_s6 + $0x218] sm:$0xff] }
 0x8bf   : > { %8430 = vmatpush1.msra.mxu0 %v392_v18 }
 0x8c0   : > { %v6828_v46 = vmax.f32 %v6796_v8, 0.0  ;;  %8431 = vmatprep.subr.mxu0 %v17743_v20 }
 0x8c2   : > { %9558 = vmatmul.mubr.msk.f32.gmra.mxu0 %vm1882_vm4, %v6828_v46 }
 0x8c3   : > { %v6658_v1 = vpop.permute.xlu1 %6657 }
 0x8c4   : > { %v16158_v60 = vsel %vm4748_vm12, %v17809_v49, %v6658_v1  ;;  %v391_v1 = vld [vmem:[%s17439_s6 + $0x210] sm:$0xff] }
 0x8c5   : > { %17810 = vst [vmem:[#allocation39_spill] sm:$0xff] %v16158_v60  ;;  %v6761_v23 = vmul.f32 %v15901_v54, %v16158_v60  ;;  %8432 = vmatpush1.msra.mxu0 %v391_v1 }
 0x8c6   : > { %8433 = vmatprep.subr.mxu0 %v17743_v20 }
 0x8c7   : > { %v6797_v58 = vadd.f32 %v15907_v55, %v6761_v23  ;;  %v6660_v61 = vpop.permute.xlu0 %6659  ;;  %8434 = vmatpush1.msra.mxu0 %v390_v44 }
 0x8c8   : > { %v16168_v39 = vsel %vm4748_vm12, %v17811_v42, %v6660_v61  ;;  %v9520_v9 = vpop.f32.mrf.mxu0  ;;  %v17815_v61 = vld [vmem:[#allocation49_spill] sm:$0xff]  ;;  %8435 = vmatprep.subr.mxu0 %v17743_v20 }
 0x8c9   : > { %17812 = vst [vmem:[#allocation40_spill] sm:$0xff] %v16168_v39  ;;  %v6829_v27 = vmax.f32 %v6797_v58, 0.0  ;;  %v6762_v57 = vmul.f32 %v15901_v54, %v16168_v39  ;;  %v7159_v59 = vmul.f32 %v9520_v9, %v16163_v22 }
 0x8ca   : > { %v6995_v29 = vpop.f32.mrf.mxu0 }
 0x8cb   : > { %v6798_v14 = vadd.f32 %v15907_v55, %v6762_v57  ;;  %9560 = vmatprep.mubr.msk.f32.mxu0 %vm1882_vm4, %v6829_v27  ;;  %v6662_v53 = vpop.permute.xlu1 %6661  ;;  %v7195_v30 = vadd.f32 %v16171_v41, %v7159_v59  ;;  %v7158_v21 = vmul.f32 %v16163_v22, %v6995_v29 }
 0x8cc   : > { %v16182_v45 = vsel %vm4748_vm12, %v17813_v16, %v6662_v53  ;;  %v389_v53 = vld [vmem:[%s17439_s6 + $0x200] sm:$0xff] }
 0x8cd   : > { %17814 = vst [vmem:[#allocation41_spill] sm:$0xff] %v16182_v45  ;;  %v6830_v8 = vmax.f32 %v6798_v14, 0.0  ;;  %v6763_v46 = vmul.f32 %v15901_v54, %v16182_v45  ;;  %v7227_v26 = vmax.f32 %v7195_v30, 0.0  ;;  %v7194_v2 = vadd.f32 %v16171_v41, %v7158_v21  ;;  %8436 = vmatpush1.msra.mxu0 %v389_v53 }
 0x8ce   : > { %8437 = vmatprep.subr.mxu0 %v17743_v20 }
 0x8cf   : > { %v6799_v49 = vadd.f32 %v15907_v55, %v6763_v46  ;;  %9561 = vmatmul.mubr.msk.f32.gmra.mxu0 %vm1882_vm4, %v6830_v8  ;;  %v6664_v23 = vpop.permute.xlu0 %6663  ;;  %v7226_v58 = vmax.f32 %v7194_v2, 0.0  ;;  %v7379_v7 = vrot.slane %v7227_v26, 1  ;;  %v7289_v27 = vrot.slane %v7227_v26, 7  ;;  %v387_v2 = vld [vmem:[%s17439_s6 + $0x1f0] sm:$0xff] }
 0x8d0   : > { %v16201_v42 = vsel %vm4748_vm12, %v17815_v61, %v6664_v23 }
 0x8d1   : > { %17816 = vst [vmem:[#allocation42_spill] sm:$0xff] %v16201_v42  ;;  %v6831_v57 = vmax.f32 %v6799_v49, 0.0  ;;  %v6764_v9 = vmul.f32 %v15901_v54, %v16201_v42  ;;  %v7378_v59 = vrot.slane %v7226_v58, 1  ;;  %v11233_v14 = vpack.i.bf16 %v7227_v26, %v7226_v58  ;;  %v388_v26 = vld [vmem:[%s17439_s6 + $0x1f8] sm:$0xff]  ;;  %v386_v49 = vld [vmem:[%s17439_s6 + $0x1e8] sm:$0xff] }
 0x8d2   : > { %v7288_v29 = vrot.slane %v7226_v58, 7  ;;  %v7438_v18 = vsel %vm1090_vm2, %v7379_v7, 0.0  ;;  %8438 = vmatpush1.msra.mxu0 %v388_v26  ;;  %v385_v58 = vld [vmem:[%s17439_s6 + $0x1e0] sm:$0xff] }
 0x8d3   : > { %v6800_v30 = vadd.f32 %v15907_v55, %v6764_v9  ;;  %9563 = vmatprep.mubr.msk.f32.mxu0 %vm1882_vm4, %v6831_v57  ;;  %11234 = vrot.lane.b32.xlu1 %v11233_v14, %s11957_s23  ;;  %v7380_v16 = vsel %vm1090_vm2, %v7378_v59, %v7379_v7  ;;  %v383_v59 = vld [vmem:[%s17439_s6 + $0x1d0] sm:$0xff] }
 0x8d4   : > { %11239 = vrot.lane.b32.xlu0 %v11233_v14, %s11956_s22  ;;  %v16215_v54 = vsel %vm994_vm3, %v7288_v29, %v7289_v27  ;;  %v16218_v21 = vsel %vm994_vm3, 0.0, %v7288_v29  ;;  %v11253_v46 = vpack.i.bf16 %v7438_v18, %v7380_v16  ;;  %8439 = vmatprep.subr.mxu0 %v17743_v20  ;;  %v384_v27 = vld [vmem:[%s17439_s6 + $0x1d8] sm:$0xff]  ;;  %v382_v16 = vld [vmem:[%s17439_s6 + $0x1c8] sm:$0xff] }
 0x8d5   : > { %v6832_v8 = vmax.f32 %v6800_v30, 0.0  ;;  %v11243_v55 = vpack.i.bf16 %v16215_v54, %v16218_v21  ;;  %8440 = vmatpush1.msra.mxu0 %v387_v2 }
 0x8d6   : > { %8441 = vmatprep.subr.mxu0 %v17743_v20 }
 0x8d7   : > { %9564 = vmatmul.mubr.msk.f32.gmra.mxu0 %vm1882_vm4, %v6832_v8  ;;  %11244 = vrot.lane.b32.xlu1 %v11243_v55, %s11958_s15 }
 0x8d8   : > { %11254 = vrot.lane.b32.xlu0 %v11253_v46, %s11954_s8  ;;  %8442 = vmatpush1.msra.mxu0 %v386_v49 }
 0x8d9   : > { %8443 = vmatprep.subr.mxu0 %v17743_v20 }
 0x8da   : > { %8444 = vmatpush1.msra.mxu0 %v385_v58  ;;  %v380_v58 = vld [vmem:[%s17439_s6 + $0x1b8] sm:$0xff] }
 0x8db   : > { %v9523_v1 = vpop.f32.mrf.mxu0  ;;  %11249 = vrot.lane.b32.xlu1 %v11253_v46, %s11959_s16  ;;  %8445 = vmatprep.subr.mxu0 %v17743_v20  ;;  %v381_v46 = vld [vmem:[%s17439_s6 + $0x1c0] sm:$0xff] }
 0x8dc   : > { %v7161_v23 = vmul.f32 %v9523_v1, %v16163_v22  ;;  %8446 = vmatpush1.msra.mxu0 %v384_v27 }
 0x8dd   : > { %v7005_v44 = vpop.f32.mrf.mxu0  ;;  %8447 = vmatprep.subr.mxu0 %v17743_v20 }
 0x8de   : > { %v7197_v61 = vadd.f32 %v16171_v41, %v7161_v23  ;;  %v7160_v7 = vmul.f32 %v16163_v22, %v7005_v44  ;;  %8448 = vmatpush1.msra.mxu0 %v383_v59  ;;  %v379_v59 = vld [vmem:[%s17439_s6 + $0x1b0] sm:$0xff] }
 0x8df   : > { %8449 = vmatprep.subr.mxu0 %v17743_v20 }
 0x8e0   : > { %v7229_v57 = vmax.f32 %v7197_v61, 0.0  ;;  %v7196_v9 = vadd.f32 %v16171_v41, %v7160_v7  ;;  %8450 = vmatpush1.msra.mxu0 %v382_v16 }
 0x8e1   : > { %8451 = vmatprep.subr.mxu0 %v17743_v20 }
 0x8e2   : > { %v7228_v14 = vmax.f32 %v7196_v9, 0.0  ;;  %v7382_v30 = vrot.slane %v7229_v57, 1  ;;  %v7292_v8 = vrot.slane %v7229_v57, 7  ;;  %8452 = vmatpush1.msra.mxu0 %v381_v46 }
 0x8e3   : > { %8453 = vmatprep.subr.mxu0 %v17743_v20 }
 0x8e4   : > { %v11263_v29 = vpack.i.bf16 %v7229_v57, %v7228_v14  ;;  %v7381_v53 = vrot.slane %v7228_v14, 1  ;;  %v7291_v18 = vrot.slane %v7228_v14, 7  ;;  %v16285_v27 = vsel %vm1090_vm2, %v7382_v30, 0.0  ;;  %8454 = vmatpush1.msra.mxu0 %v380_v58 }
 0x8e5   : > { %8455 = vmatprep.subr.mxu0 %v17743_v20 }
 0x8e6   : > { %11264 = vrot.lane.b32.xlu1 %v11263_v29, %s17654_s17  ;;  %11259 = vrot.lane.b32.xlu0 %v11263_v29, %s11957_s23  ;;  %v7383_v55 = vsel %vm1090_vm2, %v7381_v53, %v7382_v30  ;;  %v16268_v2 = vsel %vm994_vm3, %v7291_v18, %v7292_v8  ;;  %v16271_v1 = vsel %vm994_vm3, 0.0, %v7291_v18  ;;  %v395_v18 = vld [vmem:[%s17439_s6 + $0x230] sm:$0xff] }
 0x8e7   : > { %v9526_v26 = vpop.f32.mrf.mxu0  ;;  %9189 = vmatprep.mubr.msk.f32.mxu0 %vm1882_vm4, %v7383_v55  ;;  %v11278_v23 = vpack.i.bf16 %v16268_v2, %v16271_v1  ;;  %v11283_v57 = vpack.i.bf16 %v16285_v27, %v7383_v55  ;;  %8456 = vmatpush1.msra.mxu0 %v379_v59 }
 0x8e8   : > { %v7163_v49 = vmul.f32 %v9526_v26, %v16163_v22  ;;  %8485 = vmatprep.subr.mxu0 %v17743_v20 }
 0x8e9   : > { %v7015_v44 = vpop.f32.mrf.mxu0 }
 0x8ea   : > { %v7199_v61 = vadd.f32 %v16171_v41, %v7163_v49  ;;  %v7162_v7 = vmul.f32 %v16163_v22, %v7015_v44  ;;  %11279 = vrot.lane.b32.xlu1 %v11278_v23, %s11958_s15  ;;  %11269 = vrot.lane.b32.xlu0 %v11263_v29, %s11956_s22  ;;  %v396_v29 = vld [vmem:[%s17439_s6 + $0x238] sm:$0xff] }
 0x8eb   : > { %8486 = vmatpush2.msra.mxu0 %v396_v29 }
 0x8ec   : > { %v7198_v9 = vadd.f32 %v16171_v41, %v7162_v7  ;;  %v7231_v14 = vmax.f32 %v7199_v61, 0.0  ;;  %8487 = vmatprep.subr.mxu0 %v17743_v20 }
 0x8ed   : > { %8488 = vmatpush2.msra.mxu0 %v395_v18 }
 0x8ee   : > { %v7230_v53 = vmax.f32 %v7198_v9, 0.0  ;;  %11284 = vrot.lane.b32.xlu1 %v11283_v57, %s11959_s16  ;;  %11274 = vrot.lane.b32.xlu0 %v11278_v23, %s17655_s20  ;;  %v7295_v8 = vrot.slane %v7231_v14, 7  ;;  %v7385_v23 = vrot.slane %v7231_v14, 1 }
 0x8f0   : > { %v11293_v30 = vpack.i.bf16 %v7231_v14, %v7230_v53  ;;  %v7294_v16 = vrot.slane %v7230_v53, 7  ;;  %v7384_v26 = vrot.slane %v7230_v53, 1  ;;  %v16325_v9 = vsel %vm1090_vm2, %v7385_v23, 0.0 }
 0x8f2   : > { %11294 = vrot.lane.b32.xlu1 %v11293_v30, %s11957_s23  ;;  %11289 = vrot.lane.b32.xlu0 %v11283_v57, %s11954_s8  ;;  %v16307_v55 = vsel %vm994_vm3, %v7294_v16, %v7295_v8  ;;  %v16310_v46 = vsel %vm994_vm3, 0.0, %v7294_v16  ;;  %v16318_v61 = vsel %vm1090_vm2, %v7384_v26, %v7385_v23 }
 0x8f3   : > { %v11313_v58 = vpack.i.bf16 %v16307_v55, %v16310_v46  ;;  %v11318_v53 = vpack.i.bf16 %v16325_v9, %v16318_v61 }
 0x8f6   : > { %11299 = vrot.lane.b32.xlu1 %v11293_v30, %s17654_s17  ;;  %11304 = vrot.lane.b32.xlu0 %v11293_v30, %s11956_s22 }
 0x8f7   : > { %v9529_v49 = vpop.f32.mrf.mxu0 }
 0x8f8   : > { %v7165_v44 = vmul.f32 %v9529_v49, %v16163_v22 }
 0x8f9   : > { %v7025_v20 = vpop.f32.mrf.mxu0 }
 0x8fa   : > { %v7201_v7 = vadd.f32 %v16171_v41, %v7165_v44  ;;  %v7164_v57 = vmul.f32 %v16163_v22, %v7025_v20  ;;  %11314 = vrot.lane.b32.xlu1 %v11313_v58, %s11958_s15  ;;  %11309 = vrot.lane.b32.xlu0 %v11313_v58, %s17655_s20 }
 0x8fc   : > { %v7233_v59 = vmax.f32 %v7201_v7, 0.0  ;;  %v7200_v14 = vadd.f32 %v16171_v41, %v7164_v57 }
 0x8fe   : > { %v7232_v29 = vmax.f32 %v7200_v14, 0.0  ;;  %11319 = vrot.lane.b32.xlu1 %v11318_v53, %s11959_s16  ;;  %11324 = vrot.lane.b32.xlu0 %v11318_v53, %s11954_s8  ;;  %v7298_v18 = vrot.slane %v7233_v59, 7  ;;  %v7388_v44 = vrot.slane %v7233_v59, 1 }
 0x900   : > { %v11333_v30 = vpack.i.bf16 %v7233_v59, %v7232_v29  ;;  %v7297_v16 = vrot.slane %v7232_v29, 7  ;;  %v7387_v8 = vrot.slane %v7232_v29, 1  ;;  %v16348_v7 = vsel %vm1090_vm2, %v7388_v44, 0.0 }
 0x902   : > { %11334 = vrot.lane.b32.xlu1 %v11333_v30, %s17654_s17  ;;  %11329 = vrot.lane.b32.xlu0 %v11333_v30, %s11957_s23  ;;  %v16335_v26 = vsel %vm994_vm3, %v7297_v16, %v7298_v18  ;;  %v16338_v49 = vsel %vm994_vm3, 0.0, %v7297_v16  ;;  %v16343_v58 = vsel %vm1090_vm2, %v7387_v8, %v7388_v44 }
 0x903   : > { %v11348_v23 = vpack.i.bf16 %v16335_v26, %v16338_v49  ;;  %v11353_v14 = vpack.i.bf16 %v16348_v7, %v16343_v58 }
 0x906   : > { %11349 = vrot.lane.b32.xlu1 %v11348_v23, %s11958_s15  ;;  %11339 = vrot.lane.b32.xlu0 %v11333_v30, %s11956_s22 }
 0x907   : > { %v9532_v20 = vpop.f32.mrf.mxu0 }
 0x908   : > { %v7167_v57 = vmul.f32 %v9532_v20, %v16163_v22 }
 0x909   : > { %v7035_v53 = vpop.f32.mrf.mxu0 }
 0x90a   : > { %v7203_v29 = vadd.f32 %v16171_v41, %v7167_v57  ;;  %v7166_v59 = vmul.f32 %v16163_v22, %v7035_v53  ;;  %11354 = vrot.lane.b32.xlu1 %v11353_v14, %s11959_s16  ;;  %11344 = vrot.lane.b32.xlu0 %v11348_v23, %s17655_s20 }
 0x90c   : > { %v7202_v30 = vadd.f32 %v16171_v41, %v7166_v59  ;;  %v7235_v16 = vmax.f32 %v7203_v29, 0.0 }
 0x90e   : > { %v7234_v18 = vmax.f32 %v7202_v30, 0.0  ;;  %11359 = vrot.lane.b32.xlu0 %v11353_v14, %s11954_s8  ;;  %v7301_v45 = vrot.slane %v7235_v16, 7  ;;  %v7391_v14 = vrot.slane %v7235_v16, 1 }
 0x90f   : > { %v9535_v8 = vpop.f32.mrf.mxu0 }
 0x910   : > { %v11363_v44 = vpack.i.bf16 %v7235_v16, %v7234_v18  ;;  %v7300_v42 = vrot.slane %v7234_v18, 7  ;;  %v7390_v39 = vrot.slane %v7234_v18, 1  ;;  %v7169_v57 = vmul.f32 %v9535_v8, %v16163_v22 }
 0x911   : > { %v7045_v20 = vpop.f32.mrf.mxu0 }
 0x912   : > { %v7168_v53 = vmul.f32 %v16163_v22, %v7045_v20  ;;  %11364 = vrot.lane.b32.xlu1 %v11363_v44, %s11957_s23  ;;  %11374 = vrot.lane.b32.xlu0 %v11363_v44, %s11956_s22  ;;  %v16364_v23 = vsel %vm994_vm3, %v7300_v42, %v7301_v45  ;;  %v16367_v29 = vsel %vm994_vm3, 0.0, %v7300_v42  ;;  %v16373_v18 = vsel %vm1090_vm2, %v7390_v39, %v7391_v14 }
 0x913   : > { %v11378_v30 = vpack.i.bf16 %v16364_v23, %v16367_v29  ;;  %v7205_v8 = vadd.f32 %v16171_v41, %v7169_v57  ;;  %v16379_v45 = vsel %vm1090_vm2, %v7391_v14, 0.0 }
 0x914   : > { %v7204_v59 = vadd.f32 %v16171_v41, %v7168_v53  ;;  %v11393_v16 = vpack.i.bf16 %v16379_v45, %v16373_v18 }
 0x915   : > { %v7237_v20 = vmax.f32 %v7205_v8, 0.0 }
 0x916   : > { %11369 = vrot.lane.b32.xlu1 %v11363_v44, %s17654_s17  ;;  %11379 = vrot.lane.b32.xlu0 %v11378_v30, %s17655_s20  ;;  %v7236_v42 = vmax.f32 %v7204_v59, 0.0 }
 0x917   : > { %v7304_v14 = vrot.slane %v7237_v20, 7 }
 0x918   : > { %v11398_v39 = vpack.i.bf16 %v7237_v20, %v7236_v42  ;;  %v7303_v60 = vrot.slane %v7236_v42, 7  ;;  %v7393_v8 = vrot.slane %v7236_v42, 1 }
 0x91a   : > { %11384 = vrot.lane.b32.xlu1 %v11378_v30, %s11958_s15  ;;  %11394 = vrot.lane.b32.xlu0 %v11393_v16, %s11954_s8  ;;  %v16390_v56 = vsel %vm994_vm3, %v7303_v60, %v7304_v14  ;;  %v16393_v30 = vsel %vm994_vm3, 0.0, %v7303_v60 }
 0x91b   : > { %v11418_v13 = vpack.i.bf16 %v16390_v56, %v16393_v30 }
 0x91d   : > { %v9538_v53 = vpop.f32.mrf.mxu0 }
 0x91e   : > { %11389 = vrot.lane.b32.xlu1 %v11393_v16, %s11959_s16  ;;  %11399 = vrot.lane.b32.xlu0 %v11398_v39, %s11957_s23  ;;  %v7171_v44 = vmul.f32 %v9538_v53, %v16163_v22  ;;  %v7394_v53 = vrot.slane %v7237_v20, 1 }
 0x91f   : > { %v7055_v57 = vpop.f32.mrf.mxu0 }
 0x920   : > { %v7170_v59 = vmul.f32 %v16163_v22, %v7055_v57  ;;  %v7207_v16 = vadd.f32 %v16171_v41, %v7171_v44  ;;  %v16402_v14 = vsel %vm1090_vm2, %v7393_v8, %v7394_v53  ;;  %v16407_v42 = vsel %vm1090_vm2, %v7394_v53, 0.0 }
 0x922   : > { %v7206_v11 = vadd.f32 %v16171_v41, %v7170_v59  ;;  %11404 = vrot.lane.b32.xlu1 %v11398_v39, %s17654_s17  ;;  %11409 = vrot.lane.b32.xlu0 %v11398_v39, %s11956_s22  ;;  %v7239_v60 = vmax.f32 %v7207_v16, 0.0  ;;  %v11423_v39 = vpack.i.bf16 %v16407_v42, %v16402_v14 }
 0x924   : > { %v7238_v57 = vmax.f32 %v7206_v11, 0.0  ;;  %v7307_v11 = vrot.slane %v7239_v60, 7  ;;  %v7397_v4 = vrot.slane %v7239_v60, 1 }
 0x926   : > { %11419 = vrot.lane.b32.xlu1 %v11418_v13, %s11958_s15  ;;  %11414 = vrot.lane.b32.xlu0 %v11418_v13, %s17655_s20  ;;  %v7306_v44 = vrot.slane %v7238_v57, 7  ;;  %v11433_v8 = vpack.i.bf16 %v7239_v60, %v7238_v57  ;;  %v7396_v53 = vrot.slane %v7238_v57, 1  ;;  %v16433_v57 = vsel %vm1090_vm2, %v7397_v4, 0.0 }
 0x928   : > { %v16415_v13 = vsel %vm994_vm3, %v7306_v44, %v7307_v11  ;;  %v16418_v16 = vsel %vm994_vm3, 0.0, %v7306_v44 }
 0x929   : > { %v11448_v47 = vpack.i.bf16 %v16415_v13, %v16418_v16 }
 0x92a   : > { %v9541_v20 = vpop.f32.mrf.mxu0  ;;  %11424 = vrot.lane.b32.xlu1 %v11423_v39, %s11959_s16  ;;  %11429 = vrot.lane.b32.xlu0 %v11423_v39, %s11954_s8 }
 0x92b   : > { %v7173_v15 = vmul.f32 %v9541_v20, %v16163_v22 }
 0x92c   : > { %v7065_v59 = vpop.f32.mrf.mxu0 }
 0x92d   : > { %v7172_v32 = vmul.f32 %v16163_v22, %v7065_v59  ;;  %v16427_v59 = vsel %vm1090_vm2, %v7396_v53, %v7397_v4  ;;  %v7209_v11 = vadd.f32 %v16171_v41, %v7173_v15 }
 0x92e   : > { %11434 = vrot.lane.b32.xlu1 %v11433_v8, %s11957_s23  ;;  %11444 = vrot.lane.b32.xlu0 %v11433_v8, %s11956_s22  ;;  %v11463_v60 = vpack.i.bf16 %v16433_v57, %v16427_v59 }
 0x92f   : > { %v7208_v39 = vadd.f32 %v16171_v41, %v7172_v32  ;;  %v7241_v32 = vmax.f32 %v7209_v11, 0.0 }
 0x931   : > { %v7240_v44 = vmax.f32 %v7208_v39, 0.0 }
 0x932   : > { %11439 = vrot.lane.b32.xlu1 %v11433_v8, %s17654_s17  ;;  %11449 = vrot.lane.b32.xlu0 %v11448_v47, %s17655_s20  ;;  %v7310_v8 = vrot.slane %v7241_v32, 7 }
 0x933   : > { %v11468_v20 = vpack.i.bf16 %v7241_v32, %v7240_v44  ;;  %v7309_v31 = vrot.slane %v7240_v44, 7  ;;  %v7399_v11 = vrot.slane %v7240_v44, 1 }
 0x935   : > { %v16444_v19 = vsel %vm994_vm3, %v7309_v31, %v7310_v8 }
 0x936   : > { %11454 = vrot.lane.b32.xlu1 %v11448_v47, %s11958_s15  ;;  %11464 = vrot.lane.b32.xlu0 %v11463_v60, %s11954_s8  ;;  %17817 = vst [vmem:[#allocation43_spill] sm:$0xff] %v16444_v19  ;;  %v16447_v47 = vsel %vm994_vm3, 0.0, %v7309_v31 }
 0x939   : > { %v9544_v53 = vpop.f32.mrf.mxu0 }
 0x93a   : > { %11459 = vrot.lane.b32.xlu1 %v11463_v60, %s11959_s16  ;;  %11469 = vrot.lane.b32.xlu0 %v11468_v20, %s11957_s23  ;;  %v7175_v4 = vmul.f32 %v9544_v53, %v16163_v22  ;;  %v7400_v60 = vrot.slane %v7241_v32, 1  ;;  %v11488_v53 = vpack.i.bf16 %v16444_v19, %v16447_v47 }
 0x93b   : > { %v7075_v15 = vpop.f32.mrf.mxu0 }
 0x93c   : > { %v7174_v39 = vmul.f32 %v16163_v22, %v7075_v15  ;;  %v7211_v43 = vadd.f32 %v16171_v41, %v7175_v4  ;;  %v16456_v15 = vsel %vm1090_vm2, %v7399_v11, %v7400_v60  ;;  %v16461_v31 = vsel %vm1090_vm2, %v7400_v60, 0.0 }
 0x93d   : > { %v11493_v32 = vpack.i.bf16 %v16461_v31, %v16456_v15 }
 0x93e   : > { %v7210_v35 = vadd.f32 %v16171_v41, %v7174_v39  ;;  %11474 = vrot.lane.b32.xlu1 %v11468_v20, %s17654_s17  ;;  %11479 = vrot.lane.b32.xlu0 %v11468_v20, %s11956_s22  ;;  %v7243_v44 = vmax.f32 %v7211_v43, 0.0 }
 0x940   : > { %v7242_v8 = vmax.f32 %v7210_v35, 0.0  ;;  %v7313_v11 = vrot.slane %v7243_v44, 7  ;;  %v7403_v36 = vrot.slane %v7243_v44, 1 }
 0x942   : > { %11489 = vrot.lane.b32.xlu1 %v11488_v53, %s11958_s15  ;;  %11484 = vrot.lane.b32.xlu0 %v11488_v53, %s17655_s20  ;;  %v7312_v20 = vrot.slane %v7242_v8, 7  ;;  %v11503_v35 = vpack.i.bf16 %v7243_v44, %v7242_v8  ;;  %v7402_v53 = vrot.slane %v7242_v8, 1 }
 0x944   : > { %v16472_v43 = vsel %vm994_vm3, %v7312_v20, %v7313_v11  ;;  %v16475_v60 = vsel %vm994_vm3, 0.0, %v7312_v20  ;;  %v16484_v11 = vsel %vm1090_vm2, %v7402_v53, %v7403_v36 }
 0x945   : > { %v16467_v4 = vpop.permute.xlu1 %11234  ;;  %17818 = vst [vmem:[#allocation44_spill] sm:$0xff] %v16472_v43  ;;  %17819 = vst [vmem:[#allocation45_spill] sm:$0xff] %v16475_v60  ;;  %v11518_v6 = vpack.i.bf16 %v16472_v43, %v16475_v60 }
 0x946   : > { %11494 = vrot.lane.b32.xlu1 %v11493_v32, %s11959_s16  ;;  %11499 = vrot.lane.b32.xlu0 %v11493_v32, %s11954_s8  ;;  %v16486_v63 = vpop.permute.xlu0 %11239 }
 0x947   : > { %v9547_v39 = vpop.f32.mrf.mxu0  ;;  %v11241_v28 = vunpack.i.l.bf16 %v16486_v63 }
 0x948   : > { %v7177_v32 = vmul.f32 %v9547_v39, %v16163_v22 }
 0x949   : > { %v7085_v48 = vpop.f32.mrf.mxu0  ;;  %v11245_v5 = vpop.permute.xlu1 %11244 }
 0x94a   : > { %11504 = vrot.lane.b32.xlu1 %v11503_v35, %s11957_s23  ;;  %11514 = vrot.lane.b32.xlu0 %v11503_v35, %s11956_s22  ;;  %v7176_v52 = vmul.f32 %v16163_v22, %v7085_v48  ;;  %v7213_v8 = vadd.f32 %v16171_v41, %v7177_v32  ;;  %v16491_v48 = vsel %vm1090_vm2, %v7403_v36, 0.0  ;;  %v11247_v40 = vunpack.i.h.bf16 %v11245_v5 }
 0x94c   : > { %v7212_v17 = vadd.f32 %v16171_v41, %v7176_v52  ;;  %v11533_v52 = vpack.i.bf16 %v16491_v48, %v16484_v11  ;;  %v7245_v20 = vmax.f32 %v7213_v8, 0.0 }
 0x94d   : > { %v11250_v39 = vpop.permute.xlu1 %11249 }
 0x94e   : > { %11509 = vrot.lane.b32.xlu1 %v11503_v35, %s17654_s17  ;;  %11519 = vrot.lane.b32.xlu0 %v11518_v6, %s17655_s20  ;;  %v7244_v44 = vmax.f32 %v7212_v17, 0.0  ;;  %v16497_v35 = vpop.permute.xlu0 %11254  ;;  %v7316_v36 = vrot.slane %v7245_v20, 7 }
 0x94f   : > { %v11256_v60 = vunpack.i.l.bf16 %v16497_v35 }
 0x950   : > { %v11538_v53 = vpack.i.bf16 %v7245_v20, %v7244_v44  ;;  %v7315_v10 = vrot.slane %v7244_v44, 7  ;;  %v7405_v33 = vrot.slane %v7244_v44, 1 }
 0x952   : > { %11524 = vrot.lane.b32.xlu1 %v11518_v6, %s11958_s15  ;;  %11534 = vrot.lane.b32.xlu0 %v11533_v52, %s11954_s8  ;;  %v16508_v0 = vsel %vm994_vm3, %v7315_v10, %v7316_v36  ;;  %v16511_v37 = vsel %vm994_vm3, 0.0, %v7315_v10 }
 0x953   : > { %17820 = vst [vmem:[#allocation46_spill] sm:$0xff] %v16508_v0  ;;  %17821 = vst [vmem:[#allocation47_spill] sm:$0xff] %v16511_v37  ;;  %v11558_v36 = vpack.i.bf16 %v16508_v0, %v16511_v37  ;;  %v11237_v0 = vunpack.i.h.bf16 %v16467_v4  ;;  %v11236_v37 = vunpack.i.l.bf16 %v16467_v4 }
 0x956   : > { %v9550_v32 = vpop.f32.mrf.mxu0  ;;  %11529 = vrot.lane.b32.xlu1 %v11533_v52, %s11959_s16  ;;  %11539 = vrot.lane.b32.xlu0 %v11538_v53, %s11957_s23  ;;  %v11246_v52 = vunpack.i.l.bf16 %v11245_v5 }
 0x957   : > { %v7179_v17 = vmul.f32 %v9550_v32, %v16163_v22  ;;  %v7406_v32 = vrot.slane %v7245_v20, 1  ;;  %v11251_v20 = vunpack.i.l.bf16 %v11250_v39 }
 0x958   : > { %v7095_v25 = vpop.f32.mrf.mxu0  ;;  %v16502_v34 = vpop.permute.xlu1 %11264 }
 0x959   : > { %v7178_v6 = vmul.f32 %v16163_v22, %v7095_v25  ;;  %v16505_v8 = vpop.permute.xlu0 %11259  ;;  %v7215_v50 = vadd.f32 %v16171_v41, %v7179_v17  ;;  %v16524_v10 = vsel %vm1090_vm2, %v7405_v33, %v7406_v32  ;;  %v16531_v17 = vsel %vm1090_vm2, %v7406_v32, 0.0 }
 0x95a   : > { %11544 = vrot.lane.b32.xlu1 %v11538_v53, %s17654_s17  ;;  %11549 = vrot.lane.b32.xlu0 %v11538_v53, %s11956_s22  ;;  %17823 = vst [vmem:[#allocation48_spill] sm:$0xff] %v16531_v17  ;;  %v11242_v33 = vunpack.i.h.bf16 %v16486_v63  ;;  %v11266_v63 = vunpack.i.l.bf16 %v16502_v34 }
 0x95b   : > { %v7214_v62 = vadd.f32 %v16171_v41, %v7178_v6  ;;  %v17822_v6 = vld [vmem:[#allocation20_spill] sm:$0xff]  ;;  %v16534_v5 = vmax.f32 %v7215_v50, 0.0 }
 0x95c   : > { %v16517_v25 = vpop.permute.xlu1 %11279  ;;  %v8205_v53 = vsel %vm1948_vm6, %v17822_v6, %v11246_v52  ;;  %v8206_v52 = vsel %vm1948_vm6, %v17824_v24, %v11247_v40  ;;  %v11252_v6 = vunpack.i.h.bf16 %v11250_v39 }
 0x95d   : > { %v16521_v12 = vpop.permute.xlu0 %11269  ;;  %v7246_v44 = vmax.f32 %v7214_v62, 0.0  ;;  %v11563_v62 = vpack.i.bf16 %v16531_v17, %v16524_v10  ;;  %v11267_v17 = vunpack.i.h.bf16 %v16502_v34  ;;  %v11281_v19 = vunpack.i.l.bf16 %v16517_v25 }
 0x95e   : > { %11559 = vrot.lane.b32.xlu1 %v11558_v36, %s11958_s15  ;;  %11554 = vrot.lane.b32.xlu0 %v11558_v36, %s17655_s20  ;;  %v8237_v36 = vsel %vm1981_vm7, %v8205_v53, %v11241_v28  ;;  %v8238_v28 = vsel %vm1981_vm7, %v8206_v52, %v11242_v33  ;;  %v7319_v53 = vrot.slane %v16534_v5, 7  ;;  %v11282_v34 = vunpack.i.h.bf16 %v16517_v25 }
 0x95f   : > { %v7318_v50 = vrot.slane %v7246_v44, 7  ;;  %v8269_v43 = vsel %vm2014_vm8, %v8237_v36, %v11251_v20  ;;  %v8270_v36 = vsel %vm2014_vm8, %v8238_v28, %v11252_v6  ;;  %v7408_v52 = vrot.slane %v7246_v44, 1 }
 0x960   : > { %v16536_v51 = vpop.permute.xlu1 %11284 }
 0x961   : > { %v11275_v38 = vpop.permute.xlu0 %11274  ;;  %v16567_v33 = vsel %vm994_vm3, 0.0, %v7318_v50 }
 0x962   : > { %v11277_v32 = vunpack.i.h.bf16 %v11275_v38  ;;  %v11276_v3 = vunpack.i.l.bf16 %v11275_v38  ;;  %11564 = vrot.lane.b32.xlu1 %v11563_v62, %s11959_s16  ;;  %11569 = vrot.lane.b32.xlu0 %v11563_v62, %s11954_s8  ;;  %v11573_v38 = vpack.i.bf16 %v16534_v5, %v7246_v44  ;;  %v7409_v44 = vrot.slane %v16534_v5, 1 }
 0x964   : > { %v8301_v24 = vsel %vm2047_vm9, %v8269_v43, %v11276_v3  ;;  %v9553_v40 = vpop.f32.mrf.mxu0  ;;  %v16551_v39 = vpop.permute.xlu1 %11294  ;;  %v8302_v3 = vsel %vm2047_vm9, %v8270_v36, %v11277_v32  ;;  %v16564_v43 = vsel %vm994_vm3, %v7318_v50, %v7319_v53  ;;  %v8145_v32 = vsel %vm1882_vm4, %v16218_v21, %v11236_v37 }
 0x965   : > { %v16557_v4 = vpop.permute.xlu0 %11289  ;;  %v8333_v20 = vsel %vm2080_vm10, %v8301_v24, %v11266_v63  ;;  %v7181_v63 = vmul.f32 %v9553_v40, %v16163_v22  ;;  %v11257_v24 = vunpack.i.h.bf16 %v16497_v35  ;;  %v8334_v53 = vsel %vm2080_vm10, %v8302_v3, %v11267_v17 }
 0x966   : > { %v7105_v62 = vpop.f32.mrf.mxu0  ;;  %8490 = vmatmul.mubr.f32.vlgmr.msra.gmra.mxu0 %v8333_v20  ;;  %11574 = vrot.lane.b32.xlu1 %v11573_v38, %s11957_s23  ;;  %v11588_v20 = vpack.i.bf16 %v16564_v43, %v16567_v33  ;;  %v8175_v37 = vsel %vm1915_vm5, %v8145_v32, %v11256_v60  ;;  %v11271_v21 = vunpack.i.l.bf16 %v16521_v12  ;;  %v8146_v35 = vsel %vm1882_vm4, %v16215_v54, %v11237_v0 }
 0x967   : > { %v7180_v6 = vmul.f32 %v16163_v22, %v7105_v62  ;;  %11584 = vrot.lane.b32.xlu0 %v11573_v38, %s11956_s22  ;;  %9190 = vmatprep.mubr.msk.f32.mxu0 %vm1882_vm4, %v16285_v27  ;;  %v16591_v27 = vsel %vm1090_vm2, %v7408_v52, %v7409_v44  ;;  %v8207_v25 = vsel %vm1948_vm6, %v8175_v37, %v11281_v19  ;;  %v11286_v17 = vunpack.i.l.bf16 %v16536_v51 }
 0x968   : > { %v11300_v50 = vpop.permute.xlu1 %11299  ;;  %v7217_v5 = vadd.f32 %v16171_v41, %v7181_v63  ;;  %v8176_v60 = vsel %vm1915_vm5, %v8146_v35, %v11257_v24  ;;  %v16606_v62 = vsel %vm1090_vm2, %v7409_v44, 0.0  ;;  %v11287_v19 = vunpack.i.h.bf16 %v16536_v51 }
 0x969   : > { %v7216_v28 = vadd.f32 %v16171_v41, %v7180_v6  ;;  %v16582_v40 = vpop.permute.xlu0 %11304  ;;  %v8208_v0 = vsel %vm1948_vm6, %v8176_v60, %v11282_v34  ;;  %v11603_v52 = vpack.i.bf16 %v16606_v62, %v16591_v27  ;;  %v11301_v32 = vunpack.i.l.bf16 %v11300_v50 }
 0x96a   : > { %8495 = vmatmul.mubr.f32.gmra.mxu0 %v8334_v53  ;;  %11579 = vrot.lane.b32.xlu1 %v11573_v38, %s17654_s17  ;;  %v11272_v38 = vunpack.i.h.bf16 %v16521_v12  ;;  %v7249_v12 = vmax.f32 %v7217_v5, 0.0  ;;  %v11261_v60 = vunpack.i.l.bf16 %v16505_v8 }
 0x96b   : > { %11589 = vrot.lane.b32.xlu0 %v11588_v20, %s17655_s20  ;;  %9191 = vmatprep.mubr.msk.f32.mxu0 %vm1882_vm4, %v16318_v61  ;;  %v7248_v54 = vmax.f32 %v7216_v28, 0.0  ;;  %v8239_v61 = vsel %vm1981_vm7, %v8207_v25, %v11271_v21  ;;  %v11302_v25 = vunpack.i.h.bf16 %v11300_v50 }
 0x96c   : > { %v16603_v36 = vpop.permute.xlu1 %11314  ;;  %v8271_v24 = vsel %vm2014_vm8, %v8239_v61, %v11286_v17  ;;  %v8240_v44 = vsel %vm1981_vm7, %v8208_v0, %v11272_v38  ;;  %v7322_v5 = vrot.slane %v7249_v12, 7 }
 0x96d   : > { %v11310_v3 = vpop.permute.xlu0 %11309  ;;  %v11608_v37 = vpack.i.bf16 %v7249_v12, %v7248_v54  ;;  %v8272_v21 = vsel %vm2014_vm8, %v8240_v44, %v11287_v19  ;;  %v7412_v44 = vrot.slane %v7249_v12, 1 }
 0x96e   : > { %v11312_v63 = vunpack.i.h.bf16 %v11310_v3  ;;  %v11311_v6 = vunpack.i.l.bf16 %v11310_v3  ;;  %11594 = vrot.lane.b32.xlu1 %v11588_v20, %s11958_s15  ;;  %v7321_v20 = vrot.slane %v7248_v54, 7 }
 0x96f   : > { %11604 = vrot.lane.b32.xlu0 %v11603_v52, %s11954_s8 }
 0x970   : > { %v16617_v51 = vpop.permute.xlu1 %11319  ;;  %v8303_v34 = vsel %vm2047_vm9, %v8271_v24, %v11311_v6  ;;  %v8304_v35 = vsel %vm2047_vm9, %v8272_v21, %v11312_v63  ;;  %v16637_v50 = vsel %vm994_vm3, %v7321_v20, %v7322_v5  ;;  %v16640_v61 = vsel %vm994_vm3, 0.0, %v7321_v20 }
 0x971   : > { %v16620_v28 = vpop.permute.xlu0 %11324  ;;  %v8335_v53 = vsel %vm2080_vm10, %v8303_v34, %v11301_v32  ;;  %v7411_v63 = vrot.slane %v7248_v54, 1  ;;  %v11291_v6 = vunpack.i.l.bf16 %v16557_v4  ;;  %v11316_v24 = vunpack.i.l.bf16 %v16603_v36 }
 0x972   : > { %8500 = vmatmul.mubr.f32.gmra.mxu0 %v8335_v53  ;;  %11599 = vrot.lane.b32.xlu1 %v11603_v52, %s11959_s16  ;;  %v8336_v52 = vsel %vm2080_vm10, %v8304_v35, %v11302_v25  ;;  %v11292_v34 = vunpack.i.h.bf16 %v16557_v4  ;;  %v11628_v53 = vpack.i.bf16 %v16637_v50, %v16640_v61  ;;  %v8147_v21 = vsel %vm1882_vm4, %v16271_v1, %v11261_v60 }
 0x973   : > { %v9556_v17 = vpop.f32.mrf.mxu0  ;;  %11609 = vrot.lane.b32.xlu0 %v11608_v37, %s11957_s23  ;;  %9192 = vmatprep.mubr.msk.f32.mxu0 %vm1882_vm4, %v16325_v9  ;;  %v11262_v9 = vunpack.i.h.bf16 %v16505_v8  ;;  %v11317_v20 = vunpack.i.h.bf16 %v16603_v36  ;;  %v8177_v4 = vsel %vm1915_vm5, %v8147_v21, %v11291_v6  ;;  %v11297_v1 = vunpack.i.h.bf16 %v16551_v39 }
 0x974   : > { %v7183_v38 = vmul.f32 %v9556_v17, %v16163_v22  ;;  %v16631_v0 = vpop.permute.xlu1 %11334  ;;  %v8209_v36 = vsel %vm1948_vm6, %v8177_v4, %v11316_v24  ;;  %v11321_v17 = vunpack.i.l.bf16 %v16617_v51  ;;  %v16676_v5 = vsel %vm1090_vm2, %v7412_v44, 0.0 }
 0x975   : > { %v7115_v19 = vpop.f32.mrf.mxu0  ;;  %v16633_v3 = vpop.permute.xlu0 %11329  ;;  %v11306_v60 = vunpack.i.l.bf16 %v16582_v40 }
 0x976   : > { %v7182_v32 = vmul.f32 %v16163_v22, %v7115_v19  ;;  %8505 = vmatmul.mubr.f32.gmra.mxu0 %v8336_v52  ;;  %11614 = vrot.lane.b32.xlu1 %v11608_v37, %s17654_s17  ;;  %v7219_v54 = vadd.f32 %v16171_v41, %v7183_v38  ;;  %v11307_v52 = vunpack.i.h.bf16 %v16582_v40 }
 0x977   : > { %11619 = vrot.lane.b32.xlu0 %v11608_v37, %s11956_s22  ;;  %9193 = vmatprep.mubr.msk.f32.mxu0 %vm1882_vm4, %v16343_v58  ;;  %v16661_v37 = vsel %vm1090_vm2, %v7411_v63, %v7412_v44  ;;  %v8148_v58 = vsel %vm1882_vm4, %v16268_v2, %v11262_v9  ;;  %v11322_v9 = vunpack.i.h.bf16 %v16617_v51  ;;  %v8241_v44 = vsel %vm1981_vm7, %v8209_v36, %v11306_v60 }
 0x978   : > { %v7218_v8 = vadd.f32 %v16171_v41, %v7182_v32  ;;  %v16668_v25 = vpop.permute.xlu1 %11349  ;;  %v8178_v2 = vsel %vm1915_vm5, %v8148_v58, %v11292_v34  ;;  %v16680_v38 = vmax.f32 %v7219_v54, 0.0  ;;  %v11633_v19 = vpack.i.bf16 %v16676_v5, %v16661_v37 }
 0x979   : > { %v16658_v35 = vpop.permute.xlu0 %11339  ;;  %v8210_v63 = vsel %vm1948_vm6, %v8178_v2, %v11317_v20  ;;  %v11296_v54 = vunpack.i.l.bf16 %v16551_v39  ;;  %v8273_v40 = vsel %vm2014_vm8, %v8241_v44, %v11321_v17  ;;  %v11326_v39 = vunpack.i.l.bf16 %v16620_v28 }
 0x97a   : > { %v16666_v12 = vmax.f32 %v7218_v8, 0.0  ;;  %11629 = vrot.lane.b32.xlu1 %v11628_v53, %s11958_s15  ;;  %v11327_v8 = vunpack.i.h.bf16 %v16620_v28  ;;  %v8242_v58 = vsel %vm1981_vm7, %v8210_v63, %v11307_v52  ;;  %v7325_v4 = vrot.slane %v16680_v38, 7 }
 0x97b   : > { %11624 = vrot.lane.b32.xlu0 %v11628_v53, %s17655_s20  ;;  %v11336_v53 = vunpack.i.l.bf16 %v16631_v0  ;;  %v8274_v60 = vsel %vm2014_vm8, %v8242_v58, %v11322_v9  ;;  %v8150_v63 = vsel %vm1882_vm4, %v16307_v55, %v11297_v1  ;;  %v11351_v9 = vunpack.i.l.bf16 %v16668_v25 }
 0x97c   : > { %v7324_v34 = vrot.slane %v16666_v12, 7  ;;  %v16695_v51 = vpop.permute.xlu1 %11354  ;;  %v11643_v20 = vpack.i.bf16 %v16680_v38, %v16666_v12  ;;  %v7414_v28 = vrot.slane %v16666_v12, 1  ;;  %v7415_v55 = vrot.slane %v16680_v38, 1 }
 0x97d   : > { %v11345_v6 = vpop.permute.xlu0 %11344  ;;  %v11356_v58 = vunpack.i.l.bf16 %v16695_v51 }
 0x97e   : > { %v11347_v32 = vunpack.i.h.bf16 %v11345_v6  ;;  %v11346_v24 = vunpack.i.l.bf16 %v11345_v6  ;;  %11634 = vrot.lane.b32.xlu1 %v11633_v19, %s11959_s16  ;;  %v16710_v6 = vsel %vm994_vm3, %v7324_v34, %v7325_v4  ;;  %v16713_v52 = vsel %vm994_vm3, 0.0, %v7324_v34 }
 0x97f   : > { %11639 = vrot.lane.b32.xlu0 %v11633_v19, %s11954_s8  ;;  %v11352_v34 = vunpack.i.h.bf16 %v16668_v25  ;;  %v11342_v25 = vunpack.i.h.bf16 %v16658_v35  ;;  %v16742_v38 = vsel %vm1090_vm2, %v7414_v28, %v7415_v55 }
 0x980   : > { %v8305_v21 = vsel %vm2047_vm9, %v8273_v40, %v11346_v24  ;;  %v8306_v19 = vsel %vm2047_vm9, %v8274_v60, %v11347_v32  ;;  %v11337_v24 = vunpack.i.h.bf16 %v16631_v0  ;;  %v8149_v32 = vsel %vm1882_vm4, %v16310_v46, %v11296_v54 }
 0x981   : > { %v16703_v36 = vpop.permute.xlu0 %11359  ;;  %v8337_v2 = vsel %vm2080_vm10, %v8305_v21, %v11336_v53  ;;  %v8180_v0 = vsel %vm1915_vm5, %v8150_v63, %v11327_v8  ;;  %v8179_v46 = vsel %vm1915_vm5, %v8149_v32, %v11326_v39  ;;  %v11341_v54 = vunpack.i.l.bf16 %v16658_v35 }
 0x982   : > { %v9559_v17 = vpop.f32.mrf.mxu0  ;;  %8510 = vmatmul.mubr.f32.gmra.mxu0 %v8337_v2  ;;  %11644 = vrot.lane.b32.xlu1 %v11643_v20, %s11957_s23  ;;  %v8338_v21 = vsel %vm2080_vm10, %v8306_v19, %v11337_v24  ;;  %v8211_v8 = vsel %vm1948_vm6, %v8179_v46, %v11351_v9  ;;  %v8212_v35 = vsel %vm1948_vm6, %v8180_v0, %v11352_v34  ;;  %v16754_v60 = vsel %vm1090_vm2, %v7415_v55, 0.0 }
 0x983   : > { %v7185_v44 = vmul.f32 %v9559_v17, %v16163_v22  ;;  %11654 = vrot.lane.b32.xlu0 %v11643_v20, %s11956_s22  ;;  %9194 = vmatprep.mubr.msk.f32.mxu0 %vm1882_vm4, %v16348_v7  ;;  %v11658_v7 = vpack.i.bf16 %v16710_v6, %v16713_v52  ;;  %v11673_v63 = vpack.i.bf16 %v16754_v60, %v16742_v38 }
 0x984   : > { %v7125_v12 = vpop.f32.mrf.mxu0  ;;  %v16727_v53 = vpop.permute.xlu1 %11364  ;;  %v8243_v24 = vsel %vm1981_vm7, %v8211_v8, %v11341_v54  ;;  %v11331_v8 = vunpack.i.l.bf16 %v16633_v3 }
 0x985   : > { %v7184_v1 = vmul.f32 %v16163_v22, %v7125_v12  ;;  %v16732_v40 = vpop.permute.xlu0 %11374  ;;  %v7221_v4 = vadd.f32 %v16171_v41, %v7185_v44 }
 0x986   : > { %8515 = vmatmul.mubr.f32.gmra.mxu0 %v8338_v21  ;;  %11649 = vrot.lane.b32.xlu1 %v11643_v20, %s17654_s17  ;;  %v11357_v20 = vunpack.i.h.bf16 %v16695_v51  ;;  %v8275_v51 = vsel %vm2014_vm8, %v8243_v24, %v11356_v58 }
 0x987   : > { %v7220_v2 = vadd.f32 %v16171_v41, %v7184_v1  ;;  %11659 = vrot.lane.b32.xlu0 %v11658_v7, %s17655_s20  ;;  %9195 = vmatprep.mubr.msk.f32.mxu0 %vm1882_vm4, %v16373_v18  ;;  %v8244_v18 = vsel %vm1981_vm7, %v8212_v35, %v11342_v25  ;;  %v7253_v32 = vmax.f32 %v7221_v4, 0.0  ;;  %v11332_v25 = vunpack.i.h.bf16 %v16633_v3 }
 0x988   : > { %v11370_v39 = vpop.permute.xlu1 %11369  ;;  %v8276_v55 = vsel %vm2014_vm8, %v8244_v18, %v11357_v20  ;;  %v11361_v4 = vunpack.i.l.bf16 %v16703_v36 }
 0x989   : > { %v7252_v17 = vmax.f32 %v7220_v2, 0.0  ;;  %v11371_v19 = vunpack.i.l.bf16 %v11370_v39  ;;  %v11380_v28 = vpop.permute.xlu0 %11379  ;;  %v11372_v0 = vunpack.i.h.bf16 %v11370_v39  ;;  %v7328_v58 = vrot.slane %v7253_v32, 7 }
 0x98a   : > { %v11382_v9 = vunpack.i.h.bf16 %v11380_v28  ;;  %v11381_v44 = vunpack.i.l.bf16 %v11380_v28  ;;  %11664 = vrot.lane.b32.xlu1 %v11658_v7, %s11958_s15 }
 0x98b   : > { %11674 = vrot.lane.b32.xlu0 %v11673_v63, %s11954_s8  ;;  %v11678_v46 = vpack.i.bf16 %v7253_v32, %v7252_v17  ;;  %v7327_v54 = vrot.slane %v7252_v17, 7  ;;  %v7417_v20 = vrot.slane %v7252_v17, 1  ;;  %v8152_v17 = vsel %vm1882_vm4, %v16335_v26, %v11332_v25 }
 0x98c   : > { %v11385_v34 = vpop.permute.xlu1 %11384  ;;  %v8307_v12 = vsel %vm2047_vm9, %v8275_v51, %v11381_v44  ;;  %v8308_v7 = vsel %vm2047_vm9, %v8276_v55, %v11382_v9  ;;  %v7418_v51 = vrot.slane %v7253_v32, 1  ;;  %v11376_v25 = vunpack.i.l.bf16 %v16732_v40 }
 0x98d   : > { %v16765_v1 = vpop.permute.xlu0 %11394  ;;  %v8339_v21 = vsel %vm2080_vm10, %v8307_v12, %v11371_v19  ;;  %v8340_v28 = vsel %vm2080_vm10, %v8308_v7, %v11372_v0  ;;  %v16783_v3 = vsel %vm994_vm3, %v7327_v54, %v7328_v58  ;;  %v11386_v24 = vunpack.i.l.bf16 %v11385_v34 }
 0x98e   : > { %8520 = vmatmul.mubr.f32.gmra.mxu0 %v8339_v21  ;;  %11669 = vrot.lane.b32.xlu1 %v11673_v63, %s11959_s16  ;;  %v16786_v63 = vsel %vm994_vm3, 0.0, %v7327_v54  ;;  %v11366_v12 = vunpack.i.l.bf16 %v16727_v53  ;;  %v11387_v55 = vunpack.i.h.bf16 %v11385_v34 }
 0x98f   : > { %11679 = vrot.lane.b32.xlu0 %v11678_v46, %s11957_s23  ;;  %9196 = vmatprep.mubr.msk.f32.mxu0 %vm1882_vm4, %v16379_v45  ;;  %v9562_v2 = vpop.f32.mrf.mxu0  ;;  %v11362_v45 = vunpack.i.h.bf16 %v16703_v36  ;;  %v8151_v36 = vsel %vm1882_vm4, %v16338_v49, %v11331_v8  ;;  %v11698_v26 = vpack.i.bf16 %v16783_v3, %v16786_v63  ;;  %v11367_v49 = vunpack.i.h.bf16 %v16727_v53 }
 0x990   : > { %v16776_v35 = vpop.permute.xlu1 %11389  ;;  %v7187_v39 = vmul.f32 %v9562_v2, %v16163_v22  ;;  %v8181_v21 = vsel %vm1915_vm5, %v8151_v36, %v11361_v4  ;;  %v16821_v4 = vsel %vm1090_vm2, %v7418_v51, 0.0  ;;  %v8153_v2 = vsel %vm1882_vm4, %v16367_v29, %v11366_v12 }
 0x991   : > { %v16779_v19 = vpop.permute.xlu0 %11399  ;;  %v7135_v9 = vpop.f32.mrf.mxu0  ;;  %v8182_v32 = vsel %vm1915_vm5, %v8152_v17, %v11362_v45  ;;  %v8213_v34 = vsel %vm1948_vm6, %v8181_v21, %v11386_v24  ;;  %v11391_v7 = vunpack.i.l.bf16 %v16776_v35  ;;  %v11377_v53 = vunpack.i.h.bf16 %v16732_v40 }
 0x992   : > { %8525 = vmatmul.mubr.f32.gmra.mxu0 %v8340_v28  ;;  %11684 = vrot.lane.b32.xlu1 %v11678_v46, %s17654_s17  ;;  %v7223_v44 = vadd.f32 %v16171_v41, %v7187_v39  ;;  %v7186_v18 = vmul.f32 %v16163_v22, %v7135_v9  ;;  %v11396_v24 = vunpack.i.l.bf16 %v16765_v1 }
 0x993   : > { %11689 = vrot.lane.b32.xlu0 %v11678_v46, %s11956_s22  ;;  %9197 = vmatprep.mubr.msk.f32.mxu0 %vm1882_vm4, %v16402_v14  ;;  %v16809_v14 = vsel %vm1090_vm2, %v7417_v20, %v7418_v51  ;;  %v8214_v20 = vsel %vm1948_vm6, %v8182_v32, %v11387_v55 }
 0x994   : > { %v16800_v0 = vpop.permute.xlu1 %11404  ;;  %v7222_v54 = vadd.f32 %v16171_v41, %v7186_v18  ;;  %v16817_v8 = vmax.f32 %v7223_v44, 0.0  ;;  %v11703_v45 = vpack.i.bf16 %v16821_v4, %v16809_v14  ;;  %v8245_v44 = vsel %vm1981_vm7, %v8213_v34, %v11376_v25 }
 0x995   : > { %v16806_v46 = vpop.permute.xlu0 %11409  ;;  %v11392_v18 = vunpack.i.h.bf16 %v16776_v35  ;;  %v8277_v40 = vsel %vm2014_vm8, %v8245_v44, %v11391_v7  ;;  %v11407_v44 = vunpack.i.h.bf16 %v16800_v0 }
 0x996   : > { %11699 = vrot.lane.b32.xlu1 %v11698_v26, %s11958_s15  ;;  %v7254_v58 = vmax.f32 %v7222_v54, 0.0  ;;  %v7331_v21 = vrot.slane %v16817_v8, 7  ;;  %v11406_v54 = vunpack.i.l.bf16 %v16800_v0 }
 0x997   : > { %11694 = vrot.lane.b32.xlu0 %v11698_v26, %s17655_s20  ;;  %v9565_v39 = vpop.f32.mrf.mxu0  ;;  %v8246_v26 = vsel %vm1981_vm7, %v8214_v20, %v11377_v53  ;;  %v11397_v20 = vunpack.i.h.bf16 %v16765_v1 }
 0x998   : > { %v11420_v28 = vpop.permute.xlu1 %11419  ;;  %v7189_v9 = vmul.f32 %v9565_v39, %v16163_v22  ;;  %v7330_v36 = vrot.slane %v7254_v58, 7  ;;  %v11713_v7 = vpack.i.bf16 %v16817_v8, %v7254_v58 }
 0x999   : > { %v11415_v17 = vpop.permute.xlu0 %11414  ;;  %v7145_v51 = vpop.f32.mrf.mxu0  ;;  %v11422_v1 = vunpack.i.h.bf16 %v11420_v28 }
 0x99a   : > { %v11416_v29 = vunpack.i.l.bf16 %v11415_v17  ;;  %11704 = vrot.lane.b32.xlu1 %v11703_v45, %s11959_s16  ;;  %v7188_v12 = vmul.f32 %v16163_v22, %v7145_v51  ;;  %v11417_v55 = vunpack.i.h.bf16 %v11415_v17  ;;  %v7225_v35 = vadd.f32 %v16171_v41, %v7189_v9 }
 0x99b   : > { %11709 = vrot.lane.b32.xlu0 %v11703_v45, %s11954_s8  ;;  %v16849_v39 = vsel %vm994_vm3, %v7330_v36, %v7331_v21  ;;  %v16852_v53 = vsel %vm994_vm3, 0.0, %v7330_v36  ;;  %v11421_v45 = vunpack.i.l.bf16 %v11420_v28  ;;  %v8278_v17 = vsel %vm2014_vm8, %v8246_v26, %v11392_v18 }
 0x99c   : > { %v16841_v32 = vpop.permute.xlu1 %11424  ;;  %v8309_v34 = vsel %vm2047_vm9, %v8277_v40, %v11416_v29  ;;  %v7224_v25 = vadd.f32 %v16171_v41, %v7188_v12  ;;  %v8310_v51 = vsel %vm2047_vm9, %v8278_v17, %v11417_v55  ;;  %v7421_v29 = vrot.slane %v16817_v8, 1 }
 0x99d   : > { %v16846_v22 = vpop.permute.xlu0 %11429  ;;  %v8341_v9 = vsel %vm2080_vm10, %v8309_v34, %v11406_v54  ;;  %v16864_v40 = vmax.f32 %v7225_v35, 0.0  ;;  %v11733_v0 = vpack.i.bf16 %v16849_v39, %v16852_v53  ;;  %v7420_v18 = vrot.slane %v7254_v58, 1 }
 0x99e   : > { %11714 = vrot.lane.b32.xlu1 %v11713_v7, %s17654_s17  ;;  %v16859_v41 = vmax.f32 %v7224_v25, 0.0  ;;  %8530 = vmatmul.mubr.f32.gmra.mxu0 %v8341_v9  ;;  %v8154_v12 = vsel %vm1882_vm4, %v16364_v23, %v11367_v49  ;;  %v8183_v26 = vsel %vm1915_vm5, %v8153_v2, %v11396_v24  ;;  %v8342_v21 = vsel %vm2080_vm10, %v8310_v51, %v11407_v44 }
 0x99f   : > { %11719 = vrot.lane.b32.xlu0 %v11713_v7, %s11956_s22  ;;  %9198 = vmatprep.mubr.msk.f32.mxu0 %vm1882_vm4, %v16407_v42  ;;  %v8184_v8 = vsel %vm1915_vm5, %v8154_v12, %v11397_v20  ;;  %v8215_v28 = vsel %vm1948_vm6, %v8183_v26, %v11421_v45  ;;  %v16882_v42 = vsel %vm1090_vm2, %v7420_v18, %v7421_v29  ;;  %v11411_v58 = vunpack.i.l.bf16 %v16806_v46 }
 0x9a0   : > { %v16868_v36 = vpop.permute.xlu1 %11434  ;;  %v11426_v54 = vunpack.i.l.bf16 %v16841_v32  ;;  %v16888_v23 = vsel %vm1090_vm2, %v7421_v29, 0.0  ;;  %v7455_v49 = vrot.slane %v16859_v41, 7  ;;  %v11412_v2 = vunpack.i.h.bf16 %v16806_v46 }
 0x9a1   : > { %v16875_v55 = vpop.permute.xlu0 %11444  ;;  %v7456_v24 = vrot.slane %v16864_v40, 7  ;;  %v8216_v35 = vsel %vm1948_vm6, %v8184_v8, %v11422_v1  ;;  %v11738_v25 = vpack.i.bf16 %v16888_v23, %v16882_v42  ;;  %v11427_v20 = vunpack.i.h.bf16 %v16841_v32 }
 0x9a2   : > { %11734 = vrot.lane.b32.xlu1 %v11733_v0, %s11958_s15  ;;  %8535 = vmatmul.mubr.f32.gmra.mxu0 %v8342_v21  ;;  %v8247_v17 = vsel %vm1981_vm7, %v8215_v28, %v11411_v58  ;;  %v7459_v29 = vsel %vm994_vm3, 0.0, %v7455_v49  ;;  %v8248_v32 = vsel %vm1981_vm7, %v8216_v35, %v11412_v2  ;;  %v11748_v58 = vpack.i.bf16 %v16864_v40, %v16859_v41 }
 0x9a3   : > { %11724 = vrot.lane.b32.xlu0 %v11733_v0, %s17655_s20  ;;  %9199 = vmatprep.mubr.msk.f32.mxu0 %vm1882_vm4, %v16427_v59  ;;  %v7457_v46 = vsel %vm994_vm3, %v7455_v49, %v7456_v24  ;;  %v8279_v59 = vsel %vm2014_vm8, %v8247_v17, %v11426_v54  ;;  %v8280_v28 = vsel %vm2014_vm8, %v8248_v32, %v11427_v20  ;;  %v11401_v54 = vunpack.i.l.bf16 %v16779_v19 }
 0x9a4   : > { %v11440_v34 = vpop.permute.xlu1 %11439  ;;  %v11753_v8 = vpack.i.bf16 %v7457_v46, %v7459_v29  ;;  %v11431_v24 = vunpack.i.l.bf16 %v16846_v22  ;;  %v7460_v35 = vrot.slane %v16859_v41, 1 }
 0x9a5   : > { %v11441_v45 = vunpack.i.l.bf16 %v11440_v34  ;;  %v11450_v9 = vpop.permute.xlu0 %11449  ;;  %v11442_v18 = vunpack.i.h.bf16 %v11440_v34  ;;  %v11402_v34 = vunpack.i.h.bf16 %v16779_v19 }
 0x9a6   : > { %v11452_v44 = vunpack.i.h.bf16 %v11450_v9  ;;  %v11451_v51 = vunpack.i.l.bf16 %v11450_v9  ;;  %11739 = vrot.lane.b32.xlu1 %v11738_v25, %s11959_s16  ;;  %v8155_v9 = vsel %vm1882_vm4, %v16393_v30, %v11401_v54 }
 0x9a7   : > { %11729 = vrot.lane.b32.xlu0 %v11713_v7, %s11957_s23 }
 0x9a8   : > { %v11455_v1 = vpop.permute.xlu1 %11454  ;;  %v8311_v0 = vsel %vm2047_vm9, %v8279_v59, %v11451_v51  ;;  %v8312_v7 = vsel %vm2047_vm9, %v8280_v28, %v11452_v44  ;;  %v8185_v51 = vsel %vm1915_vm5, %v8155_v9, %v11431_v24  ;;  %v11446_v59 = vunpack.i.l.bf16 %v16875_v55 }
 0x9a9   : > { %v16907_v12 = vpop.permute.xlu0 %11464  ;;  %v8343_v26 = vsel %vm2080_vm10, %v8311_v0, %v11441_v45  ;;  %v8344_v2 = vsel %vm2080_vm10, %v8312_v7, %v11442_v18  ;;  %v7461_v45 = vrot.slane %v16864_v40, 1  ;;  %v11457_v17 = vunpack.i.h.bf16 %v11455_v1 }
 0x9aa   : > { %8540 = vmatmul.mubr.f32.gmra.mxu0 %v8343_v26  ;;  %11744 = vrot.lane.b32.xlu1 %v11738_v25, %s11954_s8  ;;  %v11432_v25 = vunpack.i.h.bf16 %v16846_v22  ;;  %v11447_v18 = vunpack.i.h.bf16 %v16875_v55  ;;  %s307_s8 = sand.u32 1, %s11940_s25  }
 0x9ab   : > { %11754 = vrot.lane.b32.xlu0 %v11753_v8, %s17655_s20  ;;  %9200 = vmatprep.mubr.msk.f32.mxu0 %vm1882_vm4, %v16433_v57  ;;  %v11456_v57 = vunpack.i.l.bf16 %v11455_v1  ;;  %v16939_v19 = vsel %vm1090_vm2, %v7460_v35, %v7461_v45 }
 0x9ac   : > { %v11460_v21 = vpop.permute.xlu1 %11459 }
 0x9ad   : > { %v16919_v49 = vpop.permute.xlu0 %11469  ;;  %v8217_v22 = vsel %vm1948_vm6, %v8185_v51, %v11456_v57  ;;  %v11437_v57 = vunpack.i.h.bf16 %v16868_v36 }
 0x9ae   : > { %8545 = vmatmul.mubr.f32.gmra.mxu0 %v8344_v2  ;;  %11749 = vrot.lane.b32.xlu1 %v11748_v58, %s17654_s17  ;;  %v8249_v26 = vsel %vm1981_vm7, %v8217_v22, %v11446_v59  ;;  %v11436_v2 = vunpack.i.l.bf16 %v16868_v36 }
 0x9af   : > { %7736 = vrot.lane.b32.xlu0 %v7459_v29, %s11958_s15  ;;  %9201 = vmatprep.mubr.msk.f32.mxu0 %vm1882_vm4, %v16456_v15  ;;  %v8156_v15 = vsel %vm1882_vm4, %v16390_v56, %v11402_v34  ;;  %v11461_v29 = vunpack.i.l.bf16 %v11460_v21  ;;  %v11466_v34 = vunpack.i.l.bf16 %v16907_v12  ;;  %v8158_v36 = vsel %vm1882_vm4, %v16415_v13, %v11437_v57 }
 0x9b0   : > { %v11475_v20 = vpop.permute.xlu1 %11474  ;;  %v8186_v30 = vsel %vm1915_vm5, %v8156_v15, %v11432_v25 }
 0x9b1   : > { %v16933_v44 = vpop.permute.xlu0 %11479  ;;  %v8218_v0 = vsel %vm1948_vm6, %v8186_v30, %v11457_v17  ;;  %v8281_v28 = vsel %vm2014_vm8, %v8249_v26, %v11461_v29  ;;  %v11476_v7 = vunpack.i.l.bf16 %v11475_v20  ;;  %v11477_v25 = vunpack.i.h.bf16 %v11475_v20 }
 0x9b2   : > { %7832 = vrot.lane.b32.xlu1 %v16859_v41, %s11956_s22  ;;  %v11462_v41 = vunpack.i.h.bf16 %v11460_v21  ;;  %v8250_v58 = vsel %vm1981_vm7, %v8218_v0, %v11447_v18  ;;  %v11467_v17 = vunpack.i.h.bf16 %v16907_v12  ;;  %v11482_v18 = vunpack.i.h.bf16 %v16933_v44 }
 0x9b3   : > { %7929 = vrot.lane.b32.xlu0 %v16939_v19, %s11959_s16 }
 0x9b4   : > { %v11490_v1 = vpop.permute.xlu1 %11489  ;;  %v8282_v55 = vsel %vm2014_vm8, %v8250_v58, %v11462_v41  ;;  %v8188_v12 = vsel %vm1915_vm5, %v8158_v36, %v11467_v17  ;;  %v17825_v36 = vld [vmem:[#allocation43_spill] sm:$0xff] }
 0x9b5   : > { %v11485_v32 = vpop.permute.xlu0 %11484  ;;  %v11491_v9 = vunpack.i.l.bf16 %v11490_v1  ;;  %v11492_v15 = vunpack.i.h.bf16 %v11490_v1 }
 0x9b6   : > { %v11487_v56 = vunpack.i.h.bf16 %v11485_v32  ;;  %v11486_v8 = vunpack.i.l.bf16 %v11485_v32  ;;  %7738 = vrot.lane.b32.xlu1 %v7457_v46, %s11958_s15  ;;  %v16963_v46 = vsel %vm1090_vm2, %v7461_v45, 0.0  ;;  %v8157_v45 = vsel %vm1882_vm4, %v16418_v16, %v11436_v2 }
 0x9b7   : > { %7834 = vrot.lane.b32.xlu0 %v16864_v40, %s11956_s22  ;;  %v8187_v30 = vsel %vm1915_vm5, %v8157_v45, %v11466_v34  ;;  %v11481_v16 = vunpack.i.l.bf16 %v16933_v44  ;;  %v8220_v1 = vsel %vm1948_vm6, %v8188_v12, %v11492_v15  ;;  %s8960_s22 = sshll.u32 %s307_s8, 8 }
 0x9b8   : > { %v11495_v54 = vpop.permute.xlu1 %11494  ;;  %v8313_v21 = vsel %vm2047_vm9, %v8281_v28, %v11486_v8  ;;  %v8314_v40 = vsel %vm2047_vm9, %v8282_v55, %v11487_v56  ;;  %v8219_v20 = vsel %vm1948_vm6, %v8187_v30, %v11491_v9  ;;  %s17238_s15 = scalar_lea.vmem [#allocation8], %s8960_s22 }
 0x9b9   : > { %v16959_v24 = vpop.permute.xlu0 %11499  ;;  %v8345_v35 = vsel %vm2080_vm10, %v8313_v21, %v11476_v7  ;;  %v8346_v29 = vsel %vm2080_vm10, %v8314_v40, %v11477_v25  ;;  %v11497_v0 = vunpack.i.h.bf16 %v11495_v54  ;;  %v8251_v13 = vsel %vm1981_vm7, %v8219_v20, %v11481_v16 }
 0x9ba   : > { %8550 = vmatmul.mubr.f32.gmra.mxu0 %v8345_v35  ;;  %7931 = vrot.lane.b32.xlu1 %v16963_v46, %s11959_s16  ;;  %v11471_v35 = vunpack.i.l.bf16 %v16919_v49  ;;  %v11501_v57 = vunpack.i.l.bf16 %v16959_v24  ;;  %v11472_v25 = vunpack.i.h.bf16 %v16919_v49  ;;  %v11502_v17 = vunpack.i.h.bf16 %v16959_v24  ;;  %s8857_s16 = sshll.u32 %s17238_s15, 4  ;;  %s17384_s16 = int_to_ptr.vmem [resolvable:$true] %s8857_s16 }
 0x9bb   : > { %9202 = vmatprep.mubr.msk.f32.mxu0 %vm1882_vm4, %v16461_v31  ;;  %v11496_v31 = vunpack.i.l.bf16 %v11495_v54  ;;  %s11880_s19 = scalar_lea.vmem %s17384_s16, 4096  ;;  %p11887_p4 = scmp.lt.s32.totalorder %s17384_s16, %s11885_s29 }
 0x9bc   : > { %v16973_v51 = vpop.permute.xlu1 %11504  ;;  %v8160_v20 = vsel %vm1882_vm4, %v17825_v36, %v11472_v25  ;;  %v17827_v25 = vld [vmem:[#allocation45_spill] sm:$0xff]  ;;  %p11881_p12 = scmp.ne.s32.totalorder %s17384_s16, %s11880_s19  ;;  %p11888_p5 = scmp.lt.s32.totalorder %s11886_s14, %s11880_s19 }
 0x9bd   : > { %v11515_v22 = vpop.permute.xlu0 %11514  ;;  %v8283_v8 = vsel %vm2014_vm8, %v8251_v13, %v11496_v31  ;;  %v8190_v12 = vsel %vm1915_vm5, %v8160_v20, %v11502_v17 }
 0x9be   : > { %8555 = vmatmul.mubr.f32.gmra.mxu0 %v8346_v29  ;;  %v11516_v16 = vunpack.i.l.bf16 %v11515_v22  ;;  %p11882_p9 = pnand %p11881_p12, %p17868_p2  ;;  %p11889_p6 = por %p11888_p5, %p11887_p4 }
 0x9bf   : > { %9203 = vmatprep.mubr.msk.f32.mxu0 %vm1882_vm4, %v16484_v11  ;;  %v8252_v11 = vsel %vm1981_vm7, %v8220_v1, %v11482_v18 }
 0x9c0   : > { %v11510_v59 = vpop.permute.xlu1 %11509  ;;  %v8284_v58 = vsel %vm2014_vm8, %v8252_v11, %v11497_v0  ;;  %v11517_v0 = vunpack.i.h.bf16 %v11515_v22  ;;  %v11506_v11 = vunpack.i.l.bf16 %v16973_v51  ;;  %p11883_p3 = pneg %p11882_p9 }
 0x9c1   : > { %v11511_v41 = vunpack.i.l.bf16 %v11510_v59  ;;  %v11520_v32 = vpop.permute.xlu0 %11519  ;;  %v11512_v21 = vunpack.i.h.bf16 %v11510_v59 }
 0x9c2   : > { %v11522_v26 = vunpack.i.h.bf16 %v11520_v32  ;;  %v11521_v56 = vunpack.i.l.bf16 %v11520_v32  ;;  %p11890_p10 = pnand %p11889_p6, %p11883_p3 }
 0x9c4   : > { %v11525_v28 = vpop.permute.xlu1 %11524  ;;  %v8315_v7 = vsel %vm2047_vm9, %v8283_v8, %v11521_v56  ;;  %v8316_v44 = vsel %vm2047_vm9, %v8284_v58, %v11522_v26 }
 0x9c5   : > { %v16993_v2 = vpop.permute.xlu0 %11534  ;;  %v8347_v54 = vsel %vm2080_vm10, %v8315_v7, %v11511_v41  ;;  %v8348_v40 = vsel %vm2080_vm10, %v8316_v44, %v11512_v21  ;;  %v11526_v9 = vunpack.i.l.bf16 %v11525_v28  ;;  %v11527_v15 = vunpack.i.h.bf16 %v11525_v28 }
 0x9c6   : > { %8560 = vmatmul.mubr.f32.gmra.mxu0 %v8347_v54  ;;  %v11536_v58 = vunpack.i.l.bf16 %v16993_v2  ;;  %v11507_v54 = vunpack.i.h.bf16 %v16973_v51  ;;  %v17828_v51 = vld [vmem:[#allocation44_spill] sm:$0xff] }
 0x9c7   : > { %9204 = vmatprep.mubr.msk.f32.mxu0 %vm1882_vm4, %v16491_v48  ;;  %v8159_v48 = vsel %vm1882_vm4, %v16447_v47, %v11471_v35  ;;  %v8222_v24 = vsel %vm1948_vm6, %v8190_v12, %v11527_v15  ;;  %v17826_v35 = vld [vmem:[#allocation48_spill] sm:$0xff] }
 0x9c8   : > { %v11530_v55 = vpop.permute.xlu1 %11529  ;;  %v8189_v30 = vsel %vm1915_vm5, %v8159_v48, %v11501_v57  ;;  %v8254_v26 = vsel %vm1981_vm7, %v8222_v24, %v11517_v0 }
 0x9c9   : > { %v17000_v34 = vpop.permute.xlu0 %11539  ;;  %v8221_v31 = vsel %vm1948_vm6, %v8189_v30, %v11526_v9  ;;  %v11531_v49 = vunpack.i.l.bf16 %v11530_v55  ;;  %v11532_v59 = vunpack.i.h.bf16 %v11530_v55  ;;  %v8161_v9 = vsel %vm1882_vm4, %v17827_v25, %v11506_v11 }
 0x9ca   : > { %8565 = vmatmul.mubr.f32.gmra.mxu0 %v8348_v40  ;;  %v8253_v47 = vsel %vm1981_vm7, %v8221_v31, %v11516_v16  ;;  %v11537_v40 = vunpack.i.h.bf16 %v16993_v2  ;;  %v8191_v30 = vsel %vm1915_vm5, %v8161_v9, %v11536_v58 }
 0x9cb   : > { %9205 = vmatprep.mubr.msk.f32.mxu0 %vm1882_vm4, %v16524_v10  ;;  %v8285_v18 = vsel %vm2014_vm8, %v8253_v47, %v11531_v49  ;;  %v8286_v28 = vsel %vm2014_vm8, %v8254_v26, %v11532_v59 }
 0x9cc   : > { %v11545_v45 = vpop.permute.xlu1 %11544 }
 0x9cd   : > { %v11550_v29 = vpop.permute.xlu0 %11549  ;;  %v11546_v13 = vunpack.i.l.bf16 %v11545_v45  ;;  %v11547_v44 = vunpack.i.h.bf16 %v11545_v45  ;;  %v8162_v45 = vsel %vm1882_vm4, %v17828_v51, %v11507_v54  ;;  %v11542_v54 = vunpack.i.h.bf16 %v17000_v34 }
 0x9ce   : > { %v8192_v2 = vsel %vm1915_vm5, %v8162_v45, %v11537_v40  ;;  %v11551_v31 = vunpack.i.l.bf16 %v11550_v29  ;;  %v11552_v59 = vunpack.i.h.bf16 %v11550_v29 }
 0x9d0   : > { %v11560_v10 = vpop.permute.xlu1 %11559 }
 0x9d1   : > { %v11555_v1 = vpop.permute.xlu0 %11554  ;;  %v11561_v55 = vunpack.i.l.bf16 %v11560_v10  ;;  %v11562_v17 = vunpack.i.h.bf16 %v11560_v10 }
 0x9d2   : > { %v11557_v41 = vunpack.i.h.bf16 %v11555_v1  ;;  %v11556_v32 = vunpack.i.l.bf16 %v11555_v1 }
 0x9d3   : > { %v8223_v36 = vsel %vm1948_vm6, %v8191_v30, %v11561_v55  ;;  %v8224_v12 = vsel %vm1948_vm6, %v8192_v2, %v11562_v17 }
 0x9d4   : > { %v11565_v56 = vpop.permute.xlu1 %11564  ;;  %v8317_v8 = vsel %vm2047_vm9, %v8285_v18, %v11556_v32  ;;  %v8318_v21 = vsel %vm2047_vm9, %v8286_v28, %v11557_v41  ;;  %v8255_v1 = vsel %vm1981_vm7, %v8223_v36, %v11551_v31  ;;  %v8256_v32 = vsel %vm1981_vm7, %v8224_v12, %v11552_v59 }
 0x9d5   : > { %v17022_v7 = vpop.permute.xlu0 %11569  ;;  %v8349_v22 = vsel %vm2080_vm10, %v8317_v8, %v11546_v13  ;;  %v8350_v15 = vsel %vm2080_vm10, %v8318_v21, %v11547_v44  ;;  %v11566_v20 = vunpack.i.l.bf16 %v11565_v56  ;;  %v11567_v16 = vunpack.i.h.bf16 %v11565_v56 }
 0x9d6   : > { %8570 = vmatmul.mubr.f32.gmra.mxu0 %v8349_v22  ;;  %v11541_v28 = vunpack.i.l.bf16 %v17000_v34  ;;  %v11571_v21 = vunpack.i.l.bf16 %v17022_v7  ;;  %v11572_v55 = vunpack.i.h.bf16 %v17022_v7 }
 0x9d7   : > { %9206 = vmatprep.mubr.msk.f32.mxu0 %vm1882_vm4, %v17826_v35  ;;  %v8287_v41 = vsel %vm2014_vm8, %v8255_v1, %v11566_v20  ;;  %v8288_v13 = vsel %vm2014_vm8, %v8256_v32, %v11567_v16 }
 0x9d8   : > { %v17031_v57 = vpop.permute.xlu1 %11574 }
 0x9d9   : > { %v11585_v48 = vpop.permute.xlu0 %11584 }
 0x9da   : > { %8575 = vmatmul.mubr.f32.gmra.mxu0 %v8350_v15  ;;  %v17830_v15 = vld [vmem:[#allocation46_spill] sm:$0xff]  ;;  %v11586_v36 = vunpack.i.l.bf16 %v11585_v48  ;;  %v11587_v31 = vunpack.i.h.bf16 %v11585_v48 }
 0x9db   : > { %9207 = vmatprep.mubr.msk.f32.mxu0 %vm1882_vm4, %v16591_v27  ;;  %v8164_v30 = vsel %vm1882_vm4, %v17830_v15, %v11542_v54 }
 0x9dc   : > { %v11580_v49 = vpop.permute.xlu1 %11579  ;;  %v8194_v45 = vsel %vm1915_vm5, %v8164_v30, %v11572_v55 }
 0x9dd   : > { %v11581_v10 = vunpack.i.l.bf16 %v11580_v49  ;;  %v11590_v24 = vpop.permute.xlu0 %11589  ;;  %v11582_v26 = vunpack.i.h.bf16 %v11580_v49 }
 0x9de   : > { %v11592_v0 = vunpack.i.h.bf16 %v11590_v24  ;;  %v11591_v47 = vunpack.i.l.bf16 %v11590_v24 }
 0x9e0   : > { %v11595_v18 = vpop.permute.xlu1 %11594  ;;  %v8319_v27 = vsel %vm2047_vm9, %v8287_v41, %v11591_v47  ;;  %v8320_v29 = vsel %vm2047_vm9, %v8288_v13, %v11592_v0  ;;  %v11576_v47 = vunpack.i.l.bf16 %v17031_v57  ;;  %v11577_v13 = vunpack.i.h.bf16 %v17031_v57 }
 0x9e1   : > { %v17049_v8 = vpop.permute.xlu0 %11604  ;;  %v8351_v56 = vsel %vm2080_vm10, %v8319_v27, %v11581_v10  ;;  %v8352_v58 = vsel %vm2080_vm10, %v8320_v29, %v11582_v26  ;;  %v11596_v44 = vunpack.i.l.bf16 %v11595_v18  ;;  %v11597_v25 = vunpack.i.h.bf16 %v11595_v18 }
 0x9e2   : > { %8580 = vmatmul.mubr.f32.gmra.mxu0 %v8351_v56  ;;  %v11606_v18 = vunpack.i.l.bf16 %v17049_v8  ;;  %v11607_v29 = vunpack.i.h.bf16 %v17049_v8  ;;  %v8166_v57 = vsel %vm1882_vm4, %v16564_v43, %v11577_v13 }
 0x9e3   : > { %9208 = vmatprep.mubr.msk.f32.mxu0 %vm1882_vm4, %v16606_v62  ;;  %v17829_v62 = vld [vmem:[#allocation47_spill] sm:$0xff]  ;;  %v8226_v7 = vsel %vm1948_vm6, %v8194_v45, %v11597_v25 }
 0x9e4   : > { %v11600_v11 = vpop.permute.xlu1 %11599  ;;  %v8163_v40 = vsel %vm1882_vm4, %v17829_v62, %v11541_v28  ;;  %v8258_v59 = vsel %vm1981_vm7, %v8226_v7, %v11587_v31  ;;  %v8165_v28 = vsel %vm1882_vm4, %v16567_v33, %v11576_v47  ;;  %v8196_v8 = vsel %vm1915_vm5, %v8166_v57, %v11607_v29 }
 0x9e5   : > { %v17056_v22 = vpop.permute.xlu0 %11609  ;;  %v8193_v17 = vsel %vm1915_vm5, %v8163_v40, %v11571_v21  ;;  %v11601_v34 = vunpack.i.l.bf16 %v11600_v11  ;;  %v11602_v20 = vunpack.i.h.bf16 %v11600_v11 }
 0x9e6   : > { %8585 = vmatmul.mubr.f32.gmra.mxu0 %v8352_v58  ;;  %v8225_v51 = vsel %vm1948_vm6, %v8193_v17, %v11596_v44  ;;  %v8195_v44 = vsel %vm1915_vm5, %v8165_v28, %v11606_v18 }
 0x9e7   : > { %9209 = vmatprep.mubr.msk.f32.mxu0 %vm1882_vm4, %v16661_v37  ;;  %v8257_v49 = vsel %vm1981_vm7, %v8225_v51, %v11586_v36  ;;  %v8290_v41 = vsel %vm2014_vm8, %v8258_v59, %v11602_v20 }
 0x9e8   : > { %v11615_v35 = vpop.permute.xlu1 %11614  ;;  %v8289_v10 = vsel %vm2014_vm8, %v8257_v49, %v11601_v34  ;;  %v11611_v49 = vunpack.i.l.bf16 %v17056_v22 }
 0x9e9   : > { %v11620_v9 = vpop.permute.xlu0 %11619  ;;  %v11616_v24 = vunpack.i.l.bf16 %v11615_v35  ;;  %v11617_v26 = vunpack.i.h.bf16 %v11615_v35 }
 0x9ea   : > { %v11621_v35 = vunpack.i.l.bf16 %v11620_v9  ;;  %v11622_v15 = vunpack.i.h.bf16 %v11620_v9 }
 0x9ec   : > { %v11630_v37 = vpop.permute.xlu1 %11629 }
 0x9ed   : > { %v11625_v2 = vpop.permute.xlu0 %11624  ;;  %v11631_v56 = vunpack.i.l.bf16 %v11630_v37  ;;  %v11632_v58 = vunpack.i.h.bf16 %v11630_v37 }
 0x9ee   : > { %v11627_v12 = vunpack.i.h.bf16 %v11625_v2  ;;  %v11626_v16 = vunpack.i.l.bf16 %v11625_v2 }
 0x9ef   : > { %v8227_v55 = vsel %vm1948_vm6, %v8195_v44, %v11631_v56  ;;  %v8228_v62 = vsel %vm1948_vm6, %v8196_v8, %v11632_v58 }
 0x9f0   : > { %v11635_v1 = vpop.permute.xlu1 %11634  ;;  %v8321_v0 = vsel %vm2047_vm9, %v8289_v10, %v11626_v16  ;;  %v8322_v27 = vsel %vm2047_vm9, %v8290_v41, %v11627_v12  ;;  %v8259_v30 = vsel %vm1981_vm7, %v8227_v55, %v11621_v35  ;;  %v8260_v45 = vsel %vm1981_vm7, %v8228_v62, %v11622_v15 }
 0x9f1   : > { %v17078_v32 = vpop.permute.xlu0 %11639  ;;  %v8353_v48 = vsel %vm2080_vm10, %v8321_v0, %v11616_v24  ;;  %v8354_v54 = vsel %vm2080_vm10, %v8322_v27, %v11617_v26  ;;  %v11637_v40 = vunpack.i.h.bf16 %v11635_v1  ;;  %v11612_v24 = vunpack.i.h.bf16 %v17056_v22 }
 0x9f2   : > { %8590 = vmatmul.mubr.f32.gmra.mxu0 %v8353_v48  ;;  %v11641_v10 = vunpack.i.l.bf16 %v17078_v32 }
 0x9f3   : > { %9210 = vmatprep.mubr.msk.f32.mxu0 %vm1882_vm4, %v16676_v5  ;;  %v11636_v5 = vunpack.i.l.bf16 %v11635_v1  ;;  %v8292_v37 = vsel %vm2014_vm8, %v8260_v45, %v11637_v40  ;;  %v11642_v1 = vunpack.i.h.bf16 %v17078_v32  ;;  %v8168_v18 = vsel %vm1882_vm4, %v16637_v50, %v11612_v24 }
 0x9f4   : > { %v17087_v11 = vpop.permute.xlu1 %11644 }
 0x9f5   : > { %v11655_v21 = vpop.permute.xlu0 %11654  ;;  %v8291_v34 = vsel %vm2014_vm8, %v8259_v30, %v11636_v5  ;;  %v8198_v13 = vsel %vm1915_vm5, %v8168_v18, %v11642_v1  ;;  %v11646_v8 = vunpack.i.l.bf16 %v17087_v11 }
 0x9f6   : > { %8595 = vmatmul.mubr.f32.gmra.mxu0 %v8354_v54  ;;  %v11656_v26 = vunpack.i.l.bf16 %v11655_v21  ;;  %v11657_v28 = vunpack.i.h.bf16 %v11655_v21 }
 0x9f7   : > { %9211 = vmatprep.mubr.msk.f32.mxu0 %vm1882_vm4, %v16742_v38 }
 0x9f8   : > { %v11650_v33 = vpop.permute.xlu1 %11649 }
 0x9f9   : > { %v11651_v25 = vunpack.i.l.bf16 %v11650_v33  ;;  %v11660_v17 = vpop.permute.xlu0 %11659  ;;  %v11652_v7 = vunpack.i.h.bf16 %v11650_v33 }
 0x9fa   : > { %v11662_v51 = vunpack.i.h.bf16 %v11660_v17  ;;  %v11661_v43 = vunpack.i.l.bf16 %v11660_v17 }
 0x9fc   : > { %v11665_v36 = vpop.permute.xlu1 %11664  ;;  %v8323_v38 = vsel %vm2047_vm9, %v8291_v34, %v11661_v43  ;;  %v8324_v9 = vsel %vm2047_vm9, %v8292_v37, %v11662_v51  ;;  %v8169_v43 = vsel %vm1882_vm4, %v16713_v52, %v11646_v8 }
 0x9fd   : > { %v17105_v20 = vpop.permute.xlu0 %11674  ;;  %v8355_v2 = vsel %vm2080_vm10, %v8323_v38, %v11651_v25  ;;  %v8356_v16 = vsel %vm2080_vm10, %v8324_v9, %v11652_v7  ;;  %v11666_v59 = vunpack.i.l.bf16 %v11665_v36  ;;  %v11667_v47 = vunpack.i.h.bf16 %v11665_v36 }
 0x9fe   : > { %8600 = vmatmul.mubr.f32.gmra.mxu0 %v8355_v2  ;;  %v11676_v62 = vunpack.i.l.bf16 %v17105_v20  ;;  %v11647_v25 = vunpack.i.h.bf16 %v17087_v11  ;;  %v11677_v30 = vunpack.i.h.bf16 %v17105_v20 }
 0x9ff   : > { %9212 = vmatprep.mubr.msk.f32.mxu0 %vm1882_vm4, %v16754_v60  ;;  %v8167_v60 = vsel %vm1882_vm4, %v16640_v61, %v11611_v49  ;;  %v8230_v32 = vsel %vm1948_vm6, %v8198_v13, %v11667_v47 }
 0xa00   : > { %v11670_v31 = vpop.permute.xlu1 %11669  ;;  %v8197_v48 = vsel %vm1915_vm5, %v8167_v60, %v11641_v10  ;;  %v8262_v50 = vsel %vm1981_vm7, %v8230_v32, %v11657_v28  ;;  %v8199_v38 = vsel %vm1915_vm5, %v8169_v43, %v11676_v62  ;;  %v8170_v11 = vsel %vm1882_vm4, %v16710_v6, %v11647_v25 }
 0xa01   : > { %v17112_v12 = vpop.permute.xlu0 %11679  ;;  %v8229_v27 = vsel %vm1948_vm6, %v8197_v48, %v11666_v59  ;;  %v11671_v22 = vunpack.i.l.bf16 %v11670_v31  ;;  %v11672_v56 = vunpack.i.h.bf16 %v11670_v31  ;;  %v8200_v7 = vsel %vm1915_vm5, %v8170_v11, %v11677_v30 }
 0xa02   : > { %8605 = vmatmul.mubr.f32.gmra.mxu0 %v8356_v16  ;;  %v8261_v61 = vsel %vm1981_vm7, %v8229_v27, %v11656_v26  ;;  %v11681_v6 = vunpack.i.l.bf16 %v17112_v12 }
 0xa03   : > { %9213 = vmatprep.mubr.msk.f32.mxu0 %vm1882_vm4, %v16809_v14  ;;  %v8293_v44 = vsel %vm2014_vm8, %v8261_v61, %v11671_v22  ;;  %v8294_v35 = vsel %vm2014_vm8, %v8262_v50, %v11672_v56  ;;  %v11682_v22 = vunpack.i.h.bf16 %v17112_v12 }
 0xa04   : > { %v11685_v0 = vpop.permute.xlu1 %11684  ;;  %v8171_v26 = vsel %vm1882_vm4, %v16786_v63, %v11681_v6  ;;  %v17832_v6 = vld [vmem:[#allocation13_spill] sm:$0xff] }
 0xa05   : > { %v11690_v41 = vpop.permute.xlu0 %11689  ;;  %v11686_v57 = vunpack.i.l.bf16 %v11685_v0  ;;  %v11687_v17 = vunpack.i.h.bf16 %v11685_v0  ;;  %v8172_v63 = vsel %vm1882_vm4, %v16783_v3, %v11682_v22 }
 0xa06   : > { %v11691_v52 = vunpack.i.l.bf16 %v11690_v41  ;;  %v11692_v49 = vunpack.i.h.bf16 %v11690_v41 }
 0xa08   : > { %v11700_v14 = vpop.permute.xlu1 %11699 }
 0xa09   : > { %v11695_v29 = vpop.permute.xlu0 %11694  ;;  %v11701_v15 = vunpack.i.l.bf16 %v11700_v14  ;;  %v11702_v34 = vunpack.i.h.bf16 %v11700_v14 }
 0xa0a   : > { %v11697_v58 = vunpack.i.h.bf16 %v11695_v29  ;;  %v11696_v54 = vunpack.i.l.bf16 %v11695_v29 }
 0xa0b   : > { %v8231_v37 = vsel %vm1948_vm6, %v8199_v38, %v11701_v15  ;;  %v8232_v2 = vsel %vm1948_vm6, %v8200_v7, %v11702_v34 }
 0xa0c   : > { %v11705_v55 = vpop.permute.xlu1 %11704  ;;  %v8325_v5 = vsel %vm2047_vm9, %v8293_v44, %v11696_v54  ;;  %v8326_v40 = vsel %vm2047_vm9, %v8294_v35, %v11697_v58  ;;  %v8263_v16 = vsel %vm1981_vm7, %v8231_v37, %v11691_v52 }
 0xa0d   : > { %v17134_v33 = vpop.permute.xlu0 %11709  ;;  %v8357_v21 = vsel %vm2080_vm10, %v8325_v5, %v11686_v57  ;;  %v8358_v36 = vsel %vm2080_vm10, %v8326_v40, %v11687_v17  ;;  %v11707_v9 = vunpack.i.h.bf16 %v11705_v55 }
 0xa0e   : > { %8610 = vmatmul.mubr.f32.gmra.mxu0 %v8357_v21  ;;  %v11711_v0 = vunpack.i.l.bf16 %v17134_v33  ;;  %v11712_v14 = vunpack.i.h.bf16 %v17134_v33 }
 0xa0f   : > { %9214 = vmatprep.mubr.msk.f32.mxu0 %vm1882_vm4, %v16821_v4  ;;  %v11706_v4 = vunpack.i.l.bf16 %v11705_v55 }
 0xa10   : > { %v11715_v51 = vpop.permute.xlu1 %11714  ;;  %v8201_v56 = vsel %vm1915_vm5, %v8171_v26, %v11711_v0 }
 0xa11   : > { %v17145_v45 = vpop.permute.xlu0 %11719  ;;  %v8295_v59 = vsel %vm2014_vm8, %v8263_v16, %v11706_v4  ;;  %v11716_v1 = vunpack.i.l.bf16 %v11715_v51  ;;  %v11717_v32 = vunpack.i.h.bf16 %v11715_v51 }
 0xa12   : > { %8615 = vmatmul.mubr.f32.gmra.mxu0 %v8358_v36  ;;  %v11721_v50 = vunpack.i.l.bf16 %v17145_v45  ;;  %v11722_v17 = vunpack.i.h.bf16 %v17145_v45 }
 0xa13   : > { %9215 = vmatprep.mubr.msk.f32.mxu0 %vm1882_vm4, %v16882_v42  ;;  %v8264_v42 = vsel %vm1981_vm7, %v8232_v2, %v11692_v49 }
 0xa14   : > { %v11735_v20 = vpop.permute.xlu1 %11734  ;;  %v8296_v48 = vsel %vm2014_vm8, %v8264_v42, %v11707_v9  ;;  %v17831_v9 = vld [vmem:[#allocation17_spill] sm:$0xff] }
 0xa15   : > { %v11725_v31 = vpop.permute.xlu0 %11724  ;;  %v11736_v18 = vunpack.i.l.bf16 %v11735_v20  ;;  %v11737_v29 = vunpack.i.h.bf16 %v11735_v20 }
 0xa16   : > { %v11727_v10 = vunpack.i.h.bf16 %v11725_v31  ;;  %v11726_v24 = vunpack.i.l.bf16 %v11725_v31 }
 0xa17   : > { %v8233_v58 = vsel %vm1948_vm6, %v8201_v56, %v11736_v18  ;;  %v17835_v18 = vld [vmem:[#allocation23_spill] sm:$0xff] }
 0xa18   : > { %v11740_v60 = vpop.permute.xlu1 %11739  ;;  %v8327_v47 = vsel %vm2047_vm9, %v8295_v59, %v11726_v24  ;;  %v8328_v13 = vsel %vm2047_vm9, %v8296_v48, %v11727_v10  ;;  %v8265_v8 = vsel %vm1981_vm7, %v8233_v58, %v11721_v50  ;;  %v17834_v48 = vld [vmem:[#allocation14_spill] sm:$0xff] }
 0xa19   : > { %v11730_v41 = vpop.permute.xlu0 %11729  ;;  %v8359_v27 = vsel %vm2080_vm10, %v8327_v47, %v11716_v1  ;;  %v11741_v12 = vunpack.i.l.bf16 %v11740_v60  ;;  %v8360_v57 = vsel %vm2080_vm10, %v8328_v13, %v11717_v32  ;;  %v11742_v21 = vunpack.i.h.bf16 %v11740_v60 }
 0xa1a   : > { %8620 = vmatmul.mubr.f32.gmra.mxu0 %v8359_v27  ;;  %v11731_v28 = vunpack.i.l.bf16 %v11730_v41  ;;  %v11732_v30 = vunpack.i.h.bf16 %v11730_v41 }
 0xa1b   : > { %9216 = vmatprep.mubr.msk.f32.mxu0 %vm1882_vm4, %v16888_v23  ;;  %v8202_v23 = vsel %vm1915_vm5, %v8172_v63, %v11712_v14  ;;  %v8297_v3 = vsel %vm2014_vm8, %v8265_v8, %v11741_v12 }
 0xa1c   : > { %v11745_v61 = vpop.permute.xlu1 %11744  ;;  %v8234_v5 = vsel %vm1948_vm6, %v8202_v23, %v11737_v29  ;;  %v8173_v33 = vsel %vm1882_vm4, %v16852_v53, %v11731_v28  ;;  %v8174_v20 = vsel %vm1882_vm4, %v16849_v39, %v11732_v30  ;;  %v17833_v39 = vld [vmem:[#allocation22_spill] sm:$0xff] }
 0xa1d   : > { %v11746_v54 = vunpack.i.l.bf16 %v11745_v61  ;;  %v11755_v44 = vpop.permute.xlu0 %11754  ;;  %v8266_v34 = vsel %vm1981_vm7, %v8234_v5, %v11722_v17  ;;  %v11747_v36 = vunpack.i.h.bf16 %v11745_v61 }
 0xa1e   : > { %v11756_v55 = vunpack.i.l.bf16 %v11755_v44  ;;  %8625 = vmatmul.mubr.f32.gmra.mxu0 %v8360_v57  ;;  %v11757_v15 = vunpack.i.h.bf16 %v11755_v44  ;;  %v8298_v11 = vsel %vm2014_vm8, %v8266_v34, %v11742_v21 }
 0xa1f   : > { %9217 = vmatprep.mubr.msk.f32.mxu0 %vm1882_vm4, %v16939_v19  ;;  %v8203_v25 = vsel %vm1915_vm5, %v8173_v33, %v11746_v54  ;;  %v8204_v10 = vsel %vm1915_vm5, %v8174_v20, %v11747_v36 }
 0xa20   : > { %v11750_v35 = vpop.permute.xlu1 %11749  ;;  %v8329_v19 = vsel %vm2047_vm9, %v8297_v3, %v11756_v55  ;;  %v8330_v52 = vsel %vm2047_vm9, %v8298_v11, %v11757_v15 }
 0xa21   : > { %v11751_v62 = vunpack.i.l.bf16 %v11750_v35  ;;  %v7737_v40 = vpop.permute.xlu0 %7736  ;;  %v11752_v51 = vunpack.i.h.bf16 %v11750_v35 }
 0xa22   : > { %v8235_v53 = vsel %vm1948_vm6, %v8203_v25, %v7737_v40 }
 0xa23   : > { %v8361_v43 = vsel %vm2080_vm10, %v8329_v19, %v11751_v62  ;;  %v8362_v2 = vsel %vm2080_vm10, %v8330_v52, %v11752_v51  ;;  %v17836_v51 = vld [vmem:[#allocation56_spill] sm:$0xff] }
 0xa24   : > { %v7833_v38 = vpop.permute.xlu1 %7832  ;;  %8630 = vmatmul.mubr.f32.gmra.mxu0 %v8361_v43 }
 0xa25   : > { %v8267_v37 = vsel %vm1981_vm7, %v8235_v53, %v7833_v38  ;;  %v7930_v4 = vpop.permute.xlu0 %7929  ;;  %9218 = vmatprep.mubr.msk.f32.mxu0 %vm1882_vm4, %v16963_v46  ;;  %v17837_v38 = vld [vmem:[#allocation51_spill] sm:$0xff] }
 0xa26   : > { %v8299_v45 = vsel %vm2014_vm8, %v8267_v37, %v7930_v4  ;;  %v8491_v7 = vpop.f32.mrf.mxu0 }
 0xa27   : > { %8682 = vrot.lane.b32.xlu0 %v8491_v7, %s11957_s23  ;;  %v8331_v31 = vsel %vm2047_vm9, %v8299_v45, %v17831_v9  ;;  %v17838_v7 = vld [vmem:[#allocation50_spill] sm:$0xff] }
 0xa28   : > { %v8493_v49 = vpop.f32.mrf.mxu0  ;;  %v7739_v16 = vpop.permute.xlu1 %7738  ;;  %8635 = vmatmul.mubr.f32.gmra.mxu0 %v8362_v2  ;;  %v8363_v1 = vsel %vm2080_vm10, %v8331_v31, %v17833_v39  ;;  %v17839_v31 = vld [vmem:[#allocation55_spill] sm:$0xff] }
 0xa29   : > { %v8236_v46 = vsel %vm1948_vm6, %v8204_v10, %v7739_v16  ;;  %v7835_v24 = vpop.permute.xlu0 %7834  ;;  %9219 = vmatprep.mubr.msk.f32.mxu0 %vm1882_vm4, %v17832_v6 }
 0xa2a   : > { %v8496_v59 = vpop.f32.mrf.mxu0  ;;  %v8268_v42 = vsel %vm1981_vm7, %v8236_v46, %v7835_v24  ;;  %v17840_v24 = vld [vmem:[#allocation54_spill] sm:$0xff] }
 0xa2b   : > { %8684 = vrot.lane.b32.xlu1 %v8496_v59, %s11957_s23 }
 0xa2c   : > { %v8498_v0 = vpop.f32.mrf.mxu0  ;;  %v7932_v60 = vpop.permute.xlu1 %7931  ;;  %8640 = vmatmul.mubr.f32.gmra.mxu0 %v8363_v1 }
 0xa2d   : > { %v8300_v47 = vsel %vm2014_vm8, %v8268_v42, %v7932_v60  ;;  %9220 = vmatprep.mubr.msk.f32.mxu0 %vm1882_vm4, %v17834_v48  ;;  %v17841_v42 = vld [vmem:[#allocation57_spill] sm:$0xff] }
 0xa2e   : > { %v8332_v41 = vsel %vm2047_vm9, %v8300_v47, %v17835_v18  ;;  %v17842_v18 = vld [vmem:[#allocation12_spill] sm:$0xff] }
 0xa2f   : > { %v8364_v27 = vsel %vm2080_vm10, %v8332_v41, %v17833_v39 }
 0xa30   : > { %8645 = vmatmul.mubr.f32.gmra.mxu0 %v8364_v27 }
 0xa32   : > { %v8501_v22 = vpop.f32.mrf.mxu0 }
 0xa33   : > { %8686 = vrot.lane.b32.xlu0 %v8501_v22, %s11957_s23 }
 0xa34   : > { %v8503_v13 = vpop.f32.mrf.mxu0 }
 0xa36   : > { %v8506_v26 = vpop.f32.mrf.mxu0 }
 0xa37   : > { %8688 = vrot.lane.b32.xlu1 %v8506_v26, %s11957_s23  ;;  %v17843_v26 = vld [vmem:[#allocation52_spill] sm:$0xff] }
 0xa38   : > { %v8508_v14 = vpop.f32.mrf.mxu0 }
 0xa42   : > { %v8511_v32 = vpop.f32.mrf.mxu0 }
 0xa43   : > { %8690 = vrot.lane.b32.xlu0 %v8511_v32, %s11957_s23 }
 0xa44   : > { %v8513_v56 = vpop.f32.mrf.mxu0 }
 0xa46   : > { %v8516_v29 = vpop.f32.mrf.mxu0 }
 0xa47   : > { %8692 = vrot.lane.b32.xlu1 %v8516_v29, %s11957_s23 }
 0xa48   : > { %v8518_v28 = vpop.f32.mrf.mxu0 }
 0xa4e   : > { %v8521_v61 = vpop.f32.mrf.mxu0 }
 0xa4f   : > { %8694 = vrot.lane.b32.xlu0 %v8521_v61, %s11957_s23  ;;  %v17844_v61 = vld [vmem:[#allocation53_spill] sm:$0xff] }
 0xa50   : > { %v8523_v58 = vpop.f32.mrf.mxu0 }
 0xa52   : > { %v8526_v12 = vpop.f32.mrf.mxu0 }
 0xa53   : > { %8696 = vrot.lane.b32.xlu1 %v8526_v12, %s11957_s23 }
 0xa54   : > { %v8528_v54 = vpop.f32.mrf.mxu0 }
 0xa5e   : > { %v8531_v44 = vpop.f32.mrf.mxu0 }
 0xa5f   : > { %8698 = vrot.lane.b32.xlu0 %v8531_v44, %s11957_s23  ;;  %v17845_v44 = vld [vmem:[#allocation16_spill] sm:$0xff] }
 0xa60   : > { %v8533_v57 = vpop.f32.mrf.mxu0 }
 0xa62   : > { %v8536_v63 = vpop.f32.mrf.mxu0 }
 0xa63   : > { %8700 = vrot.lane.b32.xlu1 %v8536_v63, %s11957_s23 }
 0xa64   : > { %v8538_v50 = vpop.f32.mrf.mxu0 }
 0xa6a   : > { %v8541_v55 = vpop.f32.mrf.mxu0 }
 0xa6b   : > { %8702 = vrot.lane.b32.xlu0 %v8541_v55, %s11957_s23 }
 0xa6c   : > { %v8543_v23 = vpop.f32.mrf.mxu0 }
 0xa6d   : > { %v17846_v23 = vld [vmem:[#allocation15_spill] sm:$0xff] }
 0xa6e   : > { %v8546_v5 = vpop.f32.mrf.mxu0 }
 0xa6f   : > { %8704 = vrot.lane.b32.xlu1 %v8546_v5, %s11957_s23 }
 0xa70   : > { %v8548_v8 = vpop.f32.mrf.mxu0 }
 0xa7a   : > { %v8551_v35 = vpop.f32.mrf.mxu0 }
 0xa7b   : > { %8706 = vrot.lane.b32.xlu0 %v8551_v35, %s11957_s23 }
 0xa7c   : > { %v8553_v33 = vpop.f32.mrf.mxu0 }
 0xa7e   : > { %v8556_v21 = vpop.f32.mrf.mxu0 }
 0xa7f   : > { %8708 = vrot.lane.b32.xlu1 %v8556_v21, %s11957_s23  ;;  %v17847_v21 = vld [vmem:[#allocation19_spill] sm:$0xff] }
 0xa80   : > { %v8558_v3 = vpop.f32.mrf.mxu0 }
 0xa86   : > { %v8561_v62 = vpop.f32.mrf.mxu0 }
 0xa87   : > { %8710 = vrot.lane.b32.xlu0 %v8561_v62, %s11957_s23 }
 0xa88   : > { %v8563_v40 = vpop.f32.mrf.mxu0 }
 0xa8a   : > { %v8566_v25 = vpop.f32.mrf.mxu0 }
 0xa8b   : > { %8712 = vrot.lane.b32.xlu1 %v8566_v25, %s11957_s23 }
 0xa8c   : > { %v8568_v17 = vpop.f32.mrf.mxu0 }
 0xa96   : > { %v8571_v15 = vpop.f32.mrf.mxu0 }
 0xa97   : > { %8714 = vrot.lane.b32.xlu0 %v8571_v15, %s11957_s23 }
 0xa98   : > { %v8573_v19 = vpop.f32.mrf.mxu0 }
 0xa99   : > { %v8683_v30 = vpop.permute.xlu0 %8682 }
 0xa9a   : > { %v8778_v43 = vsel %vm1882_vm4, %v17836_v51, %v8683_v30  ;;  %v8576_v34 = vpop.f32.mrf.mxu0  ;;  %v17848_v30 = vld [vmem:[#allocation18_spill] sm:$0xff] }
 0xa9b   : > { %8811 = vst.msk [vmem:[%s17238_s15] sm:$0xff] %vm8810_vm13, %v8778_v43  ;;  %8716 = vrot.lane.b32.xlu1 %v8576_v34, %s11957_s23 }
 0xa9c   : > { %v8578_v36 = vpop.f32.mrf.mxu0 }
 0xa9d   : > { %v8685_v53 = vpop.permute.xlu1 %8684 }
 0xa9e   : > { %v8779_v11 = vsel %vm1882_vm4, %v17837_v38, %v8685_v53  ;;  %v17849_v53 = vld [vmem:[#allocation24_spill] sm:$0xff] }
 0xa9f   : > { %8812 = vst.msk [vmem:[%s17238_s15 + $0x8] sm:$0xff] %vm8810_vm13, %v8779_v11 }
 0xaa2   : > { %v8581_v37 = vpop.f32.mrf.mxu0 }
 0xaa3   : > { %8718 = vrot.lane.b32.xlu0 %v8581_v37, %s11957_s23 }
 0xaa4   : > { %v8583_v4 = vpop.f32.mrf.mxu0 }
 0xaa5   : > { %v8687_v45 = vpop.permute.xlu0 %8686  ;;  %v17850_v4 = vld [vmem:[#allocation25_spill] sm:$0xff] }
 0xaa6   : > { %v8780_v52 = vsel %vm1882_vm4, %v17838_v7, %v8687_v45  ;;  %v8586_v20 = vpop.f32.mrf.mxu0 }
 0xaa7   : > { %8813 = vst.msk [vmem:[%s17238_s15 + $0x10] sm:$0xff] %vm8810_vm13, %v8780_v52  ;;  %8720 = vrot.lane.b32.xlu1 %v8586_v20, %s11957_s23  ;;  %v17851_v52 = vld [vmem:[#allocation26_spill] sm:$0xff] }
 0xaa8   : > { %v8588_v2 = vpop.f32.mrf.mxu0 }
 0xaa9   : > { %v8689_v9 = vpop.permute.xlu1 %8688 }
 0xaaa   : > { %v8781_v49 = vsel %vm1882_vm4, %v17839_v31, %v8689_v9  ;;  %v17852_v9 = vld [vmem:[#allocation27_spill] sm:$0xff] }
 0xaab   : > { %8814 = vst.msk [vmem:[%s17238_s15 + $0x18] sm:$0xff] %vm8810_vm13, %v8781_v49 }
 0xab2   : > { %v8591_v16 = vpop.f32.mrf.mxu0 }
 0xab3   : > { %8722 = vrot.lane.b32.xlu0 %v8591_v16, %s11957_s23  ;;  %v17853_v16 = vld [vmem:[#allocation28_spill] sm:$0xff] }
 0xab4   : > { %v8593_v10 = vpop.f32.mrf.mxu0 }
 0xab5   : > { %v8691_v46 = vpop.permute.xlu0 %8690 }
 0xab6   : > { %v8782_v6 = vsel %vm1882_vm4, %v17840_v24, %v8691_v46  ;;  %v8596_v59 = vpop.f32.mrf.mxu0  ;;  %v17854_v24 = vld [vmem:[#allocation29_spill] sm:$0xff] }
 0xab7   : > { %8815 = vst.msk [vmem:[%s17238_s15 + $0x20] sm:$0xff] %vm8810_vm13, %v8782_v6  ;;  %8724 = vrot.lane.b32.xlu1 %v8596_v59, %s11957_s23 }
 0xab8   : > { %v8598_v39 = vpop.f32.mrf.mxu0 }
 0xab9   : > { %v8693_v1 = vpop.permute.xlu1 %8692  ;;  %v17855_v39 = vld [vmem:[#allocation30_spill] sm:$0xff] }
 0xaba   : > { %v8783_v0 = vsel %vm1882_vm4, %v17841_v42, %v8693_v1 }
 0xabb   : > { %8816 = vst.msk [vmem:[%s17238_s15 + $0x28] sm:$0xff] %vm8810_vm13, %v8783_v0  ;;  %v17856_v0 = vld [vmem:[#allocation31_spill] sm:$0xff] }
 0xabe   : > { %v8601_v60 = vpop.f32.mrf.mxu0 }
 0xabf   : > { %8726 = vrot.lane.b32.xlu0 %v8601_v60, %s11957_s23 }
 0xac0   : > { %v8603_v47 = vpop.f32.mrf.mxu0 }
 0xac1   : > { %v8695_v48 = vpop.permute.xlu0 %8694 }
 0xac2   : > { %v8784_v41 = vsel %vm1882_vm4, %v17842_v18, %v8695_v48  ;;  %v8606_v27 = vpop.f32.mrf.mxu0  ;;  %v17857_v48 = vld [vmem:[#allocation32_spill] sm:$0xff] }
 0xac3   : > { %8817 = vst.msk [vmem:[%s17238_s15 + $0x30] sm:$0xff] %vm8810_vm13, %v8784_v41  ;;  %8728 = vrot.lane.b32.xlu1 %v8606_v27, %s11957_s23  ;;  %v17858_v27 = vld [vmem:[#allocation33_spill] sm:$0xff] }
 0xac4   : > { %v8608_v22 = vpop.f32.mrf.mxu0 }
 0xac5   : > { %v8697_v13 = vpop.permute.xlu1 %8696 }
 0xac6   : > { %v8785_v14 = vsel %vm1882_vm4, %v17843_v26, %v8697_v13  ;;  %v17859_v26 = vld [vmem:[#allocation34_spill] sm:$0xff] }
 0xac7   : > { %8818 = vst.msk [vmem:[%s17238_s15 + $0x38] sm:$0xff] %vm8810_vm13, %v8785_v14 }
 0xace   : > { %v8611_v32 = vpop.f32.mrf.mxu0 }
 0xacf   : > { %8730 = vrot.lane.b32.xlu0 %v8611_v32, %s11957_s23 }
 0xad0   : > { %v8613_v56 = vpop.f32.mrf.mxu0 }
 0xad1   : > { %v8699_v29 = vpop.permute.xlu0 %8698  ;;  %v17860_v56 = vld [vmem:[#allocation35_spill] sm:$0xff] }
 0xad2   : > { %v8616_v28 = vpop.f32.mrf.mxu0  ;;  %v8786_v58 = vsel %vm1882_vm4, %v17844_v61, %v8699_v29  ;;  %v17861_v61 = vld [vmem:[#allocation36_spill] sm:$0xff] }
 0xad3   : > { %8732 = vrot.lane.b32.xlu1 %v8616_v28, %s11957_s23  ;;  %8819 = vst.msk [vmem:[%s17238_s15 + $0x40] sm:$0xff] %vm8810_vm13, %v8786_v58 }
 0xad4   : > { %v8618_v12 = vpop.f32.mrf.mxu0 }
 0xad5   : > { %v8701_v54 = vpop.permute.xlu1 %8700 }
 0xad6   : > { %v8787_v57 = vsel %vm1882_vm4, %v17845_v44, %v8701_v54  ;;  %v17862_v54 = vld [vmem:[#allocation37_spill] sm:$0xff] }
 0xad7   : > { %8820 = vst.msk [vmem:[%s17238_s15 + $0x48] sm:$0xff] %vm8810_vm13, %v8787_v57 }
 0xada   : > { %v8621_v63 = vpop.f32.mrf.mxu0 }
 0xadb   : > { %8734 = vrot.lane.b32.xlu0 %v8621_v63, %s11957_s23  ;;  %v17863_v63 = vld [vmem:[#allocation38_spill] sm:$0xff] }
 0xadc   : > { %v8623_v50 = vpop.f32.mrf.mxu0 }
 0xadd   : > { %v8703_v55 = vpop.permute.xlu0 %8702 }
 0xade   : > { %v8788_v5 = vsel %vm1882_vm4, %v17846_v23, %v8703_v55  ;;  %v8626_v8 = vpop.f32.mrf.mxu0  ;;  %v17864_v23 = vld [vmem:[#allocation39_spill] sm:$0xff] }
 0xadf   : > { %8821 = vst.msk [vmem:[%s17238_s15 + $0x50] sm:$0xff] %vm8810_vm13, %v8788_v5  ;;  %8736 = vrot.lane.b32.xlu1 %v8626_v8, %s11957_s23 }
 0xae0   : > { %v8628_v35 = vpop.f32.mrf.mxu0 }
 0xae1   : > { %v8705_v33 = vpop.permute.xlu1 %8704  ;;  %v17865_v35 = vld [vmem:[#allocation40_spill] sm:$0xff] }
 0xae2   : > { %v8789_v3 = vsel %vm1882_vm4, %v17847_v21, %v8705_v33 }
 0xae3   : > { %8822 = vst.msk [vmem:[%s17238_s15 + $0x58] sm:$0xff] %vm8810_vm13, %v8789_v3  ;;  %v17866_v3 = vld [vmem:[#allocation41_spill] sm:$0xff] }
 0xae4   : > { %v8631_v62 = vpop.f32.mrf.mxu0 }
 0xae5   : > { %8738 = vrot.lane.b32.xlu0 %v8631_v62, %s11957_s23 }
 0xae6   : > { %v8633_v40 = vpop.f32.mrf.mxu0 }
 0xae8   : > { %v8636_v25 = vpop.f32.mrf.mxu0 }
 0xae9   : > { %8740 = vrot.lane.b32.xlu1 %v8636_v25, %s11957_s23  ;;  %v17867_v25 = vld [vmem:[#allocation42_spill] sm:$0xff] }
 0xaea   : > { %v8638_v17 = vpop.f32.mrf.mxu0 }
 0xaec   : > { %v8641_v15 = vpop.f32.mrf.mxu0 }
 0xaed   : > { %v8707_v19 = vpop.permute.xlu0 %8706  ;;  %8742 = vrot.lane.b32.xlu0 %v8641_v15, %s11957_s23 }
 0xaee   : > { %v8790_v51 = vsel %vm1882_vm4, %v17848_v30, %v8707_v19  ;;  %v8643_v43 = vpop.f32.mrf.mxu0 }
 0xaef   : > { %8823 = vst.msk [vmem:[%s17238_s15 + $0x60] sm:$0xff] %vm8810_vm13, %v8790_v51 }
 0xaf0   : > { %v8646_v34 = vpop.f32.mrf.mxu0 }
 0xaf1   : > { %v8709_v36 = vpop.permute.xlu1 %8708  ;;  %8744 = vrot.lane.b32.xlu1 %v8646_v34, %s11957_s23  ;;  %s9227_s23 = sshll.u32 %s12027_s28, 12  ;;  %s17392_s28 = scalar_lea.sflag [#allocation4], %s307_s8 }
 0xaf2   : > { %v8791_v38 = vsel %vm1882_vm4, %v17849_v53, %v8709_v36  ;;  %v8648_v11 = vpop.f32.mrf.mxu0  ;;  %s17382_s9 = scalar_lea.hbm %s17440_s7, %s9227_s23 }
 0xaf3   : > { %8824 = vst.msk [vmem:[%s17238_s15 + $0x68] sm:$0xff] %vm8810_vm13, %v8791_v38 }
 0xaf9   : > { %v8711_v37 = vpop.permute.xlu0 %8710 }
 0xafa   : > { %v8792_v45 = vsel %vm1882_vm4, %v17850_v4, %v8711_v37 }
 0xafb   : > { %8825 = vst.msk [vmem:[%s17238_s15 + $0x70] sm:$0xff] %vm8810_vm13, %v8792_v45 }
 0xafd   : > { %v8713_v7 = vpop.permute.xlu1 %8712 }
 0xafe   : > { %v8793_v20 = vsel %vm1882_vm4, %v17851_v52, %v8713_v7 }
 0xaff   : > { %8826 = vst.msk [vmem:[%s17238_s15 + $0x78] sm:$0xff] %vm8810_vm13, %v8793_v20 }
 0xb09   : > { %v8715_v2 = vpop.permute.xlu0 %8714 }
 0xb0a   : > { %v8794_v31 = vsel %vm1882_vm4, %v17852_v9, %v8715_v2 }
 0xb0b   : > { %8827 = vst.msk [vmem:[%s17238_s15 + $0x80] sm:$0xff] %vm8810_vm13, %v8794_v31 }
 0xb0d   : > { %v8717_v49 = vpop.permute.xlu1 %8716 }
 0xb0e   : > { %v8795_v10 = vsel %vm1882_vm4, %v17853_v16, %v8717_v49 }
 0xb0f   : > { %8828 = vst.msk [vmem:[%s17238_s15 + $0x88] sm:$0xff] %vm8810_vm13, %v8795_v10 }
 0xb15   : > { %v8719_v46 = vpop.permute.xlu0 %8718 }
 0xb16   : > { %v8796_v6 = vsel %vm1882_vm4, %v17854_v24, %v8719_v46 }
 0xb17   : > { %8829 = vst.msk [vmem:[%s17238_s15 + $0x90] sm:$0xff] %vm8810_vm13, %v8796_v6 }
 0xb19   : > { %v8721_v59 = vpop.permute.xlu1 %8720 }
 0xb1a   : > { %v8797_v1 = vsel %vm1882_vm4, %v17855_v39, %v8721_v59 }
 0xb1b   : > { %8830 = vst.msk [vmem:[%s17238_s15 + $0x98] sm:$0xff] %vm8810_vm13, %v8797_v1 }
 0xb25   : > { %v8723_v42 = vpop.permute.xlu0 %8722 }
 0xb26   : > { %v8798_v60 = vsel %vm1882_vm4, %v17856_v0, %v8723_v42 }
 0xb27   : > { %8831 = vst.msk [vmem:[%s17238_s15 + $0xa0] sm:$0xff] %vm8810_vm13, %v8798_v60 }
 0xb29   : > { %v8725_v47 = vpop.permute.xlu1 %8724 }
 0xb2a   : > { %v8799_v18 = vsel %vm1882_vm4, %v17857_v48, %v8725_v47 }
 0xb2b   : > { %8832 = vst.msk [vmem:[%s17238_s15 + $0xa8] sm:$0xff] %vm8810_vm13, %v8799_v18 }
 0xb31   : > { %v8727_v41 = vpop.permute.xlu0 %8726 }
 0xb32   : > { %v8800_v22 = vsel %vm1882_vm4, %v17858_v27, %v8727_v41 }
 0xb33   : > { %8833 = vst.msk [vmem:[%s17238_s15 + $0xb0] sm:$0xff] %vm8810_vm13, %v8800_v22 }
 0xb35   : > { %v8729_v13 = vpop.permute.xlu1 %8728 }
 0xb36   : > { %v8801_v14 = vsel %vm1882_vm4, %v17859_v26, %v8729_v13 }
 0xb37   : > { %8834 = vst.msk [vmem:[%s17238_s15 + $0xb8] sm:$0xff] %vm8810_vm13, %v8801_v14 }
 0xb41   : > { %v8731_v32 = vpop.permute.xlu0 %8730 }
 0xb42   : > { %v8802_v29 = vsel %vm1882_vm4, %v17860_v56, %v8731_v32 }
 0xb43   : > { %8835 = vst.msk [vmem:[%s17238_s15 + $0xc0] sm:$0xff] %vm8810_vm13, %v8802_v29 }
 0xb45   : > { %v8733_v28 = vpop.permute.xlu1 %8732 }
 0xb46   : > { %v8803_v58 = vsel %vm1882_vm4, %v17861_v61, %v8733_v28 }
 0xb47   : > { %8836 = vst.msk [vmem:[%s17238_s15 + $0xc8] sm:$0xff] %vm8810_vm13, %v8803_v58 }
 0xb4d   : > { %v8735_v12 = vpop.permute.xlu0 %8734 }
 0xb4e   : > { %v8804_v44 = vsel %vm1882_vm4, %v17862_v54, %v8735_v12 }
 0xb4f   : > { %8837 = vst.msk [vmem:[%s17238_s15 + $0xd0] sm:$0xff] %vm8810_vm13, %v8804_v44 }
 0xb51   : > { %v8737_v57 = vpop.permute.xlu1 %8736 }
 0xb52   : > { %v8805_v50 = vsel %vm1882_vm4, %v17863_v63, %v8737_v57 }
 0xb53   : > { %8838 = vst.msk [vmem:[%s17238_s15 + $0xd8] sm:$0xff] %vm8810_vm13, %v8805_v50 }
 0xb57   : > { %v8739_v55 = vpop.permute.xlu0 %8738 }
 0xb58   : > { %v8806_v5 = vsel %vm1882_vm4, %v17864_v23, %v8739_v55 }
 0xb59   : > { %8839 = vst.msk [vmem:[%s17238_s15 + $0xe0] sm:$0xff] %vm8810_vm13, %v8806_v5 }
 0xb5b   : > { %v8741_v8 = vpop.permute.xlu1 %8740 }
 0xb5c   : > { %v8807_v33 = vsel %vm1882_vm4, %v17865_v35, %v8741_v8 }
 0xb5d   : > { %8840 = vst.msk [vmem:[%s17238_s15 + $0xe8] sm:$0xff] %vm8810_vm13, %v8807_v33 }
 0xb5f   : > { %v8743_v21 = vpop.permute.xlu0 %8742 }
 0xb60   : > { %v8808_v62 = vsel %vm1882_vm4, %v17866_v3, %v8743_v21 }
 0xb61   : > { %8841 = vst.msk [vmem:[%s17238_s15 + $0xf0] sm:$0xff] %vm8810_vm13, %v8808_v62 }
 0xb63   : > { %v8745_v40 = vpop.permute.xlu1 %8744 }
 0xb64   : > { %v8809_v17 = vsel %vm1882_vm4, %v17867_v25, %v8745_v40 }
 0xb65   : > { %8842 = vst.msk [vmem:[%s17238_s15 + $0xf8] sm:$0xff] %vm8810_vm13, %v8809_v17 }
 0xb66   : > { %11893 = shalt.err (!%p11890_p10)
}
 0xb67   : > { %s11894_s13 = scalar_lea.hbm %s17382_s9, 4096  ;;  %s11898_s22 = scalar_lea.hbm %s17440_s7, 8192 }
 0xb68   : > { %p11895_p7 = scmp.ne.s32.totalorder %s17382_s9, %s11894_s13  ;;  %p11899_p11 = scmp.lt.s32.totalorder %s17382_s9, %s17440_s7 }
 0xb69   : > { %p11900_p0 = scmp.lt.s32.totalorder %s11898_s22, %s11894_s13 }
 0xb6a   : > { %p11896_p8 = pnand %p11895_p7, %p17868_p2 }
 0xb6b   : > { %p11901_p1 = por %p11900_p0, %p11899_p11 }
 0xb6c   : > { %p11897_p13 = pneg %p11896_p8 }
 0xb6e   : > { %p11902_p12 = pnand %p11901_p1, %p11897_p13 }
 0xb70   : > { %11905 = shalt.err (!%p11902_p12)
}
 0xb71   : > { %s11965_s17 = smov 128   ;;  %s17869_s20 = smov 8  }
 0xb72   : > { %9578 = dma.vmem_to_hbm [thread:$0]  (%p17868_p2), %s17384_s16, 4096, %s17382_s9, %s17392_s28, %s11965_s17, %s11965_s17, %s17869_s20  }
 0xb73 PF: > { %p9600_p9 = scmp.ge.s32.totalorder %s11948_s27, 2  ;;  %s8872_s19 = sand.u32 1, %s11936_s24  }
 0xb74   : > { %p17870_p3 = scmp.ne.s32.totalorder %s17587_s12, 0  ;;  %s8873_s21 = scalar_lea.sflag [#allocation4], %s8872_s19 }
 0xb76   : > { %p9591_p4 = pnand %p9600_p9, %p17870_p3 }
 0xb78   : > { %p9592_p5 = pneg %p9591_p4 }
 0xb7a   : > { %11931 = dma.done.wait (%p9592_p5), %s8873_s21, 4096  }
 0xb7b   : > { %11933 = vsyncadd (%p9592_p5), %s8873_s21, 4294963200  ;;  %p19_p6 = scmp.ge.s32.totalorder %s12031_s30, 4   ;;  %s17871_s24 = smov %s11940_s25 }
 0xb7c   : > { %s17872_s25 = smov %s11944_s26  ;;  %s17873_s26 = smov %s12042_s10 }
 0xb7d   : > { %s17874_s27 = smov %s12031_s30  ;;  %21 = sbr.rel (!%p19_p6) target bundleno = 5 (0x5), region = 96 }
 0xb82   :  { %8878 = vsyncpa [#allocation3], 1 }
 0xb83   :  { %8880 = vsyncpa [#allocation3 + $0x1], 1 }
 0xb84   :  { %8881 = vsyncpa [#allocation6], 1 }
 0xb85   :  { %8882 = vsyncpa [#allocation4], 1 }
 0xb86   :  { %8884 = vsyncpa [#allocation4 + $0x1], 1 }

</bundles_post_ra>
